<compile_context>
chip_gen: v7x
topology: tpu7x:2x2x1
jax: 0.10.0
libtpu: 0.0.40
codegen_flags: <defaults>
</compile_context>

<pallas_src>
import functools
import math

import jax
import jax.numpy as jnp
from jax.experimental import pallas as pl
from jax.experimental.pallas import tpu as pltpu


# ----------------------------------------------------------------------------
# Packed-parameter slab layout (one VMEM input instead of 15 tiny ones).
# ----------------------------------------------------------------------------
def slab_layout(D, H, O):
    Hd = H // 2
    G = 8 * Hd
    LW = max(128, G, D, H)
    lay = {}
    r = 0

    def add(name, nrows, ncols, align=8):
        nonlocal r
        if align > 1:
            r = ((r + align - 1) // align) * align
        lay[name] = (r, nrows, ncols)
        r += nrows

    add("w_ih", D, G)              # fused input projection  (D, 8*Hd)
    add("w_hh", 2 * Hd, G)         # block-diagonal recurrent (2*Hd, 8*Hd)
    # one 8-row "bias block" of consecutive single rows
    add("b_big", 1, G)
    add("b_h", 1, H, align=1)
    add("b_v", 1, D, align=1)
    add("w_w_h", 1, H, align=1)
    add("w_w_v", 1, D, align=1)
    add("w_b", 1, 1, align=1)
    add("b_px", 1, H, align=1)
    add("dec_b", 1, O, align=1)
    add("w_h_f", Hd, H)
    add("w_h_b", Hd, H)
    add("w_v", D, D)
    add("w_p_f", Hd, H)
    add("w_p_b", Hd, H)
    add("w_x", H, H)
    add("dec_w", H, O)
    rows = ((r + 7) // 8) * 8
    return lay, rows, LW


# ----------------------------------------------------------------------------
# Kernel
# ----------------------------------------------------------------------------
def at_lstm_kernel(ids_ref, aids_ref,            # scalar-prefetch (SMEM)
                   slab_ref, wemb_hbm, ae_hbm,   # inputs
                   out_ref,                      # output
                   x_vmem, asp_vmem, outf_sc, outb_sc, sem,  # scratch
                   *, L, D, H, BT, lay):
    Hd = H // 2
    G = 8 * Hd
    O = out_ref.shape[1]

    def ld(name):
        r0, nr, nc = lay[name]
        return slab_ref[r0:r0 + nr, 0:nc]

    # -------- fused embedding gather: SMEM ids drive row DMAs from HBM --------
    # One shared DMA semaphore: issue everything, then wait everything.
    b0 = pl.program_id(0) * BT
    V = wemb_hbm.shape[0]
    A = ae_hbm.shape[0]
    copies = []
    for i in range(BT):
        for t in range(L):
            tok = jnp.clip(ids_ref[b0 + i, t], 0, V - 1)      # clamp bad/pad ids
            copies.append(pltpu.make_async_copy(
                wemb_hbm.at[pl.ds(tok, 1)],
                x_vmem.at[pl.ds(t * BT + i, 1)],              # time-major layout
                sem.at[0]))
        asp_id = jnp.clip(aids_ref[b0 + i], 0, A - 1)
        copies.append(pltpu.make_async_copy(
            ae_hbm.at[pl.ds(asp_id, 1)],
            asp_vmem.at[pl.ds(i, 1)],
            sem.at[0]))
    for cp in copies:
        cp.start()
    for cp in copies:
        cp.wait()

    # -------- fused bidirectional LSTM over the batch tile ---------------------
    x = x_vmem[...]                                           # (L*BT, D)
    xg = jnp.dot(x, ld("w_ih"),
                 preferred_element_type=jnp.float32) + ld("b_big")   # (L*BT, G)

    # Column mask: inside each 2*Hd gate block, first Hd cols = forward direction.
    col = jax.lax.broadcasted_iota(jnp.int32, (1, G), 1)
    fwd_cols = (col % (2 * Hd)) < Hd

    # fwd/bwd time fold hoisted out of the recurrence (no dependence on h/c):
    # fwd gate cols read time t, bwd gate cols read time L-1-t.
    gx = [jnp.where(fwd_cols,
                    xg[t * BT:(t + 1) * BT, :],
                    xg[(L - 1 - t) * BT:(L - t) * BT, :]) for t in range(L)]

    whh = ld("w_hh")                                          # (2*Hd, G)
    h = jnp.zeros((BT, 2 * Hd), jnp.float32)                  # [h_fwd | h_bwd]
    c = jnp.zeros((BT, 2 * Hd), jnp.float32)
    for t in range(L):                                        # static unroll, L small
        g = gx[t] + jnp.dot(h, whh, preferred_element_type=jnp.float32)  # (BT, G)
        sg = jax.nn.sigmoid(g)     # one EUP push covers i, f, o (both directions)
        th = jnp.tanh(g)           # one EUP push covers g gate (both directions)
        i_g = sg[:, 0:2 * Hd]
        f_g = sg[:, 2 * Hd:4 * Hd]
        o_g = sg[:, 4 * Hd:6 * Hd]
        g_g = th[:, 6 * Hd:8 * Hd]
        c = f_g * c + i_g * g_g
        h = o_g * jnp.tanh(c)
        outf_sc[t * BT:(t + 1) * BT, :] = h[:, 0:Hd]              # fwd out @ t
        outb_sc[(L - 1 - t) * BT:(L - t) * BT, :] = h[:, Hd:]     # bwd out @ L-1-t

    hidden = h                                                # (BT, H) final states
    out_f = outf_sc[...]                                      # (L*BT, Hd)
    out_b = outb_sc[...]                                      # (L*BT, Hd)

    # -------- attention (concat/broadcast-free, split-matmul form; exact) ------
    m1 = jnp.tanh(jnp.dot(out_f, ld("w_h_f"), preferred_element_type=jnp.float32)
                  + jnp.dot(out_b, ld("w_h_b"), preferred_element_type=jnp.float32)
                  + ld("b_h"))                                # (L*BT, H)
    s_h = jnp.sum(m1 * ld("w_w_h"), axis=-1, keepdims=True)   # (L*BT, 1)

    asp = asp_vmem[...]                                       # (BT, D)
    mv = jnp.tanh(jnp.dot(asp, ld("w_v"), preferred_element_type=jnp.float32)
                  + ld("b_v"))                                # (BT, D)
    s_v = jnp.sum(mv * ld("w_w_v"), axis=-1, keepdims=True)   # (BT, 1) row constant

    s = s_h.reshape(L, BT, 1) + s_v + ld("w_b")               # (L, BT, 1)
    m = jnp.max(s, axis=0, keepdims=True)
    e = jnp.exp(s - m)
    denom = jnp.sum(e, axis=0, keepdims=True)
    inv = pl.reciprocal(denom, approx=True)
    inv = inv * (2.0 - denom * inv)                           # one Newton step
    w_attn = e * inv                                          # softmax over time

    r_f = jnp.sum(w_attn * out_f.reshape(L, BT, Hd), axis=0)  # (BT, Hd)
    r_b = jnp.sum(w_attn * out_b.reshape(L, BT, Hd), axis=0)  # (BT, Hd)

    r2 = jnp.tanh(jnp.dot(r_f, ld("w_p_f"), preferred_element_type=jnp.float32)
                  + jnp.dot(r_b, ld("w_p_b"), preferred_element_type=jnp.float32)
                  + jnp.dot(hidden, ld("w_x"), preferred_element_type=jnp.float32)
                  + ld("b_px"))                               # (BT, H)

    logits = (jnp.dot(r2, ld("dec_w"), preferred_element_type=jnp.float32)
              + ld("dec_b"))                                  # (BT, O)
    out_ref[...] = logits[:, :O]


# ----------------------------------------------------------------------------
# Wrapper
# ----------------------------------------------------------------------------
def at_lstm_forward(packed, sentence_ids, aspect_ids, *, batch_tile=8):
    B, L = sentence_ids.shape
    D, H, O = packed["D"], packed["H"], packed["O"]
    BT = batch_tile
    assert B % BT == 0 and BT % 8 == 0, "batch tile must be a multiple of 8"
    lay, rows, LW = slab_layout(D, H, O)

    kernel = functools.partial(at_lstm_kernel, L=L, D=D, H=H, BT=BT, lay=lay)

    return pl.pallas_call(
        kernel,
        out_shape=jax.ShapeDtypeStruct((B, O), jnp.float32),
        grid_spec=pltpu.PrefetchScalarGridSpec(
            num_scalar_prefetch=2,                      # sentence ids + aspect ids
            grid=(B // BT,),
            in_specs=[
                pl.BlockSpec((rows, LW), lambda b, ids, aids: (0, 0)),  # param slab
                pl.BlockSpec(memory_space=pl.ANY),      # word embedding table (HBM)
                pl.BlockSpec(memory_space=pl.ANY),      # aspect embedding table (HBM)
            ],
            out_specs=pl.BlockSpec((BT, O), lambda b, ids, aids: (b, 0)),
            scratch_shapes=[
                pltpu.VMEM((L * BT, D), jnp.float32),   # gathered word embeddings
                pltpu.VMEM((BT, D), jnp.float32),       # gathered aspect embeddings
                pltpu.VMEM((L * BT, H // 2), jnp.float32),  # fwd outputs
                pltpu.VMEM((L * BT, H // 2), jnp.float32),  # bwd outputs
                pltpu.SemaphoreType.DMA((1,)),          # one shared DMA semaphore
            ],
        ),
        compiler_params=pltpu.CompilerParams(
            dimension_semantics=("parallel",),          # v7x: both TCs split batch
        ),
    )(sentence_ids.astype(jnp.int32), aspect_ids.astype(jnp.int32),
      packed["slab"], packed["word_embed"], packed["AE"])


# ----------------------------------------------------------------------------
# One-time parameter repacking (gate reorder, direction fuse, single VMEM slab).
# ----------------------------------------------------------------------------
def prepare_packed(params):
    Hd = params["W_hh"].shape[-2]
    H = 2 * Hd
    D = params["word_embed"].shape[1]
    O = params["dec_w"].shape[-1]

    def reorder(w):
        # PyTorch gate order [i|f|g|o] -> [i|f|o|g]: all sigmoid gates contiguous.
        blk = lambda q: w[..., q * Hd:(q + 1) * Hd]
        return jnp.concatenate([blk(0), blk(1), blk(3), blk(2)], axis=-1)

    def interleave(w0, w1):
        # per-gate interleave of the two directions -> cols [q_fwd | q_bwd] x 4
        parts = []
        for q in range(4):
            parts.append(w0[..., q * Hd:(q + 1) * Hd])
            parts.append(w1[..., q * Hd:(q + 1) * Hd])
        return jnp.concatenate(parts, axis=-1)

    wih0, wih1 = reorder(params["W_ih"][0]), reorder(params["W_ih"][1])
    whh0, whh1 = reorder(params["W_hh"][0]), reorder(params["W_hh"][1])
    b0 = reorder(params["b_ih"][0] + params["b_hh"][0])
    b1 = reorder(params["b_ih"][1] + params["b_hh"][1])
    zhh = jnp.zeros_like(whh0)

    entries = {
        "w_ih": interleave(wih0, wih1),                               # (D, 8*Hd)
        "w_hh": jnp.concatenate([interleave(whh0, zhh),
                                 interleave(zhh, whh1)], axis=0),     # (2*Hd, 8*Hd)
        "b_big": interleave(b0, b1),                                  # (1, 8*Hd)
        "b_h": params["b_h"], "b_v": params["b_v"],
        "w_w_h": params["w_w"][:H].T, "w_w_v": params["w_w"][H:].T,   # (1,H),(1,D)
        "w_b": params["w_b"],
        "b_px": params["b_p"] + params["b_x"],
        "dec_b": params["dec_b"],
        "w_h_f": params["W_h_w"][:Hd], "w_h_b": params["W_h_w"][Hd:],
        "w_v": params["W_v_w"],
        "w_p_f": params["W_p_w"][:Hd], "w_p_b": params["W_p_w"][Hd:],
        "w_x": params["W_x_w"],
        "dec_w": params["dec_w"],
    }

    lay, rows, LW = slab_layout(D, H, O)
    slab = jnp.zeros((rows, LW), jnp.float32)
    for name, (r0, nr, nc) in lay.items():
        arr = jnp.asarray(entries[name], jnp.float32).reshape(nr, nc)
        slab = slab.at[r0:r0 + nr, 0:nc].set(arr)

    return dict(slab=slab, word_embed=params["word_embed"], AE=params["AE"],
                D=D, H=H, O=O)


# ----------------------------------------------------------------------------
# Pure-JAX reference mirroring the PyTorch forward (per example, unfused).
# ----------------------------------------------------------------------------
def at_lstm_reference(params, sentence_ids, aspect_id):
    x = params["word_embed"][sentence_ids]            # (L, D)
    asp = params["AE"][aspect_id].reshape(1, -1)      # (1, D)
    L, D = x.shape
    Hd = params["W_hh"].shape[-2]

    def lstm_dir(d, reverse):
        Wih, Whh = params["W_ih"][d], params["W_hh"][d]
        b = params["b_ih"][d] + params["b_hh"][d]
        h = jnp.zeros((1, Hd), jnp.float32)
        c = jnp.zeros((1, Hd), jnp.float32)
        outs = [None] * L
        order = range(L - 1, -1, -1) if reverse else range(L)
        for t in order:
            g = x[t:t + 1] @ Wih + h @ Whh + b           # gate cols [i|f|g|o]
            i = jax.nn.sigmoid(g[:, 0:Hd])
            f = jax.nn.sigmoid(g[:, Hd:2 * Hd])
            gg = jnp.tanh(g[:, 2 * Hd:3 * Hd])
            o = jax.nn.sigmoid(g[:, 3 * Hd:4 * Hd])
            c = f * c + i * gg
            h = o * jnp.tanh(c)
            outs[t] = h
        return jnp.concatenate(outs, axis=0), h

    out_f, hf = lstm_dir(0, False)
    out_b, hb = lstm_dir(1, True)
    output = jnp.concatenate([out_f, out_b], axis=1)      # (L, H)
    hidden = jnp.concatenate([hf, hb], axis=1)            # (1, H)

    asp_exp = jnp.broadcast_to(asp, (L, D))
    M = jnp.tanh(jnp.concatenate([output @ params["W_h_w"] + params["b_h"],
                                  asp_exp @ params["W_v_w"] + params["b_v"]], axis=1))
    s = M @ params["w_w"] + params["w_b"]
    weights = jax.nn.softmax(s, axis=0)                   # (L, 1)
    r = weights.T @ output                                # (1, H)
    r = jnp.tanh(r @ params["W_p_w"] + params["b_p"]
                 + hidden @ params["W_x_w"] + params["b_x"])
    return r @ params["dec_w"] + params["dec_b"]


def init_params(key, vocab_size, aspect_size, D, H, O):
    Hd = H // 2
    ks = jax.random.split(key, 18)

    def u(k, shape, fan_in):
        s = 1.0 / math.sqrt(fan_in)
        return jax.random.uniform(k, shape, jnp.float32, minval=-s, maxval=s)

    return dict(
        word_embed=jax.random.normal(ks[0], (vocab_size, D), jnp.float32) * 0.1,
        AE=jax.random.normal(ks[1], (aspect_size, D), jnp.float32) * 0.1,
        # bidirectional LSTM, 2 directions [fwd, bwd], gate cols [i|f|g|o]
        W_ih=u(ks[2], (2, D, 4 * Hd), Hd),
        W_hh=u(ks[3], (2, Hd, 4 * Hd), Hd),
        b_ih=u(ks[4], (2, 1, 4 * Hd), Hd),
        b_hh=u(ks[5], (2, 1, 4 * Hd), Hd),
        W_h_w=u(ks[6], (H, H), H), b_h=u(ks[7], (1, H), H),
        W_v_w=u(ks[8], (D, D), D), b_v=u(ks[9], (1, D), D),
        w_w=u(ks[10], (H + D, 1), H + D), w_b=u(ks[11], (1, 1), H + D),
        W_p_w=u(ks[12], (H, H), H), b_p=u(ks[13], (1, H), H),
        W_x_w=u(ks[14], (H, H), H), b_x=u(ks[15], (1, H), H),
        dec_w=u(ks[16], (H, O), H), dec_b=u(ks[17], (1, O), H),
    )


if __name__ == "__main__":
    key = jax.random.PRNGKey(0)
    vocab_size, aspect_size = 50, 5
    D, H, O = 32, 32, 8        # word_embed_dim, conf.hidden_size, output_size
    L, B, BT = 8, 8, 8         # seq length, batch, batch tile (multiple of 8)

    pkey, skey, akey = jax.random.split(key, 3)
    params = init_params(pkey, vocab_size, aspect_size, D, H, O)
    packed = prepare_packed(params)
    sentence_ids = jax.random.randint(skey, (B, L), 0, vocab_size)   # input_tensors[0]
    aspect_ids = jax.random.randint(akey, (B,), 0, aspect_size)      # input_tensors[2]

    out = at_lstm_forward(packed, sentence_ids, aspect_ids, batch_tile=BT)
    out = jax.block_until_ready(out)

    ref = jnp.concatenate(
        [at_lstm_reference(params, sentence_ids[i], aspect_ids[i:i + 1])
         for i in range(B)], axis=0)

    assert out.shape == (B, O)
    assert bool(jnp.all(jnp.isfinite(out)))
    # 2e-4: all-f32 kernel; only difference vs reference is summation order of the
    # exact split matmuls and the EUP transcendental path.
    assert bool(jnp.allclose(out, ref, atol=2e-4, rtol=2e-4)), (out, ref)
    print("KERNEL_OK")
</pallas_src>

<mosaic_0001>
module attributes {stable_mosaic.version = 11 : i64} {
  func.func @at_lstm_kernel(%arg0: i32, %arg1: memref<8x8xi32, #tpu.memory_space<smem>>, %arg2: memref<8xi32, #tpu.memory_space<smem>>, %arg3: memref<232x128xf32, #tpu.memory_space<vmem>>, %arg4: memref<50x32xf32, #tpu.memory_space<any>>, %arg5: memref<5x32xf32, #tpu.memory_space<any>>, %arg6: memref<8x8xf32, #tpu.memory_space<vmem>>, %arg7: memref<64x32xf32, #tpu.memory_space<vmem>>, %arg8: memref<8x32xf32, #tpu.memory_space<vmem>>, %arg9: memref<64x16xf32, #tpu.memory_space<vmem>>, %arg10: memref<64x16xf32, #tpu.memory_space<vmem>>, %arg11: memref<1x!tpu.dma_semaphore, #tpu.memory_space<semaphore_mem>>) attributes {dimension_semantics = [#tpu.dimension_semantics<parallel>], iteration_bounds = array<i64: 1>, scalar_prefetch = 2 : i64, scratch_operands = 5 : i64, tpu.core_type = #tpu.core_type<tc>, window_params = [{pipeline_mode = #tpu.pipeline_mode<synchronous>, transform_indices = @transform_0, window_bounds = array<i64: 232, 128>}, {}, {}, {transform_indices = @transform_3, window_bounds = array<i64: 8, 8>}]} {
    %c8_i32 = arith.constant 8 : i32
    %0 = arith.muli %arg0, %c8_i32 : i32
    %c0_i32 = arith.constant 0 : i32
    %1 = arith.addi %0, %c0_i32 : i32
    %2 = arith.index_cast %1 : i32 to index
    %c0 = arith.constant 0 : index
    %3 = memref.load %arg1[%2, %c0] : memref<8x8xi32, #tpu.memory_space<smem>>
    %c0_i32_0 = arith.constant 0 : i32
    %c49_i32 = arith.constant 49 : i32
    %4 = arith.maxsi %c0_i32_0, %3 : i32
    %5 = arith.minsi %c49_i32, %4 : i32
    %c0_i32_1 = arith.constant 0 : i32
    %6 = arith.addi %0, %c0_i32_1 : i32
    %7 = arith.index_cast %6 : i32 to index
    %c1 = arith.constant 1 : index
    %8 = memref.load %arg1[%7, %c1] : memref<8x8xi32, #tpu.memory_space<smem>>
    %c0_i32_2 = arith.constant 0 : i32
    %c49_i32_3 = arith.constant 49 : i32
    %9 = arith.maxsi %c0_i32_2, %8 : i32
    %10 = arith.minsi %c49_i32_3, %9 : i32
    %c0_i32_4 = arith.constant 0 : i32
    %11 = arith.addi %0, %c0_i32_4 : i32
    %12 = arith.index_cast %11 : i32 to index
    %c2 = arith.constant 2 : index
    %13 = memref.load %arg1[%12, %c2] : memref<8x8xi32, #tpu.memory_space<smem>>
    %c0_i32_5 = arith.constant 0 : i32
    %c49_i32_6 = arith.constant 49 : i32
    %14 = arith.maxsi %c0_i32_5, %13 : i32
    %15 = arith.minsi %c49_i32_6, %14 : i32
    %c0_i32_7 = arith.constant 0 : i32
    %16 = arith.addi %0, %c0_i32_7 : i32
    %17 = arith.index_cast %16 : i32 to index
    %c3 = arith.constant 3 : index
    %18 = memref.load %arg1[%17, %c3] : memref<8x8xi32, #tpu.memory_space<smem>>
    %c0_i32_8 = arith.constant 0 : i32
    %c49_i32_9 = arith.constant 49 : i32
    %19 = arith.maxsi %c0_i32_8, %18 : i32
    %20 = arith.minsi %c49_i32_9, %19 : i32
    %c0_i32_10 = arith.constant 0 : i32
    %21 = arith.addi %0, %c0_i32_10 : i32
    %22 = arith.index_cast %21 : i32 to index
    %c4 = arith.constant 4 : index
    %23 = memref.load %arg1[%22, %c4] : memref<8x8xi32, #tpu.memory_space<smem>>
    %c0_i32_11 = arith.constant 0 : i32
    %c49_i32_12 = arith.constant 49 : i32
    %24 = arith.maxsi %c0_i32_11, %23 : i32
    %25 = arith.minsi %c49_i32_12, %24 : i32
    %c0_i32_13 = arith.constant 0 : i32
    %26 = arith.addi %0, %c0_i32_13 : i32
    %27 = arith.index_cast %26 : i32 to index
    %c5 = arith.constant 5 : index
    %28 = memref.load %arg1[%27, %c5] : memref<8x8xi32, #tpu.memory_space<smem>>
    %c0_i32_14 = arith.constant 0 : i32
    %c49_i32_15 = arith.constant 49 : i32
    %29 = arith.maxsi %c0_i32_14, %28 : i32
    %30 = arith.minsi %c49_i32_15, %29 : i32
    %c0_i32_16 = arith.constant 0 : i32
    %31 = arith.addi %0, %c0_i32_16 : i32
    %32 = arith.index_cast %31 : i32 to index
    %c6 = arith.constant 6 : index
    %33 = memref.load %arg1[%32, %c6] : memref<8x8xi32, #tpu.memory_space<smem>>
    %c0_i32_17 = arith.constant 0 : i32
    %c49_i32_18 = arith.constant 49 : i32
    %34 = arith.maxsi %c0_i32_17, %33 : i32
    %35 = arith.minsi %c49_i32_18, %34 : i32
    %c0_i32_19 = arith.constant 0 : i32
    %36 = arith.addi %0, %c0_i32_19 : i32
    %37 = arith.index_cast %36 : i32 to index
    %c7 = arith.constant 7 : index
    %38 = memref.load %arg1[%37, %c7] : memref<8x8xi32, #tpu.memory_space<smem>>
    %c0_i32_20 = arith.constant 0 : i32
    %c49_i32_21 = arith.constant 49 : i32
    %39 = arith.maxsi %c0_i32_20, %38 : i32
    %40 = arith.minsi %c49_i32_21, %39 : i32
    %c0_i32_22 = arith.constant 0 : i32
    %41 = arith.addi %0, %c0_i32_22 : i32
    %42 = arith.index_cast %41 : i32 to index
    %43 = memref.load %arg2[%42] : memref<8xi32, #tpu.memory_space<smem>>
    %c0_i32_23 = arith.constant 0 : i32
    %c4_i32 = arith.constant 4 : i32
    %44 = arith.maxsi %c0_i32_23, %43 : i32
    %45 = arith.minsi %c4_i32, %44 : i32
    %c1_i32 = arith.constant 1 : i32
    %46 = arith.addi %0, %c1_i32 : i32
    %47 = arith.index_cast %46 : i32 to index
    %c0_24 = arith.constant 0 : index
    %48 = memref.load %arg1[%47, %c0_24] : memref<8x8xi32, #tpu.memory_space<smem>>
    %c0_i32_25 = arith.constant 0 : i32
    %c49_i32_26 = arith.constant 49 : i32
    %49 = arith.maxsi %c0_i32_25, %48 : i32
    %50 = arith.minsi %c49_i32_26, %49 : i32
    %c1_i32_27 = arith.constant 1 : i32
    %51 = arith.addi %0, %c1_i32_27 : i32
    %52 = arith.index_cast %51 : i32 to index
    %c1_28 = arith.constant 1 : index
    %53 = memref.load %arg1[%52, %c1_28] : memref<8x8xi32, #tpu.memory_space<smem>>
    %c0_i32_29 = arith.constant 0 : i32
    %c49_i32_30 = arith.constant 49 : i32
    %54 = arith.maxsi %c0_i32_29, %53 : i32
    %55 = arith.minsi %c49_i32_30, %54 : i32
    %c1_i32_31 = arith.constant 1 : i32
    %56 = arith.addi %0, %c1_i32_31 : i32
    %57 = arith.index_cast %56 : i32 to index
    %c2_32 = arith.constant 2 : index
    %58 = memref.load %arg1[%57, %c2_32] : memref<8x8xi32, #tpu.memory_space<smem>>
    %c0_i32_33 = arith.constant 0 : i32
    %c49_i32_34 = arith.constant 49 : i32
    %59 = arith.maxsi %c0_i32_33, %58 : i32
    %60 = arith.minsi %c49_i32_34, %59 : i32
    %c1_i32_35 = arith.constant 1 : i32
    %61 = arith.addi %0, %c1_i32_35 : i32
    %62 = arith.index_cast %61 : i32 to index
    %c3_36 = arith.constant 3 : index
    %63 = memref.load %arg1[%62, %c3_36] : memref<8x8xi32, #tpu.memory_space<smem>>
    %c0_i32_37 = arith.constant 0 : i32
    %c49_i32_38 = arith.constant 49 : i32
    %64 = arith.maxsi %c0_i32_37, %63 : i32
    %65 = arith.minsi %c49_i32_38, %64 : i32
    %c1_i32_39 = arith.constant 1 : i32
    %66 = arith.addi %0, %c1_i32_39 : i32
    %67 = arith.index_cast %66 : i32 to index
    %c4_40 = arith.constant 4 : index
    %68 = memref.load %arg1[%67, %c4_40] : memref<8x8xi32, #tpu.memory_space<smem>>
    %c0_i32_41 = arith.constant 0 : i32
    %c49_i32_42 = arith.constant 49 : i32
    %69 = arith.maxsi %c0_i32_41, %68 : i32
    %70 = arith.minsi %c49_i32_42, %69 : i32
    %c1_i32_43 = arith.constant 1 : i32
    %71 = arith.addi %0, %c1_i32_43 : i32
    %72 = arith.index_cast %71 : i32 to index
    %c5_44 = arith.constant 5 : index
    %73 = memref.load %arg1[%72, %c5_44] : memref<8x8xi32, #tpu.memory_space<smem>>
    %c0_i32_45 = arith.constant 0 : i32
    %c49_i32_46 = arith.constant 49 : i32
    %74 = arith.maxsi %c0_i32_45, %73 : i32
    %75 = arith.minsi %c49_i32_46, %74 : i32
    %c1_i32_47 = arith.constant 1 : i32
    %76 = arith.addi %0, %c1_i32_47 : i32
    %77 = arith.index_cast %76 : i32 to index
    %c6_48 = arith.constant 6 : index
    %78 = memref.load %arg1[%77, %c6_48] : memref<8x8xi32, #tpu.memory_space<smem>>
    %c0_i32_49 = arith.constant 0 : i32
    %c49_i32_50 = arith.constant 49 : i32
    %79 = arith.maxsi %c0_i32_49, %78 : i32
    %80 = arith.minsi %c49_i32_50, %79 : i32
    %c1_i32_51 = arith.constant 1 : i32
    %81 = arith.addi %0, %c1_i32_51 : i32
    %82 = arith.index_cast %81 : i32 to index
    %c7_52 = arith.constant 7 : index
    %83 = memref.load %arg1[%82, %c7_52] : memref<8x8xi32, #tpu.memory_space<smem>>
    %c0_i32_53 = arith.constant 0 : i32
    %c49_i32_54 = arith.constant 49 : i32
    %84 = arith.maxsi %c0_i32_53, %83 : i32
    %85 = arith.minsi %c49_i32_54, %84 : i32
    %c1_i32_55 = arith.constant 1 : i32
    %86 = arith.addi %0, %c1_i32_55 : i32
    %87 = arith.index_cast %86 : i32 to index
    %88 = memref.load %arg2[%87] : memref<8xi32, #tpu.memory_space<smem>>
    %c0_i32_56 = arith.constant 0 : i32
    %c4_i32_57 = arith.constant 4 : i32
    %89 = arith.maxsi %c0_i32_56, %88 : i32
    %90 = arith.minsi %c4_i32_57, %89 : i32
    %c2_i32 = arith.constant 2 : i32
    %91 = arith.addi %0, %c2_i32 : i32
    %92 = arith.index_cast %91 : i32 to index
    %c0_58 = arith.constant 0 : index
    %93 = memref.load %arg1[%92, %c0_58] : memref<8x8xi32, #tpu.memory_space<smem>>
    %c0_i32_59 = arith.constant 0 : i32
    %c49_i32_60 = arith.constant 49 : i32
    %94 = arith.maxsi %c0_i32_59, %93 : i32
    %95 = arith.minsi %c49_i32_60, %94 : i32
    %c2_i32_61 = arith.constant 2 : i32
    %96 = arith.addi %0, %c2_i32_61 : i32
    %97 = arith.index_cast %96 : i32 to index
    %c1_62 = arith.constant 1 : index
    %98 = memref.load %arg1[%97, %c1_62] : memref<8x8xi32, #tpu.memory_space<smem>>
    %c0_i32_63 = arith.constant 0 : i32
    %c49_i32_64 = arith.constant 49 : i32
    %99 = arith.maxsi %c0_i32_63, %98 : i32
    %100 = arith.minsi %c49_i32_64, %99 : i32
    %c2_i32_65 = arith.constant 2 : i32
    %101 = arith.addi %0, %c2_i32_65 : i32
    %102 = arith.index_cast %101 : i32 to index
    %c2_66 = arith.constant 2 : index
    %103 = memref.load %arg1[%102, %c2_66] : memref<8x8xi32, #tpu.memory_space<smem>>
    %c0_i32_67 = arith.constant 0 : i32
    %c49_i32_68 = arith.constant 49 : i32
    %104 = arith.maxsi %c0_i32_67, %103 : i32
    %105 = arith.minsi %c49_i32_68, %104 : i32
    %c2_i32_69 = arith.constant 2 : i32
    %106 = arith.addi %0, %c2_i32_69 : i32
    %107 = arith.index_cast %106 : i32 to index
    %c3_70 = arith.constant 3 : index
    %108 = memref.load %arg1[%107, %c3_70] : memref<8x8xi32, #tpu.memory_space<smem>>
    %c0_i32_71 = arith.constant 0 : i32
    %c49_i32_72 = arith.constant 49 : i32
    %109 = arith.maxsi %c0_i32_71, %108 : i32
    %110 = arith.minsi %c49_i32_72, %109 : i32
    %c2_i32_73 = arith.constant 2 : i32
    %111 = arith.addi %0, %c2_i32_73 : i32
    %112 = arith.index_cast %111 : i32 to index
    %c4_74 = arith.constant 4 : index
    %113 = memref.load %arg1[%112, %c4_74] : memref<8x8xi32, #tpu.memory_space<smem>>
    %c0_i32_75 = arith.constant 0 : i32
    %c49_i32_76 = arith.constant 49 : i32
    %114 = arith.maxsi %c0_i32_75, %113 : i32
    %115 = arith.minsi %c49_i32_76, %114 : i32
    %c2_i32_77 = arith.constant 2 : i32
    %116 = arith.addi %0, %c2_i32_77 : i32
    %117 = arith.index_cast %116 : i32 to index
    %c5_78 = arith.constant 5 : index
    %118 = memref.load %arg1[%117, %c5_78] : memref<8x8xi32, #tpu.memory_space<smem>>
    %c0_i32_79 = arith.constant 0 : i32
    %c49_i32_80 = arith.constant 49 : i32
    %119 = arith.maxsi %c0_i32_79, %118 : i32
    %120 = arith.minsi %c49_i32_80, %119 : i32
    %c2_i32_81 = arith.constant 2 : i32
    %121 = arith.addi %0, %c2_i32_81 : i32
    %122 = arith.index_cast %121 : i32 to index
    %c6_82 = arith.constant 6 : index
    %123 = memref.load %arg1[%122, %c6_82] : memref<8x8xi32, #tpu.memory_space<smem>>
    %c0_i32_83 = arith.constant 0 : i32
    %c49_i32_84 = arith.constant 49 : i32
    %124 = arith.maxsi %c0_i32_83, %123 : i32
    %125 = arith.minsi %c49_i32_84, %124 : i32
    %c2_i32_85 = arith.constant 2 : i32
    %126 = arith.addi %0, %c2_i32_85 : i32
    %127 = arith.index_cast %126 : i32 to index
    %c7_86 = arith.constant 7 : index
    %128 = memref.load %arg1[%127, %c7_86] : memref<8x8xi32, #tpu.memory_space<smem>>
    %c0_i32_87 = arith.constant 0 : i32
    %c49_i32_88 = arith.constant 49 : i32
    %129 = arith.maxsi %c0_i32_87, %128 : i32
    %130 = arith.minsi %c49_i32_88, %129 : i32
    %c2_i32_89 = arith.constant 2 : i32
    %131 = arith.addi %0, %c2_i32_89 : i32
    %132 = arith.index_cast %131 : i32 to index
    %133 = memref.load %arg2[%132] : memref<8xi32, #tpu.memory_space<smem>>
    %c0_i32_90 = arith.constant 0 : i32
    %c4_i32_91 = arith.constant 4 : i32
    %134 = arith.maxsi %c0_i32_90, %133 : i32
    %135 = arith.minsi %c4_i32_91, %134 : i32
    %c3_i32 = arith.constant 3 : i32
    %136 = arith.addi %0, %c3_i32 : i32
    %137 = arith.index_cast %136 : i32 to index
    %c0_92 = arith.constant 0 : index
    %138 = memref.load %arg1[%137, %c0_92] : memref<8x8xi32, #tpu.memory_space<smem>>
    %c0_i32_93 = arith.constant 0 : i32
    %c49_i32_94 = arith.constant 49 : i32
    %139 = arith.maxsi %c0_i32_93, %138 : i32
    %140 = arith.minsi %c49_i32_94, %139 : i32
    %c3_i32_95 = arith.constant 3 : i32
    %141 = arith.addi %0, %c3_i32_95 : i32
    %142 = arith.index_cast %141 : i32 to index
    %c1_96 = arith.constant 1 : index
    %143 = memref.load %arg1[%142, %c1_96] : memref<8x8xi32, #tpu.memory_space<smem>>
    %c0_i32_97 = arith.constant 0 : i32
    %c49_i32_98 = arith.constant 49 : i32
    %144 = arith.maxsi %c0_i32_97, %143 : i32
    %145 = arith.minsi %c49_i32_98, %144 : i32
    %c3_i32_99 = arith.constant 3 : i32
    %146 = arith.addi %0, %c3_i32_99 : i32
    %147 = arith.index_cast %146 : i32 to index
    %c2_100 = arith.constant 2 : index
    %148 = memref.load %arg1[%147, %c2_100] : memref<8x8xi32, #tpu.memory_space<smem>>
    %c0_i32_101 = arith.constant 0 : i32
    %c49_i32_102 = arith.constant 49 : i32
    %149 = arith.maxsi %c0_i32_101, %148 : i32
    %150 = arith.minsi %c49_i32_102, %149 : i32
    %c3_i32_103 = arith.constant 3 : i32
    %151 = arith.addi %0, %c3_i32_103 : i32
    %152 = arith.index_cast %151 : i32 to index
    %c3_104 = arith.constant 3 : index
    %153 = memref.load %arg1[%152, %c3_104] : memref<8x8xi32, #tpu.memory_space<smem>>
    %c0_i32_105 = arith.constant 0 : i32
    %c49_i32_106 = arith.constant 49 : i32
    %154 = arith.maxsi %c0_i32_105, %153 : i32
    %155 = arith.minsi %c49_i32_106, %154 : i32
    %c3_i32_107 = arith.constant 3 : i32
    %156 = arith.addi %0, %c3_i32_107 : i32
    %157 = arith.index_cast %156 : i32 to index
    %c4_108 = arith.constant 4 : index
    %158 = memref.load %arg1[%157, %c4_108] : memref<8x8xi32, #tpu.memory_space<smem>>
    %c0_i32_109 = arith.constant 0 : i32
    %c49_i32_110 = arith.constant 49 : i32
    %159 = arith.maxsi %c0_i32_109, %158 : i32
    %160 = arith.minsi %c49_i32_110, %159 : i32
    %c3_i32_111 = arith.constant 3 : i32
    %161 = arith.addi %0, %c3_i32_111 : i32
    %162 = arith.index_cast %161 : i32 to index
    %c5_112 = arith.constant 5 : index
    %163 = memref.load %arg1[%162, %c5_112] : memref<8x8xi32, #tpu.memory_space<smem>>
    %c0_i32_113 = arith.constant 0 : i32
    %c49_i32_114 = arith.constant 49 : i32
    %164 = arith.maxsi %c0_i32_113, %163 : i32
    %165 = arith.minsi %c49_i32_114, %164 : i32
    %c3_i32_115 = arith.constant 3 : i32
    %166 = arith.addi %0, %c3_i32_115 : i32
    %167 = arith.index_cast %166 : i32 to index
    %c6_116 = arith.constant 6 : index
    %168 = memref.load %arg1[%167, %c6_116] : memref<8x8xi32, #tpu.memory_space<smem>>
    %c0_i32_117 = arith.constant 0 : i32
    %c49_i32_118 = arith.constant 49 : i32
    %169 = arith.maxsi %c0_i32_117, %168 : i32
    %170 = arith.minsi %c49_i32_118, %169 : i32
    %c3_i32_119 = arith.constant 3 : i32
    %171 = arith.addi %0, %c3_i32_119 : i32
    %172 = arith.index_cast %171 : i32 to index
    %c7_120 = arith.constant 7 : index
    %173 = memref.load %arg1[%172, %c7_120] : memref<8x8xi32, #tpu.memory_space<smem>>
    %c0_i32_121 = arith.constant 0 : i32
    %c49_i32_122 = arith.constant 49 : i32
    %174 = arith.maxsi %c0_i32_121, %173 : i32
    %175 = arith.minsi %c49_i32_122, %174 : i32
    %c3_i32_123 = arith.constant 3 : i32
    %176 = arith.addi %0, %c3_i32_123 : i32
    %177 = arith.index_cast %176 : i32 to index
    %178 = memref.load %arg2[%177] : memref<8xi32, #tpu.memory_space<smem>>
    %c0_i32_124 = arith.constant 0 : i32
    %c4_i32_125 = arith.constant 4 : i32
    %179 = arith.maxsi %c0_i32_124, %178 : i32
    %180 = arith.minsi %c4_i32_125, %179 : i32
    %c4_i32_126 = arith.constant 4 : i32
    %181 = arith.addi %0, %c4_i32_126 : i32
    %182 = arith.index_cast %181 : i32 to index
    %c0_127 = arith.constant 0 : index
    %183 = memref.load %arg1[%182, %c0_127] : memref<8x8xi32, #tpu.memory_space<smem>>
    %c0_i32_128 = arith.constant 0 : i32
    %c49_i32_129 = arith.constant 49 : i32
    %184 = arith.maxsi %c0_i32_128, %183 : i32
    %185 = arith.minsi %c49_i32_129, %184 : i32
    %c4_i32_130 = arith.constant 4 : i32
    %186 = arith.addi %0, %c4_i32_130 : i32
    %187 = arith.index_cast %186 : i32 to index
    %c1_131 = arith.constant 1 : index
    %188 = memref.load %arg1[%187, %c1_131] : memref<8x8xi32, #tpu.memory_space<smem>>
    %c0_i32_132 = arith.constant 0 : i32
    %c49_i32_133 = arith.constant 49 : i32
    %189 = arith.maxsi %c0_i32_132, %188 : i32
    %190 = arith.minsi %c49_i32_133, %189 : i32
    %c4_i32_134 = arith.constant 4 : i32
    %191 = arith.addi %0, %c4_i32_134 : i32
    %192 = arith.index_cast %191 : i32 to index
    %c2_135 = arith.constant 2 : index
    %193 = memref.load %arg1[%192, %c2_135] : memref<8x8xi32, #tpu.memory_space<smem>>
    %c0_i32_136 = arith.constant 0 : i32
    %c49_i32_137 = arith.constant 49 : i32
    %194 = arith.maxsi %c0_i32_136, %193 : i32
    %195 = arith.minsi %c49_i32_137, %194 : i32
    %c4_i32_138 = arith.constant 4 : i32
    %196 = arith.addi %0, %c4_i32_138 : i32
    %197 = arith.index_cast %196 : i32 to index
    %c3_139 = arith.constant 3 : index
    %198 = memref.load %arg1[%197, %c3_139] : memref<8x8xi32, #tpu.memory_space<smem>>
    %c0_i32_140 = arith.constant 0 : i32
    %c49_i32_141 = arith.constant 49 : i32
    %199 = arith.maxsi %c0_i32_140, %198 : i32
    %200 = arith.minsi %c49_i32_141, %199 : i32
    %c4_i32_142 = arith.constant 4 : i32
    %201 = arith.addi %0, %c4_i32_142 : i32
    %202 = arith.index_cast %201 : i32 to index
    %c4_143 = arith.constant 4 : index
    %203 = memref.load %arg1[%202, %c4_143] : memref<8x8xi32, #tpu.memory_space<smem>>
    %c0_i32_144 = arith.constant 0 : i32
    %c49_i32_145 = arith.constant 49 : i32
    %204 = arith.maxsi %c0_i32_144, %203 : i32
    %205 = arith.minsi %c49_i32_145, %204 : i32
    %c4_i32_146 = arith.constant 4 : i32
    %206 = arith.addi %0, %c4_i32_146 : i32
    %207 = arith.index_cast %206 : i32 to index
    %c5_147 = arith.constant 5 : index
    %208 = memref.load %arg1[%207, %c5_147] : memref<8x8xi32, #tpu.memory_space<smem>>
    %c0_i32_148 = arith.constant 0 : i32
    %c49_i32_149 = arith.constant 49 : i32
    %209 = arith.maxsi %c0_i32_148, %208 : i32
    %210 = arith.minsi %c49_i32_149, %209 : i32
    %c4_i32_150 = arith.constant 4 : i32
    %211 = arith.addi %0, %c4_i32_150 : i32
    %212 = arith.index_cast %211 : i32 to index
    %c6_151 = arith.constant 6 : index
    %213 = memref.load %arg1[%212, %c6_151] : memref<8x8xi32, #tpu.memory_space<smem>>
    %c0_i32_152 = arith.constant 0 : i32
    %c49_i32_153 = arith.constant 49 : i32
    %214 = arith.maxsi %c0_i32_152, %213 : i32
    %215 = arith.minsi %c49_i32_153, %214 : i32
    %c4_i32_154 = arith.constant 4 : i32
    %216 = arith.addi %0, %c4_i32_154 : i32
    %217 = arith.index_cast %216 : i32 to index
    %c7_155 = arith.constant 7 : index
    %218 = memref.load %arg1[%217, %c7_155] : memref<8x8xi32, #tpu.memory_space<smem>>
    %c0_i32_156 = arith.constant 0 : i32
    %c49_i32_157 = arith.constant 49 : i32
    %219 = arith.maxsi %c0_i32_156, %218 : i32
    %220 = arith.minsi %c49_i32_157, %219 : i32
    %c4_i32_158 = arith.constant 4 : i32
    %221 = arith.addi %0, %c4_i32_158 : i32
    %222 = arith.index_cast %221 : i32 to index
    %223 = memref.load %arg2[%222] : memref<8xi32, #tpu.memory_space<smem>>
    %c0_i32_159 = arith.constant 0 : i32
    %c4_i32_160 = arith.constant 4 : i32
    %224 = arith.maxsi %c0_i32_159, %223 : i32
    %225 = arith.minsi %c4_i32_160, %224 : i32
    %c5_i32 = arith.constant 5 : i32
    %226 = arith.addi %0, %c5_i32 : i32
    %227 = arith.index_cast %226 : i32 to index
    %c0_161 = arith.constant 0 : index
    %228 = memref.load %arg1[%227, %c0_161] : memref<8x8xi32, #tpu.memory_space<smem>>
    %c0_i32_162 = arith.constant 0 : i32
    %c49_i32_163 = arith.constant 49 : i32
    %229 = arith.maxsi %c0_i32_162, %228 : i32
    %230 = arith.minsi %c49_i32_163, %229 : i32
    %c5_i32_164 = arith.constant 5 : i32
    %231 = arith.addi %0, %c5_i32_164 : i32
    %232 = arith.index_cast %231 : i32 to index
    %c1_165 = arith.constant 1 : index
    %233 = memref.load %arg1[%232, %c1_165] : memref<8x8xi32, #tpu.memory_space<smem>>
    %c0_i32_166 = arith.constant 0 : i32
    %c49_i32_167 = arith.constant 49 : i32
    %234 = arith.maxsi %c0_i32_166, %233 : i32
    %235 = arith.minsi %c49_i32_167, %234 : i32
    %c5_i32_168 = arith.constant 5 : i32
    %236 = arith.addi %0, %c5_i32_168 : i32
    %237 = arith.index_cast %236 : i32 to index
    %c2_169 = arith.constant 2 : index
    %238 = memref.load %arg1[%237, %c2_169] : memref<8x8xi32, #tpu.memory_space<smem>>
    %c0_i32_170 = arith.constant 0 : i32
    %c49_i32_171 = arith.constant 49 : i32
    %239 = arith.maxsi %c0_i32_170, %238 : i32
    %240 = arith.minsi %c49_i32_171, %239 : i32
    %c5_i32_172 = arith.constant 5 : i32
    %241 = arith.addi %0, %c5_i32_172 : i32
    %242 = arith.index_cast %241 : i32 to index
    %c3_173 = arith.constant 3 : index
    %243 = memref.load %arg1[%242, %c3_173] : memref<8x8xi32, #tpu.memory_space<smem>>
    %c0_i32_174 = arith.constant 0 : i32
    %c49_i32_175 = arith.constant 49 : i32
    %244 = arith.maxsi %c0_i32_174, %243 : i32
    %245 = arith.minsi %c49_i32_175, %244 : i32
    %c5_i32_176 = arith.constant 5 : i32
    %246 = arith.addi %0, %c5_i32_176 : i32
    %247 = arith.index_cast %246 : i32 to index
    %c4_177 = arith.constant 4 : index
    %248 = memref.load %arg1[%247, %c4_177] : memref<8x8xi32, #tpu.memory_space<smem>>
    %c0_i32_178 = arith.constant 0 : i32
    %c49_i32_179 = arith.constant 49 : i32
    %249 = arith.maxsi %c0_i32_178, %248 : i32
    %250 = arith.minsi %c49_i32_179, %249 : i32
    %c5_i32_180 = arith.constant 5 : i32
    %251 = arith.addi %0, %c5_i32_180 : i32
    %252 = arith.index_cast %251 : i32 to index
    %c5_181 = arith.constant 5 : index
    %253 = memref.load %arg1[%252, %c5_181] : memref<8x8xi32, #tpu.memory_space<smem>>
    %c0_i32_182 = arith.constant 0 : i32
    %c49_i32_183 = arith.constant 49 : i32
    %254 = arith.maxsi %c0_i32_182, %253 : i32
    %255 = arith.minsi %c49_i32_183, %254 : i32
    %c5_i32_184 = arith.constant 5 : i32
    %256 = arith.addi %0, %c5_i32_184 : i32
    %257 = arith.index_cast %256 : i32 to index
    %c6_185 = arith.constant 6 : index
    %258 = memref.load %arg1[%257, %c6_185] : memref<8x8xi32, #tpu.memory_space<smem>>
    %c0_i32_186 = arith.constant 0 : i32
    %c49_i32_187 = arith.constant 49 : i32
    %259 = arith.maxsi %c0_i32_186, %258 : i32
    %260 = arith.minsi %c49_i32_187, %259 : i32
    %c5_i32_188 = arith.constant 5 : i32
    %261 = arith.addi %0, %c5_i32_188 : i32
    %262 = arith.index_cast %261 : i32 to index
    %c7_189 = arith.constant 7 : index
    %263 = memref.load %arg1[%262, %c7_189] : memref<8x8xi32, #tpu.memory_space<smem>>
    %c0_i32_190 = arith.constant 0 : i32
    %c49_i32_191 = arith.constant 49 : i32
    %264 = arith.maxsi %c0_i32_190, %263 : i32
    %265 = arith.minsi %c49_i32_191, %264 : i32
    %c5_i32_192 = arith.constant 5 : i32
    %266 = arith.addi %0, %c5_i32_192 : i32
    %267 = arith.index_cast %266 : i32 to index
    %268 = memref.load %arg2[%267] : memref<8xi32, #tpu.memory_space<smem>>
    %c0_i32_193 = arith.constant 0 : i32
    %c4_i32_194 = arith.constant 4 : i32
    %269 = arith.maxsi %c0_i32_193, %268 : i32
    %270 = arith.minsi %c4_i32_194, %269 : i32
    %c6_i32 = arith.constant 6 : i32
    %271 = arith.addi %0, %c6_i32 : i32
    %272 = arith.index_cast %271 : i32 to index
    %c0_195 = arith.constant 0 : index
    %273 = memref.load %arg1[%272, %c0_195] : memref<8x8xi32, #tpu.memory_space<smem>>
    %c0_i32_196 = arith.constant 0 : i32
    %c49_i32_197 = arith.constant 49 : i32
    %274 = arith.maxsi %c0_i32_196, %273 : i32
    %275 = arith.minsi %c49_i32_197, %274 : i32
    %c6_i32_198 = arith.constant 6 : i32
    %276 = arith.addi %0, %c6_i32_198 : i32
    %277 = arith.index_cast %276 : i32 to index
    %c1_199 = arith.constant 1 : index
    %278 = memref.load %arg1[%277, %c1_199] : memref<8x8xi32, #tpu.memory_space<smem>>
    %c0_i32_200 = arith.constant 0 : i32
    %c49_i32_201 = arith.constant 49 : i32
    %279 = arith.maxsi %c0_i32_200, %278 : i32
    %280 = arith.minsi %c49_i32_201, %279 : i32
    %c6_i32_202 = arith.constant 6 : i32
    %281 = arith.addi %0, %c6_i32_202 : i32
    %282 = arith.index_cast %281 : i32 to index
    %c2_203 = arith.constant 2 : index
    %283 = memref.load %arg1[%282, %c2_203] : memref<8x8xi32, #tpu.memory_space<smem>>
    %c0_i32_204 = arith.constant 0 : i32
    %c49_i32_205 = arith.constant 49 : i32
    %284 = arith.maxsi %c0_i32_204, %283 : i32
    %285 = arith.minsi %c49_i32_205, %284 : i32
    %c6_i32_206 = arith.constant 6 : i32
    %286 = arith.addi %0, %c6_i32_206 : i32
    %287 = arith.index_cast %286 : i32 to index
    %c3_207 = arith.constant 3 : index
    %288 = memref.load %arg1[%287, %c3_207] : memref<8x8xi32, #tpu.memory_space<smem>>
    %c0_i32_208 = arith.constant 0 : i32
    %c49_i32_209 = arith.constant 49 : i32
    %289 = arith.maxsi %c0_i32_208, %288 : i32
    %290 = arith.minsi %c49_i32_209, %289 : i32
    %c6_i32_210 = arith.constant 6 : i32
    %291 = arith.addi %0, %c6_i32_210 : i32
    %292 = arith.index_cast %291 : i32 to index
    %c4_211 = arith.constant 4 : index
    %293 = memref.load %arg1[%292, %c4_211] : memref<8x8xi32, #tpu.memory_space<smem>>
    %c0_i32_212 = arith.constant 0 : i32
    %c49_i32_213 = arith.constant 49 : i32
    %294 = arith.maxsi %c0_i32_212, %293 : i32
    %295 = arith.minsi %c49_i32_213, %294 : i32
    %c6_i32_214 = arith.constant 6 : i32
    %296 = arith.addi %0, %c6_i32_214 : i32
    %297 = arith.index_cast %296 : i32 to index
    %c5_215 = arith.constant 5 : index
    %298 = memref.load %arg1[%297, %c5_215] : memref<8x8xi32, #tpu.memory_space<smem>>
    %c0_i32_216 = arith.constant 0 : i32
    %c49_i32_217 = arith.constant 49 : i32
    %299 = arith.maxsi %c0_i32_216, %298 : i32
    %300 = arith.minsi %c49_i32_217, %299 : i32
    %c6_i32_218 = arith.constant 6 : i32
    %301 = arith.addi %0, %c6_i32_218 : i32
    %302 = arith.index_cast %301 : i32 to index
    %c6_219 = arith.constant 6 : index
    %303 = memref.load %arg1[%302, %c6_219] : memref<8x8xi32, #tpu.memory_space<smem>>
    %c0_i32_220 = arith.constant 0 : i32
    %c49_i32_221 = arith.constant 49 : i32
    %304 = arith.maxsi %c0_i32_220, %303 : i32
    %305 = arith.minsi %c49_i32_221, %304 : i32
    %c6_i32_222 = arith.constant 6 : i32
    %306 = arith.addi %0, %c6_i32_222 : i32
    %307 = arith.index_cast %306 : i32 to index
    %c7_223 = arith.constant 7 : index
    %308 = memref.load %arg1[%307, %c7_223] : memref<8x8xi32, #tpu.memory_space<smem>>
    %c0_i32_224 = arith.constant 0 : i32
    %c49_i32_225 = arith.constant 49 : i32
    %309 = arith.maxsi %c0_i32_224, %308 : i32
    %310 = arith.minsi %c49_i32_225, %309 : i32
    %c6_i32_226 = arith.constant 6 : i32
    %311 = arith.addi %0, %c6_i32_226 : i32
    %312 = arith.index_cast %311 : i32 to index
    %313 = memref.load %arg2[%312] : memref<8xi32, #tpu.memory_space<smem>>
    %c0_i32_227 = arith.constant 0 : i32
    %c4_i32_228 = arith.constant 4 : i32
    %314 = arith.maxsi %c0_i32_227, %313 : i32
    %315 = arith.minsi %c4_i32_228, %314 : i32
    %c7_i32 = arith.constant 7 : i32
    %316 = arith.addi %0, %c7_i32 : i32
    %317 = arith.index_cast %316 : i32 to index
    %c0_229 = arith.constant 0 : index
    %318 = memref.load %arg1[%317, %c0_229] : memref<8x8xi32, #tpu.memory_space<smem>>
    %c0_i32_230 = arith.constant 0 : i32
    %c49_i32_231 = arith.constant 49 : i32
    %319 = arith.maxsi %c0_i32_230, %318 : i32
    %320 = arith.minsi %c49_i32_231, %319 : i32
    %c7_i32_232 = arith.constant 7 : i32
    %321 = arith.addi %0, %c7_i32_232 : i32
    %322 = arith.index_cast %321 : i32 to index
    %c1_233 = arith.constant 1 : index
    %323 = memref.load %arg1[%322, %c1_233] : memref<8x8xi32, #tpu.memory_space<smem>>
    %c0_i32_234 = arith.constant 0 : i32
    %c49_i32_235 = arith.constant 49 : i32
    %324 = arith.maxsi %c0_i32_234, %323 : i32
    %325 = arith.minsi %c49_i32_235, %324 : i32
    %c7_i32_236 = arith.constant 7 : i32
    %326 = arith.addi %0, %c7_i32_236 : i32
    %327 = arith.index_cast %326 : i32 to index
    %c2_237 = arith.constant 2 : index
    %328 = memref.load %arg1[%327, %c2_237] : memref<8x8xi32, #tpu.memory_space<smem>>
    %c0_i32_238 = arith.constant 0 : i32
    %c49_i32_239 = arith.constant 49 : i32
    %329 = arith.maxsi %c0_i32_238, %328 : i32
    %330 = arith.minsi %c49_i32_239, %329 : i32
    %c7_i32_240 = arith.constant 7 : i32
    %331 = arith.addi %0, %c7_i32_240 : i32
    %332 = arith.index_cast %331 : i32 to index
    %c3_241 = arith.constant 3 : index
    %333 = memref.load %arg1[%332, %c3_241] : memref<8x8xi32, #tpu.memory_space<smem>>
    %c0_i32_242 = arith.constant 0 : i32
    %c49_i32_243 = arith.constant 49 : i32
    %334 = arith.maxsi %c0_i32_242, %333 : i32
    %335 = arith.minsi %c49_i32_243, %334 : i32
    %c7_i32_244 = arith.constant 7 : i32
    %336 = arith.addi %0, %c7_i32_244 : i32
    %337 = arith.index_cast %336 : i32 to index
    %c4_245 = arith.constant 4 : index
    %338 = memref.load %arg1[%337, %c4_245] : memref<8x8xi32, #tpu.memory_space<smem>>
    %c0_i32_246 = arith.constant 0 : i32
    %c49_i32_247 = arith.constant 49 : i32
    %339 = arith.maxsi %c0_i32_246, %338 : i32
    %340 = arith.minsi %c49_i32_247, %339 : i32
    %c7_i32_248 = arith.constant 7 : i32
    %341 = arith.addi %0, %c7_i32_248 : i32
    %342 = arith.index_cast %341 : i32 to index
    %c5_249 = arith.constant 5 : index
    %343 = memref.load %arg1[%342, %c5_249] : memref<8x8xi32, #tpu.memory_space<smem>>
    %c0_i32_250 = arith.constant 0 : i32
    %c49_i32_251 = arith.constant 49 : i32
    %344 = arith.maxsi %c0_i32_250, %343 : i32
    %345 = arith.minsi %c49_i32_251, %344 : i32
    %c7_i32_252 = arith.constant 7 : i32
    %346 = arith.addi %0, %c7_i32_252 : i32
    %347 = arith.index_cast %346 : i32 to index
    %c6_253 = arith.constant 6 : index
    %348 = memref.load %arg1[%347, %c6_253] : memref<8x8xi32, #tpu.memory_space<smem>>
    %c0_i32_254 = arith.constant 0 : i32
    %c49_i32_255 = arith.constant 49 : i32
    %349 = arith.maxsi %c0_i32_254, %348 : i32
    %350 = arith.minsi %c49_i32_255, %349 : i32
    %c7_i32_256 = arith.constant 7 : i32
    %351 = arith.addi %0, %c7_i32_256 : i32
    %352 = arith.index_cast %351 : i32 to index
    %c7_257 = arith.constant 7 : index
    %353 = memref.load %arg1[%352, %c7_257] : memref<8x8xi32, #tpu.memory_space<smem>>
    %c0_i32_258 = arith.constant 0 : i32
    %c49_i32_259 = arith.constant 49 : i32
    %354 = arith.maxsi %c0_i32_258, %353 : i32
    %355 = arith.minsi %c49_i32_259, %354 : i32
    %c7_i32_260 = arith.constant 7 : i32
    %356 = arith.addi %0, %c7_i32_260 : i32
    %357 = arith.index_cast %356 : i32 to index
    %358 = memref.load %arg2[%357] : memref<8xi32, #tpu.memory_space<smem>>
    %c0_i32_261 = arith.constant 0 : i32
    %c4_i32_262 = arith.constant 4 : i32
    %359 = arith.maxsi %c0_i32_261, %358 : i32
    %360 = arith.minsi %c4_i32_262, %359 : i32
    %c0_i32_263 = arith.constant 0 : i32
    %c0_i32_264 = arith.constant 0 : i32
    %361 = tpu.memref_slice %arg4[%5, %c0_i32_264] : memref<50x32xf32, #tpu.memory_space<any>> -> memref<1x32xf32, #tpu.memory_space<any>>
    %c0_i32_265 = arith.constant 0 : i32
    %c0_i32_266 = arith.constant 0 : i32
    %362 = tpu.memref_slice %arg7[%c0_i32_265, %c0_i32_266] : memref<64x32xf32, #tpu.memory_space<vmem>> -> memref<1x32xf32, #tpu.memory_space<vmem>>
    %363 = tpu.memref_slice %arg11[%c0_i32_263] : memref<1x!tpu.dma_semaphore, #tpu.memory_space<semaphore_mem>> -> memref<1x!tpu.dma_semaphore, #tpu.memory_space<semaphore_mem>>
    %364 = tpu.memref_squeeze %363 : memref<1x!tpu.dma_semaphore, #tpu.memory_space<semaphore_mem>> -> memref<!tpu.dma_semaphore, #tpu.memory_space<semaphore_mem>>
    tpu.enqueue_dma source(%361 : memref<1x32xf32, #tpu.memory_space<any>>) target(%362 : memref<1x32xf32, #tpu.memory_space<vmem>>) target_semaphore(%364 : memref<!tpu.dma_semaphore, #tpu.memory_space<semaphore_mem>>)
    %c0_i32_267 = arith.constant 0 : i32
    %c0_i32_268 = arith.constant 0 : i32
    %365 = tpu.memref_slice %arg4[%10, %c0_i32_268] : memref<50x32xf32, #tpu.memory_space<any>> -> memref<1x32xf32, #tpu.memory_space<any>>
    %c8_i32_269 = arith.constant 8 : i32
    %c0_i32_270 = arith.constant 0 : i32
    %366 = tpu.memref_slice %arg7[%c8_i32_269, %c0_i32_270] : memref<64x32xf32, #tpu.memory_space<vmem>> -> memref<1x32xf32, #tpu.memory_space<vmem>>
    %367 = tpu.memref_slice %arg11[%c0_i32_267] : memref<1x!tpu.dma_semaphore, #tpu.memory_space<semaphore_mem>> -> memref<1x!tpu.dma_semaphore, #tpu.memory_space<semaphore_mem>>
    %368 = tpu.memref_squeeze %367 : memref<1x!tpu.dma_semaphore, #tpu.memory_space<semaphore_mem>> -> memref<!tpu.dma_semaphore, #tpu.memory_space<semaphore_mem>>
    tpu.enqueue_dma source(%365 : memref<1x32xf32, #tpu.memory_space<any>>) target(%366 : memref<1x32xf32, #tpu.memory_space<vmem>>) target_semaphore(%368 : memref<!tpu.dma_semaphore, #tpu.memory_space<semaphore_mem>>)
    %c0_i32_271 = arith.constant 0 : i32
    %c0_i32_272 = arith.constant 0 : i32
    %369 = tpu.memref_slice %arg4[%15, %c0_i32_272] : memref<50x32xf32, #tpu.memory_space<any>> -> memref<1x32xf32, #tpu.memory_space<any>>
    %c16_i32 = arith.constant 16 : i32
    %c0_i32_273 = arith.constant 0 : i32
    %370 = tpu.memref_slice %arg7[%c16_i32, %c0_i32_273] : memref<64x32xf32, #tpu.memory_space<vmem>> -> memref<1x32xf32, #tpu.memory_space<vmem>>
    %371 = tpu.memref_slice %arg11[%c0_i32_271] : memref<1x!tpu.dma_semaphore, #tpu.memory_space<semaphore_mem>> -> memref<1x!tpu.dma_semaphore, #tpu.memory_space<semaphore_mem>>
    %372 = tpu.memref_squeeze %371 : memref<1x!tpu.dma_semaphore, #tpu.memory_space<semaphore_mem>> -> memref<!tpu.dma_semaphore, #tpu.memory_space<semaphore_mem>>
    tpu.enqueue_dma source(%369 : memref<1x32xf32, #tpu.memory_space<any>>) target(%370 : memref<1x32xf32, #tpu.memory_space<vmem>>) target_semaphore(%372 : memref<!tpu.dma_semaphore, #tpu.memory_space<semaphore_mem>>)
    %c0_i32_274 = arith.constant 0 : i32
    %c0_i32_275 = arith.constant 0 : i32
    %373 = tpu.memref_slice %arg4[%20, %c0_i32_275] : memref<50x32xf32, #tpu.memory_space<any>> -> memref<1x32xf32, #tpu.memory_space<any>>
    %c24_i32 = arith.constant 24 : i32
    %c0_i32_276 = arith.constant 0 : i32
    %374 = tpu.memref_slice %arg7[%c24_i32, %c0_i32_276] : memref<64x32xf32, #tpu.memory_space<vmem>> -> memref<1x32xf32, #tpu.memory_space<vmem>>
    %375 = tpu.memref_slice %arg11[%c0_i32_274] : memref<1x!tpu.dma_semaphore, #tpu.memory_space<semaphore_mem>> -> memref<1x!tpu.dma_semaphore, #tpu.memory_space<semaphore_mem>>
    %376 = tpu.memref_squeeze %375 : memref<1x!tpu.dma_semaphore, #tpu.memory_space<semaphore_mem>> -> memref<!tpu.dma_semaphore, #tpu.memory_space<semaphore_mem>>
    tpu.enqueue_dma source(%373 : memref<1x32xf32, #tpu.memory_space<any>>) target(%374 : memref<1x32xf32, #tpu.memory_space<vmem>>) target_semaphore(%376 : memref<!tpu.dma_semaphore, #tpu.memory_space<semaphore_mem>>)
    %c0_i32_277 = arith.constant 0 : i32
    %c0_i32_278 = arith.constant 0 : i32
    %377 = tpu.memref_slice %arg4[%25, %c0_i32_278] : memref<50x32xf32, #tpu.memory_space<any>> -> memref<1x32xf32, #tpu.memory_space<any>>
    %c32_i32 = arith.constant 32 : i32
    %c0_i32_279 = arith.constant 0 : i32
    %378 = tpu.memref_slice %arg7[%c32_i32, %c0_i32_279] : memref<64x32xf32, #tpu.memory_space<vmem>> -> memref<1x32xf32, #tpu.memory_space<vmem>>
    %379 = tpu.memref_slice %arg11[%c0_i32_277] : memref<1x!tpu.dma_semaphore, #tpu.memory_space<semaphore_mem>> -> memref<1x!tpu.dma_semaphore, #tpu.memory_space<semaphore_mem>>
    %380 = tpu.memref_squeeze %379 : memref<1x!tpu.dma_semaphore, #tpu.memory_space<semaphore_mem>> -> memref<!tpu.dma_semaphore, #tpu.memory_space<semaphore_mem>>
    tpu.enqueue_dma source(%377 : memref<1x32xf32, #tpu.memory_space<any>>) target(%378 : memref<1x32xf32, #tpu.memory_space<vmem>>) target_semaphore(%380 : memref<!tpu.dma_semaphore, #tpu.memory_space<semaphore_mem>>)
    %c0_i32_280 = arith.constant 0 : i32
    %c0_i32_281 = arith.constant 0 : i32
    %381 = tpu.memref_slice %arg4[%30, %c0_i32_281] : memref<50x32xf32, #tpu.memory_space<any>> -> memref<1x32xf32, #tpu.memory_space<any>>
    %c40_i32 = arith.constant 40 : i32
    %c0_i32_282 = arith.constant 0 : i32
    %382 = tpu.memref_slice %arg7[%c40_i32, %c0_i32_282] : memref<64x32xf32, #tpu.memory_space<vmem>> -> memref<1x32xf32, #tpu.memory_space<vmem>>
    %383 = tpu.memref_slice %arg11[%c0_i32_280] : memref<1x!tpu.dma_semaphore, #tpu.memory_space<semaphore_mem>> -> memref<1x!tpu.dma_semaphore, #tpu.memory_space<semaphore_mem>>
    %384 = tpu.memref_squeeze %383 : memref<1x!tpu.dma_semaphore, #tpu.memory_space<semaphore_mem>> -> memref<!tpu.dma_semaphore, #tpu.memory_space<semaphore_mem>>
    tpu.enqueue_dma source(%381 : memref<1x32xf32, #tpu.memory_space<any>>) target(%382 : memref<1x32xf32, #tpu.memory_space<vmem>>) target_semaphore(%384 : memref<!tpu.dma_semaphore, #tpu.memory_space<semaphore_mem>>)
    %c0_i32_283 = arith.constant 0 : i32
    %c0_i32_284 = arith.constant 0 : i32
    %385 = tpu.memref_slice %arg4[%35, %c0_i32_284] : memref<50x32xf32, #tpu.memory_space<any>> -> memref<1x32xf32, #tpu.memory_space<any>>
    %c48_i32 = arith.constant 48 : i32
    %c0_i32_285 = arith.constant 0 : i32
    %386 = tpu.memref_slice %arg7[%c48_i32, %c0_i32_285] : memref<64x32xf32, #tpu.memory_space<vmem>> -> memref<1x32xf32, #tpu.memory_space<vmem>>
    %387 = tpu.memref_slice %arg11[%c0_i32_283] : memref<1x!tpu.dma_semaphore, #tpu.memory_space<semaphore_mem>> -> memref<1x!tpu.dma_semaphore, #tpu.memory_space<semaphore_mem>>
    %388 = tpu.memref_squeeze %387 : memref<1x!tpu.dma_semaphore, #tpu.memory_space<semaphore_mem>> -> memref<!tpu.dma_semaphore, #tpu.memory_space<semaphore_mem>>
    tpu.enqueue_dma source(%385 : memref<1x32xf32, #tpu.memory_space<any>>) target(%386 : memref<1x32xf32, #tpu.memory_space<vmem>>) target_semaphore(%388 : memref<!tpu.dma_semaphore, #tpu.memory_space<semaphore_mem>>)
    %c0_i32_286 = arith.constant 0 : i32
    %c0_i32_287 = arith.constant 0 : i32
    %389 = tpu.memref_slice %arg4[%40, %c0_i32_287] : memref<50x32xf32, #tpu.memory_space<any>> -> memref<1x32xf32, #tpu.memory_space<any>>
    %c56_i32 = arith.constant 56 : i32
    %c0_i32_288 = arith.constant 0 : i32
    %390 = tpu.memref_slice %arg7[%c56_i32, %c0_i32_288] : memref<64x32xf32, #tpu.memory_space<vmem>> -> memref<1x32xf32, #tpu.memory_space<vmem>>
    %391 = tpu.memref_slice %arg11[%c0_i32_286] : memref<1x!tpu.dma_semaphore, #tpu.memory_space<semaphore_mem>> -> memref<1x!tpu.dma_semaphore, #tpu.memory_space<semaphore_mem>>
    %392 = tpu.memref_squeeze %391 : memref<1x!tpu.dma_semaphore, #tpu.memory_space<semaphore_mem>> -> memref<!tpu.dma_semaphore, #tpu.memory_space<semaphore_mem>>
    tpu.enqueue_dma source(%389 : memref<1x32xf32, #tpu.memory_space<any>>) target(%390 : memref<1x32xf32, #tpu.memory_space<vmem>>) target_semaphore(%392 : memref<!tpu.dma_semaphore, #tpu.memory_space<semaphore_mem>>)
    %c0_i32_289 = arith.constant 0 : i32
    %c0_i32_290 = arith.constant 0 : i32
    %393 = tpu.memref_slice %arg5[%45, %c0_i32_290] : memref<5x32xf32, #tpu.memory_space<any>> -> memref<1x32xf32, #tpu.memory_space<any>>
    %c0_i32_291 = arith.constant 0 : i32
    %c0_i32_292 = arith.constant 0 : i32
    %394 = tpu.memref_slice %arg8[%c0_i32_291, %c0_i32_292] : memref<8x32xf32, #tpu.memory_space<vmem>> -> memref<1x32xf32, #tpu.memory_space<vmem>>
    %395 = tpu.memref_slice %arg11[%c0_i32_289] : memref<1x!tpu.dma_semaphore, #tpu.memory_space<semaphore_mem>> -> memref<1x!tpu.dma_semaphore, #tpu.memory_space<semaphore_mem>>
    %396 = tpu.memref_squeeze %395 : memref<1x!tpu.dma_semaphore, #tpu.memory_space<semaphore_mem>> -> memref<!tpu.dma_semaphore, #tpu.memory_space<semaphore_mem>>
    tpu.enqueue_dma source(%393 : memref<1x32xf32, #tpu.memory_space<any>>) target(%394 : memref<1x32xf32, #tpu.memory_space<vmem>>) target_semaphore(%396 : memref<!tpu.dma_semaphore, #tpu.memory_space<semaphore_mem>>)
    %c0_i32_293 = arith.constant 0 : i32
    %c0_i32_294 = arith.constant 0 : i32
    %397 = tpu.memref_slice %arg4[%50, %c0_i32_294] : memref<50x32xf32, #tpu.memory_space<any>> -> memref<1x32xf32, #tpu.memory_space<any>>
    %c1_i32_295 = arith.constant 1 : i32
    %c0_i32_296 = arith.constant 0 : i32
    %398 = tpu.memref_slice %arg7[%c1_i32_295, %c0_i32_296] : memref<64x32xf32, #tpu.memory_space<vmem>> -> memref<1x32xf32, #tpu.memory_space<vmem>>
    %399 = tpu.memref_slice %arg11[%c0_i32_293] : memref<1x!tpu.dma_semaphore, #tpu.memory_space<semaphore_mem>> -> memref<1x!tpu.dma_semaphore, #tpu.memory_space<semaphore_mem>>
    %400 = tpu.memref_squeeze %399 : memref<1x!tpu.dma_semaphore, #tpu.memory_space<semaphore_mem>> -> memref<!tpu.dma_semaphore, #tpu.memory_space<semaphore_mem>>
    tpu.enqueue_dma source(%397 : memref<1x32xf32, #tpu.memory_space<any>>) target(%398 : memref<1x32xf32, #tpu.memory_space<vmem>>) target_semaphore(%400 : memref<!tpu.dma_semaphore, #tpu.memory_space<semaphore_mem>>)
    %c0_i32_297 = arith.constant 0 : i32
    %c0_i32_298 = arith.constant 0 : i32
    %401 = tpu.memref_slice %arg4[%55, %c0_i32_298] : memref<50x32xf32, #tpu.memory_space<any>> -> memref<1x32xf32, #tpu.memory_space<any>>
    %c9_i32 = arith.constant 9 : i32
    %c0_i32_299 = arith.constant 0 : i32
    %402 = tpu.memref_slice %arg7[%c9_i32, %c0_i32_299] : memref<64x32xf32, #tpu.memory_space<vmem>> -> memref<1x32xf32, #tpu.memory_space<vmem>>
    %403 = tpu.memref_slice %arg11[%c0_i32_297] : memref<1x!tpu.dma_semaphore, #tpu.memory_space<semaphore_mem>> -> memref<1x!tpu.dma_semaphore, #tpu.memory_space<semaphore_mem>>
    %404 = tpu.memref_squeeze %403 : memref<1x!tpu.dma_semaphore, #tpu.memory_space<semaphore_mem>> -> memref<!tpu.dma_semaphore, #tpu.memory_space<semaphore_mem>>
    tpu.enqueue_dma source(%401 : memref<1x32xf32, #tpu.memory_space<any>>) target(%402 : memref<1x32xf32, #tpu.memory_space<vmem>>) target_semaphore(%404 : memref<!tpu.dma_semaphore, #tpu.memory_space<semaphore_mem>>)
    %c0_i32_300 = arith.constant 0 : i32
    %c0_i32_301 = arith.constant 0 : i32
    %405 = tpu.memref_slice %arg4[%60, %c0_i32_301] : memref<50x32xf32, #tpu.memory_space<any>> -> memref<1x32xf32, #tpu.memory_space<any>>
    %c17_i32 = arith.constant 17 : i32
    %c0_i32_302 = arith.constant 0 : i32
    %406 = tpu.memref_slice %arg7[%c17_i32, %c0_i32_302] : memref<64x32xf32, #tpu.memory_space<vmem>> -> memref<1x32xf32, #tpu.memory_space<vmem>>
    %407 = tpu.memref_slice %arg11[%c0_i32_300] : memref<1x!tpu.dma_semaphore, #tpu.memory_space<semaphore_mem>> -> memref<1x!tpu.dma_semaphore, #tpu.memory_space<semaphore_mem>>
    %408 = tpu.memref_squeeze %407 : memref<1x!tpu.dma_semaphore, #tpu.memory_space<semaphore_mem>> -> memref<!tpu.dma_semaphore, #tpu.memory_space<semaphore_mem>>
    tpu.enqueue_dma source(%405 : memref<1x32xf32, #tpu.memory_space<any>>) target(%406 : memref<1x32xf32, #tpu.memory_space<vmem>>) target_semaphore(%408 : memref<!tpu.dma_semaphore, #tpu.memory_space<semaphore_mem>>)
    %c0_i32_303 = arith.constant 0 : i32
    %c0_i32_304 = arith.constant 0 : i32
    %409 = tpu.memref_slice %arg4[%65, %c0_i32_304] : memref<50x32xf32, #tpu.memory_space<any>> -> memref<1x32xf32, #tpu.memory_space<any>>
    %c25_i32 = arith.constant 25 : i32
    %c0_i32_305 = arith.constant 0 : i32
    %410 = tpu.memref_slice %arg7[%c25_i32, %c0_i32_305] : memref<64x32xf32, #tpu.memory_space<vmem>> -> memref<1x32xf32, #tpu.memory_space<vmem>>
    %411 = tpu.memref_slice %arg11[%c0_i32_303] : memref<1x!tpu.dma_semaphore, #tpu.memory_space<semaphore_mem>> -> memref<1x!tpu.dma_semaphore, #tpu.memory_space<semaphore_mem>>
    %412 = tpu.memref_squeeze %411 : memref<1x!tpu.dma_semaphore, #tpu.memory_space<semaphore_mem>> -> memref<!tpu.dma_semaphore, #tpu.memory_space<semaphore_mem>>
    tpu.enqueue_dma source(%409 : memref<1x32xf32, #tpu.memory_space<any>>) target(%410 : memref<1x32xf32, #tpu.memory_space<vmem>>) target_semaphore(%412 : memref<!tpu.dma_semaphore, #tpu.memory_space<semaphore_mem>>)
    %c0_i32_306 = arith.constant 0 : i32
    %c0_i32_307 = arith.constant 0 : i32
    %413 = tpu.memref_slice %arg4[%70, %c0_i32_307] : memref<50x32xf32, #tpu.memory_space<any>> -> memref<1x32xf32, #tpu.memory_space<any>>
    %c33_i32 = arith.constant 33 : i32
    %c0_i32_308 = arith.constant 0 : i32
    %414 = tpu.memref_slice %arg7[%c33_i32, %c0_i32_308] : memref<64x32xf32, #tpu.memory_space<vmem>> -> memref<1x32xf32, #tpu.memory_space<vmem>>
    %415 = tpu.memref_slice %arg11[%c0_i32_306] : memref<1x!tpu.dma_semaphore, #tpu.memory_space<semaphore_mem>> -> memref<1x!tpu.dma_semaphore, #tpu.memory_space<semaphore_mem>>
    %416 = tpu.memref_squeeze %415 : memref<1x!tpu.dma_semaphore, #tpu.memory_space<semaphore_mem>> -> memref<!tpu.dma_semaphore, #tpu.memory_space<semaphore_mem>>
    tpu.enqueue_dma source(%413 : memref<1x32xf32, #tpu.memory_space<any>>) target(%414 : memref<1x32xf32, #tpu.memory_space<vmem>>) target_semaphore(%416 : memref<!tpu.dma_semaphore, #tpu.memory_space<semaphore_mem>>)
    %c0_i32_309 = arith.constant 0 : i32
    %c0_i32_310 = arith.constant 0 : i32
    %417 = tpu.memref_slice %arg4[%75, %c0_i32_310] : memref<50x32xf32, #tpu.memory_space<any>> -> memref<1x32xf32, #tpu.memory_space<any>>
    %c41_i32 = arith.constant 41 : i32
    %c0_i32_311 = arith.constant 0 : i32
    %418 = tpu.memref_slice %arg7[%c41_i32, %c0_i32_311] : memref<64x32xf32, #tpu.memory_space<vmem>> -> memref<1x32xf32, #tpu.memory_space<vmem>>
    %419 = tpu.memref_slice %arg11[%c0_i32_309] : memref<1x!tpu.dma_semaphore, #tpu.memory_space<semaphore_mem>> -> memref<1x!tpu.dma_semaphore, #tpu.memory_space<semaphore_mem>>
    %420 = tpu.memref_squeeze %419 : memref<1x!tpu.dma_semaphore, #tpu.memory_space<semaphore_mem>> -> memref<!tpu.dma_semaphore, #tpu.memory_space<semaphore_mem>>
    tpu.enqueue_dma source(%417 : memref<1x32xf32, #tpu.memory_space<any>>) target(%418 : memref<1x32xf32, #tpu.memory_space<vmem>>) target_semaphore(%420 : memref<!tpu.dma_semaphore, #tpu.memory_space<semaphore_mem>>)
    %c0_i32_312 = arith.constant 0 : i32
    %c0_i32_313 = arith.constant 0 : i32
    %421 = tpu.memref_slice %arg4[%80, %c0_i32_313] : memref<50x32xf32, #tpu.memory_space<any>> -> memref<1x32xf32, #tpu.memory_space<any>>
    %c49_i32_314 = arith.constant 49 : i32
    %c0_i32_315 = arith.constant 0 : i32
    %422 = tpu.memref_slice %arg7[%c49_i32_314, %c0_i32_315] : memref<64x32xf32, #tpu.memory_space<vmem>> -> memref<1x32xf32, #tpu.memory_space<vmem>>
    %423 = tpu.memref_slice %arg11[%c0_i32_312] : memref<1x!tpu.dma_semaphore, #tpu.memory_space<semaphore_mem>> -> memref<1x!tpu.dma_semaphore, #tpu.memory_space<semaphore_mem>>
    %424 = tpu.memref_squeeze %423 : memref<1x!tpu.dma_semaphore, #tpu.memory_space<semaphore_mem>> -> memref<!tpu.dma_semaphore, #tpu.memory_space<semaphore_mem>>
    tpu.enqueue_dma source(%421 : memref<1x32xf32, #tpu.memory_space<any>>) target(%422 : memref<1x32xf32, #tpu.memory_space<vmem>>) target_semaphore(%424 : memref<!tpu.dma_semaphore, #tpu.memory_space<semaphore_mem>>)
    %c0_i32_316 = arith.constant 0 : i32
    %c0_i32_317 = arith.constant 0 : i32
    %425 = tpu.memref_slice %arg4[%85, %c0_i32_317] : memref<50x32xf32, #tpu.memory_space<any>> -> memref<1x32xf32, #tpu.memory_space<any>>
    %c57_i32 = arith.constant 57 : i32
    %c0_i32_318 = arith.constant 0 : i32
    %426 = tpu.memref_slice %arg7[%c57_i32, %c0_i32_318] : memref<64x32xf32, #tpu.memory_space<vmem>> -> memref<1x32xf32, #tpu.memory_space<vmem>>
    %427 = tpu.memref_slice %arg11[%c0_i32_316] : memref<1x!tpu.dma_semaphore, #tpu.memory_space<semaphore_mem>> -> memref<1x!tpu.dma_semaphore, #tpu.memory_space<semaphore_mem>>
    %428 = tpu.memref_squeeze %427 : memref<1x!tpu.dma_semaphore, #tpu.memory_space<semaphore_mem>> -> memref<!tpu.dma_semaphore, #tpu.memory_space<semaphore_mem>>
    tpu.enqueue_dma source(%425 : memref<1x32xf32, #tpu.memory_space<any>>) target(%426 : memref<1x32xf32, #tpu.memory_space<vmem>>) target_semaphore(%428 : memref<!tpu.dma_semaphore, #tpu.memory_space<semaphore_mem>>)
    %c0_i32_319 = arith.constant 0 : i32
    %c0_i32_320 = arith.constant 0 : i32
    %429 = tpu.memref_slice %arg5[%90, %c0_i32_320] : memref<5x32xf32, #tpu.memory_space<any>> -> memref<1x32xf32, #tpu.memory_space<any>>
    %c1_i32_321 = arith.constant 1 : i32
    %c0_i32_322 = arith.constant 0 : i32
    %430 = tpu.memref_slice %arg8[%c1_i32_321, %c0_i32_322] : memref<8x32xf32, #tpu.memory_space<vmem>> -> memref<1x32xf32, #tpu.memory_space<vmem>>
    %431 = tpu.memref_slice %arg11[%c0_i32_319] : memref<1x!tpu.dma_semaphore, #tpu.memory_space<semaphore_mem>> -> memref<1x!tpu.dma_semaphore, #tpu.memory_space<semaphore_mem>>
    %432 = tpu.memref_squeeze %431 : memref<1x!tpu.dma_semaphore, #tpu.memory_space<semaphore_mem>> -> memref<!tpu.dma_semaphore, #tpu.memory_space<semaphore_mem>>
    tpu.enqueue_dma source(%429 : memref<1x32xf32, #tpu.memory_space<any>>) target(%430 : memref<1x32xf32, #tpu.memory_space<vmem>>) target_semaphore(%432 : memref<!tpu.dma_semaphore, #tpu.memory_space<semaphore_mem>>)
    %c0_i32_323 = arith.constant 0 : i32
    %c0_i32_324 = arith.constant 0 : i32
    %433 = tpu.memref_slice %arg4[%95, %c0_i32_324] : memref<50x32xf32, #tpu.memory_space<any>> -> memref<1x32xf32, #tpu.memory_space<any>>
    %c2_i32_325 = arith.constant 2 : i32
    %c0_i32_326 = arith.constant 0 : i32
    %434 = tpu.memref_slice %arg7[%c2_i32_325, %c0_i32_326] : memref<64x32xf32, #tpu.memory_space<vmem>> -> memref<1x32xf32, #tpu.memory_space<vmem>>
    %435 = tpu.memref_slice %arg11[%c0_i32_323] : memref<1x!tpu.dma_semaphore, #tpu.memory_space<semaphore_mem>> -> memref<1x!tpu.dma_semaphore, #tpu.memory_space<semaphore_mem>>
    %436 = tpu.memref_squeeze %435 : memref<1x!tpu.dma_semaphore, #tpu.memory_space<semaphore_mem>> -> memref<!tpu.dma_semaphore, #tpu.memory_space<semaphore_mem>>
    tpu.enqueue_dma source(%433 : memref<1x32xf32, #tpu.memory_space<any>>) target(%434 : memref<1x32xf32, #tpu.memory_space<vmem>>) target_semaphore(%436 : memref<!tpu.dma_semaphore, #tpu.memory_space<semaphore_mem>>)
    %c0_i32_327 = arith.constant 0 : i32
    %c0_i32_328 = arith.constant 0 : i32
    %437 = tpu.memref_slice %arg4[%100, %c0_i32_328] : memref<50x32xf32, #tpu.memory_space<any>> -> memref<1x32xf32, #tpu.memory_space<any>>
    %c10_i32 = arith.constant 10 : i32
    %c0_i32_329 = arith.constant 0 : i32
    %438 = tpu.memref_slice %arg7[%c10_i32, %c0_i32_329] : memref<64x32xf32, #tpu.memory_space<vmem>> -> memref<1x32xf32, #tpu.memory_space<vmem>>
    %439 = tpu.memref_slice %arg11[%c0_i32_327] : memref<1x!tpu.dma_semaphore, #tpu.memory_space<semaphore_mem>> -> memref<1x!tpu.dma_semaphore, #tpu.memory_space<semaphore_mem>>
    %440 = tpu.memref_squeeze %439 : memref<1x!tpu.dma_semaphore, #tpu.memory_space<semaphore_mem>> -> memref<!tpu.dma_semaphore, #tpu.memory_space<semaphore_mem>>
    tpu.enqueue_dma source(%437 : memref<1x32xf32, #tpu.memory_space<any>>) target(%438 : memref<1x32xf32, #tpu.memory_space<vmem>>) target_semaphore(%440 : memref<!tpu.dma_semaphore, #tpu.memory_space<semaphore_mem>>)
    %c0_i32_330 = arith.constant 0 : i32
    %c0_i32_331 = arith.constant 0 : i32
    %441 = tpu.memref_slice %arg4[%105, %c0_i32_331] : memref<50x32xf32, #tpu.memory_space<any>> -> memref<1x32xf32, #tpu.memory_space<any>>
    %c18_i32 = arith.constant 18 : i32
    %c0_i32_332 = arith.constant 0 : i32
    %442 = tpu.memref_slice %arg7[%c18_i32, %c0_i32_332] : memref<64x32xf32, #tpu.memory_space<vmem>> -> memref<1x32xf32, #tpu.memory_space<vmem>>
    %443 = tpu.memref_slice %arg11[%c0_i32_330] : memref<1x!tpu.dma_semaphore, #tpu.memory_space<semaphore_mem>> -> memref<1x!tpu.dma_semaphore, #tpu.memory_space<semaphore_mem>>
    %444 = tpu.memref_squeeze %443 : memref<1x!tpu.dma_semaphore, #tpu.memory_space<semaphore_mem>> -> memref<!tpu.dma_semaphore, #tpu.memory_space<semaphore_mem>>
    tpu.enqueue_dma source(%441 : memref<1x32xf32, #tpu.memory_space<any>>) target(%442 : memref<1x32xf32, #tpu.memory_space<vmem>>) target_semaphore(%444 : memref<!tpu.dma_semaphore, #tpu.memory_space<semaphore_mem>>)
    %c0_i32_333 = arith.constant 0 : i32
    %c0_i32_334 = arith.constant 0 : i32
    %445 = tpu.memref_slice %arg4[%110, %c0_i32_334] : memref<50x32xf32, #tpu.memory_space<any>> -> memref<1x32xf32, #tpu.memory_space<any>>
    %c26_i32 = arith.constant 26 : i32
    %c0_i32_335 = arith.constant 0 : i32
    %446 = tpu.memref_slice %arg7[%c26_i32, %c0_i32_335] : memref<64x32xf32, #tpu.memory_space<vmem>> -> memref<1x32xf32, #tpu.memory_space<vmem>>
    %447 = tpu.memref_slice %arg11[%c0_i32_333] : memref<1x!tpu.dma_semaphore, #tpu.memory_space<semaphore_mem>> -> memref<1x!tpu.dma_semaphore, #tpu.memory_space<semaphore_mem>>
    %448 = tpu.memref_squeeze %447 : memref<1x!tpu.dma_semaphore, #tpu.memory_space<semaphore_mem>> -> memref<!tpu.dma_semaphore, #tpu.memory_space<semaphore_mem>>
    tpu.enqueue_dma source(%445 : memref<1x32xf32, #tpu.memory_space<any>>) target(%446 : memref<1x32xf32, #tpu.memory_space<vmem>>) target_semaphore(%448 : memref<!tpu.dma_semaphore, #tpu.memory_space<semaphore_mem>>)
    %c0_i32_336 = arith.constant 0 : i32
    %c0_i32_337 = arith.constant 0 : i32
    %449 = tpu.memref_slice %arg4[%115, %c0_i32_337] : memref<50x32xf32, #tpu.memory_space<any>> -> memref<1x32xf32, #tpu.memory_space<any>>
    %c34_i32 = arith.constant 34 : i32
    %c0_i32_338 = arith.constant 0 : i32
    %450 = tpu.memref_slice %arg7[%c34_i32, %c0_i32_338] : memref<64x32xf32, #tpu.memory_space<vmem>> -> memref<1x32xf32, #tpu.memory_space<vmem>>
    %451 = tpu.memref_slice %arg11[%c0_i32_336] : memref<1x!tpu.dma_semaphore, #tpu.memory_space<semaphore_mem>> -> memref<1x!tpu.dma_semaphore, #tpu.memory_space<semaphore_mem>>
    %452 = tpu.memref_squeeze %451 : memref<1x!tpu.dma_semaphore, #tpu.memory_space<semaphore_mem>> -> memref<!tpu.dma_semaphore, #tpu.memory_space<semaphore_mem>>
    tpu.enqueue_dma source(%449 : memref<1x32xf32, #tpu.memory_space<any>>) target(%450 : memref<1x32xf32, #tpu.memory_space<vmem>>) target_semaphore(%452 : memref<!tpu.dma_semaphore, #tpu.memory_space<semaphore_mem>>)
    %c0_i32_339 = arith.constant 0 : i32
    %c0_i32_340 = arith.constant 0 : i32
    %453 = tpu.memref_slice %arg4[%120, %c0_i32_340] : memref<50x32xf32, #tpu.memory_space<any>> -> memref<1x32xf32, #tpu.memory_space<any>>
    %c42_i32 = arith.constant 42 : i32
    %c0_i32_341 = arith.constant 0 : i32
    %454 = tpu.memref_slice %arg7[%c42_i32, %c0_i32_341] : memref<64x32xf32, #tpu.memory_space<vmem>> -> memref<1x32xf32, #tpu.memory_space<vmem>>
    %455 = tpu.memref_slice %arg11[%c0_i32_339] : memref<1x!tpu.dma_semaphore, #tpu.memory_space<semaphore_mem>> -> memref<1x!tpu.dma_semaphore, #tpu.memory_space<semaphore_mem>>
    %456 = tpu.memref_squeeze %455 : memref<1x!tpu.dma_semaphore, #tpu.memory_space<semaphore_mem>> -> memref<!tpu.dma_semaphore, #tpu.memory_space<semaphore_mem>>
    tpu.enqueue_dma source(%453 : memref<1x32xf32, #tpu.memory_space<any>>) target(%454 : memref<1x32xf32, #tpu.memory_space<vmem>>) target_semaphore(%456 : memref<!tpu.dma_semaphore, #tpu.memory_space<semaphore_mem>>)
    %c0_i32_342 = arith.constant 0 : i32
    %c0_i32_343 = arith.constant 0 : i32
    %457 = tpu.memref_slice %arg4[%125, %c0_i32_343] : memref<50x32xf32, #tpu.memory_space<any>> -> memref<1x32xf32, #tpu.memory_space<any>>
    %c50_i32 = arith.constant 50 : i32
    %c0_i32_344 = arith.constant 0 : i32
    %458 = tpu.memref_slice %arg7[%c50_i32, %c0_i32_344] : memref<64x32xf32, #tpu.memory_space<vmem>> -> memref<1x32xf32, #tpu.memory_space<vmem>>
    %459 = tpu.memref_slice %arg11[%c0_i32_342] : memref<1x!tpu.dma_semaphore, #tpu.memory_space<semaphore_mem>> -> memref<1x!tpu.dma_semaphore, #tpu.memory_space<semaphore_mem>>
    %460 = tpu.memref_squeeze %459 : memref<1x!tpu.dma_semaphore, #tpu.memory_space<semaphore_mem>> -> memref<!tpu.dma_semaphore, #tpu.memory_space<semaphore_mem>>
    tpu.enqueue_dma source(%457 : memref<1x32xf32, #tpu.memory_space<any>>) target(%458 : memref<1x32xf32, #tpu.memory_space<vmem>>) target_semaphore(%460 : memref<!tpu.dma_semaphore, #tpu.memory_space<semaphore_mem>>)
    %c0_i32_345 = arith.constant 0 : i32
    %c0_i32_346 = arith.constant 0 : i32
    %461 = tpu.memref_slice %arg4[%130, %c0_i32_346] : memref<50x32xf32, #tpu.memory_space<any>> -> memref<1x32xf32, #tpu.memory_space<any>>
    %c58_i32 = arith.constant 58 : i32
    %c0_i32_347 = arith.constant 0 : i32
    %462 = tpu.memref_slice %arg7[%c58_i32, %c0_i32_347] : memref<64x32xf32, #tpu.memory_space<vmem>> -> memref<1x32xf32, #tpu.memory_space<vmem>>
    %463 = tpu.memref_slice %arg11[%c0_i32_345] : memref<1x!tpu.dma_semaphore, #tpu.memory_space<semaphore_mem>> -> memref<1x!tpu.dma_semaphore, #tpu.memory_space<semaphore_mem>>
    %464 = tpu.memref_squeeze %463 : memref<1x!tpu.dma_semaphore, #tpu.memory_space<semaphore_mem>> -> memref<!tpu.dma_semaphore, #tpu.memory_space<semaphore_mem>>
    tpu.enqueue_dma source(%461 : memref<1x32xf32, #tpu.memory_space<any>>) target(%462 : memref<1x32xf32, #tpu.memory_space<vmem>>) target_semaphore(%464 : memref<!tpu.dma_semaphore, #tpu.memory_space<semaphore_mem>>)
    %c0_i32_348 = arith.constant 0 : i32
    %c0_i32_349 = arith.constant 0 : i32
    %465 = tpu.memref_slice %arg5[%135, %c0_i32_349] : memref<5x32xf32, #tpu.memory_space<any>> -> memref<1x32xf32, #tpu.memory_space<any>>
    %c2_i32_350 = arith.constant 2 : i32
    %c0_i32_351 = arith.constant 0 : i32
    %466 = tpu.memref_slice %arg8[%c2_i32_350, %c0_i32_351] : memref<8x32xf32, #tpu.memory_space<vmem>> -> memref<1x32xf32, #tpu.memory_space<vmem>>
    %467 = tpu.memref_slice %arg11[%c0_i32_348] : memref<1x!tpu.dma_semaphore, #tpu.memory_space<semaphore_mem>> -> memref<1x!tpu.dma_semaphore, #tpu.memory_space<semaphore_mem>>
    %468 = tpu.memref_squeeze %467 : memref<1x!tpu.dma_semaphore, #tpu.memory_space<semaphore_mem>> -> memref<!tpu.dma_semaphore, #tpu.memory_space<semaphore_mem>>
    tpu.enqueue_dma source(%465 : memref<1x32xf32, #tpu.memory_space<any>>) target(%466 : memref<1x32xf32, #tpu.memory_space<vmem>>) target_semaphore(%468 : memref<!tpu.dma_semaphore, #tpu.memory_space<semaphore_mem>>)
    %c0_i32_352 = arith.constant 0 : i32
    %c0_i32_353 = arith.constant 0 : i32
    %469 = tpu.memref_slice %arg4[%140, %c0_i32_353] : memref<50x32xf32, #tpu.memory_space<any>> -> memref<1x32xf32, #tpu.memory_space<any>>
    %c3_i32_354 = arith.constant 3 : i32
    %c0_i32_355 = arith.constant 0 : i32
    %470 = tpu.memref_slice %arg7[%c3_i32_354, %c0_i32_355] : memref<64x32xf32, #tpu.memory_space<vmem>> -> memref<1x32xf32, #tpu.memory_space<vmem>>
    %471 = tpu.memref_slice %arg11[%c0_i32_352] : memref<1x!tpu.dma_semaphore, #tpu.memory_space<semaphore_mem>> -> memref<1x!tpu.dma_semaphore, #tpu.memory_space<semaphore_mem>>
    %472 = tpu.memref_squeeze %471 : memref<1x!tpu.dma_semaphore, #tpu.memory_space<semaphore_mem>> -> memref<!tpu.dma_semaphore, #tpu.memory_space<semaphore_mem>>
    tpu.enqueue_dma source(%469 : memref<1x32xf32, #tpu.memory_space<any>>) target(%470 : memref<1x32xf32, #tpu.memory_space<vmem>>) target_semaphore(%472 : memref<!tpu.dma_semaphore, #tpu.memory_space<semaphore_mem>>)
    %c0_i32_356 = arith.constant 0 : i32
    %c0_i32_357 = arith.constant 0 : i32
    %473 = tpu.memref_slice %arg4[%145, %c0_i32_357] : memref<50x32xf32, #tpu.memory_space<any>> -> memref<1x32xf32, #tpu.memory_space<any>>
    %c11_i32 = arith.constant 11 : i32
    %c0_i32_358 = arith.constant 0 : i32
    %474 = tpu.memref_slice %arg7[%c11_i32, %c0_i32_358] : memref<64x32xf32, #tpu.memory_space<vmem>> -> memref<1x32xf32, #tpu.memory_space<vmem>>
    %475 = tpu.memref_slice %arg11[%c0_i32_356] : memref<1x!tpu.dma_semaphore, #tpu.memory_space<semaphore_mem>> -> memref<1x!tpu.dma_semaphore, #tpu.memory_space<semaphore_mem>>
    %476 = tpu.memref_squeeze %475 : memref<1x!tpu.dma_semaphore, #tpu.memory_space<semaphore_mem>> -> memref<!tpu.dma_semaphore, #tpu.memory_space<semaphore_mem>>
    tpu.enqueue_dma source(%473 : memref<1x32xf32, #tpu.memory_space<any>>) target(%474 : memref<1x32xf32, #tpu.memory_space<vmem>>) target_semaphore(%476 : memref<!tpu.dma_semaphore, #tpu.memory_space<semaphore_mem>>)
    %c0_i32_359 = arith.constant 0 : i32
    %c0_i32_360 = arith.constant 0 : i32
    %477 = tpu.memref_slice %arg4[%150, %c0_i32_360] : memref<50x32xf32, #tpu.memory_space<any>> -> memref<1x32xf32, #tpu.memory_space<any>>
    %c19_i32 = arith.constant 19 : i32
    %c0_i32_361 = arith.constant 0 : i32
    %478 = tpu.memref_slice %arg7[%c19_i32, %c0_i32_361] : memref<64x32xf32, #tpu.memory_space<vmem>> -> memref<1x32xf32, #tpu.memory_space<vmem>>
    %479 = tpu.memref_slice %arg11[%c0_i32_359] : memref<1x!tpu.dma_semaphore, #tpu.memory_space<semaphore_mem>> -> memref<1x!tpu.dma_semaphore, #tpu.memory_space<semaphore_mem>>
    %480 = tpu.memref_squeeze %479 : memref<1x!tpu.dma_semaphore, #tpu.memory_space<semaphore_mem>> -> memref<!tpu.dma_semaphore, #tpu.memory_space<semaphore_mem>>
    tpu.enqueue_dma source(%477 : memref<1x32xf32, #tpu.memory_space<any>>) target(%478 : memref<1x32xf32, #tpu.memory_space<vmem>>) target_semaphore(%480 : memref<!tpu.dma_semaphore, #tpu.memory_space<semaphore_mem>>)
    %c0_i32_362 = arith.constant 0 : i32
    %c0_i32_363 = arith.constant 0 : i32
    %481 = tpu.memref_slice %arg4[%155, %c0_i32_363] : memref<50x32xf32, #tpu.memory_space<any>> -> memref<1x32xf32, #tpu.memory_space<any>>
    %c27_i32 = arith.constant 27 : i32
    %c0_i32_364 = arith.constant 0 : i32
    %482 = tpu.memref_slice %arg7[%c27_i32, %c0_i32_364] : memref<64x32xf32, #tpu.memory_space<vmem>> -> memref<1x32xf32, #tpu.memory_space<vmem>>
    %483 = tpu.memref_slice %arg11[%c0_i32_362] : memref<1x!tpu.dma_semaphore, #tpu.memory_space<semaphore_mem>> -> memref<1x!tpu.dma_semaphore, #tpu.memory_space<semaphore_mem>>
    %484 = tpu.memref_squeeze %483 : memref<1x!tpu.dma_semaphore, #tpu.memory_space<semaphore_mem>> -> memref<!tpu.dma_semaphore, #tpu.memory_space<semaphore_mem>>
    tpu.enqueue_dma source(%481 : memref<1x32xf32, #tpu.memory_space<any>>) target(%482 : memref<1x32xf32, #tpu.memory_space<vmem>>) target_semaphore(%484 : memref<!tpu.dma_semaphore, #tpu.memory_space<semaphore_mem>>)
    %c0_i32_365 = arith.constant 0 : i32
    %c0_i32_366 = arith.constant 0 : i32
    %485 = tpu.memref_slice %arg4[%160, %c0_i32_366] : memref<50x32xf32, #tpu.memory_space<any>> -> memref<1x32xf32, #tpu.memory_space<any>>
    %c35_i32 = arith.constant 35 : i32
    %c0_i32_367 = arith.constant 0 : i32
    %486 = tpu.memref_slice %arg7[%c35_i32, %c0_i32_367] : memref<64x32xf32, #tpu.memory_space<vmem>> -> memref<1x32xf32, #tpu.memory_space<vmem>>
    %487 = tpu.memref_slice %arg11[%c0_i32_365] : memref<1x!tpu.dma_semaphore, #tpu.memory_space<semaphore_mem>> -> memref<1x!tpu.dma_semaphore, #tpu.memory_space<semaphore_mem>>
    %488 = tpu.memref_squeeze %487 : memref<1x!tpu.dma_semaphore, #tpu.memory_space<semaphore_mem>> -> memref<!tpu.dma_semaphore, #tpu.memory_space<semaphore_mem>>
    tpu.enqueue_dma source(%485 : memref<1x32xf32, #tpu.memory_space<any>>) target(%486 : memref<1x32xf32, #tpu.memory_space<vmem>>) target_semaphore(%488 : memref<!tpu.dma_semaphore, #tpu.memory_space<semaphore_mem>>)
    %c0_i32_368 = arith.constant 0 : i32
    %c0_i32_369 = arith.constant 0 : i32
    %489 = tpu.memref_slice %arg4[%165, %c0_i32_369] : memref<50x32xf32, #tpu.memory_space<any>> -> memref<1x32xf32, #tpu.memory_space<any>>
    %c43_i32 = arith.constant 43 : i32
    %c0_i32_370 = arith.constant 0 : i32
    %490 = tpu.memref_slice %arg7[%c43_i32, %c0_i32_370] : memref<64x32xf32, #tpu.memory_space<vmem>> -> memref<1x32xf32, #tpu.memory_space<vmem>>
    %491 = tpu.memref_slice %arg11[%c0_i32_368] : memref<1x!tpu.dma_semaphore, #tpu.memory_space<semaphore_mem>> -> memref<1x!tpu.dma_semaphore, #tpu.memory_space<semaphore_mem>>
    %492 = tpu.memref_squeeze %491 : memref<1x!tpu.dma_semaphore, #tpu.memory_space<semaphore_mem>> -> memref<!tpu.dma_semaphore, #tpu.memory_space<semaphore_mem>>
    tpu.enqueue_dma source(%489 : memref<1x32xf32, #tpu.memory_space<any>>) target(%490 : memref<1x32xf32, #tpu.memory_space<vmem>>) target_semaphore(%492 : memref<!tpu.dma_semaphore, #tpu.memory_space<semaphore_mem>>)
    %c0_i32_371 = arith.constant 0 : i32
    %c0_i32_372 = arith.constant 0 : i32
    %493 = tpu.memref_slice %arg4[%170, %c0_i32_372] : memref<50x32xf32, #tpu.memory_space<any>> -> memref<1x32xf32, #tpu.memory_space<any>>
    %c51_i32 = arith.constant 51 : i32
    %c0_i32_373 = arith.constant 0 : i32
    %494 = tpu.memref_slice %arg7[%c51_i32, %c0_i32_373] : memref<64x32xf32, #tpu.memory_space<vmem>> -> memref<1x32xf32, #tpu.memory_space<vmem>>
    %495 = tpu.memref_slice %arg11[%c0_i32_371] : memref<1x!tpu.dma_semaphore, #tpu.memory_space<semaphore_mem>> -> memref<1x!tpu.dma_semaphore, #tpu.memory_space<semaphore_mem>>
    %496 = tpu.memref_squeeze %495 : memref<1x!tpu.dma_semaphore, #tpu.memory_space<semaphore_mem>> -> memref<!tpu.dma_semaphore, #tpu.memory_space<semaphore_mem>>
    tpu.enqueue_dma source(%493 : memref<1x32xf32, #tpu.memory_space<any>>) target(%494 : memref<1x32xf32, #tpu.memory_space<vmem>>) target_semaphore(%496 : memref<!tpu.dma_semaphore, #tpu.memory_space<semaphore_mem>>)
    %c0_i32_374 = arith.constant 0 : i32
    %c0_i32_375 = arith.constant 0 : i32
    %497 = tpu.memref_slice %arg4[%175, %c0_i32_375] : memref<50x32xf32, #tpu.memory_space<any>> -> memref<1x32xf32, #tpu.memory_space<any>>
    %c59_i32 = arith.constant 59 : i32
    %c0_i32_376 = arith.constant 0 : i32
    %498 = tpu.memref_slice %arg7[%c59_i32, %c0_i32_376] : memref<64x32xf32, #tpu.memory_space<vmem>> -> memref<1x32xf32, #tpu.memory_space<vmem>>
    %499 = tpu.memref_slice %arg11[%c0_i32_374] : memref<1x!tpu.dma_semaphore, #tpu.memory_space<semaphore_mem>> -> memref<1x!tpu.dma_semaphore, #tpu.memory_space<semaphore_mem>>
    %500 = tpu.memref_squeeze %499 : memref<1x!tpu.dma_semaphore, #tpu.memory_space<semaphore_mem>> -> memref<!tpu.dma_semaphore, #tpu.memory_space<semaphore_mem>>
    tpu.enqueue_dma source(%497 : memref<1x32xf32, #tpu.memory_space<any>>) target(%498 : memref<1x32xf32, #tpu.memory_space<vmem>>) target_semaphore(%500 : memref<!tpu.dma_semaphore, #tpu.memory_space<semaphore_mem>>)
    %c0_i32_377 = arith.constant 0 : i32
    %c0_i32_378 = arith.constant 0 : i32
    %501 = tpu.memref_slice %arg5[%180, %c0_i32_378] : memref<5x32xf32, #tpu.memory_space<any>> -> memref<1x32xf32, #tpu.memory_space<any>>
    %c3_i32_379 = arith.constant 3 : i32
    %c0_i32_380 = arith.constant 0 : i32
    %502 = tpu.memref_slice %arg8[%c3_i32_379, %c0_i32_380] : memref<8x32xf32, #tpu.memory_space<vmem>> -> memref<1x32xf32, #tpu.memory_space<vmem>>
    %503 = tpu.memref_slice %arg11[%c0_i32_377] : memref<1x!tpu.dma_semaphore, #tpu.memory_space<semaphore_mem>> -> memref<1x!tpu.dma_semaphore, #tpu.memory_space<semaphore_mem>>
    %504 = tpu.memref_squeeze %503 : memref<1x!tpu.dma_semaphore, #tpu.memory_space<semaphore_mem>> -> memref<!tpu.dma_semaphore, #tpu.memory_space<semaphore_mem>>
    tpu.enqueue_dma source(%501 : memref<1x32xf32, #tpu.memory_space<any>>) target(%502 : memref<1x32xf32, #tpu.memory_space<vmem>>) target_semaphore(%504 : memref<!tpu.dma_semaphore, #tpu.memory_space<semaphore_mem>>)
    %c0_i32_381 = arith.constant 0 : i32
    %c0_i32_382 = arith.constant 0 : i32
    %505 = tpu.memref_slice %arg4[%185, %c0_i32_382] : memref<50x32xf32, #tpu.memory_space<any>> -> memref<1x32xf32, #tpu.memory_space<any>>
    %c4_i32_383 = arith.constant 4 : i32
    %c0_i32_384 = arith.constant 0 : i32
    %506 = tpu.memref_slice %arg7[%c4_i32_383, %c0_i32_384] : memref<64x32xf32, #tpu.memory_space<vmem>> -> memref<1x32xf32, #tpu.memory_space<vmem>>
    %507 = tpu.memref_slice %arg11[%c0_i32_381] : memref<1x!tpu.dma_semaphore, #tpu.memory_space<semaphore_mem>> -> memref<1x!tpu.dma_semaphore, #tpu.memory_space<semaphore_mem>>
    %508 = tpu.memref_squeeze %507 : memref<1x!tpu.dma_semaphore, #tpu.memory_space<semaphore_mem>> -> memref<!tpu.dma_semaphore, #tpu.memory_space<semaphore_mem>>
    tpu.enqueue_dma source(%505 : memref<1x32xf32, #tpu.memory_space<any>>) target(%506 : memref<1x32xf32, #tpu.memory_space<vmem>>) target_semaphore(%508 : memref<!tpu.dma_semaphore, #tpu.memory_space<semaphore_mem>>)
    %c0_i32_385 = arith.constant 0 : i32
    %c0_i32_386 = arith.constant 0 : i32
    %509 = tpu.memref_slice %arg4[%190, %c0_i32_386] : memref<50x32xf32, #tpu.memory_space<any>> -> memref<1x32xf32, #tpu.memory_space<any>>
    %c12_i32 = arith.constant 12 : i32
    %c0_i32_387 = arith.constant 0 : i32
    %510 = tpu.memref_slice %arg7[%c12_i32, %c0_i32_387] : memref<64x32xf32, #tpu.memory_space<vmem>> -> memref<1x32xf32, #tpu.memory_space<vmem>>
    %511 = tpu.memref_slice %arg11[%c0_i32_385] : memref<1x!tpu.dma_semaphore, #tpu.memory_space<semaphore_mem>> -> memref<1x!tpu.dma_semaphore, #tpu.memory_space<semaphore_mem>>
    %512 = tpu.memref_squeeze %511 : memref<1x!tpu.dma_semaphore, #tpu.memory_space<semaphore_mem>> -> memref<!tpu.dma_semaphore, #tpu.memory_space<semaphore_mem>>
    tpu.enqueue_dma source(%509 : memref<1x32xf32, #tpu.memory_space<any>>) target(%510 : memref<1x32xf32, #tpu.memory_space<vmem>>) target_semaphore(%512 : memref<!tpu.dma_semaphore, #tpu.memory_space<semaphore_mem>>)
    %c0_i32_388 = arith.constant 0 : i32
    %c0_i32_389 = arith.constant 0 : i32
    %513 = tpu.memref_slice %arg4[%195, %c0_i32_389] : memref<50x32xf32, #tpu.memory_space<any>> -> memref<1x32xf32, #tpu.memory_space<any>>
    %c20_i32 = arith.constant 20 : i32
    %c0_i32_390 = arith.constant 0 : i32
    %514 = tpu.memref_slice %arg7[%c20_i32, %c0_i32_390] : memref<64x32xf32, #tpu.memory_space<vmem>> -> memref<1x32xf32, #tpu.memory_space<vmem>>
    %515 = tpu.memref_slice %arg11[%c0_i32_388] : memref<1x!tpu.dma_semaphore, #tpu.memory_space<semaphore_mem>> -> memref<1x!tpu.dma_semaphore, #tpu.memory_space<semaphore_mem>>
    %516 = tpu.memref_squeeze %515 : memref<1x!tpu.dma_semaphore, #tpu.memory_space<semaphore_mem>> -> memref<!tpu.dma_semaphore, #tpu.memory_space<semaphore_mem>>
    tpu.enqueue_dma source(%513 : memref<1x32xf32, #tpu.memory_space<any>>) target(%514 : memref<1x32xf32, #tpu.memory_space<vmem>>) target_semaphore(%516 : memref<!tpu.dma_semaphore, #tpu.memory_space<semaphore_mem>>)
    %c0_i32_391 = arith.constant 0 : i32
    %c0_i32_392 = arith.constant 0 : i32
    %517 = tpu.memref_slice %arg4[%200, %c0_i32_392] : memref<50x32xf32, #tpu.memory_space<any>> -> memref<1x32xf32, #tpu.memory_space<any>>
    %c28_i32 = arith.constant 28 : i32
    %c0_i32_393 = arith.constant 0 : i32
    %518 = tpu.memref_slice %arg7[%c28_i32, %c0_i32_393] : memref<64x32xf32, #tpu.memory_space<vmem>> -> memref<1x32xf32, #tpu.memory_space<vmem>>
    %519 = tpu.memref_slice %arg11[%c0_i32_391] : memref<1x!tpu.dma_semaphore, #tpu.memory_space<semaphore_mem>> -> memref<1x!tpu.dma_semaphore, #tpu.memory_space<semaphore_mem>>
    %520 = tpu.memref_squeeze %519 : memref<1x!tpu.dma_semaphore, #tpu.memory_space<semaphore_mem>> -> memref<!tpu.dma_semaphore, #tpu.memory_space<semaphore_mem>>
    tpu.enqueue_dma source(%517 : memref<1x32xf32, #tpu.memory_space<any>>) target(%518 : memref<1x32xf32, #tpu.memory_space<vmem>>) target_semaphore(%520 : memref<!tpu.dma_semaphore, #tpu.memory_space<semaphore_mem>>)
    %c0_i32_394 = arith.constant 0 : i32
    %c0_i32_395 = arith.constant 0 : i32
    %521 = tpu.memref_slice %arg4[%205, %c0_i32_395] : memref<50x32xf32, #tpu.memory_space<any>> -> memref<1x32xf32, #tpu.memory_space<any>>
    %c36_i32 = arith.constant 36 : i32
    %c0_i32_396 = arith.constant 0 : i32
    %522 = tpu.memref_slice %arg7[%c36_i32, %c0_i32_396] : memref<64x32xf32, #tpu.memory_space<vmem>> -> memref<1x32xf32, #tpu.memory_space<vmem>>
    %523 = tpu.memref_slice %arg11[%c0_i32_394] : memref<1x!tpu.dma_semaphore, #tpu.memory_space<semaphore_mem>> -> memref<1x!tpu.dma_semaphore, #tpu.memory_space<semaphore_mem>>
    %524 = tpu.memref_squeeze %523 : memref<1x!tpu.dma_semaphore, #tpu.memory_space<semaphore_mem>> -> memref<!tpu.dma_semaphore, #tpu.memory_space<semaphore_mem>>
    tpu.enqueue_dma source(%521 : memref<1x32xf32, #tpu.memory_space<any>>) target(%522 : memref<1x32xf32, #tpu.memory_space<vmem>>) target_semaphore(%524 : memref<!tpu.dma_semaphore, #tpu.memory_space<semaphore_mem>>)
    %c0_i32_397 = arith.constant 0 : i32
    %c0_i32_398 = arith.constant 0 : i32
    %525 = tpu.memref_slice %arg4[%210, %c0_i32_398] : memref<50x32xf32, #tpu.memory_space<any>> -> memref<1x32xf32, #tpu.memory_space<any>>
    %c44_i32 = arith.constant 44 : i32
    %c0_i32_399 = arith.constant 0 : i32
    %526 = tpu.memref_slice %arg7[%c44_i32, %c0_i32_399] : memref<64x32xf32, #tpu.memory_space<vmem>> -> memref<1x32xf32, #tpu.memory_space<vmem>>
    %527 = tpu.memref_slice %arg11[%c0_i32_397] : memref<1x!tpu.dma_semaphore, #tpu.memory_space<semaphore_mem>> -> memref<1x!tpu.dma_semaphore, #tpu.memory_space<semaphore_mem>>
    %528 = tpu.memref_squeeze %527 : memref<1x!tpu.dma_semaphore, #tpu.memory_space<semaphore_mem>> -> memref<!tpu.dma_semaphore, #tpu.memory_space<semaphore_mem>>
    tpu.enqueue_dma source(%525 : memref<1x32xf32, #tpu.memory_space<any>>) target(%526 : memref<1x32xf32, #tpu.memory_space<vmem>>) target_semaphore(%528 : memref<!tpu.dma_semaphore, #tpu.memory_space<semaphore_mem>>)
    %c0_i32_400 = arith.constant 0 : i32
    %c0_i32_401 = arith.constant 0 : i32
    %529 = tpu.memref_slice %arg4[%215, %c0_i32_401] : memref<50x32xf32, #tpu.memory_space<any>> -> memref<1x32xf32, #tpu.memory_space<any>>
    %c52_i32 = arith.constant 52 : i32
    %c0_i32_402 = arith.constant 0 : i32
    %530 = tpu.memref_slice %arg7[%c52_i32, %c0_i32_402] : memref<64x32xf32, #tpu.memory_space<vmem>> -> memref<1x32xf32, #tpu.memory_space<vmem>>
    %531 = tpu.memref_slice %arg11[%c0_i32_400] : memref<1x!tpu.dma_semaphore, #tpu.memory_space<semaphore_mem>> -> memref<1x!tpu.dma_semaphore, #tpu.memory_space<semaphore_mem>>
    %532 = tpu.memref_squeeze %531 : memref<1x!tpu.dma_semaphore, #tpu.memory_space<semaphore_mem>> -> memref<!tpu.dma_semaphore, #tpu.memory_space<semaphore_mem>>
    tpu.enqueue_dma source(%529 : memref<1x32xf32, #tpu.memory_space<any>>) target(%530 : memref<1x32xf32, #tpu.memory_space<vmem>>) target_semaphore(%532 : memref<!tpu.dma_semaphore, #tpu.memory_space<semaphore_mem>>)
    %c0_i32_403 = arith.constant 0 : i32
    %c0_i32_404 = arith.constant 0 : i32
    %533 = tpu.memref_slice %arg4[%220, %c0_i32_404] : memref<50x32xf32, #tpu.memory_space<any>> -> memref<1x32xf32, #tpu.memory_space<any>>
    %c60_i32 = arith.constant 60 : i32
    %c0_i32_405 = arith.constant 0 : i32
    %534 = tpu.memref_slice %arg7[%c60_i32, %c0_i32_405] : memref<64x32xf32, #tpu.memory_space<vmem>> -> memref<1x32xf32, #tpu.memory_space<vmem>>
    %535 = tpu.memref_slice %arg11[%c0_i32_403] : memref<1x!tpu.dma_semaphore, #tpu.memory_space<semaphore_mem>> -> memref<1x!tpu.dma_semaphore, #tpu.memory_space<semaphore_mem>>
    %536 = tpu.memref_squeeze %535 : memref<1x!tpu.dma_semaphore, #tpu.memory_space<semaphore_mem>> -> memref<!tpu.dma_semaphore, #tpu.memory_space<semaphore_mem>>
    tpu.enqueue_dma source(%533 : memref<1x32xf32, #tpu.memory_space<any>>) target(%534 : memref<1x32xf32, #tpu.memory_space<vmem>>) target_semaphore(%536 : memref<!tpu.dma_semaphore, #tpu.memory_space<semaphore_mem>>)
    %c0_i32_406 = arith.constant 0 : i32
    %c0_i32_407 = arith.constant 0 : i32
    %537 = tpu.memref_slice %arg5[%225, %c0_i32_407] : memref<5x32xf32, #tpu.memory_space<any>> -> memref<1x32xf32, #tpu.memory_space<any>>
    %c4_i32_408 = arith.constant 4 : i32
    %c0_i32_409 = arith.constant 0 : i32
    %538 = tpu.memref_slice %arg8[%c4_i32_408, %c0_i32_409] : memref<8x32xf32, #tpu.memory_space<vmem>> -> memref<1x32xf32, #tpu.memory_space<vmem>>
    %539 = tpu.memref_slice %arg11[%c0_i32_406] : memref<1x!tpu.dma_semaphore, #tpu.memory_space<semaphore_mem>> -> memref<1x!tpu.dma_semaphore, #tpu.memory_space<semaphore_mem>>
    %540 = tpu.memref_squeeze %539 : memref<1x!tpu.dma_semaphore, #tpu.memory_space<semaphore_mem>> -> memref<!tpu.dma_semaphore, #tpu.memory_space<semaphore_mem>>
    tpu.enqueue_dma source(%537 : memref<1x32xf32, #tpu.memory_space<any>>) target(%538 : memref<1x32xf32, #tpu.memory_space<vmem>>) target_semaphore(%540 : memref<!tpu.dma_semaphore, #tpu.memory_space<semaphore_mem>>)
    %c0_i32_410 = arith.constant 0 : i32
    %c0_i32_411 = arith.constant 0 : i32
    %541 = tpu.memref_slice %arg4[%230, %c0_i32_411] : memref<50x32xf32, #tpu.memory_space<any>> -> memref<1x32xf32, #tpu.memory_space<any>>
    %c5_i32_412 = arith.constant 5 : i32
    %c0_i32_413 = arith.constant 0 : i32
    %542 = tpu.memref_slice %arg7[%c5_i32_412, %c0_i32_413] : memref<64x32xf32, #tpu.memory_space<vmem>> -> memref<1x32xf32, #tpu.memory_space<vmem>>
    %543 = tpu.memref_slice %arg11[%c0_i32_410] : memref<1x!tpu.dma_semaphore, #tpu.memory_space<semaphore_mem>> -> memref<1x!tpu.dma_semaphore, #tpu.memory_space<semaphore_mem>>
    %544 = tpu.memref_squeeze %543 : memref<1x!tpu.dma_semaphore, #tpu.memory_space<semaphore_mem>> -> memref<!tpu.dma_semaphore, #tpu.memory_space<semaphore_mem>>
    tpu.enqueue_dma source(%541 : memref<1x32xf32, #tpu.memory_space<any>>) target(%542 : memref<1x32xf32, #tpu.memory_space<vmem>>) target_semaphore(%544 : memref<!tpu.dma_semaphore, #tpu.memory_space<semaphore_mem>>)
    %c0_i32_414 = arith.constant 0 : i32
    %c0_i32_415 = arith.constant 0 : i32
    %545 = tpu.memref_slice %arg4[%235, %c0_i32_415] : memref<50x32xf32, #tpu.memory_space<any>> -> memref<1x32xf32, #tpu.memory_space<any>>
    %c13_i32 = arith.constant 13 : i32
    %c0_i32_416 = arith.constant 0 : i32
    %546 = tpu.memref_slice %arg7[%c13_i32, %c0_i32_416] : memref<64x32xf32, #tpu.memory_space<vmem>> -> memref<1x32xf32, #tpu.memory_space<vmem>>
    %547 = tpu.memref_slice %arg11[%c0_i32_414] : memref<1x!tpu.dma_semaphore, #tpu.memory_space<semaphore_mem>> -> memref<1x!tpu.dma_semaphore, #tpu.memory_space<semaphore_mem>>
    %548 = tpu.memref_squeeze %547 : memref<1x!tpu.dma_semaphore, #tpu.memory_space<semaphore_mem>> -> memref<!tpu.dma_semaphore, #tpu.memory_space<semaphore_mem>>
    tpu.enqueue_dma source(%545 : memref<1x32xf32, #tpu.memory_space<any>>) target(%546 : memref<1x32xf32, #tpu.memory_space<vmem>>) target_semaphore(%548 : memref<!tpu.dma_semaphore, #tpu.memory_space<semaphore_mem>>)
    %c0_i32_417 = arith.constant 0 : i32
    %c0_i32_418 = arith.constant 0 : i32
    %549 = tpu.memref_slice %arg4[%240, %c0_i32_418] : memref<50x32xf32, #tpu.memory_space<any>> -> memref<1x32xf32, #tpu.memory_space<any>>
    %c21_i32 = arith.constant 21 : i32
    %c0_i32_419 = arith.constant 0 : i32
    %550 = tpu.memref_slice %arg7[%c21_i32, %c0_i32_419] : memref<64x32xf32, #tpu.memory_space<vmem>> -> memref<1x32xf32, #tpu.memory_space<vmem>>
    %551 = tpu.memref_slice %arg11[%c0_i32_417] : memref<1x!tpu.dma_semaphore, #tpu.memory_space<semaphore_mem>> -> memref<1x!tpu.dma_semaphore, #tpu.memory_space<semaphore_mem>>
    %552 = tpu.memref_squeeze %551 : memref<1x!tpu.dma_semaphore, #tpu.memory_space<semaphore_mem>> -> memref<!tpu.dma_semaphore, #tpu.memory_space<semaphore_mem>>
    tpu.enqueue_dma source(%549 : memref<1x32xf32, #tpu.memory_space<any>>) target(%550 : memref<1x32xf32, #tpu.memory_space<vmem>>) target_semaphore(%552 : memref<!tpu.dma_semaphore, #tpu.memory_space<semaphore_mem>>)
    %c0_i32_420 = arith.constant 0 : i32
    %c0_i32_421 = arith.constant 0 : i32
    %553 = tpu.memref_slice %arg4[%245, %c0_i32_421] : memref<50x32xf32, #tpu.memory_space<any>> -> memref<1x32xf32, #tpu.memory_space<any>>
    %c29_i32 = arith.constant 29 : i32
    %c0_i32_422 = arith.constant 0 : i32
    %554 = tpu.memref_slice %arg7[%c29_i32, %c0_i32_422] : memref<64x32xf32, #tpu.memory_space<vmem>> -> memref<1x32xf32, #tpu.memory_space<vmem>>
    %555 = tpu.memref_slice %arg11[%c0_i32_420] : memref<1x!tpu.dma_semaphore, #tpu.memory_space<semaphore_mem>> -> memref<1x!tpu.dma_semaphore, #tpu.memory_space<semaphore_mem>>
    %556 = tpu.memref_squeeze %555 : memref<1x!tpu.dma_semaphore, #tpu.memory_space<semaphore_mem>> -> memref<!tpu.dma_semaphore, #tpu.memory_space<semaphore_mem>>
    tpu.enqueue_dma source(%553 : memref<1x32xf32, #tpu.memory_space<any>>) target(%554 : memref<1x32xf32, #tpu.memory_space<vmem>>) target_semaphore(%556 : memref<!tpu.dma_semaphore, #tpu.memory_space<semaphore_mem>>)
    %c0_i32_423 = arith.constant 0 : i32
    %c0_i32_424 = arith.constant 0 : i32
    %557 = tpu.memref_slice %arg4[%250, %c0_i32_424] : memref<50x32xf32, #tpu.memory_space<any>> -> memref<1x32xf32, #tpu.memory_space<any>>
    %c37_i32 = arith.constant 37 : i32
    %c0_i32_425 = arith.constant 0 : i32
    %558 = tpu.memref_slice %arg7[%c37_i32, %c0_i32_425] : memref<64x32xf32, #tpu.memory_space<vmem>> -> memref<1x32xf32, #tpu.memory_space<vmem>>
    %559 = tpu.memref_slice %arg11[%c0_i32_423] : memref<1x!tpu.dma_semaphore, #tpu.memory_space<semaphore_mem>> -> memref<1x!tpu.dma_semaphore, #tpu.memory_space<semaphore_mem>>
    %560 = tpu.memref_squeeze %559 : memref<1x!tpu.dma_semaphore, #tpu.memory_space<semaphore_mem>> -> memref<!tpu.dma_semaphore, #tpu.memory_space<semaphore_mem>>
    tpu.enqueue_dma source(%557 : memref<1x32xf32, #tpu.memory_space<any>>) target(%558 : memref<1x32xf32, #tpu.memory_space<vmem>>) target_semaphore(%560 : memref<!tpu.dma_semaphore, #tpu.memory_space<semaphore_mem>>)
    %c0_i32_426 = arith.constant 0 : i32
    %c0_i32_427 = arith.constant 0 : i32
    %561 = tpu.memref_slice %arg4[%255, %c0_i32_427] : memref<50x32xf32, #tpu.memory_space<any>> -> memref<1x32xf32, #tpu.memory_space<any>>
    %c45_i32 = arith.constant 45 : i32
    %c0_i32_428 = arith.constant 0 : i32
    %562 = tpu.memref_slice %arg7[%c45_i32, %c0_i32_428] : memref<64x32xf32, #tpu.memory_space<vmem>> -> memref<1x32xf32, #tpu.memory_space<vmem>>
    %563 = tpu.memref_slice %arg11[%c0_i32_426] : memref<1x!tpu.dma_semaphore, #tpu.memory_space<semaphore_mem>> -> memref<1x!tpu.dma_semaphore, #tpu.memory_space<semaphore_mem>>
    %564 = tpu.memref_squeeze %563 : memref<1x!tpu.dma_semaphore, #tpu.memory_space<semaphore_mem>> -> memref<!tpu.dma_semaphore, #tpu.memory_space<semaphore_mem>>
    tpu.enqueue_dma source(%561 : memref<1x32xf32, #tpu.memory_space<any>>) target(%562 : memref<1x32xf32, #tpu.memory_space<vmem>>) target_semaphore(%564 : memref<!tpu.dma_semaphore, #tpu.memory_space<semaphore_mem>>)
    %c0_i32_429 = arith.constant 0 : i32
    %c0_i32_430 = arith.constant 0 : i32
    %565 = tpu.memref_slice %arg4[%260, %c0_i32_430] : memref<50x32xf32, #tpu.memory_space<any>> -> memref<1x32xf32, #tpu.memory_space<any>>
    %c53_i32 = arith.constant 53 : i32
    %c0_i32_431 = arith.constant 0 : i32
    %566 = tpu.memref_slice %arg7[%c53_i32, %c0_i32_431] : memref<64x32xf32, #tpu.memory_space<vmem>> -> memref<1x32xf32, #tpu.memory_space<vmem>>
    %567 = tpu.memref_slice %arg11[%c0_i32_429] : memref<1x!tpu.dma_semaphore, #tpu.memory_space<semaphore_mem>> -> memref<1x!tpu.dma_semaphore, #tpu.memory_space<semaphore_mem>>
    %568 = tpu.memref_squeeze %567 : memref<1x!tpu.dma_semaphore, #tpu.memory_space<semaphore_mem>> -> memref<!tpu.dma_semaphore, #tpu.memory_space<semaphore_mem>>
    tpu.enqueue_dma source(%565 : memref<1x32xf32, #tpu.memory_space<any>>) target(%566 : memref<1x32xf32, #tpu.memory_space<vmem>>) target_semaphore(%568 : memref<!tpu.dma_semaphore, #tpu.memory_space<semaphore_mem>>)
    %c0_i32_432 = arith.constant 0 : i32
    %c0_i32_433 = arith.constant 0 : i32
    %569 = tpu.memref_slice %arg4[%265, %c0_i32_433] : memref<50x32xf32, #tpu.memory_space<any>> -> memref<1x32xf32, #tpu.memory_space<any>>
    %c61_i32 = arith.constant 61 : i32
    %c0_i32_434 = arith.constant 0 : i32
    %570 = tpu.memref_slice %arg7[%c61_i32, %c0_i32_434] : memref<64x32xf32, #tpu.memory_space<vmem>> -> memref<1x32xf32, #tpu.memory_space<vmem>>
    %571 = tpu.memref_slice %arg11[%c0_i32_432] : memref<1x!tpu.dma_semaphore, #tpu.memory_space<semaphore_mem>> -> memref<1x!tpu.dma_semaphore, #tpu.memory_space<semaphore_mem>>
    %572 = tpu.memref_squeeze %571 : memref<1x!tpu.dma_semaphore, #tpu.memory_space<semaphore_mem>> -> memref<!tpu.dma_semaphore, #tpu.memory_space<semaphore_mem>>
    tpu.enqueue_dma source(%569 : memref<1x32xf32, #tpu.memory_space<any>>) target(%570 : memref<1x32xf32, #tpu.memory_space<vmem>>) target_semaphore(%572 : memref<!tpu.dma_semaphore, #tpu.memory_space<semaphore_mem>>)
    %c0_i32_435 = arith.constant 0 : i32
    %c0_i32_436 = arith.constant 0 : i32
    %573 = tpu.memref_slice %arg5[%270, %c0_i32_436] : memref<5x32xf32, #tpu.memory_space<any>> -> memref<1x32xf32, #tpu.memory_space<any>>
    %c5_i32_437 = arith.constant 5 : i32
    %c0_i32_438 = arith.constant 0 : i32
    %574 = tpu.memref_slice %arg8[%c5_i32_437, %c0_i32_438] : memref<8x32xf32, #tpu.memory_space<vmem>> -> memref<1x32xf32, #tpu.memory_space<vmem>>
    %575 = tpu.memref_slice %arg11[%c0_i32_435] : memref<1x!tpu.dma_semaphore, #tpu.memory_space<semaphore_mem>> -> memref<1x!tpu.dma_semaphore, #tpu.memory_space<semaphore_mem>>
    %576 = tpu.memref_squeeze %575 : memref<1x!tpu.dma_semaphore, #tpu.memory_space<semaphore_mem>> -> memref<!tpu.dma_semaphore, #tpu.memory_space<semaphore_mem>>
    tpu.enqueue_dma source(%573 : memref<1x32xf32, #tpu.memory_space<any>>) target(%574 : memref<1x32xf32, #tpu.memory_space<vmem>>) target_semaphore(%576 : memref<!tpu.dma_semaphore, #tpu.memory_space<semaphore_mem>>)
    %c0_i32_439 = arith.constant 0 : i32
    %c0_i32_440 = arith.constant 0 : i32
    %577 = tpu.memref_slice %arg4[%275, %c0_i32_440] : memref<50x32xf32, #tpu.memory_space<any>> -> memref<1x32xf32, #tpu.memory_space<any>>
    %c6_i32_441 = arith.constant 6 : i32
    %c0_i32_442 = arith.constant 0 : i32
    %578 = tpu.memref_slice %arg7[%c6_i32_441, %c0_i32_442] : memref<64x32xf32, #tpu.memory_space<vmem>> -> memref<1x32xf32, #tpu.memory_space<vmem>>
    %579 = tpu.memref_slice %arg11[%c0_i32_439] : memref<1x!tpu.dma_semaphore, #tpu.memory_space<semaphore_mem>> -> memref<1x!tpu.dma_semaphore, #tpu.memory_space<semaphore_mem>>
    %580 = tpu.memref_squeeze %579 : memref<1x!tpu.dma_semaphore, #tpu.memory_space<semaphore_mem>> -> memref<!tpu.dma_semaphore, #tpu.memory_space<semaphore_mem>>
    tpu.enqueue_dma source(%577 : memref<1x32xf32, #tpu.memory_space<any>>) target(%578 : memref<1x32xf32, #tpu.memory_space<vmem>>) target_semaphore(%580 : memref<!tpu.dma_semaphore, #tpu.memory_space<semaphore_mem>>)
    %c0_i32_443 = arith.constant 0 : i32
    %c0_i32_444 = arith.constant 0 : i32
    %581 = tpu.memref_slice %arg4[%280, %c0_i32_444] : memref<50x32xf32, #tpu.memory_space<any>> -> memref<1x32xf32, #tpu.memory_space<any>>
    %c14_i32 = arith.constant 14 : i32
    %c0_i32_445 = arith.constant 0 : i32
    %582 = tpu.memref_slice %arg7[%c14_i32, %c0_i32_445] : memref<64x32xf32, #tpu.memory_space<vmem>> -> memref<1x32xf32, #tpu.memory_space<vmem>>
    %583 = tpu.memref_slice %arg11[%c0_i32_443] : memref<1x!tpu.dma_semaphore, #tpu.memory_space<semaphore_mem>> -> memref<1x!tpu.dma_semaphore, #tpu.memory_space<semaphore_mem>>
    %584 = tpu.memref_squeeze %583 : memref<1x!tpu.dma_semaphore, #tpu.memory_space<semaphore_mem>> -> memref<!tpu.dma_semaphore, #tpu.memory_space<semaphore_mem>>
    tpu.enqueue_dma source(%581 : memref<1x32xf32, #tpu.memory_space<any>>) target(%582 : memref<1x32xf32, #tpu.memory_space<vmem>>) target_semaphore(%584 : memref<!tpu.dma_semaphore, #tpu.memory_space<semaphore_mem>>)
    %c0_i32_446 = arith.constant 0 : i32
    %c0_i32_447 = arith.constant 0 : i32
    %585 = tpu.memref_slice %arg4[%285, %c0_i32_447] : memref<50x32xf32, #tpu.memory_space<any>> -> memref<1x32xf32, #tpu.memory_space<any>>
    %c22_i32 = arith.constant 22 : i32
    %c0_i32_448 = arith.constant 0 : i32
    %586 = tpu.memref_slice %arg7[%c22_i32, %c0_i32_448] : memref<64x32xf32, #tpu.memory_space<vmem>> -> memref<1x32xf32, #tpu.memory_space<vmem>>
    %587 = tpu.memref_slice %arg11[%c0_i32_446] : memref<1x!tpu.dma_semaphore, #tpu.memory_space<semaphore_mem>> -> memref<1x!tpu.dma_semaphore, #tpu.memory_space<semaphore_mem>>
    %588 = tpu.memref_squeeze %587 : memref<1x!tpu.dma_semaphore, #tpu.memory_space<semaphore_mem>> -> memref<!tpu.dma_semaphore, #tpu.memory_space<semaphore_mem>>
    tpu.enqueue_dma source(%585 : memref<1x32xf32, #tpu.memory_space<any>>) target(%586 : memref<1x32xf32, #tpu.memory_space<vmem>>) target_semaphore(%588 : memref<!tpu.dma_semaphore, #tpu.memory_space<semaphore_mem>>)
    %c0_i32_449 = arith.constant 0 : i32
    %c0_i32_450 = arith.constant 0 : i32
    %589 = tpu.memref_slice %arg4[%290, %c0_i32_450] : memref<50x32xf32, #tpu.memory_space<any>> -> memref<1x32xf32, #tpu.memory_space<any>>
    %c30_i32 = arith.constant 30 : i32
    %c0_i32_451 = arith.constant 0 : i32
    %590 = tpu.memref_slice %arg7[%c30_i32, %c0_i32_451] : memref<64x32xf32, #tpu.memory_space<vmem>> -> memref<1x32xf32, #tpu.memory_space<vmem>>
    %591 = tpu.memref_slice %arg11[%c0_i32_449] : memref<1x!tpu.dma_semaphore, #tpu.memory_space<semaphore_mem>> -> memref<1x!tpu.dma_semaphore, #tpu.memory_space<semaphore_mem>>
    %592 = tpu.memref_squeeze %591 : memref<1x!tpu.dma_semaphore, #tpu.memory_space<semaphore_mem>> -> memref<!tpu.dma_semaphore, #tpu.memory_space<semaphore_mem>>
    tpu.enqueue_dma source(%589 : memref<1x32xf32, #tpu.memory_space<any>>) target(%590 : memref<1x32xf32, #tpu.memory_space<vmem>>) target_semaphore(%592 : memref<!tpu.dma_semaphore, #tpu.memory_space<semaphore_mem>>)
    %c0_i32_452 = arith.constant 0 : i32
    %c0_i32_453 = arith.constant 0 : i32
    %593 = tpu.memref_slice %arg4[%295, %c0_i32_453] : memref<50x32xf32, #tpu.memory_space<any>> -> memref<1x32xf32, #tpu.memory_space<any>>
    %c38_i32 = arith.constant 38 : i32
    %c0_i32_454 = arith.constant 0 : i32
    %594 = tpu.memref_slice %arg7[%c38_i32, %c0_i32_454] : memref<64x32xf32, #tpu.memory_space<vmem>> -> memref<1x32xf32, #tpu.memory_space<vmem>>
    %595 = tpu.memref_slice %arg11[%c0_i32_452] : memref<1x!tpu.dma_semaphore, #tpu.memory_space<semaphore_mem>> -> memref<1x!tpu.dma_semaphore, #tpu.memory_space<semaphore_mem>>
    %596 = tpu.memref_squeeze %595 : memref<1x!tpu.dma_semaphore, #tpu.memory_space<semaphore_mem>> -> memref<!tpu.dma_semaphore, #tpu.memory_space<semaphore_mem>>
    tpu.enqueue_dma source(%593 : memref<1x32xf32, #tpu.memory_space<any>>) target(%594 : memref<1x32xf32, #tpu.memory_space<vmem>>) target_semaphore(%596 : memref<!tpu.dma_semaphore, #tpu.memory_space<semaphore_mem>>)
    %c0_i32_455 = arith.constant 0 : i32
    %c0_i32_456 = arith.constant 0 : i32
    %597 = tpu.memref_slice %arg4[%300, %c0_i32_456] : memref<50x32xf32, #tpu.memory_space<any>> -> memref<1x32xf32, #tpu.memory_space<any>>
    %c46_i32 = arith.constant 46 : i32
    %c0_i32_457 = arith.constant 0 : i32
    %598 = tpu.memref_slice %arg7[%c46_i32, %c0_i32_457] : memref<64x32xf32, #tpu.memory_space<vmem>> -> memref<1x32xf32, #tpu.memory_space<vmem>>
    %599 = tpu.memref_slice %arg11[%c0_i32_455] : memref<1x!tpu.dma_semaphore, #tpu.memory_space<semaphore_mem>> -> memref<1x!tpu.dma_semaphore, #tpu.memory_space<semaphore_mem>>
    %600 = tpu.memref_squeeze %599 : memref<1x!tpu.dma_semaphore, #tpu.memory_space<semaphore_mem>> -> memref<!tpu.dma_semaphore, #tpu.memory_space<semaphore_mem>>
    tpu.enqueue_dma source(%597 : memref<1x32xf32, #tpu.memory_space<any>>) target(%598 : memref<1x32xf32, #tpu.memory_space<vmem>>) target_semaphore(%600 : memref<!tpu.dma_semaphore, #tpu.memory_space<semaphore_mem>>)
    %c0_i32_458 = arith.constant 0 : i32
    %c0_i32_459 = arith.constant 0 : i32
    %601 = tpu.memref_slice %arg4[%305, %c0_i32_459] : memref<50x32xf32, #tpu.memory_space<any>> -> memref<1x32xf32, #tpu.memory_space<any>>
    %c54_i32 = arith.constant 54 : i32
    %c0_i32_460 = arith.constant 0 : i32
    %602 = tpu.memref_slice %arg7[%c54_i32, %c0_i32_460] : memref<64x32xf32, #tpu.memory_space<vmem>> -> memref<1x32xf32, #tpu.memory_space<vmem>>
    %603 = tpu.memref_slice %arg11[%c0_i32_458] : memref<1x!tpu.dma_semaphore, #tpu.memory_space<semaphore_mem>> -> memref<1x!tpu.dma_semaphore, #tpu.memory_space<semaphore_mem>>
    %604 = tpu.memref_squeeze %603 : memref<1x!tpu.dma_semaphore, #tpu.memory_space<semaphore_mem>> -> memref<!tpu.dma_semaphore, #tpu.memory_space<semaphore_mem>>
    tpu.enqueue_dma source(%601 : memref<1x32xf32, #tpu.memory_space<any>>) target(%602 : memref<1x32xf32, #tpu.memory_space<vmem>>) target_semaphore(%604 : memref<!tpu.dma_semaphore, #tpu.memory_space<semaphore_mem>>)
    %c0_i32_461 = arith.constant 0 : i32
    %c0_i32_462 = arith.constant 0 : i32
    %605 = tpu.memref_slice %arg4[%310, %c0_i32_462] : memref<50x32xf32, #tpu.memory_space<any>> -> memref<1x32xf32, #tpu.memory_space<any>>
    %c62_i32 = arith.constant 62 : i32
    %c0_i32_463 = arith.constant 0 : i32
    %606 = tpu.memref_slice %arg7[%c62_i32, %c0_i32_463] : memref<64x32xf32, #tpu.memory_space<vmem>> -> memref<1x32xf32, #tpu.memory_space<vmem>>
    %607 = tpu.memref_slice %arg11[%c0_i32_461] : memref<1x!tpu.dma_semaphore, #tpu.memory_space<semaphore_mem>> -> memref<1x!tpu.dma_semaphore, #tpu.memory_space<semaphore_mem>>
    %608 = tpu.memref_squeeze %607 : memref<1x!tpu.dma_semaphore, #tpu.memory_space<semaphore_mem>> -> memref<!tpu.dma_semaphore, #tpu.memory_space<semaphore_mem>>
    tpu.enqueue_dma source(%605 : memref<1x32xf32, #tpu.memory_space<any>>) target(%606 : memref<1x32xf32, #tpu.memory_space<vmem>>) target_semaphore(%608 : memref<!tpu.dma_semaphore, #tpu.memory_space<semaphore_mem>>)
    %c0_i32_464 = arith.constant 0 : i32
    %c0_i32_465 = arith.constant 0 : i32
    %609 = tpu.memref_slice %arg5[%315, %c0_i32_465] : memref<5x32xf32, #tpu.memory_space<any>> -> memref<1x32xf32, #tpu.memory_space<any>>
    %c6_i32_466 = arith.constant 6 : i32
    %c0_i32_467 = arith.constant 0 : i32
    %610 = tpu.memref_slice %arg8[%c6_i32_466, %c0_i32_467] : memref<8x32xf32, #tpu.memory_space<vmem>> -> memref<1x32xf32, #tpu.memory_space<vmem>>
    %611 = tpu.memref_slice %arg11[%c0_i32_464] : memref<1x!tpu.dma_semaphore, #tpu.memory_space<semaphore_mem>> -> memref<1x!tpu.dma_semaphore, #tpu.memory_space<semaphore_mem>>
    %612 = tpu.memref_squeeze %611 : memref<1x!tpu.dma_semaphore, #tpu.memory_space<semaphore_mem>> -> memref<!tpu.dma_semaphore, #tpu.memory_space<semaphore_mem>>
    tpu.enqueue_dma source(%609 : memref<1x32xf32, #tpu.memory_space<any>>) target(%610 : memref<1x32xf32, #tpu.memory_space<vmem>>) target_semaphore(%612 : memref<!tpu.dma_semaphore, #tpu.memory_space<semaphore_mem>>)
    %c0_i32_468 = arith.constant 0 : i32
    %c0_i32_469 = arith.constant 0 : i32
    %613 = tpu.memref_slice %arg4[%320, %c0_i32_469] : memref<50x32xf32, #tpu.memory_space<any>> -> memref<1x32xf32, #tpu.memory_space<any>>
    %c7_i32_470 = arith.constant 7 : i32
    %c0_i32_471 = arith.constant 0 : i32
    %614 = tpu.memref_slice %arg7[%c7_i32_470, %c0_i32_471] : memref<64x32xf32, #tpu.memory_space<vmem>> -> memref<1x32xf32, #tpu.memory_space<vmem>>
    %615 = tpu.memref_slice %arg11[%c0_i32_468] : memref<1x!tpu.dma_semaphore, #tpu.memory_space<semaphore_mem>> -> memref<1x!tpu.dma_semaphore, #tpu.memory_space<semaphore_mem>>
    %616 = tpu.memref_squeeze %615 : memref<1x!tpu.dma_semaphore, #tpu.memory_space<semaphore_mem>> -> memref<!tpu.dma_semaphore, #tpu.memory_space<semaphore_mem>>
    tpu.enqueue_dma source(%613 : memref<1x32xf32, #tpu.memory_space<any>>) target(%614 : memref<1x32xf32, #tpu.memory_space<vmem>>) target_semaphore(%616 : memref<!tpu.dma_semaphore, #tpu.memory_space<semaphore_mem>>)
    %c0_i32_472 = arith.constant 0 : i32
    %c0_i32_473 = arith.constant 0 : i32
    %617 = tpu.memref_slice %arg4[%325, %c0_i32_473] : memref<50x32xf32, #tpu.memory_space<any>> -> memref<1x32xf32, #tpu.memory_space<any>>
    %c15_i32 = arith.constant 15 : i32
    %c0_i32_474 = arith.constant 0 : i32
    %618 = tpu.memref_slice %arg7[%c15_i32, %c0_i32_474] : memref<64x32xf32, #tpu.memory_space<vmem>> -> memref<1x32xf32, #tpu.memory_space<vmem>>
    %619 = tpu.memref_slice %arg11[%c0_i32_472] : memref<1x!tpu.dma_semaphore, #tpu.memory_space<semaphore_mem>> -> memref<1x!tpu.dma_semaphore, #tpu.memory_space<semaphore_mem>>
    %620 = tpu.memref_squeeze %619 : memref<1x!tpu.dma_semaphore, #tpu.memory_space<semaphore_mem>> -> memref<!tpu.dma_semaphore, #tpu.memory_space<semaphore_mem>>
    tpu.enqueue_dma source(%617 : memref<1x32xf32, #tpu.memory_space<any>>) target(%618 : memref<1x32xf32, #tpu.memory_space<vmem>>) target_semaphore(%620 : memref<!tpu.dma_semaphore, #tpu.memory_space<semaphore_mem>>)
    %c0_i32_475 = arith.constant 0 : i32
    %c0_i32_476 = arith.constant 0 : i32
    %621 = tpu.memref_slice %arg4[%330, %c0_i32_476] : memref<50x32xf32, #tpu.memory_space<any>> -> memref<1x32xf32, #tpu.memory_space<any>>
    %c23_i32 = arith.constant 23 : i32
    %c0_i32_477 = arith.constant 0 : i32
    %622 = tpu.memref_slice %arg7[%c23_i32, %c0_i32_477] : memref<64x32xf32, #tpu.memory_space<vmem>> -> memref<1x32xf32, #tpu.memory_space<vmem>>
    %623 = tpu.memref_slice %arg11[%c0_i32_475] : memref<1x!tpu.dma_semaphore, #tpu.memory_space<semaphore_mem>> -> memref<1x!tpu.dma_semaphore, #tpu.memory_space<semaphore_mem>>
    %624 = tpu.memref_squeeze %623 : memref<1x!tpu.dma_semaphore, #tpu.memory_space<semaphore_mem>> -> memref<!tpu.dma_semaphore, #tpu.memory_space<semaphore_mem>>
    tpu.enqueue_dma source(%621 : memref<1x32xf32, #tpu.memory_space<any>>) target(%622 : memref<1x32xf32, #tpu.memory_space<vmem>>) target_semaphore(%624 : memref<!tpu.dma_semaphore, #tpu.memory_space<semaphore_mem>>)
    %c0_i32_478 = arith.constant 0 : i32
    %c0_i32_479 = arith.constant 0 : i32
    %625 = tpu.memref_slice %arg4[%335, %c0_i32_479] : memref<50x32xf32, #tpu.memory_space<any>> -> memref<1x32xf32, #tpu.memory_space<any>>
    %c31_i32 = arith.constant 31 : i32
    %c0_i32_480 = arith.constant 0 : i32
    %626 = tpu.memref_slice %arg7[%c31_i32, %c0_i32_480] : memref<64x32xf32, #tpu.memory_space<vmem>> -> memref<1x32xf32, #tpu.memory_space<vmem>>
    %627 = tpu.memref_slice %arg11[%c0_i32_478] : memref<1x!tpu.dma_semaphore, #tpu.memory_space<semaphore_mem>> -> memref<1x!tpu.dma_semaphore, #tpu.memory_space<semaphore_mem>>
    %628 = tpu.memref_squeeze %627 : memref<1x!tpu.dma_semaphore, #tpu.memory_space<semaphore_mem>> -> memref<!tpu.dma_semaphore, #tpu.memory_space<semaphore_mem>>
    tpu.enqueue_dma source(%625 : memref<1x32xf32, #tpu.memory_space<any>>) target(%626 : memref<1x32xf32, #tpu.memory_space<vmem>>) target_semaphore(%628 : memref<!tpu.dma_semaphore, #tpu.memory_space<semaphore_mem>>)
    %c0_i32_481 = arith.constant 0 : i32
    %c0_i32_482 = arith.constant 0 : i32
    %629 = tpu.memref_slice %arg4[%340, %c0_i32_482] : memref<50x32xf32, #tpu.memory_space<any>> -> memref<1x32xf32, #tpu.memory_space<any>>
    %c39_i32 = arith.constant 39 : i32
    %c0_i32_483 = arith.constant 0 : i32
    %630 = tpu.memref_slice %arg7[%c39_i32, %c0_i32_483] : memref<64x32xf32, #tpu.memory_space<vmem>> -> memref<1x32xf32, #tpu.memory_space<vmem>>
    %631 = tpu.memref_slice %arg11[%c0_i32_481] : memref<1x!tpu.dma_semaphore, #tpu.memory_space<semaphore_mem>> -> memref<1x!tpu.dma_semaphore, #tpu.memory_space<semaphore_mem>>
    %632 = tpu.memref_squeeze %631 : memref<1x!tpu.dma_semaphore, #tpu.memory_space<semaphore_mem>> -> memref<!tpu.dma_semaphore, #tpu.memory_space<semaphore_mem>>
    tpu.enqueue_dma source(%629 : memref<1x32xf32, #tpu.memory_space<any>>) target(%630 : memref<1x32xf32, #tpu.memory_space<vmem>>) target_semaphore(%632 : memref<!tpu.dma_semaphore, #tpu.memory_space<semaphore_mem>>)
    %c0_i32_484 = arith.constant 0 : i32
    %c0_i32_485 = arith.constant 0 : i32
    %633 = tpu.memref_slice %arg4[%345, %c0_i32_485] : memref<50x32xf32, #tpu.memory_space<any>> -> memref<1x32xf32, #tpu.memory_space<any>>
    %c47_i32 = arith.constant 47 : i32
    %c0_i32_486 = arith.constant 0 : i32
    %634 = tpu.memref_slice %arg7[%c47_i32, %c0_i32_486] : memref<64x32xf32, #tpu.memory_space<vmem>> -> memref<1x32xf32, #tpu.memory_space<vmem>>
    %635 = tpu.memref_slice %arg11[%c0_i32_484] : memref<1x!tpu.dma_semaphore, #tpu.memory_space<semaphore_mem>> -> memref<1x!tpu.dma_semaphore, #tpu.memory_space<semaphore_mem>>
    %636 = tpu.memref_squeeze %635 : memref<1x!tpu.dma_semaphore, #tpu.memory_space<semaphore_mem>> -> memref<!tpu.dma_semaphore, #tpu.memory_space<semaphore_mem>>
    tpu.enqueue_dma source(%633 : memref<1x32xf32, #tpu.memory_space<any>>) target(%634 : memref<1x32xf32, #tpu.memory_space<vmem>>) target_semaphore(%636 : memref<!tpu.dma_semaphore, #tpu.memory_space<semaphore_mem>>)
    %c0_i32_487 = arith.constant 0 : i32
    %c0_i32_488 = arith.constant 0 : i32
    %637 = tpu.memref_slice %arg4[%350, %c0_i32_488] : memref<50x32xf32, #tpu.memory_space<any>> -> memref<1x32xf32, #tpu.memory_space<any>>
    %c55_i32 = arith.constant 55 : i32
    %c0_i32_489 = arith.constant 0 : i32
    %638 = tpu.memref_slice %arg7[%c55_i32, %c0_i32_489] : memref<64x32xf32, #tpu.memory_space<vmem>> -> memref<1x32xf32, #tpu.memory_space<vmem>>
    %639 = tpu.memref_slice %arg11[%c0_i32_487] : memref<1x!tpu.dma_semaphore, #tpu.memory_space<semaphore_mem>> -> memref<1x!tpu.dma_semaphore, #tpu.memory_space<semaphore_mem>>
    %640 = tpu.memref_squeeze %639 : memref<1x!tpu.dma_semaphore, #tpu.memory_space<semaphore_mem>> -> memref<!tpu.dma_semaphore, #tpu.memory_space<semaphore_mem>>
    tpu.enqueue_dma source(%637 : memref<1x32xf32, #tpu.memory_space<any>>) target(%638 : memref<1x32xf32, #tpu.memory_space<vmem>>) target_semaphore(%640 : memref<!tpu.dma_semaphore, #tpu.memory_space<semaphore_mem>>)
    %c0_i32_490 = arith.constant 0 : i32
    %c0_i32_491 = arith.constant 0 : i32
    %641 = tpu.memref_slice %arg4[%355, %c0_i32_491] : memref<50x32xf32, #tpu.memory_space<any>> -> memref<1x32xf32, #tpu.memory_space<any>>
    %c63_i32 = arith.constant 63 : i32
    %c0_i32_492 = arith.constant 0 : i32
    %642 = tpu.memref_slice %arg7[%c63_i32, %c0_i32_492] : memref<64x32xf32, #tpu.memory_space<vmem>> -> memref<1x32xf32, #tpu.memory_space<vmem>>
    %643 = tpu.memref_slice %arg11[%c0_i32_490] : memref<1x!tpu.dma_semaphore, #tpu.memory_space<semaphore_mem>> -> memref<1x!tpu.dma_semaphore, #tpu.memory_space<semaphore_mem>>
    %644 = tpu.memref_squeeze %643 : memref<1x!tpu.dma_semaphore, #tpu.memory_space<semaphore_mem>> -> memref<!tpu.dma_semaphore, #tpu.memory_space<semaphore_mem>>
    tpu.enqueue_dma source(%641 : memref<1x32xf32, #tpu.memory_space<any>>) target(%642 : memref<1x32xf32, #tpu.memory_space<vmem>>) target_semaphore(%644 : memref<!tpu.dma_semaphore, #tpu.memory_space<semaphore_mem>>)
    %c0_i32_493 = arith.constant 0 : i32
    %c0_i32_494 = arith.constant 0 : i32
    %645 = tpu.memref_slice %arg5[%360, %c0_i32_494] : memref<5x32xf32, #tpu.memory_space<any>> -> memref<1x32xf32, #tpu.memory_space<any>>
    %c7_i32_495 = arith.constant 7 : i32
    %c0_i32_496 = arith.constant 0 : i32
    %646 = tpu.memref_slice %arg8[%c7_i32_495, %c0_i32_496] : memref<8x32xf32, #tpu.memory_space<vmem>> -> memref<1x32xf32, #tpu.memory_space<vmem>>
    %647 = tpu.memref_slice %arg11[%c0_i32_493] : memref<1x!tpu.dma_semaphore, #tpu.memory_space<semaphore_mem>> -> memref<1x!tpu.dma_semaphore, #tpu.memory_space<semaphore_mem>>
    %648 = tpu.memref_squeeze %647 : memref<1x!tpu.dma_semaphore, #tpu.memory_space<semaphore_mem>> -> memref<!tpu.dma_semaphore, #tpu.memory_space<semaphore_mem>>
    tpu.enqueue_dma source(%645 : memref<1x32xf32, #tpu.memory_space<any>>) target(%646 : memref<1x32xf32, #tpu.memory_space<vmem>>) target_semaphore(%648 : memref<!tpu.dma_semaphore, #tpu.memory_space<semaphore_mem>>)
    %c0_i32_497 = arith.constant 0 : i32
    %c0_i32_498 = arith.constant 0 : i32
    %649 = tpu.memref_slice %arg4[%5, %c0_i32_498] : memref<50x32xf32, #tpu.memory_space<any>> -> memref<1x32xf32, #tpu.memory_space<any>>
    %c0_i32_499 = arith.constant 0 : i32
    %c0_i32_500 = arith.constant 0 : i32
    %650 = tpu.memref_slice %arg7[%c0_i32_499, %c0_i32_500] : memref<64x32xf32, #tpu.memory_space<vmem>> -> memref<1x32xf32, #tpu.memory_space<vmem>>
    %651 = tpu.memref_slice %arg11[%c0_i32_497] : memref<1x!tpu.dma_semaphore, #tpu.memory_space<semaphore_mem>> -> memref<1x!tpu.dma_semaphore, #tpu.memory_space<semaphore_mem>>
    %652 = tpu.memref_squeeze %651 : memref<1x!tpu.dma_semaphore, #tpu.memory_space<semaphore_mem>> -> memref<!tpu.dma_semaphore, #tpu.memory_space<semaphore_mem>>
    tpu.wait_dma2 semaphore(%652 : memref<!tpu.dma_semaphore, #tpu.memory_space<semaphore_mem>>) src(%649 : memref<1x32xf32, #tpu.memory_space<any>>) dst(%650 : memref<1x32xf32, #tpu.memory_space<vmem>>)
    %c0_i32_501 = arith.constant 0 : i32
    %c0_i32_502 = arith.constant 0 : i32
    %653 = tpu.memref_slice %arg4[%10, %c0_i32_502] : memref<50x32xf32, #tpu.memory_space<any>> -> memref<1x32xf32, #tpu.memory_space<any>>
    %c8_i32_503 = arith.constant 8 : i32
    %c0_i32_504 = arith.constant 0 : i32
    %654 = tpu.memref_slice %arg7[%c8_i32_503, %c0_i32_504] : memref<64x32xf32, #tpu.memory_space<vmem>> -> memref<1x32xf32, #tpu.memory_space<vmem>>
    %655 = tpu.memref_slice %arg11[%c0_i32_501] : memref<1x!tpu.dma_semaphore, #tpu.memory_space<semaphore_mem>> -> memref<1x!tpu.dma_semaphore, #tpu.memory_space<semaphore_mem>>
    %656 = tpu.memref_squeeze %655 : memref<1x!tpu.dma_semaphore, #tpu.memory_space<semaphore_mem>> -> memref<!tpu.dma_semaphore, #tpu.memory_space<semaphore_mem>>
    tpu.wait_dma2 semaphore(%656 : memref<!tpu.dma_semaphore, #tpu.memory_space<semaphore_mem>>) src(%653 : memref<1x32xf32, #tpu.memory_space<any>>) dst(%654 : memref<1x32xf32, #tpu.memory_space<vmem>>)
    %c0_i32_505 = arith.constant 0 : i32
    %c0_i32_506 = arith.constant 0 : i32
    %657 = tpu.memref_slice %arg4[%15, %c0_i32_506] : memref<50x32xf32, #tpu.memory_space<any>> -> memref<1x32xf32, #tpu.memory_space<any>>
    %c16_i32_507 = arith.constant 16 : i32
    %c0_i32_508 = arith.constant 0 : i32
    %658 = tpu.memref_slice %arg7[%c16_i32_507, %c0_i32_508] : memref<64x32xf32, #tpu.memory_space<vmem>> -> memref<1x32xf32, #tpu.memory_space<vmem>>
    %659 = tpu.memref_slice %arg11[%c0_i32_505] : memref<1x!tpu.dma_semaphore, #tpu.memory_space<semaphore_mem>> -> memref<1x!tpu.dma_semaphore, #tpu.memory_space<semaphore_mem>>
    %660 = tpu.memref_squeeze %659 : memref<1x!tpu.dma_semaphore, #tpu.memory_space<semaphore_mem>> -> memref<!tpu.dma_semaphore, #tpu.memory_space<semaphore_mem>>
    tpu.wait_dma2 semaphore(%660 : memref<!tpu.dma_semaphore, #tpu.memory_space<semaphore_mem>>) src(%657 : memref<1x32xf32, #tpu.memory_space<any>>) dst(%658 : memref<1x32xf32, #tpu.memory_space<vmem>>)
    %c0_i32_509 = arith.constant 0 : i32
    %c0_i32_510 = arith.constant 0 : i32
    %661 = tpu.memref_slice %arg4[%20, %c0_i32_510] : memref<50x32xf32, #tpu.memory_space<any>> -> memref<1x32xf32, #tpu.memory_space<any>>
    %c24_i32_511 = arith.constant 24 : i32
    %c0_i32_512 = arith.constant 0 : i32
    %662 = tpu.memref_slice %arg7[%c24_i32_511, %c0_i32_512] : memref<64x32xf32, #tpu.memory_space<vmem>> -> memref<1x32xf32, #tpu.memory_space<vmem>>
    %663 = tpu.memref_slice %arg11[%c0_i32_509] : memref<1x!tpu.dma_semaphore, #tpu.memory_space<semaphore_mem>> -> memref<1x!tpu.dma_semaphore, #tpu.memory_space<semaphore_mem>>
    %664 = tpu.memref_squeeze %663 : memref<1x!tpu.dma_semaphore, #tpu.memory_space<semaphore_mem>> -> memref<!tpu.dma_semaphore, #tpu.memory_space<semaphore_mem>>
    tpu.wait_dma2 semaphore(%664 : memref<!tpu.dma_semaphore, #tpu.memory_space<semaphore_mem>>) src(%661 : memref<1x32xf32, #tpu.memory_space<any>>) dst(%662 : memref<1x32xf32, #tpu.memory_space<vmem>>)
    %c0_i32_513 = arith.constant 0 : i32
    %c0_i32_514 = arith.constant 0 : i32
    %665 = tpu.memref_slice %arg4[%25, %c0_i32_514] : memref<50x32xf32, #tpu.memory_space<any>> -> memref<1x32xf32, #tpu.memory_space<any>>
    %c32_i32_515 = arith.constant 32 : i32
    %c0_i32_516 = arith.constant 0 : i32
    %666 = tpu.memref_slice %arg7[%c32_i32_515, %c0_i32_516] : memref<64x32xf32, #tpu.memory_space<vmem>> -> memref<1x32xf32, #tpu.memory_space<vmem>>
    %667 = tpu.memref_slice %arg11[%c0_i32_513] : memref<1x!tpu.dma_semaphore, #tpu.memory_space<semaphore_mem>> -> memref<1x!tpu.dma_semaphore, #tpu.memory_space<semaphore_mem>>
    %668 = tpu.memref_squeeze %667 : memref<1x!tpu.dma_semaphore, #tpu.memory_space<semaphore_mem>> -> memref<!tpu.dma_semaphore, #tpu.memory_space<semaphore_mem>>
    tpu.wait_dma2 semaphore(%668 : memref<!tpu.dma_semaphore, #tpu.memory_space<semaphore_mem>>) src(%665 : memref<1x32xf32, #tpu.memory_space<any>>) dst(%666 : memref<1x32xf32, #tpu.memory_space<vmem>>)
    %c0_i32_517 = arith.constant 0 : i32
    %c0_i32_518 = arith.constant 0 : i32
    %669 = tpu.memref_slice %arg4[%30, %c0_i32_518] : memref<50x32xf32, #tpu.memory_space<any>> -> memref<1x32xf32, #tpu.memory_space<any>>
    %c40_i32_519 = arith.constant 40 : i32
    %c0_i32_520 = arith.constant 0 : i32
    %670 = tpu.memref_slice %arg7[%c40_i32_519, %c0_i32_520] : memref<64x32xf32, #tpu.memory_space<vmem>> -> memref<1x32xf32, #tpu.memory_space<vmem>>
    %671 = tpu.memref_slice %arg11[%c0_i32_517] : memref<1x!tpu.dma_semaphore, #tpu.memory_space<semaphore_mem>> -> memref<1x!tpu.dma_semaphore, #tpu.memory_space<semaphore_mem>>
    %672 = tpu.memref_squeeze %671 : memref<1x!tpu.dma_semaphore, #tpu.memory_space<semaphore_mem>> -> memref<!tpu.dma_semaphore, #tpu.memory_space<semaphore_mem>>
    tpu.wait_dma2 semaphore(%672 : memref<!tpu.dma_semaphore, #tpu.memory_space<semaphore_mem>>) src(%669 : memref<1x32xf32, #tpu.memory_space<any>>) dst(%670 : memref<1x32xf32, #tpu.memory_space<vmem>>)
    %c0_i32_521 = arith.constant 0 : i32
    %c0_i32_522 = arith.constant 0 : i32
    %673 = tpu.memref_slice %arg4[%35, %c0_i32_522] : memref<50x32xf32, #tpu.memory_space<any>> -> memref<1x32xf32, #tpu.memory_space<any>>
    %c48_i32_523 = arith.constant 48 : i32
    %c0_i32_524 = arith.constant 0 : i32
    %674 = tpu.memref_slice %arg7[%c48_i32_523, %c0_i32_524] : memref<64x32xf32, #tpu.memory_space<vmem>> -> memref<1x32xf32, #tpu.memory_space<vmem>>
    %675 = tpu.memref_slice %arg11[%c0_i32_521] : memref<1x!tpu.dma_semaphore, #tpu.memory_space<semaphore_mem>> -> memref<1x!tpu.dma_semaphore, #tpu.memory_space<semaphore_mem>>
    %676 = tpu.memref_squeeze %675 : memref<1x!tpu.dma_semaphore, #tpu.memory_space<semaphore_mem>> -> memref<!tpu.dma_semaphore, #tpu.memory_space<semaphore_mem>>
    tpu.wait_dma2 semaphore(%676 : memref<!tpu.dma_semaphore, #tpu.memory_space<semaphore_mem>>) src(%673 : memref<1x32xf32, #tpu.memory_space<any>>) dst(%674 : memref<1x32xf32, #tpu.memory_space<vmem>>)
    %c0_i32_525 = arith.constant 0 : i32
    %c0_i32_526 = arith.constant 0 : i32
    %677 = tpu.memref_slice %arg4[%40, %c0_i32_526] : memref<50x32xf32, #tpu.memory_space<any>> -> memref<1x32xf32, #tpu.memory_space<any>>
    %c56_i32_527 = arith.constant 56 : i32
    %c0_i32_528 = arith.constant 0 : i32
    %678 = tpu.memref_slice %arg7[%c56_i32_527, %c0_i32_528] : memref<64x32xf32, #tpu.memory_space<vmem>> -> memref<1x32xf32, #tpu.memory_space<vmem>>
    %679 = tpu.memref_slice %arg11[%c0_i32_525] : memref<1x!tpu.dma_semaphore, #tpu.memory_space<semaphore_mem>> -> memref<1x!tpu.dma_semaphore, #tpu.memory_space<semaphore_mem>>
    %680 = tpu.memref_squeeze %679 : memref<1x!tpu.dma_semaphore, #tpu.memory_space<semaphore_mem>> -> memref<!tpu.dma_semaphore, #tpu.memory_space<semaphore_mem>>
    tpu.wait_dma2 semaphore(%680 : memref<!tpu.dma_semaphore, #tpu.memory_space<semaphore_mem>>) src(%677 : memref<1x32xf32, #tpu.memory_space<any>>) dst(%678 : memref<1x32xf32, #tpu.memory_space<vmem>>)
    %c0_i32_529 = arith.constant 0 : i32
    %c0_i32_530 = arith.constant 0 : i32
    %681 = tpu.memref_slice %arg5[%45, %c0_i32_530] : memref<5x32xf32, #tpu.memory_space<any>> -> memref<1x32xf32, #tpu.memory_space<any>>
    %c0_i32_531 = arith.constant 0 : i32
    %c0_i32_532 = arith.constant 0 : i32
    %682 = tpu.memref_slice %arg8[%c0_i32_531, %c0_i32_532] : memref<8x32xf32, #tpu.memory_space<vmem>> -> memref<1x32xf32, #tpu.memory_space<vmem>>
    %683 = tpu.memref_slice %arg11[%c0_i32_529] : memref<1x!tpu.dma_semaphore, #tpu.memory_space<semaphore_mem>> -> memref<1x!tpu.dma_semaphore, #tpu.memory_space<semaphore_mem>>
    %684 = tpu.memref_squeeze %683 : memref<1x!tpu.dma_semaphore, #tpu.memory_space<semaphore_mem>> -> memref<!tpu.dma_semaphore, #tpu.memory_space<semaphore_mem>>
    tpu.wait_dma2 semaphore(%684 : memref<!tpu.dma_semaphore, #tpu.memory_space<semaphore_mem>>) src(%681 : memref<1x32xf32, #tpu.memory_space<any>>) dst(%682 : memref<1x32xf32, #tpu.memory_space<vmem>>)
    %c0_i32_533 = arith.constant 0 : i32
    %c0_i32_534 = arith.constant 0 : i32
    %685 = tpu.memref_slice %arg4[%50, %c0_i32_534] : memref<50x32xf32, #tpu.memory_space<any>> -> memref<1x32xf32, #tpu.memory_space<any>>
    %c1_i32_535 = arith.constant 1 : i32
    %c0_i32_536 = arith.constant 0 : i32
    %686 = tpu.memref_slice %arg7[%c1_i32_535, %c0_i32_536] : memref<64x32xf32, #tpu.memory_space<vmem>> -> memref<1x32xf32, #tpu.memory_space<vmem>>
    %687 = tpu.memref_slice %arg11[%c0_i32_533] : memref<1x!tpu.dma_semaphore, #tpu.memory_space<semaphore_mem>> -> memref<1x!tpu.dma_semaphore, #tpu.memory_space<semaphore_mem>>
    %688 = tpu.memref_squeeze %687 : memref<1x!tpu.dma_semaphore, #tpu.memory_space<semaphore_mem>> -> memref<!tpu.dma_semaphore, #tpu.memory_space<semaphore_mem>>
    tpu.wait_dma2 semaphore(%688 : memref<!tpu.dma_semaphore, #tpu.memory_space<semaphore_mem>>) src(%685 : memref<1x32xf32, #tpu.memory_space<any>>) dst(%686 : memref<1x32xf32, #tpu.memory_space<vmem>>)
    %c0_i32_537 = arith.constant 0 : i32
    %c0_i32_538 = arith.constant 0 : i32
    %689 = tpu.memref_slice %arg4[%55, %c0_i32_538] : memref<50x32xf32, #tpu.memory_space<any>> -> memref<1x32xf32, #tpu.memory_space<any>>
    %c9_i32_539 = arith.constant 9 : i32
    %c0_i32_540 = arith.constant 0 : i32
    %690 = tpu.memref_slice %arg7[%c9_i32_539, %c0_i32_540] : memref<64x32xf32, #tpu.memory_space<vmem>> -> memref<1x32xf32, #tpu.memory_space<vmem>>
    %691 = tpu.memref_slice %arg11[%c0_i32_537] : memref<1x!tpu.dma_semaphore, #tpu.memory_space<semaphore_mem>> -> memref<1x!tpu.dma_semaphore, #tpu.memory_space<semaphore_mem>>
    %692 = tpu.memref_squeeze %691 : memref<1x!tpu.dma_semaphore, #tpu.memory_space<semaphore_mem>> -> memref<!tpu.dma_semaphore, #tpu.memory_space<semaphore_mem>>
    tpu.wait_dma2 semaphore(%692 : memref<!tpu.dma_semaphore, #tpu.memory_space<semaphore_mem>>) src(%689 : memref<1x32xf32, #tpu.memory_space<any>>) dst(%690 : memref<1x32xf32, #tpu.memory_space<vmem>>)
    %c0_i32_541 = arith.constant 0 : i32
    %c0_i32_542 = arith.constant 0 : i32
    %693 = tpu.memref_slice %arg4[%60, %c0_i32_542] : memref<50x32xf32, #tpu.memory_space<any>> -> memref<1x32xf32, #tpu.memory_space<any>>
    %c17_i32_543 = arith.constant 17 : i32
    %c0_i32_544 = arith.constant 0 : i32
    %694 = tpu.memref_slice %arg7[%c17_i32_543, %c0_i32_544] : memref<64x32xf32, #tpu.memory_space<vmem>> -> memref<1x32xf32, #tpu.memory_space<vmem>>
    %695 = tpu.memref_slice %arg11[%c0_i32_541] : memref<1x!tpu.dma_semaphore, #tpu.memory_space<semaphore_mem>> -> memref<1x!tpu.dma_semaphore, #tpu.memory_space<semaphore_mem>>
    %696 = tpu.memref_squeeze %695 : memref<1x!tpu.dma_semaphore, #tpu.memory_space<semaphore_mem>> -> memref<!tpu.dma_semaphore, #tpu.memory_space<semaphore_mem>>
    tpu.wait_dma2 semaphore(%696 : memref<!tpu.dma_semaphore, #tpu.memory_space<semaphore_mem>>) src(%693 : memref<1x32xf32, #tpu.memory_space<any>>) dst(%694 : memref<1x32xf32, #tpu.memory_space<vmem>>)
    %c0_i32_545 = arith.constant 0 : i32
    %c0_i32_546 = arith.constant 0 : i32
    %697 = tpu.memref_slice %arg4[%65, %c0_i32_546] : memref<50x32xf32, #tpu.memory_space<any>> -> memref<1x32xf32, #tpu.memory_space<any>>
    %c25_i32_547 = arith.constant 25 : i32
    %c0_i32_548 = arith.constant 0 : i32
    %698 = tpu.memref_slice %arg7[%c25_i32_547, %c0_i32_548] : memref<64x32xf32, #tpu.memory_space<vmem>> -> memref<1x32xf32, #tpu.memory_space<vmem>>
    %699 = tpu.memref_slice %arg11[%c0_i32_545] : memref<1x!tpu.dma_semaphore, #tpu.memory_space<semaphore_mem>> -> memref<1x!tpu.dma_semaphore, #tpu.memory_space<semaphore_mem>>
    %700 = tpu.memref_squeeze %699 : memref<1x!tpu.dma_semaphore, #tpu.memory_space<semaphore_mem>> -> memref<!tpu.dma_semaphore, #tpu.memory_space<semaphore_mem>>
    tpu.wait_dma2 semaphore(%700 : memref<!tpu.dma_semaphore, #tpu.memory_space<semaphore_mem>>) src(%697 : memref<1x32xf32, #tpu.memory_space<any>>) dst(%698 : memref<1x32xf32, #tpu.memory_space<vmem>>)
    %c0_i32_549 = arith.constant 0 : i32
    %c0_i32_550 = arith.constant 0 : i32
    %701 = tpu.memref_slice %arg4[%70, %c0_i32_550] : memref<50x32xf32, #tpu.memory_space<any>> -> memref<1x32xf32, #tpu.memory_space<any>>
    %c33_i32_551 = arith.constant 33 : i32
    %c0_i32_552 = arith.constant 0 : i32
    %702 = tpu.memref_slice %arg7[%c33_i32_551, %c0_i32_552] : memref<64x32xf32, #tpu.memory_space<vmem>> -> memref<1x32xf32, #tpu.memory_space<vmem>>
    %703 = tpu.memref_slice %arg11[%c0_i32_549] : memref<1x!tpu.dma_semaphore, #tpu.memory_space<semaphore_mem>> -> memref<1x!tpu.dma_semaphore, #tpu.memory_space<semaphore_mem>>
    %704 = tpu.memref_squeeze %703 : memref<1x!tpu.dma_semaphore, #tpu.memory_space<semaphore_mem>> -> memref<!tpu.dma_semaphore, #tpu.memory_space<semaphore_mem>>
    tpu.wait_dma2 semaphore(%704 : memref<!tpu.dma_semaphore, #tpu.memory_space<semaphore_mem>>) src(%701 : memref<1x32xf32, #tpu.memory_space<any>>) dst(%702 : memref<1x32xf32, #tpu.memory_space<vmem>>)
    %c0_i32_553 = arith.constant 0 : i32
    %c0_i32_554 = arith.constant 0 : i32
    %705 = tpu.memref_slice %arg4[%75, %c0_i32_554] : memref<50x32xf32, #tpu.memory_space<any>> -> memref<1x32xf32, #tpu.memory_space<any>>
    %c41_i32_555 = arith.constant 41 : i32
    %c0_i32_556 = arith.constant 0 : i32
    %706 = tpu.memref_slice %arg7[%c41_i32_555, %c0_i32_556] : memref<64x32xf32, #tpu.memory_space<vmem>> -> memref<1x32xf32, #tpu.memory_space<vmem>>
    %707 = tpu.memref_slice %arg11[%c0_i32_553] : memref<1x!tpu.dma_semaphore, #tpu.memory_space<semaphore_mem>> -> memref<1x!tpu.dma_semaphore, #tpu.memory_space<semaphore_mem>>
    %708 = tpu.memref_squeeze %707 : memref<1x!tpu.dma_semaphore, #tpu.memory_space<semaphore_mem>> -> memref<!tpu.dma_semaphore, #tpu.memory_space<semaphore_mem>>
    tpu.wait_dma2 semaphore(%708 : memref<!tpu.dma_semaphore, #tpu.memory_space<semaphore_mem>>) src(%705 : memref<1x32xf32, #tpu.memory_space<any>>) dst(%706 : memref<1x32xf32, #tpu.memory_space<vmem>>)
    %c0_i32_557 = arith.constant 0 : i32
    %c0_i32_558 = arith.constant 0 : i32
    %709 = tpu.memref_slice %arg4[%80, %c0_i32_558] : memref<50x32xf32, #tpu.memory_space<any>> -> memref<1x32xf32, #tpu.memory_space<any>>
    %c49_i32_559 = arith.constant 49 : i32
    %c0_i32_560 = arith.constant 0 : i32
    %710 = tpu.memref_slice %arg7[%c49_i32_559, %c0_i32_560] : memref<64x32xf32, #tpu.memory_space<vmem>> -> memref<1x32xf32, #tpu.memory_space<vmem>>
    %711 = tpu.memref_slice %arg11[%c0_i32_557] : memref<1x!tpu.dma_semaphore, #tpu.memory_space<semaphore_mem>> -> memref<1x!tpu.dma_semaphore, #tpu.memory_space<semaphore_mem>>
    %712 = tpu.memref_squeeze %711 : memref<1x!tpu.dma_semaphore, #tpu.memory_space<semaphore_mem>> -> memref<!tpu.dma_semaphore, #tpu.memory_space<semaphore_mem>>
    tpu.wait_dma2 semaphore(%712 : memref<!tpu.dma_semaphore, #tpu.memory_space<semaphore_mem>>) src(%709 : memref<1x32xf32, #tpu.memory_space<any>>) dst(%710 : memref<1x32xf32, #tpu.memory_space<vmem>>)
    %c0_i32_561 = arith.constant 0 : i32
    %c0_i32_562 = arith.constant 0 : i32
    %713 = tpu.memref_slice %arg4[%85, %c0_i32_562] : memref<50x32xf32, #tpu.memory_space<any>> -> memref<1x32xf32, #tpu.memory_space<any>>
    %c57_i32_563 = arith.constant 57 : i32
    %c0_i32_564 = arith.constant 0 : i32
    %714 = tpu.memref_slice %arg7[%c57_i32_563, %c0_i32_564] : memref<64x32xf32, #tpu.memory_space<vmem>> -> memref<1x32xf32, #tpu.memory_space<vmem>>
    %715 = tpu.memref_slice %arg11[%c0_i32_561] : memref<1x!tpu.dma_semaphore, #tpu.memory_space<semaphore_mem>> -> memref<1x!tpu.dma_semaphore, #tpu.memory_space<semaphore_mem>>
    %716 = tpu.memref_squeeze %715 : memref<1x!tpu.dma_semaphore, #tpu.memory_space<semaphore_mem>> -> memref<!tpu.dma_semaphore, #tpu.memory_space<semaphore_mem>>
    tpu.wait_dma2 semaphore(%716 : memref<!tpu.dma_semaphore, #tpu.memory_space<semaphore_mem>>) src(%713 : memref<1x32xf32, #tpu.memory_space<any>>) dst(%714 : memref<1x32xf32, #tpu.memory_space<vmem>>)
    %c0_i32_565 = arith.constant 0 : i32
    %c0_i32_566 = arith.constant 0 : i32
    %717 = tpu.memref_slice %arg5[%90, %c0_i32_566] : memref<5x32xf32, #tpu.memory_space<any>> -> memref<1x32xf32, #tpu.memory_space<any>>
    %c1_i32_567 = arith.constant 1 : i32
    %c0_i32_568 = arith.constant 0 : i32
    %718 = tpu.memref_slice %arg8[%c1_i32_567, %c0_i32_568] : memref<8x32xf32, #tpu.memory_space<vmem>> -> memref<1x32xf32, #tpu.memory_space<vmem>>
    %719 = tpu.memref_slice %arg11[%c0_i32_565] : memref<1x!tpu.dma_semaphore, #tpu.memory_space<semaphore_mem>> -> memref<1x!tpu.dma_semaphore, #tpu.memory_space<semaphore_mem>>
    %720 = tpu.memref_squeeze %719 : memref<1x!tpu.dma_semaphore, #tpu.memory_space<semaphore_mem>> -> memref<!tpu.dma_semaphore, #tpu.memory_space<semaphore_mem>>
    tpu.wait_dma2 semaphore(%720 : memref<!tpu.dma_semaphore, #tpu.memory_space<semaphore_mem>>) src(%717 : memref<1x32xf32, #tpu.memory_space<any>>) dst(%718 : memref<1x32xf32, #tpu.memory_space<vmem>>)
    %c0_i32_569 = arith.constant 0 : i32
    %c0_i32_570 = arith.constant 0 : i32
    %721 = tpu.memref_slice %arg4[%95, %c0_i32_570] : memref<50x32xf32, #tpu.memory_space<any>> -> memref<1x32xf32, #tpu.memory_space<any>>
    %c2_i32_571 = arith.constant 2 : i32
    %c0_i32_572 = arith.constant 0 : i32
    %722 = tpu.memref_slice %arg7[%c2_i32_571, %c0_i32_572] : memref<64x32xf32, #tpu.memory_space<vmem>> -> memref<1x32xf32, #tpu.memory_space<vmem>>
    %723 = tpu.memref_slice %arg11[%c0_i32_569] : memref<1x!tpu.dma_semaphore, #tpu.memory_space<semaphore_mem>> -> memref<1x!tpu.dma_semaphore, #tpu.memory_space<semaphore_mem>>
    %724 = tpu.memref_squeeze %723 : memref<1x!tpu.dma_semaphore, #tpu.memory_space<semaphore_mem>> -> memref<!tpu.dma_semaphore, #tpu.memory_space<semaphore_mem>>
    tpu.wait_dma2 semaphore(%724 : memref<!tpu.dma_semaphore, #tpu.memory_space<semaphore_mem>>) src(%721 : memref<1x32xf32, #tpu.memory_space<any>>) dst(%722 : memref<1x32xf32, #tpu.memory_space<vmem>>)
    %c0_i32_573 = arith.constant 0 : i32
    %c0_i32_574 = arith.constant 0 : i32
    %725 = tpu.memref_slice %arg4[%100, %c0_i32_574] : memref<50x32xf32, #tpu.memory_space<any>> -> memref<1x32xf32, #tpu.memory_space<any>>
    %c10_i32_575 = arith.constant 10 : i32
    %c0_i32_576 = arith.constant 0 : i32
    %726 = tpu.memref_slice %arg7[%c10_i32_575, %c0_i32_576] : memref<64x32xf32, #tpu.memory_space<vmem>> -> memref<1x32xf32, #tpu.memory_space<vmem>>
    %727 = tpu.memref_slice %arg11[%c0_i32_573] : memref<1x!tpu.dma_semaphore, #tpu.memory_space<semaphore_mem>> -> memref<1x!tpu.dma_semaphore, #tpu.memory_space<semaphore_mem>>
    %728 = tpu.memref_squeeze %727 : memref<1x!tpu.dma_semaphore, #tpu.memory_space<semaphore_mem>> -> memref<!tpu.dma_semaphore, #tpu.memory_space<semaphore_mem>>
    tpu.wait_dma2 semaphore(%728 : memref<!tpu.dma_semaphore, #tpu.memory_space<semaphore_mem>>) src(%725 : memref<1x32xf32, #tpu.memory_space<any>>) dst(%726 : memref<1x32xf32, #tpu.memory_space<vmem>>)
    %c0_i32_577 = arith.constant 0 : i32
    %c0_i32_578 = arith.constant 0 : i32
    %729 = tpu.memref_slice %arg4[%105, %c0_i32_578] : memref<50x32xf32, #tpu.memory_space<any>> -> memref<1x32xf32, #tpu.memory_space<any>>
    %c18_i32_579 = arith.constant 18 : i32
    %c0_i32_580 = arith.constant 0 : i32
    %730 = tpu.memref_slice %arg7[%c18_i32_579, %c0_i32_580] : memref<64x32xf32, #tpu.memory_space<vmem>> -> memref<1x32xf32, #tpu.memory_space<vmem>>
    %731 = tpu.memref_slice %arg11[%c0_i32_577] : memref<1x!tpu.dma_semaphore, #tpu.memory_space<semaphore_mem>> -> memref<1x!tpu.dma_semaphore, #tpu.memory_space<semaphore_mem>>
    %732 = tpu.memref_squeeze %731 : memref<1x!tpu.dma_semaphore, #tpu.memory_space<semaphore_mem>> -> memref<!tpu.dma_semaphore, #tpu.memory_space<semaphore_mem>>
    tpu.wait_dma2 semaphore(%732 : memref<!tpu.dma_semaphore, #tpu.memory_space<semaphore_mem>>) src(%729 : memref<1x32xf32, #tpu.memory_space<any>>) dst(%730 : memref<1x32xf32, #tpu.memory_space<vmem>>)
    %c0_i32_581 = arith.constant 0 : i32
    %c0_i32_582 = arith.constant 0 : i32
    %733 = tpu.memref_slice %arg4[%110, %c0_i32_582] : memref<50x32xf32, #tpu.memory_space<any>> -> memref<1x32xf32, #tpu.memory_space<any>>
    %c26_i32_583 = arith.constant 26 : i32
    %c0_i32_584 = arith.constant 0 : i32
    %734 = tpu.memref_slice %arg7[%c26_i32_583, %c0_i32_584] : memref<64x32xf32, #tpu.memory_space<vmem>> -> memref<1x32xf32, #tpu.memory_space<vmem>>
    %735 = tpu.memref_slice %arg11[%c0_i32_581] : memref<1x!tpu.dma_semaphore, #tpu.memory_space<semaphore_mem>> -> memref<1x!tpu.dma_semaphore, #tpu.memory_space<semaphore_mem>>
    %736 = tpu.memref_squeeze %735 : memref<1x!tpu.dma_semaphore, #tpu.memory_space<semaphore_mem>> -> memref<!tpu.dma_semaphore, #tpu.memory_space<semaphore_mem>>
    tpu.wait_dma2 semaphore(%736 : memref<!tpu.dma_semaphore, #tpu.memory_space<semaphore_mem>>) src(%733 : memref<1x32xf32, #tpu.memory_space<any>>) dst(%734 : memref<1x32xf32, #tpu.memory_space<vmem>>)
    %c0_i32_585 = arith.constant 0 : i32
    %c0_i32_586 = arith.constant 0 : i32
    %737 = tpu.memref_slice %arg4[%115, %c0_i32_586] : memref<50x32xf32, #tpu.memory_space<any>> -> memref<1x32xf32, #tpu.memory_space<any>>
    %c34_i32_587 = arith.constant 34 : i32
    %c0_i32_588 = arith.constant 0 : i32
    %738 = tpu.memref_slice %arg7[%c34_i32_587, %c0_i32_588] : memref<64x32xf32, #tpu.memory_space<vmem>> -> memref<1x32xf32, #tpu.memory_space<vmem>>
    %739 = tpu.memref_slice %arg11[%c0_i32_585] : memref<1x!tpu.dma_semaphore, #tpu.memory_space<semaphore_mem>> -> memref<1x!tpu.dma_semaphore, #tpu.memory_space<semaphore_mem>>
    %740 = tpu.memref_squeeze %739 : memref<1x!tpu.dma_semaphore, #tpu.memory_space<semaphore_mem>> -> memref<!tpu.dma_semaphore, #tpu.memory_space<semaphore_mem>>
    tpu.wait_dma2 semaphore(%740 : memref<!tpu.dma_semaphore, #tpu.memory_space<semaphore_mem>>) src(%737 : memref<1x32xf32, #tpu.memory_space<any>>) dst(%738 : memref<1x32xf32, #tpu.memory_space<vmem>>)
    %c0_i32_589 = arith.constant 0 : i32
    %c0_i32_590 = arith.constant 0 : i32
    %741 = tpu.memref_slice %arg4[%120, %c0_i32_590] : memref<50x32xf32, #tpu.memory_space<any>> -> memref<1x32xf32, #tpu.memory_space<any>>
    %c42_i32_591 = arith.constant 42 : i32
    %c0_i32_592 = arith.constant 0 : i32
    %742 = tpu.memref_slice %arg7[%c42_i32_591, %c0_i32_592] : memref<64x32xf32, #tpu.memory_space<vmem>> -> memref<1x32xf32, #tpu.memory_space<vmem>>
    %743 = tpu.memref_slice %arg11[%c0_i32_589] : memref<1x!tpu.dma_semaphore, #tpu.memory_space<semaphore_mem>> -> memref<1x!tpu.dma_semaphore, #tpu.memory_space<semaphore_mem>>
    %744 = tpu.memref_squeeze %743 : memref<1x!tpu.dma_semaphore, #tpu.memory_space<semaphore_mem>> -> memref<!tpu.dma_semaphore, #tpu.memory_space<semaphore_mem>>
    tpu.wait_dma2 semaphore(%744 : memref<!tpu.dma_semaphore, #tpu.memory_space<semaphore_mem>>) src(%741 : memref<1x32xf32, #tpu.memory_space<any>>) dst(%742 : memref<1x32xf32, #tpu.memory_space<vmem>>)
    %c0_i32_593 = arith.constant 0 : i32
    %c0_i32_594 = arith.constant 0 : i32
    %745 = tpu.memref_slice %arg4[%125, %c0_i32_594] : memref<50x32xf32, #tpu.memory_space<any>> -> memref<1x32xf32, #tpu.memory_space<any>>
    %c50_i32_595 = arith.constant 50 : i32
    %c0_i32_596 = arith.constant 0 : i32
    %746 = tpu.memref_slice %arg7[%c50_i32_595, %c0_i32_596] : memref<64x32xf32, #tpu.memory_space<vmem>> -> memref<1x32xf32, #tpu.memory_space<vmem>>
    %747 = tpu.memref_slice %arg11[%c0_i32_593] : memref<1x!tpu.dma_semaphore, #tpu.memory_space<semaphore_mem>> -> memref<1x!tpu.dma_semaphore, #tpu.memory_space<semaphore_mem>>
    %748 = tpu.memref_squeeze %747 : memref<1x!tpu.dma_semaphore, #tpu.memory_space<semaphore_mem>> -> memref<!tpu.dma_semaphore, #tpu.memory_space<semaphore_mem>>
    tpu.wait_dma2 semaphore(%748 : memref<!tpu.dma_semaphore, #tpu.memory_space<semaphore_mem>>) src(%745 : memref<1x32xf32, #tpu.memory_space<any>>) dst(%746 : memref<1x32xf32, #tpu.memory_space<vmem>>)
    %c0_i32_597 = arith.constant 0 : i32
    %c0_i32_598 = arith.constant 0 : i32
    %749 = tpu.memref_slice %arg4[%130, %c0_i32_598] : memref<50x32xf32, #tpu.memory_space<any>> -> memref<1x32xf32, #tpu.memory_space<any>>
    %c58_i32_599 = arith.constant 58 : i32
    %c0_i32_600 = arith.constant 0 : i32
    %750 = tpu.memref_slice %arg7[%c58_i32_599, %c0_i32_600] : memref<64x32xf32, #tpu.memory_space<vmem>> -> memref<1x32xf32, #tpu.memory_space<vmem>>
    %751 = tpu.memref_slice %arg11[%c0_i32_597] : memref<1x!tpu.dma_semaphore, #tpu.memory_space<semaphore_mem>> -> memref<1x!tpu.dma_semaphore, #tpu.memory_space<semaphore_mem>>
    %752 = tpu.memref_squeeze %751 : memref<1x!tpu.dma_semaphore, #tpu.memory_space<semaphore_mem>> -> memref<!tpu.dma_semaphore, #tpu.memory_space<semaphore_mem>>
    tpu.wait_dma2 semaphore(%752 : memref<!tpu.dma_semaphore, #tpu.memory_space<semaphore_mem>>) src(%749 : memref<1x32xf32, #tpu.memory_space<any>>) dst(%750 : memref<1x32xf32, #tpu.memory_space<vmem>>)
    %c0_i32_601 = arith.constant 0 : i32
    %c0_i32_602 = arith.constant 0 : i32
    %753 = tpu.memref_slice %arg5[%135, %c0_i32_602] : memref<5x32xf32, #tpu.memory_space<any>> -> memref<1x32xf32, #tpu.memory_space<any>>
    %c2_i32_603 = arith.constant 2 : i32
    %c0_i32_604 = arith.constant 0 : i32
    %754 = tpu.memref_slice %arg8[%c2_i32_603, %c0_i32_604] : memref<8x32xf32, #tpu.memory_space<vmem>> -> memref<1x32xf32, #tpu.memory_space<vmem>>
    %755 = tpu.memref_slice %arg11[%c0_i32_601] : memref<1x!tpu.dma_semaphore, #tpu.memory_space<semaphore_mem>> -> memref<1x!tpu.dma_semaphore, #tpu.memory_space<semaphore_mem>>
    %756 = tpu.memref_squeeze %755 : memref<1x!tpu.dma_semaphore, #tpu.memory_space<semaphore_mem>> -> memref<!tpu.dma_semaphore, #tpu.memory_space<semaphore_mem>>
    tpu.wait_dma2 semaphore(%756 : memref<!tpu.dma_semaphore, #tpu.memory_space<semaphore_mem>>) src(%753 : memref<1x32xf32, #tpu.memory_space<any>>) dst(%754 : memref<1x32xf32, #tpu.memory_space<vmem>>)
    %c0_i32_605 = arith.constant 0 : i32
    %c0_i32_606 = arith.constant 0 : i32
    %757 = tpu.memref_slice %arg4[%140, %c0_i32_606] : memref<50x32xf32, #tpu.memory_space<any>> -> memref<1x32xf32, #tpu.memory_space<any>>
    %c3_i32_607 = arith.constant 3 : i32
    %c0_i32_608 = arith.constant 0 : i32
    %758 = tpu.memref_slice %arg7[%c3_i32_607, %c0_i32_608] : memref<64x32xf32, #tpu.memory_space<vmem>> -> memref<1x32xf32, #tpu.memory_space<vmem>>
    %759 = tpu.memref_slice %arg11[%c0_i32_605] : memref<1x!tpu.dma_semaphore, #tpu.memory_space<semaphore_mem>> -> memref<1x!tpu.dma_semaphore, #tpu.memory_space<semaphore_mem>>
    %760 = tpu.memref_squeeze %759 : memref<1x!tpu.dma_semaphore, #tpu.memory_space<semaphore_mem>> -> memref<!tpu.dma_semaphore, #tpu.memory_space<semaphore_mem>>
    tpu.wait_dma2 semaphore(%760 : memref<!tpu.dma_semaphore, #tpu.memory_space<semaphore_mem>>) src(%757 : memref<1x32xf32, #tpu.memory_space<any>>) dst(%758 : memref<1x32xf32, #tpu.memory_space<vmem>>)
    %c0_i32_609 = arith.constant 0 : i32
    %c0_i32_610 = arith.constant 0 : i32
    %761 = tpu.memref_slice %arg4[%145, %c0_i32_610] : memref<50x32xf32, #tpu.memory_space<any>> -> memref<1x32xf32, #tpu.memory_space<any>>
    %c11_i32_611 = arith.constant 11 : i32
    %c0_i32_612 = arith.constant 0 : i32
    %762 = tpu.memref_slice %arg7[%c11_i32_611, %c0_i32_612] : memref<64x32xf32, #tpu.memory_space<vmem>> -> memref<1x32xf32, #tpu.memory_space<vmem>>
    %763 = tpu.memref_slice %arg11[%c0_i32_609] : memref<1x!tpu.dma_semaphore, #tpu.memory_space<semaphore_mem>> -> memref<1x!tpu.dma_semaphore, #tpu.memory_space<semaphore_mem>>
    %764 = tpu.memref_squeeze %763 : memref<1x!tpu.dma_semaphore, #tpu.memory_space<semaphore_mem>> -> memref<!tpu.dma_semaphore, #tpu.memory_space<semaphore_mem>>
    tpu.wait_dma2 semaphore(%764 : memref<!tpu.dma_semaphore, #tpu.memory_space<semaphore_mem>>) src(%761 : memref<1x32xf32, #tpu.memory_space<any>>) dst(%762 : memref<1x32xf32, #tpu.memory_space<vmem>>)
    %c0_i32_613 = arith.constant 0 : i32
    %c0_i32_614 = arith.constant 0 : i32
    %765 = tpu.memref_slice %arg4[%150, %c0_i32_614] : memref<50x32xf32, #tpu.memory_space<any>> -> memref<1x32xf32, #tpu.memory_space<any>>
    %c19_i32_615 = arith.constant 19 : i32
    %c0_i32_616 = arith.constant 0 : i32
    %766 = tpu.memref_slice %arg7[%c19_i32_615, %c0_i32_616] : memref<64x32xf32, #tpu.memory_space<vmem>> -> memref<1x32xf32, #tpu.memory_space<vmem>>
    %767 = tpu.memref_slice %arg11[%c0_i32_613] : memref<1x!tpu.dma_semaphore, #tpu.memory_space<semaphore_mem>> -> memref<1x!tpu.dma_semaphore, #tpu.memory_space<semaphore_mem>>
    %768 = tpu.memref_squeeze %767 : memref<1x!tpu.dma_semaphore, #tpu.memory_space<semaphore_mem>> -> memref<!tpu.dma_semaphore, #tpu.memory_space<semaphore_mem>>
    tpu.wait_dma2 semaphore(%768 : memref<!tpu.dma_semaphore, #tpu.memory_space<semaphore_mem>>) src(%765 : memref<1x32xf32, #tpu.memory_space<any>>) dst(%766 : memref<1x32xf32, #tpu.memory_space<vmem>>)
    %c0_i32_617 = arith.constant 0 : i32
    %c0_i32_618 = arith.constant 0 : i32
    %769 = tpu.memref_slice %arg4[%155, %c0_i32_618] : memref<50x32xf32, #tpu.memory_space<any>> -> memref<1x32xf32, #tpu.memory_space<any>>
    %c27_i32_619 = arith.constant 27 : i32
    %c0_i32_620 = arith.constant 0 : i32
    %770 = tpu.memref_slice %arg7[%c27_i32_619, %c0_i32_620] : memref<64x32xf32, #tpu.memory_space<vmem>> -> memref<1x32xf32, #tpu.memory_space<vmem>>
    %771 = tpu.memref_slice %arg11[%c0_i32_617] : memref<1x!tpu.dma_semaphore, #tpu.memory_space<semaphore_mem>> -> memref<1x!tpu.dma_semaphore, #tpu.memory_space<semaphore_mem>>
    %772 = tpu.memref_squeeze %771 : memref<1x!tpu.dma_semaphore, #tpu.memory_space<semaphore_mem>> -> memref<!tpu.dma_semaphore, #tpu.memory_space<semaphore_mem>>
    tpu.wait_dma2 semaphore(%772 : memref<!tpu.dma_semaphore, #tpu.memory_space<semaphore_mem>>) src(%769 : memref<1x32xf32, #tpu.memory_space<any>>) dst(%770 : memref<1x32xf32, #tpu.memory_space<vmem>>)
    %c0_i32_621 = arith.constant 0 : i32
    %c0_i32_622 = arith.constant 0 : i32
    %773 = tpu.memref_slice %arg4[%160, %c0_i32_622] : memref<50x32xf32, #tpu.memory_space<any>> -> memref<1x32xf32, #tpu.memory_space<any>>
    %c35_i32_623 = arith.constant 35 : i32
    %c0_i32_624 = arith.constant 0 : i32
    %774 = tpu.memref_slice %arg7[%c35_i32_623, %c0_i32_624] : memref<64x32xf32, #tpu.memory_space<vmem>> -> memref<1x32xf32, #tpu.memory_space<vmem>>
    %775 = tpu.memref_slice %arg11[%c0_i32_621] : memref<1x!tpu.dma_semaphore, #tpu.memory_space<semaphore_mem>> -> memref<1x!tpu.dma_semaphore, #tpu.memory_space<semaphore_mem>>
    %776 = tpu.memref_squeeze %775 : memref<1x!tpu.dma_semaphore, #tpu.memory_space<semaphore_mem>> -> memref<!tpu.dma_semaphore, #tpu.memory_space<semaphore_mem>>
    tpu.wait_dma2 semaphore(%776 : memref<!tpu.dma_semaphore, #tpu.memory_space<semaphore_mem>>) src(%773 : memref<1x32xf32, #tpu.memory_space<any>>) dst(%774 : memref<1x32xf32, #tpu.memory_space<vmem>>)
    %c0_i32_625 = arith.constant 0 : i32
    %c0_i32_626 = arith.constant 0 : i32
    %777 = tpu.memref_slice %arg4[%165, %c0_i32_626] : memref<50x32xf32, #tpu.memory_space<any>> -> memref<1x32xf32, #tpu.memory_space<any>>
    %c43_i32_627 = arith.constant 43 : i32
    %c0_i32_628 = arith.constant 0 : i32
    %778 = tpu.memref_slice %arg7[%c43_i32_627, %c0_i32_628] : memref<64x32xf32, #tpu.memory_space<vmem>> -> memref<1x32xf32, #tpu.memory_space<vmem>>
    %779 = tpu.memref_slice %arg11[%c0_i32_625] : memref<1x!tpu.dma_semaphore, #tpu.memory_space<semaphore_mem>> -> memref<1x!tpu.dma_semaphore, #tpu.memory_space<semaphore_mem>>
    %780 = tpu.memref_squeeze %779 : memref<1x!tpu.dma_semaphore, #tpu.memory_space<semaphore_mem>> -> memref<!tpu.dma_semaphore, #tpu.memory_space<semaphore_mem>>
    tpu.wait_dma2 semaphore(%780 : memref<!tpu.dma_semaphore, #tpu.memory_space<semaphore_mem>>) src(%777 : memref<1x32xf32, #tpu.memory_space<any>>) dst(%778 : memref<1x32xf32, #tpu.memory_space<vmem>>)
    %c0_i32_629 = arith.constant 0 : i32
    %c0_i32_630 = arith.constant 0 : i32
    %781 = tpu.memref_slice %arg4[%170, %c0_i32_630] : memref<50x32xf32, #tpu.memory_space<any>> -> memref<1x32xf32, #tpu.memory_space<any>>
    %c51_i32_631 = arith.constant 51 : i32
    %c0_i32_632 = arith.constant 0 : i32
    %782 = tpu.memref_slice %arg7[%c51_i32_631, %c0_i32_632] : memref<64x32xf32, #tpu.memory_space<vmem>> -> memref<1x32xf32, #tpu.memory_space<vmem>>
    %783 = tpu.memref_slice %arg11[%c0_i32_629] : memref<1x!tpu.dma_semaphore, #tpu.memory_space<semaphore_mem>> -> memref<1x!tpu.dma_semaphore, #tpu.memory_space<semaphore_mem>>
    %784 = tpu.memref_squeeze %783 : memref<1x!tpu.dma_semaphore, #tpu.memory_space<semaphore_mem>> -> memref<!tpu.dma_semaphore, #tpu.memory_space<semaphore_mem>>
    tpu.wait_dma2 semaphore(%784 : memref<!tpu.dma_semaphore, #tpu.memory_space<semaphore_mem>>) src(%781 : memref<1x32xf32, #tpu.memory_space<any>>) dst(%782 : memref<1x32xf32, #tpu.memory_space<vmem>>)
    %c0_i32_633 = arith.constant 0 : i32
    %c0_i32_634 = arith.constant 0 : i32
    %785 = tpu.memref_slice %arg4[%175, %c0_i32_634] : memref<50x32xf32, #tpu.memory_space<any>> -> memref<1x32xf32, #tpu.memory_space<any>>
    %c59_i32_635 = arith.constant 59 : i32
    %c0_i32_636 = arith.constant 0 : i32
    %786 = tpu.memref_slice %arg7[%c59_i32_635, %c0_i32_636] : memref<64x32xf32, #tpu.memory_space<vmem>> -> memref<1x32xf32, #tpu.memory_space<vmem>>
    %787 = tpu.memref_slice %arg11[%c0_i32_633] : memref<1x!tpu.dma_semaphore, #tpu.memory_space<semaphore_mem>> -> memref<1x!tpu.dma_semaphore, #tpu.memory_space<semaphore_mem>>
    %788 = tpu.memref_squeeze %787 : memref<1x!tpu.dma_semaphore, #tpu.memory_space<semaphore_mem>> -> memref<!tpu.dma_semaphore, #tpu.memory_space<semaphore_mem>>
    tpu.wait_dma2 semaphore(%788 : memref<!tpu.dma_semaphore, #tpu.memory_space<semaphore_mem>>) src(%785 : memref<1x32xf32, #tpu.memory_space<any>>) dst(%786 : memref<1x32xf32, #tpu.memory_space<vmem>>)
    %c0_i32_637 = arith.constant 0 : i32
    %c0_i32_638 = arith.constant 0 : i32
    %789 = tpu.memref_slice %arg5[%180, %c0_i32_638] : memref<5x32xf32, #tpu.memory_space<any>> -> memref<1x32xf32, #tpu.memory_space<any>>
    %c3_i32_639 = arith.constant 3 : i32
    %c0_i32_640 = arith.constant 0 : i32
    %790 = tpu.memref_slice %arg8[%c3_i32_639, %c0_i32_640] : memref<8x32xf32, #tpu.memory_space<vmem>> -> memref<1x32xf32, #tpu.memory_space<vmem>>
    %791 = tpu.memref_slice %arg11[%c0_i32_637] : memref<1x!tpu.dma_semaphore, #tpu.memory_space<semaphore_mem>> -> memref<1x!tpu.dma_semaphore, #tpu.memory_space<semaphore_mem>>
    %792 = tpu.memref_squeeze %791 : memref<1x!tpu.dma_semaphore, #tpu.memory_space<semaphore_mem>> -> memref<!tpu.dma_semaphore, #tpu.memory_space<semaphore_mem>>
    tpu.wait_dma2 semaphore(%792 : memref<!tpu.dma_semaphore, #tpu.memory_space<semaphore_mem>>) src(%789 : memref<1x32xf32, #tpu.memory_space<any>>) dst(%790 : memref<1x32xf32, #tpu.memory_space<vmem>>)
    %c0_i32_641 = arith.constant 0 : i32
    %c0_i32_642 = arith.constant 0 : i32
    %793 = tpu.memref_slice %arg4[%185, %c0_i32_642] : memref<50x32xf32, #tpu.memory_space<any>> -> memref<1x32xf32, #tpu.memory_space<any>>
    %c4_i32_643 = arith.constant 4 : i32
    %c0_i32_644 = arith.constant 0 : i32
    %794 = tpu.memref_slice %arg7[%c4_i32_643, %c0_i32_644] : memref<64x32xf32, #tpu.memory_space<vmem>> -> memref<1x32xf32, #tpu.memory_space<vmem>>
    %795 = tpu.memref_slice %arg11[%c0_i32_641] : memref<1x!tpu.dma_semaphore, #tpu.memory_space<semaphore_mem>> -> memref<1x!tpu.dma_semaphore, #tpu.memory_space<semaphore_mem>>
    %796 = tpu.memref_squeeze %795 : memref<1x!tpu.dma_semaphore, #tpu.memory_space<semaphore_mem>> -> memref<!tpu.dma_semaphore, #tpu.memory_space<semaphore_mem>>
    tpu.wait_dma2 semaphore(%796 : memref<!tpu.dma_semaphore, #tpu.memory_space<semaphore_mem>>) src(%793 : memref<1x32xf32, #tpu.memory_space<any>>) dst(%794 : memref<1x32xf32, #tpu.memory_space<vmem>>)
    %c0_i32_645 = arith.constant 0 : i32
    %c0_i32_646 = arith.constant 0 : i32
    %797 = tpu.memref_slice %arg4[%190, %c0_i32_646] : memref<50x32xf32, #tpu.memory_space<any>> -> memref<1x32xf32, #tpu.memory_space<any>>
    %c12_i32_647 = arith.constant 12 : i32
    %c0_i32_648 = arith.constant 0 : i32
    %798 = tpu.memref_slice %arg7[%c12_i32_647, %c0_i32_648] : memref<64x32xf32, #tpu.memory_space<vmem>> -> memref<1x32xf32, #tpu.memory_space<vmem>>
    %799 = tpu.memref_slice %arg11[%c0_i32_645] : memref<1x!tpu.dma_semaphore, #tpu.memory_space<semaphore_mem>> -> memref<1x!tpu.dma_semaphore, #tpu.memory_space<semaphore_mem>>
    %800 = tpu.memref_squeeze %799 : memref<1x!tpu.dma_semaphore, #tpu.memory_space<semaphore_mem>> -> memref<!tpu.dma_semaphore, #tpu.memory_space<semaphore_mem>>
    tpu.wait_dma2 semaphore(%800 : memref<!tpu.dma_semaphore, #tpu.memory_space<semaphore_mem>>) src(%797 : memref<1x32xf32, #tpu.memory_space<any>>) dst(%798 : memref<1x32xf32, #tpu.memory_space<vmem>>)
    %c0_i32_649 = arith.constant 0 : i32
    %c0_i32_650 = arith.constant 0 : i32
    %801 = tpu.memref_slice %arg4[%195, %c0_i32_650] : memref<50x32xf32, #tpu.memory_space<any>> -> memref<1x32xf32, #tpu.memory_space<any>>
    %c20_i32_651 = arith.constant 20 : i32
    %c0_i32_652 = arith.constant 0 : i32
    %802 = tpu.memref_slice %arg7[%c20_i32_651, %c0_i32_652] : memref<64x32xf32, #tpu.memory_space<vmem>> -> memref<1x32xf32, #tpu.memory_space<vmem>>
    %803 = tpu.memref_slice %arg11[%c0_i32_649] : memref<1x!tpu.dma_semaphore, #tpu.memory_space<semaphore_mem>> -> memref<1x!tpu.dma_semaphore, #tpu.memory_space<semaphore_mem>>
    %804 = tpu.memref_squeeze %803 : memref<1x!tpu.dma_semaphore, #tpu.memory_space<semaphore_mem>> -> memref<!tpu.dma_semaphore, #tpu.memory_space<semaphore_mem>>
    tpu.wait_dma2 semaphore(%804 : memref<!tpu.dma_semaphore, #tpu.memory_space<semaphore_mem>>) src(%801 : memref<1x32xf32, #tpu.memory_space<any>>) dst(%802 : memref<1x32xf32, #tpu.memory_space<vmem>>)
    %c0_i32_653 = arith.constant 0 : i32
    %c0_i32_654 = arith.constant 0 : i32
    %805 = tpu.memref_slice %arg4[%200, %c0_i32_654] : memref<50x32xf32, #tpu.memory_space<any>> -> memref<1x32xf32, #tpu.memory_space<any>>
    %c28_i32_655 = arith.constant 28 : i32
    %c0_i32_656 = arith.constant 0 : i32
    %806 = tpu.memref_slice %arg7[%c28_i32_655, %c0_i32_656] : memref<64x32xf32, #tpu.memory_space<vmem>> -> memref<1x32xf32, #tpu.memory_space<vmem>>
    %807 = tpu.memref_slice %arg11[%c0_i32_653] : memref<1x!tpu.dma_semaphore, #tpu.memory_space<semaphore_mem>> -> memref<1x!tpu.dma_semaphore, #tpu.memory_space<semaphore_mem>>
    %808 = tpu.memref_squeeze %807 : memref<1x!tpu.dma_semaphore, #tpu.memory_space<semaphore_mem>> -> memref<!tpu.dma_semaphore, #tpu.memory_space<semaphore_mem>>
    tpu.wait_dma2 semaphore(%808 : memref<!tpu.dma_semaphore, #tpu.memory_space<semaphore_mem>>) src(%805 : memref<1x32xf32, #tpu.memory_space<any>>) dst(%806 : memref<1x32xf32, #tpu.memory_space<vmem>>)
    %c0_i32_657 = arith.constant 0 : i32
    %c0_i32_658 = arith.constant 0 : i32
    %809 = tpu.memref_slice %arg4[%205, %c0_i32_658] : memref<50x32xf32, #tpu.memory_space<any>> -> memref<1x32xf32, #tpu.memory_space<any>>
    %c36_i32_659 = arith.constant 36 : i32
    %c0_i32_660 = arith.constant 0 : i32
    %810 = tpu.memref_slice %arg7[%c36_i32_659, %c0_i32_660] : memref<64x32xf32, #tpu.memory_space<vmem>> -> memref<1x32xf32, #tpu.memory_space<vmem>>
    %811 = tpu.memref_slice %arg11[%c0_i32_657] : memref<1x!tpu.dma_semaphore, #tpu.memory_space<semaphore_mem>> -> memref<1x!tpu.dma_semaphore, #tpu.memory_space<semaphore_mem>>
    %812 = tpu.memref_squeeze %811 : memref<1x!tpu.dma_semaphore, #tpu.memory_space<semaphore_mem>> -> memref<!tpu.dma_semaphore, #tpu.memory_space<semaphore_mem>>
    tpu.wait_dma2 semaphore(%812 : memref<!tpu.dma_semaphore, #tpu.memory_space<semaphore_mem>>) src(%809 : memref<1x32xf32, #tpu.memory_space<any>>) dst(%810 : memref<1x32xf32, #tpu.memory_space<vmem>>)
    %c0_i32_661 = arith.constant 0 : i32
    %c0_i32_662 = arith.constant 0 : i32
    %813 = tpu.memref_slice %arg4[%210, %c0_i32_662] : memref<50x32xf32, #tpu.memory_space<any>> -> memref<1x32xf32, #tpu.memory_space<any>>
    %c44_i32_663 = arith.constant 44 : i32
    %c0_i32_664 = arith.constant 0 : i32
    %814 = tpu.memref_slice %arg7[%c44_i32_663, %c0_i32_664] : memref<64x32xf32, #tpu.memory_space<vmem>> -> memref<1x32xf32, #tpu.memory_space<vmem>>
    %815 = tpu.memref_slice %arg11[%c0_i32_661] : memref<1x!tpu.dma_semaphore, #tpu.memory_space<semaphore_mem>> -> memref<1x!tpu.dma_semaphore, #tpu.memory_space<semaphore_mem>>
    %816 = tpu.memref_squeeze %815 : memref<1x!tpu.dma_semaphore, #tpu.memory_space<semaphore_mem>> -> memref<!tpu.dma_semaphore, #tpu.memory_space<semaphore_mem>>
    tpu.wait_dma2 semaphore(%816 : memref<!tpu.dma_semaphore, #tpu.memory_space<semaphore_mem>>) src(%813 : memref<1x32xf32, #tpu.memory_space<any>>) dst(%814 : memref<1x32xf32, #tpu.memory_space<vmem>>)
    %c0_i32_665 = arith.constant 0 : i32
    %c0_i32_666 = arith.constant 0 : i32
    %817 = tpu.memref_slice %arg4[%215, %c0_i32_666] : memref<50x32xf32, #tpu.memory_space<any>> -> memref<1x32xf32, #tpu.memory_space<any>>
    %c52_i32_667 = arith.constant 52 : i32
    %c0_i32_668 = arith.constant 0 : i32
    %818 = tpu.memref_slice %arg7[%c52_i32_667, %c0_i32_668] : memref<64x32xf32, #tpu.memory_space<vmem>> -> memref<1x32xf32, #tpu.memory_space<vmem>>
    %819 = tpu.memref_slice %arg11[%c0_i32_665] : memref<1x!tpu.dma_semaphore, #tpu.memory_space<semaphore_mem>> -> memref<1x!tpu.dma_semaphore, #tpu.memory_space<semaphore_mem>>
    %820 = tpu.memref_squeeze %819 : memref<1x!tpu.dma_semaphore, #tpu.memory_space<semaphore_mem>> -> memref<!tpu.dma_semaphore, #tpu.memory_space<semaphore_mem>>
    tpu.wait_dma2 semaphore(%820 : memref<!tpu.dma_semaphore, #tpu.memory_space<semaphore_mem>>) src(%817 : memref<1x32xf32, #tpu.memory_space<any>>) dst(%818 : memref<1x32xf32, #tpu.memory_space<vmem>>)
    %c0_i32_669 = arith.constant 0 : i32
    %c0_i32_670 = arith.constant 0 : i32
    %821 = tpu.memref_slice %arg4[%220, %c0_i32_670] : memref<50x32xf32, #tpu.memory_space<any>> -> memref<1x32xf32, #tpu.memory_space<any>>
    %c60_i32_671 = arith.constant 60 : i32
    %c0_i32_672 = arith.constant 0 : i32
    %822 = tpu.memref_slice %arg7[%c60_i32_671, %c0_i32_672] : memref<64x32xf32, #tpu.memory_space<vmem>> -> memref<1x32xf32, #tpu.memory_space<vmem>>
    %823 = tpu.memref_slice %arg11[%c0_i32_669] : memref<1x!tpu.dma_semaphore, #tpu.memory_space<semaphore_mem>> -> memref<1x!tpu.dma_semaphore, #tpu.memory_space<semaphore_mem>>
    %824 = tpu.memref_squeeze %823 : memref<1x!tpu.dma_semaphore, #tpu.memory_space<semaphore_mem>> -> memref<!tpu.dma_semaphore, #tpu.memory_space<semaphore_mem>>
    tpu.wait_dma2 semaphore(%824 : memref<!tpu.dma_semaphore, #tpu.memory_space<semaphore_mem>>) src(%821 : memref<1x32xf32, #tpu.memory_space<any>>) dst(%822 : memref<1x32xf32, #tpu.memory_space<vmem>>)
    %c0_i32_673 = arith.constant 0 : i32
    %c0_i32_674 = arith.constant 0 : i32
    %825 = tpu.memref_slice %arg5[%225, %c0_i32_674] : memref<5x32xf32, #tpu.memory_space<any>> -> memref<1x32xf32, #tpu.memory_space<any>>
    %c4_i32_675 = arith.constant 4 : i32
    %c0_i32_676 = arith.constant 0 : i32
    %826 = tpu.memref_slice %arg8[%c4_i32_675, %c0_i32_676] : memref<8x32xf32, #tpu.memory_space<vmem>> -> memref<1x32xf32, #tpu.memory_space<vmem>>
    %827 = tpu.memref_slice %arg11[%c0_i32_673] : memref<1x!tpu.dma_semaphore, #tpu.memory_space<semaphore_mem>> -> memref<1x!tpu.dma_semaphore, #tpu.memory_space<semaphore_mem>>
    %828 = tpu.memref_squeeze %827 : memref<1x!tpu.dma_semaphore, #tpu.memory_space<semaphore_mem>> -> memref<!tpu.dma_semaphore, #tpu.memory_space<semaphore_mem>>
    tpu.wait_dma2 semaphore(%828 : memref<!tpu.dma_semaphore, #tpu.memory_space<semaphore_mem>>) src(%825 : memref<1x32xf32, #tpu.memory_space<any>>) dst(%826 : memref<1x32xf32, #tpu.memory_space<vmem>>)
    %c0_i32_677 = arith.constant 0 : i32
    %c0_i32_678 = arith.constant 0 : i32
    %829 = tpu.memref_slice %arg4[%230, %c0_i32_678] : memref<50x32xf32, #tpu.memory_space<any>> -> memref<1x32xf32, #tpu.memory_space<any>>
    %c5_i32_679 = arith.constant 5 : i32
    %c0_i32_680 = arith.constant 0 : i32
    %830 = tpu.memref_slice %arg7[%c5_i32_679, %c0_i32_680] : memref<64x32xf32, #tpu.memory_space<vmem>> -> memref<1x32xf32, #tpu.memory_space<vmem>>
    %831 = tpu.memref_slice %arg11[%c0_i32_677] : memref<1x!tpu.dma_semaphore, #tpu.memory_space<semaphore_mem>> -> memref<1x!tpu.dma_semaphore, #tpu.memory_space<semaphore_mem>>
    %832 = tpu.memref_squeeze %831 : memref<1x!tpu.dma_semaphore, #tpu.memory_space<semaphore_mem>> -> memref<!tpu.dma_semaphore, #tpu.memory_space<semaphore_mem>>
    tpu.wait_dma2 semaphore(%832 : memref<!tpu.dma_semaphore, #tpu.memory_space<semaphore_mem>>) src(%829 : memref<1x32xf32, #tpu.memory_space<any>>) dst(%830 : memref<1x32xf32, #tpu.memory_space<vmem>>)
    %c0_i32_681 = arith.constant 0 : i32
    %c0_i32_682 = arith.constant 0 : i32
    %833 = tpu.memref_slice %arg4[%235, %c0_i32_682] : memref<50x32xf32, #tpu.memory_space<any>> -> memref<1x32xf32, #tpu.memory_space<any>>
    %c13_i32_683 = arith.constant 13 : i32
    %c0_i32_684 = arith.constant 0 : i32
    %834 = tpu.memref_slice %arg7[%c13_i32_683, %c0_i32_684] : memref<64x32xf32, #tpu.memory_space<vmem>> -> memref<1x32xf32, #tpu.memory_space<vmem>>
    %835 = tpu.memref_slice %arg11[%c0_i32_681] : memref<1x!tpu.dma_semaphore, #tpu.memory_space<semaphore_mem>> -> memref<1x!tpu.dma_semaphore, #tpu.memory_space<semaphore_mem>>
    %836 = tpu.memref_squeeze %835 : memref<1x!tpu.dma_semaphore, #tpu.memory_space<semaphore_mem>> -> memref<!tpu.dma_semaphore, #tpu.memory_space<semaphore_mem>>
    tpu.wait_dma2 semaphore(%836 : memref<!tpu.dma_semaphore, #tpu.memory_space<semaphore_mem>>) src(%833 : memref<1x32xf32, #tpu.memory_space<any>>) dst(%834 : memref<1x32xf32, #tpu.memory_space<vmem>>)
    %c0_i32_685 = arith.constant 0 : i32
    %c0_i32_686 = arith.constant 0 : i32
    %837 = tpu.memref_slice %arg4[%240, %c0_i32_686] : memref<50x32xf32, #tpu.memory_space<any>> -> memref<1x32xf32, #tpu.memory_space<any>>
    %c21_i32_687 = arith.constant 21 : i32
    %c0_i32_688 = arith.constant 0 : i32
    %838 = tpu.memref_slice %arg7[%c21_i32_687, %c0_i32_688] : memref<64x32xf32, #tpu.memory_space<vmem>> -> memref<1x32xf32, #tpu.memory_space<vmem>>
    %839 = tpu.memref_slice %arg11[%c0_i32_685] : memref<1x!tpu.dma_semaphore, #tpu.memory_space<semaphore_mem>> -> memref<1x!tpu.dma_semaphore, #tpu.memory_space<semaphore_mem>>
    %840 = tpu.memref_squeeze %839 : memref<1x!tpu.dma_semaphore, #tpu.memory_space<semaphore_mem>> -> memref<!tpu.dma_semaphore, #tpu.memory_space<semaphore_mem>>
    tpu.wait_dma2 semaphore(%840 : memref<!tpu.dma_semaphore, #tpu.memory_space<semaphore_mem>>) src(%837 : memref<1x32xf32, #tpu.memory_space<any>>) dst(%838 : memref<1x32xf32, #tpu.memory_space<vmem>>)
    %c0_i32_689 = arith.constant 0 : i32
    %c0_i32_690 = arith.constant 0 : i32
    %841 = tpu.memref_slice %arg4[%245, %c0_i32_690] : memref<50x32xf32, #tpu.memory_space<any>> -> memref<1x32xf32, #tpu.memory_space<any>>
    %c29_i32_691 = arith.constant 29 : i32
    %c0_i32_692 = arith.constant 0 : i32
    %842 = tpu.memref_slice %arg7[%c29_i32_691, %c0_i32_692] : memref<64x32xf32, #tpu.memory_space<vmem>> -> memref<1x32xf32, #tpu.memory_space<vmem>>
    %843 = tpu.memref_slice %arg11[%c0_i32_689] : memref<1x!tpu.dma_semaphore, #tpu.memory_space<semaphore_mem>> -> memref<1x!tpu.dma_semaphore, #tpu.memory_space<semaphore_mem>>
    %844 = tpu.memref_squeeze %843 : memref<1x!tpu.dma_semaphore, #tpu.memory_space<semaphore_mem>> -> memref<!tpu.dma_semaphore, #tpu.memory_space<semaphore_mem>>
    tpu.wait_dma2 semaphore(%844 : memref<!tpu.dma_semaphore, #tpu.memory_space<semaphore_mem>>) src(%841 : memref<1x32xf32, #tpu.memory_space<any>>) dst(%842 : memref<1x32xf32, #tpu.memory_space<vmem>>)
    %c0_i32_693 = arith.constant 0 : i32
    %c0_i32_694 = arith.constant 0 : i32
    %845 = tpu.memref_slice %arg4[%250, %c0_i32_694] : memref<50x32xf32, #tpu.memory_space<any>> -> memref<1x32xf32, #tpu.memory_space<any>>
    %c37_i32_695 = arith.constant 37 : i32
    %c0_i32_696 = arith.constant 0 : i32
    %846 = tpu.memref_slice %arg7[%c37_i32_695, %c0_i32_696] : memref<64x32xf32, #tpu.memory_space<vmem>> -> memref<1x32xf32, #tpu.memory_space<vmem>>
    %847 = tpu.memref_slice %arg11[%c0_i32_693] : memref<1x!tpu.dma_semaphore, #tpu.memory_space<semaphore_mem>> -> memref<1x!tpu.dma_semaphore, #tpu.memory_space<semaphore_mem>>
    %848 = tpu.memref_squeeze %847 : memref<1x!tpu.dma_semaphore, #tpu.memory_space<semaphore_mem>> -> memref<!tpu.dma_semaphore, #tpu.memory_space<semaphore_mem>>
    tpu.wait_dma2 semaphore(%848 : memref<!tpu.dma_semaphore, #tpu.memory_space<semaphore_mem>>) src(%845 : memref<1x32xf32, #tpu.memory_space<any>>) dst(%846 : memref<1x32xf32, #tpu.memory_space<vmem>>)
    %c0_i32_697 = arith.constant 0 : i32
    %c0_i32_698 = arith.constant 0 : i32
    %849 = tpu.memref_slice %arg4[%255, %c0_i32_698] : memref<50x32xf32, #tpu.memory_space<any>> -> memref<1x32xf32, #tpu.memory_space<any>>
    %c45_i32_699 = arith.constant 45 : i32
    %c0_i32_700 = arith.constant 0 : i32
    %850 = tpu.memref_slice %arg7[%c45_i32_699, %c0_i32_700] : memref<64x32xf32, #tpu.memory_space<vmem>> -> memref<1x32xf32, #tpu.memory_space<vmem>>
    %851 = tpu.memref_slice %arg11[%c0_i32_697] : memref<1x!tpu.dma_semaphore, #tpu.memory_space<semaphore_mem>> -> memref<1x!tpu.dma_semaphore, #tpu.memory_space<semaphore_mem>>
    %852 = tpu.memref_squeeze %851 : memref<1x!tpu.dma_semaphore, #tpu.memory_space<semaphore_mem>> -> memref<!tpu.dma_semaphore, #tpu.memory_space<semaphore_mem>>
    tpu.wait_dma2 semaphore(%852 : memref<!tpu.dma_semaphore, #tpu.memory_space<semaphore_mem>>) src(%849 : memref<1x32xf32, #tpu.memory_space<any>>) dst(%850 : memref<1x32xf32, #tpu.memory_space<vmem>>)
    %c0_i32_701 = arith.constant 0 : i32
    %c0_i32_702 = arith.constant 0 : i32
    %853 = tpu.memref_slice %arg4[%260, %c0_i32_702] : memref<50x32xf32, #tpu.memory_space<any>> -> memref<1x32xf32, #tpu.memory_space<any>>
    %c53_i32_703 = arith.constant 53 : i32
    %c0_i32_704 = arith.constant 0 : i32
    %854 = tpu.memref_slice %arg7[%c53_i32_703, %c0_i32_704] : memref<64x32xf32, #tpu.memory_space<vmem>> -> memref<1x32xf32, #tpu.memory_space<vmem>>
    %855 = tpu.memref_slice %arg11[%c0_i32_701] : memref<1x!tpu.dma_semaphore, #tpu.memory_space<semaphore_mem>> -> memref<1x!tpu.dma_semaphore, #tpu.memory_space<semaphore_mem>>
    %856 = tpu.memref_squeeze %855 : memref<1x!tpu.dma_semaphore, #tpu.memory_space<semaphore_mem>> -> memref<!tpu.dma_semaphore, #tpu.memory_space<semaphore_mem>>
    tpu.wait_dma2 semaphore(%856 : memref<!tpu.dma_semaphore, #tpu.memory_space<semaphore_mem>>) src(%853 : memref<1x32xf32, #tpu.memory_space<any>>) dst(%854 : memref<1x32xf32, #tpu.memory_space<vmem>>)
    %c0_i32_705 = arith.constant 0 : i32
    %c0_i32_706 = arith.constant 0 : i32
    %857 = tpu.memref_slice %arg4[%265, %c0_i32_706] : memref<50x32xf32, #tpu.memory_space<any>> -> memref<1x32xf32, #tpu.memory_space<any>>
    %c61_i32_707 = arith.constant 61 : i32
    %c0_i32_708 = arith.constant 0 : i32
    %858 = tpu.memref_slice %arg7[%c61_i32_707, %c0_i32_708] : memref<64x32xf32, #tpu.memory_space<vmem>> -> memref<1x32xf32, #tpu.memory_space<vmem>>
    %859 = tpu.memref_slice %arg11[%c0_i32_705] : memref<1x!tpu.dma_semaphore, #tpu.memory_space<semaphore_mem>> -> memref<1x!tpu.dma_semaphore, #tpu.memory_space<semaphore_mem>>
    %860 = tpu.memref_squeeze %859 : memref<1x!tpu.dma_semaphore, #tpu.memory_space<semaphore_mem>> -> memref<!tpu.dma_semaphore, #tpu.memory_space<semaphore_mem>>
    tpu.wait_dma2 semaphore(%860 : memref<!tpu.dma_semaphore, #tpu.memory_space<semaphore_mem>>) src(%857 : memref<1x32xf32, #tpu.memory_space<any>>) dst(%858 : memref<1x32xf32, #tpu.memory_space<vmem>>)
    %c0_i32_709 = arith.constant 0 : i32
    %c0_i32_710 = arith.constant 0 : i32
    %861 = tpu.memref_slice %arg5[%270, %c0_i32_710] : memref<5x32xf32, #tpu.memory_space<any>> -> memref<1x32xf32, #tpu.memory_space<any>>
    %c5_i32_711 = arith.constant 5 : i32
    %c0_i32_712 = arith.constant 0 : i32
    %862 = tpu.memref_slice %arg8[%c5_i32_711, %c0_i32_712] : memref<8x32xf32, #tpu.memory_space<vmem>> -> memref<1x32xf32, #tpu.memory_space<vmem>>
    %863 = tpu.memref_slice %arg11[%c0_i32_709] : memref<1x!tpu.dma_semaphore, #tpu.memory_space<semaphore_mem>> -> memref<1x!tpu.dma_semaphore, #tpu.memory_space<semaphore_mem>>
    %864 = tpu.memref_squeeze %863 : memref<1x!tpu.dma_semaphore, #tpu.memory_space<semaphore_mem>> -> memref<!tpu.dma_semaphore, #tpu.memory_space<semaphore_mem>>
    tpu.wait_dma2 semaphore(%864 : memref<!tpu.dma_semaphore, #tpu.memory_space<semaphore_mem>>) src(%861 : memref<1x32xf32, #tpu.memory_space<any>>) dst(%862 : memref<1x32xf32, #tpu.memory_space<vmem>>)
    %c0_i32_713 = arith.constant 0 : i32
    %c0_i32_714 = arith.constant 0 : i32
    %865 = tpu.memref_slice %arg4[%275, %c0_i32_714] : memref<50x32xf32, #tpu.memory_space<any>> -> memref<1x32xf32, #tpu.memory_space<any>>
    %c6_i32_715 = arith.constant 6 : i32
    %c0_i32_716 = arith.constant 0 : i32
    %866 = tpu.memref_slice %arg7[%c6_i32_715, %c0_i32_716] : memref<64x32xf32, #tpu.memory_space<vmem>> -> memref<1x32xf32, #tpu.memory_space<vmem>>
    %867 = tpu.memref_slice %arg11[%c0_i32_713] : memref<1x!tpu.dma_semaphore, #tpu.memory_space<semaphore_mem>> -> memref<1x!tpu.dma_semaphore, #tpu.memory_space<semaphore_mem>>
    %868 = tpu.memref_squeeze %867 : memref<1x!tpu.dma_semaphore, #tpu.memory_space<semaphore_mem>> -> memref<!tpu.dma_semaphore, #tpu.memory_space<semaphore_mem>>
    tpu.wait_dma2 semaphore(%868 : memref<!tpu.dma_semaphore, #tpu.memory_space<semaphore_mem>>) src(%865 : memref<1x32xf32, #tpu.memory_space<any>>) dst(%866 : memref<1x32xf32, #tpu.memory_space<vmem>>)
    %c0_i32_717 = arith.constant 0 : i32
    %c0_i32_718 = arith.constant 0 : i32
    %869 = tpu.memref_slice %arg4[%280, %c0_i32_718] : memref<50x32xf32, #tpu.memory_space<any>> -> memref<1x32xf32, #tpu.memory_space<any>>
    %c14_i32_719 = arith.constant 14 : i32
    %c0_i32_720 = arith.constant 0 : i32
    %870 = tpu.memref_slice %arg7[%c14_i32_719, %c0_i32_720] : memref<64x32xf32, #tpu.memory_space<vmem>> -> memref<1x32xf32, #tpu.memory_space<vmem>>
    %871 = tpu.memref_slice %arg11[%c0_i32_717] : memref<1x!tpu.dma_semaphore, #tpu.memory_space<semaphore_mem>> -> memref<1x!tpu.dma_semaphore, #tpu.memory_space<semaphore_mem>>
    %872 = tpu.memref_squeeze %871 : memref<1x!tpu.dma_semaphore, #tpu.memory_space<semaphore_mem>> -> memref<!tpu.dma_semaphore, #tpu.memory_space<semaphore_mem>>
    tpu.wait_dma2 semaphore(%872 : memref<!tpu.dma_semaphore, #tpu.memory_space<semaphore_mem>>) src(%869 : memref<1x32xf32, #tpu.memory_space<any>>) dst(%870 : memref<1x32xf32, #tpu.memory_space<vmem>>)
    %c0_i32_721 = arith.constant 0 : i32
    %c0_i32_722 = arith.constant 0 : i32
    %873 = tpu.memref_slice %arg4[%285, %c0_i32_722] : memref<50x32xf32, #tpu.memory_space<any>> -> memref<1x32xf32, #tpu.memory_space<any>>
    %c22_i32_723 = arith.constant 22 : i32
    %c0_i32_724 = arith.constant 0 : i32
    %874 = tpu.memref_slice %arg7[%c22_i32_723, %c0_i32_724] : memref<64x32xf32, #tpu.memory_space<vmem>> -> memref<1x32xf32, #tpu.memory_space<vmem>>
    %875 = tpu.memref_slice %arg11[%c0_i32_721] : memref<1x!tpu.dma_semaphore, #tpu.memory_space<semaphore_mem>> -> memref<1x!tpu.dma_semaphore, #tpu.memory_space<semaphore_mem>>
    %876 = tpu.memref_squeeze %875 : memref<1x!tpu.dma_semaphore, #tpu.memory_space<semaphore_mem>> -> memref<!tpu.dma_semaphore, #tpu.memory_space<semaphore_mem>>
    tpu.wait_dma2 semaphore(%876 : memref<!tpu.dma_semaphore, #tpu.memory_space<semaphore_mem>>) src(%873 : memref<1x32xf32, #tpu.memory_space<any>>) dst(%874 : memref<1x32xf32, #tpu.memory_space<vmem>>)
    %c0_i32_725 = arith.constant 0 : i32
    %c0_i32_726 = arith.constant 0 : i32
    %877 = tpu.memref_slice %arg4[%290, %c0_i32_726] : memref<50x32xf32, #tpu.memory_space<any>> -> memref<1x32xf32, #tpu.memory_space<any>>
    %c30_i32_727 = arith.constant 30 : i32
    %c0_i32_728 = arith.constant 0 : i32
    %878 = tpu.memref_slice %arg7[%c30_i32_727, %c0_i32_728] : memref<64x32xf32, #tpu.memory_space<vmem>> -> memref<1x32xf32, #tpu.memory_space<vmem>>
    %879 = tpu.memref_slice %arg11[%c0_i32_725] : memref<1x!tpu.dma_semaphore, #tpu.memory_space<semaphore_mem>> -> memref<1x!tpu.dma_semaphore, #tpu.memory_space<semaphore_mem>>
    %880 = tpu.memref_squeeze %879 : memref<1x!tpu.dma_semaphore, #tpu.memory_space<semaphore_mem>> -> memref<!tpu.dma_semaphore, #tpu.memory_space<semaphore_mem>>
    tpu.wait_dma2 semaphore(%880 : memref<!tpu.dma_semaphore, #tpu.memory_space<semaphore_mem>>) src(%877 : memref<1x32xf32, #tpu.memory_space<any>>) dst(%878 : memref<1x32xf32, #tpu.memory_space<vmem>>)
    %c0_i32_729 = arith.constant 0 : i32
    %c0_i32_730 = arith.constant 0 : i32
    %881 = tpu.memref_slice %arg4[%295, %c0_i32_730] : memref<50x32xf32, #tpu.memory_space<any>> -> memref<1x32xf32, #tpu.memory_space<any>>
    %c38_i32_731 = arith.constant 38 : i32
    %c0_i32_732 = arith.constant 0 : i32
    %882 = tpu.memref_slice %arg7[%c38_i32_731, %c0_i32_732] : memref<64x32xf32, #tpu.memory_space<vmem>> -> memref<1x32xf32, #tpu.memory_space<vmem>>
    %883 = tpu.memref_slice %arg11[%c0_i32_729] : memref<1x!tpu.dma_semaphore, #tpu.memory_space<semaphore_mem>> -> memref<1x!tpu.dma_semaphore, #tpu.memory_space<semaphore_mem>>
    %884 = tpu.memref_squeeze %883 : memref<1x!tpu.dma_semaphore, #tpu.memory_space<semaphore_mem>> -> memref<!tpu.dma_semaphore, #tpu.memory_space<semaphore_mem>>
    tpu.wait_dma2 semaphore(%884 : memref<!tpu.dma_semaphore, #tpu.memory_space<semaphore_mem>>) src(%881 : memref<1x32xf32, #tpu.memory_space<any>>) dst(%882 : memref<1x32xf32, #tpu.memory_space<vmem>>)
    %c0_i32_733 = arith.constant 0 : i32
    %c0_i32_734 = arith.constant 0 : i32
    %885 = tpu.memref_slice %arg4[%300, %c0_i32_734] : memref<50x32xf32, #tpu.memory_space<any>> -> memref<1x32xf32, #tpu.memory_space<any>>
    %c46_i32_735 = arith.constant 46 : i32
    %c0_i32_736 = arith.constant 0 : i32
    %886 = tpu.memref_slice %arg7[%c46_i32_735, %c0_i32_736] : memref<64x32xf32, #tpu.memory_space<vmem>> -> memref<1x32xf32, #tpu.memory_space<vmem>>
    %887 = tpu.memref_slice %arg11[%c0_i32_733] : memref<1x!tpu.dma_semaphore, #tpu.memory_space<semaphore_mem>> -> memref<1x!tpu.dma_semaphore, #tpu.memory_space<semaphore_mem>>
    %888 = tpu.memref_squeeze %887 : memref<1x!tpu.dma_semaphore, #tpu.memory_space<semaphore_mem>> -> memref<!tpu.dma_semaphore, #tpu.memory_space<semaphore_mem>>
    tpu.wait_dma2 semaphore(%888 : memref<!tpu.dma_semaphore, #tpu.memory_space<semaphore_mem>>) src(%885 : memref<1x32xf32, #tpu.memory_space<any>>) dst(%886 : memref<1x32xf32, #tpu.memory_space<vmem>>)
    %c0_i32_737 = arith.constant 0 : i32
    %c0_i32_738 = arith.constant 0 : i32
    %889 = tpu.memref_slice %arg4[%305, %c0_i32_738] : memref<50x32xf32, #tpu.memory_space<any>> -> memref<1x32xf32, #tpu.memory_space<any>>
    %c54_i32_739 = arith.constant 54 : i32
    %c0_i32_740 = arith.constant 0 : i32
    %890 = tpu.memref_slice %arg7[%c54_i32_739, %c0_i32_740] : memref<64x32xf32, #tpu.memory_space<vmem>> -> memref<1x32xf32, #tpu.memory_space<vmem>>
    %891 = tpu.memref_slice %arg11[%c0_i32_737] : memref<1x!tpu.dma_semaphore, #tpu.memory_space<semaphore_mem>> -> memref<1x!tpu.dma_semaphore, #tpu.memory_space<semaphore_mem>>
    %892 = tpu.memref_squeeze %891 : memref<1x!tpu.dma_semaphore, #tpu.memory_space<semaphore_mem>> -> memref<!tpu.dma_semaphore, #tpu.memory_space<semaphore_mem>>
    tpu.wait_dma2 semaphore(%892 : memref<!tpu.dma_semaphore, #tpu.memory_space<semaphore_mem>>) src(%889 : memref<1x32xf32, #tpu.memory_space<any>>) dst(%890 : memref<1x32xf32, #tpu.memory_space<vmem>>)
    %c0_i32_741 = arith.constant 0 : i32
    %c0_i32_742 = arith.constant 0 : i32
    %893 = tpu.memref_slice %arg4[%310, %c0_i32_742] : memref<50x32xf32, #tpu.memory_space<any>> -> memref<1x32xf32, #tpu.memory_space<any>>
    %c62_i32_743 = arith.constant 62 : i32
    %c0_i32_744 = arith.constant 0 : i32
    %894 = tpu.memref_slice %arg7[%c62_i32_743, %c0_i32_744] : memref<64x32xf32, #tpu.memory_space<vmem>> -> memref<1x32xf32, #tpu.memory_space<vmem>>
    %895 = tpu.memref_slice %arg11[%c0_i32_741] : memref<1x!tpu.dma_semaphore, #tpu.memory_space<semaphore_mem>> -> memref<1x!tpu.dma_semaphore, #tpu.memory_space<semaphore_mem>>
    %896 = tpu.memref_squeeze %895 : memref<1x!tpu.dma_semaphore, #tpu.memory_space<semaphore_mem>> -> memref<!tpu.dma_semaphore, #tpu.memory_space<semaphore_mem>>
    tpu.wait_dma2 semaphore(%896 : memref<!tpu.dma_semaphore, #tpu.memory_space<semaphore_mem>>) src(%893 : memref<1x32xf32, #tpu.memory_space<any>>) dst(%894 : memref<1x32xf32, #tpu.memory_space<vmem>>)
    %c0_i32_745 = arith.constant 0 : i32
    %c0_i32_746 = arith.constant 0 : i32
    %897 = tpu.memref_slice %arg5[%315, %c0_i32_746] : memref<5x32xf32, #tpu.memory_space<any>> -> memref<1x32xf32, #tpu.memory_space<any>>
    %c6_i32_747 = arith.constant 6 : i32
    %c0_i32_748 = arith.constant 0 : i32
    %898 = tpu.memref_slice %arg8[%c6_i32_747, %c0_i32_748] : memref<8x32xf32, #tpu.memory_space<vmem>> -> memref<1x32xf32, #tpu.memory_space<vmem>>
    %899 = tpu.memref_slice %arg11[%c0_i32_745] : memref<1x!tpu.dma_semaphore, #tpu.memory_space<semaphore_mem>> -> memref<1x!tpu.dma_semaphore, #tpu.memory_space<semaphore_mem>>
    %900 = tpu.memref_squeeze %899 : memref<1x!tpu.dma_semaphore, #tpu.memory_space<semaphore_mem>> -> memref<!tpu.dma_semaphore, #tpu.memory_space<semaphore_mem>>
    tpu.wait_dma2 semaphore(%900 : memref<!tpu.dma_semaphore, #tpu.memory_space<semaphore_mem>>) src(%897 : memref<1x32xf32, #tpu.memory_space<any>>) dst(%898 : memref<1x32xf32, #tpu.memory_space<vmem>>)
    %c0_i32_749 = arith.constant 0 : i32
    %c0_i32_750 = arith.constant 0 : i32
    %901 = tpu.memref_slice %arg4[%320, %c0_i32_750] : memref<50x32xf32, #tpu.memory_space<any>> -> memref<1x32xf32, #tpu.memory_space<any>>
    %c7_i32_751 = arith.constant 7 : i32
    %c0_i32_752 = arith.constant 0 : i32
    %902 = tpu.memref_slice %arg7[%c7_i32_751, %c0_i32_752] : memref<64x32xf32, #tpu.memory_space<vmem>> -> memref<1x32xf32, #tpu.memory_space<vmem>>
    %903 = tpu.memref_slice %arg11[%c0_i32_749] : memref<1x!tpu.dma_semaphore, #tpu.memory_space<semaphore_mem>> -> memref<1x!tpu.dma_semaphore, #tpu.memory_space<semaphore_mem>>
    %904 = tpu.memref_squeeze %903 : memref<1x!tpu.dma_semaphore, #tpu.memory_space<semaphore_mem>> -> memref<!tpu.dma_semaphore, #tpu.memory_space<semaphore_mem>>
    tpu.wait_dma2 semaphore(%904 : memref<!tpu.dma_semaphore, #tpu.memory_space<semaphore_mem>>) src(%901 : memref<1x32xf32, #tpu.memory_space<any>>) dst(%902 : memref<1x32xf32, #tpu.memory_space<vmem>>)
    %c0_i32_753 = arith.constant 0 : i32
    %c0_i32_754 = arith.constant 0 : i32
    %905 = tpu.memref_slice %arg4[%325, %c0_i32_754] : memref<50x32xf32, #tpu.memory_space<any>> -> memref<1x32xf32, #tpu.memory_space<any>>
    %c15_i32_755 = arith.constant 15 : i32
    %c0_i32_756 = arith.constant 0 : i32
    %906 = tpu.memref_slice %arg7[%c15_i32_755, %c0_i32_756] : memref<64x32xf32, #tpu.memory_space<vmem>> -> memref<1x32xf32, #tpu.memory_space<vmem>>
    %907 = tpu.memref_slice %arg11[%c0_i32_753] : memref<1x!tpu.dma_semaphore, #tpu.memory_space<semaphore_mem>> -> memref<1x!tpu.dma_semaphore, #tpu.memory_space<semaphore_mem>>
    %908 = tpu.memref_squeeze %907 : memref<1x!tpu.dma_semaphore, #tpu.memory_space<semaphore_mem>> -> memref<!tpu.dma_semaphore, #tpu.memory_space<semaphore_mem>>
    tpu.wait_dma2 semaphore(%908 : memref<!tpu.dma_semaphore, #tpu.memory_space<semaphore_mem>>) src(%905 : memref<1x32xf32, #tpu.memory_space<any>>) dst(%906 : memref<1x32xf32, #tpu.memory_space<vmem>>)
    %c0_i32_757 = arith.constant 0 : i32
    %c0_i32_758 = arith.constant 0 : i32
    %909 = tpu.memref_slice %arg4[%330, %c0_i32_758] : memref<50x32xf32, #tpu.memory_space<any>> -> memref<1x32xf32, #tpu.memory_space<any>>
    %c23_i32_759 = arith.constant 23 : i32
    %c0_i32_760 = arith.constant 0 : i32
    %910 = tpu.memref_slice %arg7[%c23_i32_759, %c0_i32_760] : memref<64x32xf32, #tpu.memory_space<vmem>> -> memref<1x32xf32, #tpu.memory_space<vmem>>
    %911 = tpu.memref_slice %arg11[%c0_i32_757] : memref<1x!tpu.dma_semaphore, #tpu.memory_space<semaphore_mem>> -> memref<1x!tpu.dma_semaphore, #tpu.memory_space<semaphore_mem>>
    %912 = tpu.memref_squeeze %911 : memref<1x!tpu.dma_semaphore, #tpu.memory_space<semaphore_mem>> -> memref<!tpu.dma_semaphore, #tpu.memory_space<semaphore_mem>>
    tpu.wait_dma2 semaphore(%912 : memref<!tpu.dma_semaphore, #tpu.memory_space<semaphore_mem>>) src(%909 : memref<1x32xf32, #tpu.memory_space<any>>) dst(%910 : memref<1x32xf32, #tpu.memory_space<vmem>>)
    %c0_i32_761 = arith.constant 0 : i32
    %c0_i32_762 = arith.constant 0 : i32
    %913 = tpu.memref_slice %arg4[%335, %c0_i32_762] : memref<50x32xf32, #tpu.memory_space<any>> -> memref<1x32xf32, #tpu.memory_space<any>>
    %c31_i32_763 = arith.constant 31 : i32
    %c0_i32_764 = arith.constant 0 : i32
    %914 = tpu.memref_slice %arg7[%c31_i32_763, %c0_i32_764] : memref<64x32xf32, #tpu.memory_space<vmem>> -> memref<1x32xf32, #tpu.memory_space<vmem>>
    %915 = tpu.memref_slice %arg11[%c0_i32_761] : memref<1x!tpu.dma_semaphore, #tpu.memory_space<semaphore_mem>> -> memref<1x!tpu.dma_semaphore, #tpu.memory_space<semaphore_mem>>
    %916 = tpu.memref_squeeze %915 : memref<1x!tpu.dma_semaphore, #tpu.memory_space<semaphore_mem>> -> memref<!tpu.dma_semaphore, #tpu.memory_space<semaphore_mem>>
    tpu.wait_dma2 semaphore(%916 : memref<!tpu.dma_semaphore, #tpu.memory_space<semaphore_mem>>) src(%913 : memref<1x32xf32, #tpu.memory_space<any>>) dst(%914 : memref<1x32xf32, #tpu.memory_space<vmem>>)
    %c0_i32_765 = arith.constant 0 : i32
    %c0_i32_766 = arith.constant 0 : i32
    %917 = tpu.memref_slice %arg4[%340, %c0_i32_766] : memref<50x32xf32, #tpu.memory_space<any>> -> memref<1x32xf32, #tpu.memory_space<any>>
    %c39_i32_767 = arith.constant 39 : i32
    %c0_i32_768 = arith.constant 0 : i32
    %918 = tpu.memref_slice %arg7[%c39_i32_767, %c0_i32_768] : memref<64x32xf32, #tpu.memory_space<vmem>> -> memref<1x32xf32, #tpu.memory_space<vmem>>
    %919 = tpu.memref_slice %arg11[%c0_i32_765] : memref<1x!tpu.dma_semaphore, #tpu.memory_space<semaphore_mem>> -> memref<1x!tpu.dma_semaphore, #tpu.memory_space<semaphore_mem>>
    %920 = tpu.memref_squeeze %919 : memref<1x!tpu.dma_semaphore, #tpu.memory_space<semaphore_mem>> -> memref<!tpu.dma_semaphore, #tpu.memory_space<semaphore_mem>>
    tpu.wait_dma2 semaphore(%920 : memref<!tpu.dma_semaphore, #tpu.memory_space<semaphore_mem>>) src(%917 : memref<1x32xf32, #tpu.memory_space<any>>) dst(%918 : memref<1x32xf32, #tpu.memory_space<vmem>>)
    %c0_i32_769 = arith.constant 0 : i32
    %c0_i32_770 = arith.constant 0 : i32
    %921 = tpu.memref_slice %arg4[%345, %c0_i32_770] : memref<50x32xf32, #tpu.memory_space<any>> -> memref<1x32xf32, #tpu.memory_space<any>>
    %c47_i32_771 = arith.constant 47 : i32
    %c0_i32_772 = arith.constant 0 : i32
    %922 = tpu.memref_slice %arg7[%c47_i32_771, %c0_i32_772] : memref<64x32xf32, #tpu.memory_space<vmem>> -> memref<1x32xf32, #tpu.memory_space<vmem>>
    %923 = tpu.memref_slice %arg11[%c0_i32_769] : memref<1x!tpu.dma_semaphore, #tpu.memory_space<semaphore_mem>> -> memref<1x!tpu.dma_semaphore, #tpu.memory_space<semaphore_mem>>
    %924 = tpu.memref_squeeze %923 : memref<1x!tpu.dma_semaphore, #tpu.memory_space<semaphore_mem>> -> memref<!tpu.dma_semaphore, #tpu.memory_space<semaphore_mem>>
    tpu.wait_dma2 semaphore(%924 : memref<!tpu.dma_semaphore, #tpu.memory_space<semaphore_mem>>) src(%921 : memref<1x32xf32, #tpu.memory_space<any>>) dst(%922 : memref<1x32xf32, #tpu.memory_space<vmem>>)
    %c0_i32_773 = arith.constant 0 : i32
    %c0_i32_774 = arith.constant 0 : i32
    %925 = tpu.memref_slice %arg4[%350, %c0_i32_774] : memref<50x32xf32, #tpu.memory_space<any>> -> memref<1x32xf32, #tpu.memory_space<any>>
    %c55_i32_775 = arith.constant 55 : i32
    %c0_i32_776 = arith.constant 0 : i32
    %926 = tpu.memref_slice %arg7[%c55_i32_775, %c0_i32_776] : memref<64x32xf32, #tpu.memory_space<vmem>> -> memref<1x32xf32, #tpu.memory_space<vmem>>
    %927 = tpu.memref_slice %arg11[%c0_i32_773] : memref<1x!tpu.dma_semaphore, #tpu.memory_space<semaphore_mem>> -> memref<1x!tpu.dma_semaphore, #tpu.memory_space<semaphore_mem>>
    %928 = tpu.memref_squeeze %927 : memref<1x!tpu.dma_semaphore, #tpu.memory_space<semaphore_mem>> -> memref<!tpu.dma_semaphore, #tpu.memory_space<semaphore_mem>>
    tpu.wait_dma2 semaphore(%928 : memref<!tpu.dma_semaphore, #tpu.memory_space<semaphore_mem>>) src(%925 : memref<1x32xf32, #tpu.memory_space<any>>) dst(%926 : memref<1x32xf32, #tpu.memory_space<vmem>>)
    %c0_i32_777 = arith.constant 0 : i32
    %c0_i32_778 = arith.constant 0 : i32
    %929 = tpu.memref_slice %arg4[%355, %c0_i32_778] : memref<50x32xf32, #tpu.memory_space<any>> -> memref<1x32xf32, #tpu.memory_space<any>>
    %c63_i32_779 = arith.constant 63 : i32
    %c0_i32_780 = arith.constant 0 : i32
    %930 = tpu.memref_slice %arg7[%c63_i32_779, %c0_i32_780] : memref<64x32xf32, #tpu.memory_space<vmem>> -> memref<1x32xf32, #tpu.memory_space<vmem>>
    %931 = tpu.memref_slice %arg11[%c0_i32_777] : memref<1x!tpu.dma_semaphore, #tpu.memory_space<semaphore_mem>> -> memref<1x!tpu.dma_semaphore, #tpu.memory_space<semaphore_mem>>
    %932 = tpu.memref_squeeze %931 : memref<1x!tpu.dma_semaphore, #tpu.memory_space<semaphore_mem>> -> memref<!tpu.dma_semaphore, #tpu.memory_space<semaphore_mem>>
    tpu.wait_dma2 semaphore(%932 : memref<!tpu.dma_semaphore, #tpu.memory_space<semaphore_mem>>) src(%929 : memref<1x32xf32, #tpu.memory_space<any>>) dst(%930 : memref<1x32xf32, #tpu.memory_space<vmem>>)
    %c0_i32_781 = arith.constant 0 : i32
    %c0_i32_782 = arith.constant 0 : i32
    %933 = tpu.memref_slice %arg5[%360, %c0_i32_782] : memref<5x32xf32, #tpu.memory_space<any>> -> memref<1x32xf32, #tpu.memory_space<any>>
    %c7_i32_783 = arith.constant 7 : i32
    %c0_i32_784 = arith.constant 0 : i32
    %934 = tpu.memref_slice %arg8[%c7_i32_783, %c0_i32_784] : memref<8x32xf32, #tpu.memory_space<vmem>> -> memref<1x32xf32, #tpu.memory_space<vmem>>
    %935 = tpu.memref_slice %arg11[%c0_i32_781] : memref<1x!tpu.dma_semaphore, #tpu.memory_space<semaphore_mem>> -> memref<1x!tpu.dma_semaphore, #tpu.memory_space<semaphore_mem>>
    %936 = tpu.memref_squeeze %935 : memref<1x!tpu.dma_semaphore, #tpu.memory_space<semaphore_mem>> -> memref<!tpu.dma_semaphore, #tpu.memory_space<semaphore_mem>>
    tpu.wait_dma2 semaphore(%936 : memref<!tpu.dma_semaphore, #tpu.memory_space<semaphore_mem>>) src(%933 : memref<1x32xf32, #tpu.memory_space<any>>) dst(%934 : memref<1x32xf32, #tpu.memory_space<vmem>>)
    %c0_785 = arith.constant 0 : index
    %c0_786 = arith.constant 0 : index
    %937 = vector.load %arg7[%c0_785, %c0_786] : memref<64x32xf32, #tpu.memory_space<vmem>>, vector<64x32xf32>
    %c0_787 = arith.constant 0 : index
    %c0_788 = arith.constant 0 : index
    %938 = vector.load %arg3[%c0_787, %c0_788] : memref<232x128xf32, #tpu.memory_space<vmem>>, vector<32x128xf32>
    %cst = arith.constant dense<0.000000e+00> : vector<64x128xf32>
    %939 = tpu.matmul %937, %938, %cst {dimension_numbers = #tpu.dot_dimension_numbers<[1], [0], [0], [1], [0, 0, 1, 1], [], []>} : vector<64x32xf32>, vector<32x128xf32>, vector<64x128xf32> -> vector<64x128xf32>
    %c64 = arith.constant 64 : index
    %c0_789 = arith.constant 0 : index
    %940 = vector.load %arg3[%c64, %c0_789] : memref<232x128xf32, #tpu.memory_space<vmem>>, vector<1x128xf32>
    %941 = vector.broadcast %940 : vector<1x128xf32> to vector<64x128xf32>
    %942 = arith.addf %939, %941 : vector<64x128xf32>
    %943 = tpu.iota {dimensions = array<i32: 1>} : vector<1x128xi32>
    %c32_i32_790 = arith.constant 32 : i32
    %c0_i32_791 = arith.constant 0 : i32
    %944 = arith.cmpi eq, %c32_i32_790, %c0_i32_791 : i32
    %c1_i32_792 = arith.constant 1 : i32
    %945 = arith.select %944, %c1_i32_792, %c32_i32_790 : i32
    %946 = vector.broadcast %945 : i32 to vector<1x128xi32>
    %947 = arith.remsi %943, %946 : vector<1x128xi32>
    %c0_i32_793 = arith.constant 0 : i32
    %948 = vector.broadcast %c0_i32_793 : i32 to vector<1x128xi32>
    %949 = arith.cmpi ne, %947, %948 : vector<1x128xi32>
    %c0_i32_794 = arith.constant 0 : i32
    %950 = vector.broadcast %c0_i32_794 : i32 to vector<1x128xi32>
    %951 = arith.cmpi slt, %947, %950 : vector<1x128xi32>
    %c0_i32_795 = arith.constant 0 : i32
    %952 = arith.cmpi slt, %945, %c0_i32_795 : i32
    %953 = vector.broadcast %952 : i1 to vector<1x128xi1>
    %954 = vector.broadcast %953 : vector<1x128xi1> to vector<1x128xi1>
    %955 = arith.xori %951, %954 : vector<1x128xi1>
    %956 = arith.andi %955, %949 : vector<1x128xi1>
    %957 = vector.broadcast %945 : i32 to vector<1x128xi32>
    %958 = arith.addi %947, %957 : vector<1x128xi32>
    %959 = arith.select %956, %958, %947 : vector<1x128xi1>, vector<1x128xi32>
    %c16_i32_796 = arith.constant 16 : i32
    %960 = vector.broadcast %c16_i32_796 : i32 to vector<1x128xi32>
    %961 = arith.cmpi slt, %959, %960 : vector<1x128xi32>
    %962 = vector.extract_strided_slice %942 {offsets = [0, 0], sizes = [8, 128], strides = [1, 1]} : vector<64x128xf32> to vector<8x128xf32>
    %963 = vector.extract_strided_slice %942 {offsets = [56, 0], sizes = [8, 128], strides = [1, 1]} : vector<64x128xf32> to vector<8x128xf32>
    %964 = vector.shape_cast %961 : vector<1x128xi1> to vector<1x128xi1>
    %965 = vector.broadcast %964 : vector<1x128xi1> to vector<8x128xi1>
    %966 = arith.select %965, %962, %963 : vector<8x128xi1>, vector<8x128xf32>
    %967 = vector.extract_strided_slice %942 {offsets = [8, 0], sizes = [8, 128], strides = [1, 1]} : vector<64x128xf32> to vector<8x128xf32>
    %968 = vector.extract_strided_slice %942 {offsets = [48, 0], sizes = [8, 128], strides = [1, 1]} : vector<64x128xf32> to vector<8x128xf32>
    %969 = vector.shape_cast %961 : vector<1x128xi1> to vector<1x128xi1>
    %970 = vector.broadcast %969 : vector<1x128xi1> to vector<8x128xi1>
    %971 = arith.select %970, %967, %968 : vector<8x128xi1>, vector<8x128xf32>
    %972 = vector.extract_strided_slice %942 {offsets = [16, 0], sizes = [8, 128], strides = [1, 1]} : vector<64x128xf32> to vector<8x128xf32>
    %973 = vector.extract_strided_slice %942 {offsets = [40, 0], sizes = [8, 128], strides = [1, 1]} : vector<64x128xf32> to vector<8x128xf32>
    %974 = vector.shape_cast %961 : vector<1x128xi1> to vector<1x128xi1>
    %975 = vector.broadcast %974 : vector<1x128xi1> to vector<8x128xi1>
    %976 = arith.select %975, %972, %973 : vector<8x128xi1>, vector<8x128xf32>
    %977 = vector.extract_strided_slice %942 {offsets = [24, 0], sizes = [8, 128], strides = [1, 1]} : vector<64x128xf32> to vector<8x128xf32>
    %978 = vector.extract_strided_slice %942 {offsets = [32, 0], sizes = [8, 128], strides = [1, 1]} : vector<64x128xf32> to vector<8x128xf32>
    %979 = vector.shape_cast %961 : vector<1x128xi1> to vector<1x128xi1>
    %980 = vector.broadcast %979 : vector<1x128xi1> to vector<8x128xi1>
    %981 = arith.select %980, %977, %978 : vector<8x128xi1>, vector<8x128xf32>
    %982 = vector.extract_strided_slice %942 {offsets = [32, 0], sizes = [8, 128], strides = [1, 1]} : vector<64x128xf32> to vector<8x128xf32>
    %983 = vector.extract_strided_slice %942 {offsets = [24, 0], sizes = [8, 128], strides = [1, 1]} : vector<64x128xf32> to vector<8x128xf32>
    %984 = vector.shape_cast %961 : vector<1x128xi1> to vector<1x128xi1>
    %985 = vector.broadcast %984 : vector<1x128xi1> to vector<8x128xi1>
    %986 = arith.select %985, %982, %983 : vector<8x128xi1>, vector<8x128xf32>
    %987 = vector.extract_strided_slice %942 {offsets = [40, 0], sizes = [8, 128], strides = [1, 1]} : vector<64x128xf32> to vector<8x128xf32>
    %988 = vector.extract_strided_slice %942 {offsets = [16, 0], sizes = [8, 128], strides = [1, 1]} : vector<64x128xf32> to vector<8x128xf32>
    %989 = vector.shape_cast %961 : vector<1x128xi1> to vector<1x128xi1>
    %990 = vector.broadcast %989 : vector<1x128xi1> to vector<8x128xi1>
    %991 = arith.select %990, %987, %988 : vector<8x128xi1>, vector<8x128xf32>
    %992 = vector.extract_strided_slice %942 {offsets = [48, 0], sizes = [8, 128], strides = [1, 1]} : vector<64x128xf32> to vector<8x128xf32>
    %993 = vector.extract_strided_slice %942 {offsets = [8, 0], sizes = [8, 128], strides = [1, 1]} : vector<64x128xf32> to vector<8x128xf32>
    %994 = vector.shape_cast %961 : vector<1x128xi1> to vector<1x128xi1>
    %995 = vector.broadcast %994 : vector<1x128xi1> to vector<8x128xi1>
    %996 = arith.select %995, %992, %993 : vector<8x128xi1>, vector<8x128xf32>
    %997 = vector.extract_strided_slice %942 {offsets = [56, 0], sizes = [8, 128], strides = [1, 1]} : vector<64x128xf32> to vector<8x128xf32>
    %998 = vector.extract_strided_slice %942 {offsets = [0, 0], sizes = [8, 128], strides = [1, 1]} : vector<64x128xf32> to vector<8x128xf32>
    %999 = vector.shape_cast %961 : vector<1x128xi1> to vector<1x128xi1>
    %1000 = vector.broadcast %999 : vector<1x128xi1> to vector<8x128xi1>
    %1001 = arith.select %1000, %997, %998 : vector<8x128xi1>, vector<8x128xf32>
    %c32 = arith.constant 32 : index
    %c0_797 = arith.constant 0 : index
    %1002 = vector.load %arg3[%c32, %c0_797] : memref<232x128xf32, #tpu.memory_space<vmem>>, vector<32x128xf32>
    %cst_798 = arith.constant 0.000000e+00 : f32
    %1003 = vector.broadcast %cst_798 : f32 to vector<8x32xf32>
    %cst_799 = arith.constant 0.000000e+00 : f32
    %1004 = vector.broadcast %cst_799 : f32 to vector<8x32xf32>
    %cst_800 = arith.constant dense<0.000000e+00> : vector<8x128xf32>
    %1005 = tpu.matmul %1003, %1002, %cst_800 {dimension_numbers = #tpu.dot_dimension_numbers<[1], [0], [0], [1], [0, 0, 1, 1], [], []>} : vector<8x32xf32>, vector<32x128xf32>, vector<8x128xf32> -> vector<8x128xf32>
    %1006 = arith.addf %966, %1005 : vector<8x128xf32>
    %1007 = arith.negf %1006 : vector<8x128xf32>
    %1008 = math.exp %1007 : vector<8x128xf32>
    %cst_801 = arith.constant 1.000000e+00 : f32
    %1009 = vector.broadcast %cst_801 : f32 to vector<8x128xf32>
    %1010 = arith.addf %1009, %1008 : vector<8x128xf32>
    %1011 = arith.divf %1009, %1010 : vector<8x128xf32>
    %1012 = math.tanh %1006 : vector<8x128xf32>
    %1013 = vector.extract_strided_slice %1011 {offsets = [0, 0], sizes = [8, 32], strides = [1, 1]} : vector<8x128xf32> to vector<8x32xf32>
    %1014 = vector.extract_strided_slice %1011 {offsets = [0, 32], sizes = [8, 32], strides = [1, 1]} : vector<8x128xf32> to vector<8x32xf32>
    %1015 = vector.extract_strided_slice %1011 {offsets = [0, 64], sizes = [8, 32], strides = [1, 1]} : vector<8x128xf32> to vector<8x32xf32>
    %1016 = vector.extract_strided_slice %1012 {offsets = [0, 96], sizes = [8, 32], strides = [1, 1]} : vector<8x128xf32> to vector<8x32xf32>
    %1017 = arith.mulf %1014, %1004 : vector<8x32xf32>
    %1018 = arith.mulf %1013, %1016 : vector<8x32xf32>
    %1019 = arith.addf %1017, %1018 : vector<8x32xf32>
    %1020 = math.tanh %1019 : vector<8x32xf32>
    %1021 = arith.mulf %1015, %1020 : vector<8x32xf32>
    %1022 = vector.extract_strided_slice %1021 {offsets = [0, 0], sizes = [8, 16], strides = [1, 1]} : vector<8x32xf32> to vector<8x16xf32>
    %c0_802 = arith.constant 0 : index
    %c0_803 = arith.constant 0 : index
    %1023 = vector.load %arg9[%c0_802, %c0_803] : memref<64x16xf32, #tpu.memory_space<vmem>>, vector<8x16xf32>
    tpu.vector_store %arg9[%c0_802, %c0_803], %1022 {strides = array<i32>} : memref<64x16xf32, #tpu.memory_space<vmem>>, vector<8x16xf32>,
    %1024 = vector.extract_strided_slice %1021 {offsets = [0, 16], sizes = [8, 16], strides = [1, 1]} : vector<8x32xf32> to vector<8x16xf32>
    %c56 = arith.constant 56 : index
    %c0_804 = arith.constant 0 : index
    %1025 = vector.load %arg10[%c56, %c0_804] : memref<64x16xf32, #tpu.memory_space<vmem>>, vector<8x16xf32>
    tpu.vector_store %arg10[%c56, %c0_804], %1024 {strides = array<i32>} : memref<64x16xf32, #tpu.memory_space<vmem>>, vector<8x16xf32>,
    %cst_805 = arith.constant dense<0.000000e+00> : vector<8x128xf32>
    %1026 = tpu.matmul %1021, %1002, %cst_805 {dimension_numbers = #tpu.dot_dimension_numbers<[1], [0], [0], [1], [0, 0, 1, 1], [], []>} : vector<8x32xf32>, vector<32x128xf32>, vector<8x128xf32> -> vector<8x128xf32>
    %1027 = arith.addf %971, %1026 : vector<8x128xf32>
    %1028 = arith.negf %1027 : vector<8x128xf32>
    %1029 = math.exp %1028 : vector<8x128xf32>
    %cst_806 = arith.constant 1.000000e+00 : f32
    %1030 = vector.broadcast %cst_806 : f32 to vector<8x128xf32>
    %1031 = arith.addf %1030, %1029 : vector<8x128xf32>
    %1032 = arith.divf %1030, %1031 : vector<8x128xf32>
    %1033 = math.tanh %1027 : vector<8x128xf32>
    %1034 = vector.extract_strided_slice %1032 {offsets = [0, 0], sizes = [8, 32], strides = [1, 1]} : vector<8x128xf32> to vector<8x32xf32>
    %1035 = vector.extract_strided_slice %1032 {offsets = [0, 32], sizes = [8, 32], strides = [1, 1]} : vector<8x128xf32> to vector<8x32xf32>
    %1036 = vector.extract_strided_slice %1032 {offsets = [0, 64], sizes = [8, 32], strides = [1, 1]} : vector<8x128xf32> to vector<8x32xf32>
    %1037 = vector.extract_strided_slice %1033 {offsets = [0, 96], sizes = [8, 32], strides = [1, 1]} : vector<8x128xf32> to vector<8x32xf32>
    %1038 = arith.mulf %1035, %1019 : vector<8x32xf32>
    %1039 = arith.mulf %1034, %1037 : vector<8x32xf32>
    %1040 = arith.addf %1038, %1039 : vector<8x32xf32>
    %1041 = math.tanh %1040 : vector<8x32xf32>
    %1042 = arith.mulf %1036, %1041 : vector<8x32xf32>
    %1043 = vector.extract_strided_slice %1042 {offsets = [0, 0], sizes = [8, 16], strides = [1, 1]} : vector<8x32xf32> to vector<8x16xf32>
    %c8 = arith.constant 8 : index
    %c0_807 = arith.constant 0 : index
    %1044 = vector.load %arg9[%c8, %c0_807] : memref<64x16xf32, #tpu.memory_space<vmem>>, vector<8x16xf32>
    tpu.vector_store %arg9[%c8, %c0_807], %1043 {strides = array<i32>} : memref<64x16xf32, #tpu.memory_space<vmem>>, vector<8x16xf32>,
    %1045 = vector.extract_strided_slice %1042 {offsets = [0, 16], sizes = [8, 16], strides = [1, 1]} : vector<8x32xf32> to vector<8x16xf32>
    %c48 = arith.constant 48 : index
    %c0_808 = arith.constant 0 : index
    %1046 = vector.load %arg10[%c48, %c0_808] : memref<64x16xf32, #tpu.memory_space<vmem>>, vector<8x16xf32>
    tpu.vector_store %arg10[%c48, %c0_808], %1045 {strides = array<i32>} : memref<64x16xf32, #tpu.memory_space<vmem>>, vector<8x16xf32>,
    %cst_809 = arith.constant dense<0.000000e+00> : vector<8x128xf32>
    %1047 = tpu.matmul %1042, %1002, %cst_809 {dimension_numbers = #tpu.dot_dimension_numbers<[1], [0], [0], [1], [0, 0, 1, 1], [], []>} : vector<8x32xf32>, vector<32x128xf32>, vector<8x128xf32> -> vector<8x128xf32>
    %1048 = arith.addf %976, %1047 : vector<8x128xf32>
    %1049 = arith.negf %1048 : vector<8x128xf32>
    %1050 = math.exp %1049 : vector<8x128xf32>
    %cst_810 = arith.constant 1.000000e+00 : f32
    %1051 = vector.broadcast %cst_810 : f32 to vector<8x128xf32>
    %1052 = arith.addf %1051, %1050 : vector<8x128xf32>
    %1053 = arith.divf %1051, %1052 : vector<8x128xf32>
    %1054 = math.tanh %1048 : vector<8x128xf32>
    %1055 = vector.extract_strided_slice %1053 {offsets = [0, 0], sizes = [8, 32], strides = [1, 1]} : vector<8x128xf32> to vector<8x32xf32>
    %1056 = vector.extract_strided_slice %1053 {offsets = [0, 32], sizes = [8, 32], strides = [1, 1]} : vector<8x128xf32> to vector<8x32xf32>
    %1057 = vector.extract_strided_slice %1053 {offsets = [0, 64], sizes = [8, 32], strides = [1, 1]} : vector<8x128xf32> to vector<8x32xf32>
    %1058 = vector.extract_strided_slice %1054 {offsets = [0, 96], sizes = [8, 32], strides = [1, 1]} : vector<8x128xf32> to vector<8x32xf32>
    %1059 = arith.mulf %1056, %1040 : vector<8x32xf32>
    %1060 = arith.mulf %1055, %1058 : vector<8x32xf32>
    %1061 = arith.addf %1059, %1060 : vector<8x32xf32>
    %1062 = math.tanh %1061 : vector<8x32xf32>
    %1063 = arith.mulf %1057, %1062 : vector<8x32xf32>
    %1064 = vector.extract_strided_slice %1063 {offsets = [0, 0], sizes = [8, 16], strides = [1, 1]} : vector<8x32xf32> to vector<8x16xf32>
    %c16 = arith.constant 16 : index
    %c0_811 = arith.constant 0 : index
    %1065 = vector.load %arg9[%c16, %c0_811] : memref<64x16xf32, #tpu.memory_space<vmem>>, vector<8x16xf32>
    tpu.vector_store %arg9[%c16, %c0_811], %1064 {strides = array<i32>} : memref<64x16xf32, #tpu.memory_space<vmem>>, vector<8x16xf32>,
    %1066 = vector.extract_strided_slice %1063 {offsets = [0, 16], sizes = [8, 16], strides = [1, 1]} : vector<8x32xf32> to vector<8x16xf32>
    %c40 = arith.constant 40 : index
    %c0_812 = arith.constant 0 : index
    %1067 = vector.load %arg10[%c40, %c0_812] : memref<64x16xf32, #tpu.memory_space<vmem>>, vector<8x16xf32>
    tpu.vector_store %arg10[%c40, %c0_812], %1066 {strides = array<i32>} : memref<64x16xf32, #tpu.memory_space<vmem>>, vector<8x16xf32>,
    %cst_813 = arith.constant dense<0.000000e+00> : vector<8x128xf32>
    %1068 = tpu.matmul %1063, %1002, %cst_813 {dimension_numbers = #tpu.dot_dimension_numbers<[1], [0], [0], [1], [0, 0, 1, 1], [], []>} : vector<8x32xf32>, vector<32x128xf32>, vector<8x128xf32> -> vector<8x128xf32>
    %1069 = arith.addf %981, %1068 : vector<8x128xf32>
    %1070 = arith.negf %1069 : vector<8x128xf32>
    %1071 = math.exp %1070 : vector<8x128xf32>
    %cst_814 = arith.constant 1.000000e+00 : f32
    %1072 = vector.broadcast %cst_814 : f32 to vector<8x128xf32>
    %1073 = arith.addf %1072, %1071 : vector<8x128xf32>
    %1074 = arith.divf %1072, %1073 : vector<8x128xf32>
    %1075 = math.tanh %1069 : vector<8x128xf32>
    %1076 = vector.extract_strided_slice %1074 {offsets = [0, 0], sizes = [8, 32], strides = [1, 1]} : vector<8x128xf32> to vector<8x32xf32>
    %1077 = vector.extract_strided_slice %1074 {offsets = [0, 32], sizes = [8, 32], strides = [1, 1]} : vector<8x128xf32> to vector<8x32xf32>
    %1078 = vector.extract_strided_slice %1074 {offsets = [0, 64], sizes = [8, 32], strides = [1, 1]} : vector<8x128xf32> to vector<8x32xf32>
    %1079 = vector.extract_strided_slice %1075 {offsets = [0, 96], sizes = [8, 32], strides = [1, 1]} : vector<8x128xf32> to vector<8x32xf32>
    %1080 = arith.mulf %1077, %1061 : vector<8x32xf32>
    %1081 = arith.mulf %1076, %1079 : vector<8x32xf32>
    %1082 = arith.addf %1080, %1081 : vector<8x32xf32>
    %1083 = math.tanh %1082 : vector<8x32xf32>
    %1084 = arith.mulf %1078, %1083 : vector<8x32xf32>
    %1085 = vector.extract_strided_slice %1084 {offsets = [0, 0], sizes = [8, 16], strides = [1, 1]} : vector<8x32xf32> to vector<8x16xf32>
    %c24 = arith.constant 24 : index
    %c0_815 = arith.constant 0 : index
    %1086 = vector.load %arg9[%c24, %c0_815] : memref<64x16xf32, #tpu.memory_space<vmem>>, vector<8x16xf32>
    tpu.vector_store %arg9[%c24, %c0_815], %1085 {strides = array<i32>} : memref<64x16xf32, #tpu.memory_space<vmem>>, vector<8x16xf32>,
    %1087 = vector.extract_strided_slice %1084 {offsets = [0, 16], sizes = [8, 16], strides = [1, 1]} : vector<8x32xf32> to vector<8x16xf32>
    %c32_816 = arith.constant 32 : index
    %c0_817 = arith.constant 0 : index
    %1088 = vector.load %arg10[%c32_816, %c0_817] : memref<64x16xf32, #tpu.memory_space<vmem>>, vector<8x16xf32>
    tpu.vector_store %arg10[%c32_816, %c0_817], %1087 {strides = array<i32>} : memref<64x16xf32, #tpu.memory_space<vmem>>, vector<8x16xf32>,
    %cst_818 = arith.constant dense<0.000000e+00> : vector<8x128xf32>
    %1089 = tpu.matmul %1084, %1002, %cst_818 {dimension_numbers = #tpu.dot_dimension_numbers<[1], [0], [0], [1], [0, 0, 1, 1], [], []>} : vector<8x32xf32>, vector<32x128xf32>, vector<8x128xf32> -> vector<8x128xf32>
    %1090 = arith.addf %986, %1089 : vector<8x128xf32>
    %1091 = arith.negf %1090 : vector<8x128xf32>
    %1092 = math.exp %1091 : vector<8x128xf32>
    %cst_819 = arith.constant 1.000000e+00 : f32
    %1093 = vector.broadcast %cst_819 : f32 to vector<8x128xf32>
    %1094 = arith.addf %1093, %1092 : vector<8x128xf32>
    %1095 = arith.divf %1093, %1094 : vector<8x128xf32>
    %1096 = math.tanh %1090 : vector<8x128xf32>
    %1097 = vector.extract_strided_slice %1095 {offsets = [0, 0], sizes = [8, 32], strides = [1, 1]} : vector<8x128xf32> to vector<8x32xf32>
    %1098 = vector.extract_strided_slice %1095 {offsets = [0, 32], sizes = [8, 32], strides = [1, 1]} : vector<8x128xf32> to vector<8x32xf32>
    %1099 = vector.extract_strided_slice %1095 {offsets = [0, 64], sizes = [8, 32], strides = [1, 1]} : vector<8x128xf32> to vector<8x32xf32>
    %1100 = vector.extract_strided_slice %1096 {offsets = [0, 96], sizes = [8, 32], strides = [1, 1]} : vector<8x128xf32> to vector<8x32xf32>
    %1101 = arith.mulf %1098, %1082 : vector<8x32xf32>
    %1102 = arith.mulf %1097, %1100 : vector<8x32xf32>
    %1103 = arith.addf %1101, %1102 : vector<8x32xf32>
    %1104 = math.tanh %1103 : vector<8x32xf32>
    %1105 = arith.mulf %1099, %1104 : vector<8x32xf32>
    %1106 = vector.extract_strided_slice %1105 {offsets = [0, 0], sizes = [8, 16], strides = [1, 1]} : vector<8x32xf32> to vector<8x16xf32>
    %c32_820 = arith.constant 32 : index
    %c0_821 = arith.constant 0 : index
    %1107 = vector.load %arg9[%c32_820, %c0_821] : memref<64x16xf32, #tpu.memory_space<vmem>>, vector<8x16xf32>
    tpu.vector_store %arg9[%c32_820, %c0_821], %1106 {strides = array<i32>} : memref<64x16xf32, #tpu.memory_space<vmem>>, vector<8x16xf32>,
    %1108 = vector.extract_strided_slice %1105 {offsets = [0, 16], sizes = [8, 16], strides = [1, 1]} : vector<8x32xf32> to vector<8x16xf32>
    %c24_822 = arith.constant 24 : index
    %c0_823 = arith.constant 0 : index
    %1109 = vector.load %arg10[%c24_822, %c0_823] : memref<64x16xf32, #tpu.memory_space<vmem>>, vector<8x16xf32>
    tpu.vector_store %arg10[%c24_822, %c0_823], %1108 {strides = array<i32>} : memref<64x16xf32, #tpu.memory_space<vmem>>, vector<8x16xf32>,
    %cst_824 = arith.constant dense<0.000000e+00> : vector<8x128xf32>
    %1110 = tpu.matmul %1105, %1002, %cst_824 {dimension_numbers = #tpu.dot_dimension_numbers<[1], [0], [0], [1], [0, 0, 1, 1], [], []>} : vector<8x32xf32>, vector<32x128xf32>, vector<8x128xf32> -> vector<8x128xf32>
    %1111 = arith.addf %991, %1110 : vector<8x128xf32>
    %1112 = arith.negf %1111 : vector<8x128xf32>
    %1113 = math.exp %1112 : vector<8x128xf32>
    %cst_825 = arith.constant 1.000000e+00 : f32
    %1114 = vector.broadcast %cst_825 : f32 to vector<8x128xf32>
    %1115 = arith.addf %1114, %1113 : vector<8x128xf32>
    %1116 = arith.divf %1114, %1115 : vector<8x128xf32>
    %1117 = math.tanh %1111 : vector<8x128xf32>
    %1118 = vector.extract_strided_slice %1116 {offsets = [0, 0], sizes = [8, 32], strides = [1, 1]} : vector<8x128xf32> to vector<8x32xf32>
    %1119 = vector.extract_strided_slice %1116 {offsets = [0, 32], sizes = [8, 32], strides = [1, 1]} : vector<8x128xf32> to vector<8x32xf32>
    %1120 = vector.extract_strided_slice %1116 {offsets = [0, 64], sizes = [8, 32], strides = [1, 1]} : vector<8x128xf32> to vector<8x32xf32>
    %1121 = vector.extract_strided_slice %1117 {offsets = [0, 96], sizes = [8, 32], strides = [1, 1]} : vector<8x128xf32> to vector<8x32xf32>
    %1122 = arith.mulf %1119, %1103 : vector<8x32xf32>
    %1123 = arith.mulf %1118, %1121 : vector<8x32xf32>
    %1124 = arith.addf %1122, %1123 : vector<8x32xf32>
    %1125 = math.tanh %1124 : vector<8x32xf32>
    %1126 = arith.mulf %1120, %1125 : vector<8x32xf32>
    %1127 = vector.extract_strided_slice %1126 {offsets = [0, 0], sizes = [8, 16], strides = [1, 1]} : vector<8x32xf32> to vector<8x16xf32>
    %c40_826 = arith.constant 40 : index
    %c0_827 = arith.constant 0 : index
    %1128 = vector.load %arg9[%c40_826, %c0_827] : memref<64x16xf32, #tpu.memory_space<vmem>>, vector<8x16xf32>
    tpu.vector_store %arg9[%c40_826, %c0_827], %1127 {strides = array<i32>} : memref<64x16xf32, #tpu.memory_space<vmem>>, vector<8x16xf32>,
    %1129 = vector.extract_strided_slice %1126 {offsets = [0, 16], sizes = [8, 16], strides = [1, 1]} : vector<8x32xf32> to vector<8x16xf32>
    %c16_828 = arith.constant 16 : index
    %c0_829 = arith.constant 0 : index
    %1130 = vector.load %arg10[%c16_828, %c0_829] : memref<64x16xf32, #tpu.memory_space<vmem>>, vector<8x16xf32>
    tpu.vector_store %arg10[%c16_828, %c0_829], %1129 {strides = array<i32>} : memref<64x16xf32, #tpu.memory_space<vmem>>, vector<8x16xf32>,
    %cst_830 = arith.constant dense<0.000000e+00> : vector<8x128xf32>
    %1131 = tpu.matmul %1126, %1002, %cst_830 {dimension_numbers = #tpu.dot_dimension_numbers<[1], [0], [0], [1], [0, 0, 1, 1], [], []>} : vector<8x32xf32>, vector<32x128xf32>, vector<8x128xf32> -> vector<8x128xf32>
    %1132 = arith.addf %996, %1131 : vector<8x128xf32>
    %1133 = arith.negf %1132 : vector<8x128xf32>
    %1134 = math.exp %1133 : vector<8x128xf32>
    %cst_831 = arith.constant 1.000000e+00 : f32
    %1135 = vector.broadcast %cst_831 : f32 to vector<8x128xf32>
    %1136 = arith.addf %1135, %1134 : vector<8x128xf32>
    %1137 = arith.divf %1135, %1136 : vector<8x128xf32>
    %1138 = math.tanh %1132 : vector<8x128xf32>
    %1139 = vector.extract_strided_slice %1137 {offsets = [0, 0], sizes = [8, 32], strides = [1, 1]} : vector<8x128xf32> to vector<8x32xf32>
    %1140 = vector.extract_strided_slice %1137 {offsets = [0, 32], sizes = [8, 32], strides = [1, 1]} : vector<8x128xf32> to vector<8x32xf32>
    %1141 = vector.extract_strided_slice %1137 {offsets = [0, 64], sizes = [8, 32], strides = [1, 1]} : vector<8x128xf32> to vector<8x32xf32>
    %1142 = vector.extract_strided_slice %1138 {offsets = [0, 96], sizes = [8, 32], strides = [1, 1]} : vector<8x128xf32> to vector<8x32xf32>
    %1143 = arith.mulf %1140, %1124 : vector<8x32xf32>
    %1144 = arith.mulf %1139, %1142 : vector<8x32xf32>
    %1145 = arith.addf %1143, %1144 : vector<8x32xf32>
    %1146 = math.tanh %1145 : vector<8x32xf32>
    %1147 = arith.mulf %1141, %1146 : vector<8x32xf32>
    %1148 = vector.extract_strided_slice %1147 {offsets = [0, 0], sizes = [8, 16], strides = [1, 1]} : vector<8x32xf32> to vector<8x16xf32>
    %c48_832 = arith.constant 48 : index
    %c0_833 = arith.constant 0 : index
    %1149 = vector.load %arg9[%c48_832, %c0_833] : memref<64x16xf32, #tpu.memory_space<vmem>>, vector<8x16xf32>
    tpu.vector_store %arg9[%c48_832, %c0_833], %1148 {strides = array<i32>} : memref<64x16xf32, #tpu.memory_space<vmem>>, vector<8x16xf32>,
    %1150 = vector.extract_strided_slice %1147 {offsets = [0, 16], sizes = [8, 16], strides = [1, 1]} : vector<8x32xf32> to vector<8x16xf32>
    %c8_834 = arith.constant 8 : index
    %c0_835 = arith.constant 0 : index
    %1151 = vector.load %arg10[%c8_834, %c0_835] : memref<64x16xf32, #tpu.memory_space<vmem>>, vector<8x16xf32>
    tpu.vector_store %arg10[%c8_834, %c0_835], %1150 {strides = array<i32>} : memref<64x16xf32, #tpu.memory_space<vmem>>, vector<8x16xf32>,
    %cst_836 = arith.constant dense<0.000000e+00> : vector<8x128xf32>
    %1152 = tpu.matmul %1147, %1002, %cst_836 {dimension_numbers = #tpu.dot_dimension_numbers<[1], [0], [0], [1], [0, 0, 1, 1], [], []>} : vector<8x32xf32>, vector<32x128xf32>, vector<8x128xf32> -> vector<8x128xf32>
    %1153 = arith.addf %1001, %1152 : vector<8x128xf32>
    %1154 = arith.negf %1153 : vector<8x128xf32>
    %1155 = math.exp %1154 : vector<8x128xf32>
    %cst_837 = arith.constant 1.000000e+00 : f32
    %1156 = vector.broadcast %cst_837 : f32 to vector<8x128xf32>
    %1157 = arith.addf %1156, %1155 : vector<8x128xf32>
    %1158 = arith.divf %1156, %1157 : vector<8x128xf32>
    %1159 = math.tanh %1153 : vector<8x128xf32>
    %1160 = vector.extract_strided_slice %1158 {offsets = [0, 0], sizes = [8, 32], strides = [1, 1]} : vector<8x128xf32> to vector<8x32xf32>
    %1161 = vector.extract_strided_slice %1158 {offsets = [0, 32], sizes = [8, 32], strides = [1, 1]} : vector<8x128xf32> to vector<8x32xf32>
    %1162 = vector.extract_strided_slice %1158 {offsets = [0, 64], sizes = [8, 32], strides = [1, 1]} : vector<8x128xf32> to vector<8x32xf32>
    %1163 = vector.extract_strided_slice %1159 {offsets = [0, 96], sizes = [8, 32], strides = [1, 1]} : vector<8x128xf32> to vector<8x32xf32>
    %1164 = arith.mulf %1161, %1145 : vector<8x32xf32>
    %1165 = arith.mulf %1160, %1163 : vector<8x32xf32>
    %1166 = arith.addf %1164, %1165 : vector<8x32xf32>
    %1167 = math.tanh %1166 : vector<8x32xf32>
    %1168 = arith.mulf %1162, %1167 : vector<8x32xf32>
    %1169 = vector.extract_strided_slice %1168 {offsets = [0, 0], sizes = [8, 16], strides = [1, 1]} : vector<8x32xf32> to vector<8x16xf32>
    %c56_838 = arith.constant 56 : index
    %c0_839 = arith.constant 0 : index
    %1170 = vector.load %arg9[%c56_838, %c0_839] : memref<64x16xf32, #tpu.memory_space<vmem>>, vector<8x16xf32>
    tpu.vector_store %arg9[%c56_838, %c0_839], %1169 {strides = array<i32>} : memref<64x16xf32, #tpu.memory_space<vmem>>, vector<8x16xf32>,
    %1171 = vector.extract_strided_slice %1168 {offsets = [0, 16], sizes = [8, 16], strides = [1, 1]} : vector<8x32xf32> to vector<8x16xf32>
    %c0_840 = arith.constant 0 : index
    %c0_841 = arith.constant 0 : index
    %1172 = vector.load %arg10[%c0_840, %c0_841] : memref<64x16xf32, #tpu.memory_space<vmem>>, vector<8x16xf32>
    tpu.vector_store %arg10[%c0_840, %c0_841], %1171 {strides = array<i32>} : memref<64x16xf32, #tpu.memory_space<vmem>>, vector<8x16xf32>,
    %c0_842 = arith.constant 0 : index
    %c0_843 = arith.constant 0 : index
    %1173 = vector.load %arg9[%c0_842, %c0_843] : memref<64x16xf32, #tpu.memory_space<vmem>>, vector<64x16xf32>
    %c0_844 = arith.constant 0 : index
    %c0_845 = arith.constant 0 : index
    %1174 = vector.load %arg10[%c0_844, %c0_845] : memref<64x16xf32, #tpu.memory_space<vmem>>, vector<64x16xf32>
    %c72 = arith.constant 72 : index
    %c0_846 = arith.constant 0 : index
    %1175 = vector.load %arg3[%c72, %c0_846] : memref<232x128xf32, #tpu.memory_space<vmem>>, vector<16x32xf32>
    %cst_847 = arith.constant dense<0.000000e+00> : vector<64x32xf32>
    %1176 = tpu.matmul %1173, %1175, %cst_847 {dimension_numbers = #tpu.dot_dimension_numbers<[1], [0], [0], [1], [0, 0, 1, 1], [], []>} : vector<64x16xf32>, vector<16x32xf32>, vector<64x32xf32> -> vector<64x32xf32>
    %c88 = arith.constant 88 : index
    %c0_848 = arith.constant 0 : index
    %1177 = vector.load %arg3[%c88, %c0_848] : memref<232x128xf32, #tpu.memory_space<vmem>>, vector<16x32xf32>
    %cst_849 = arith.constant dense<0.000000e+00> : vector<64x32xf32>
    %1178 = tpu.matmul %1174, %1177, %cst_849 {dimension_numbers = #tpu.dot_dimension_numbers<[1], [0], [0], [1], [0, 0, 1, 1], [], []>} : vector<64x16xf32>, vector<16x32xf32>, vector<64x32xf32> -> vector<64x32xf32>
    %1179 = arith.addf %1176, %1178 : vector<64x32xf32>
    %c65 = arith.constant 65 : index
    %c0_850 = arith.constant 0 : index
    %1180 = vector.load %arg3[%c65, %c0_850] : memref<232x128xf32, #tpu.memory_space<vmem>>, vector<1x32xf32>
    %1181 = vector.broadcast %1180 : vector<1x32xf32> to vector<64x32xf32>
    %1182 = arith.addf %1179, %1181 : vector<64x32xf32>
    %1183 = math.tanh %1182 : vector<64x32xf32>
    %c67 = arith.constant 67 : index
    %c0_851 = arith.constant 0 : index
    %1184 = vector.load %arg3[%c67, %c0_851] : memref<232x128xf32, #tpu.memory_space<vmem>>, vector<1x32xf32>
    %1185 = vector.broadcast %1184 : vector<1x32xf32> to vector<64x32xf32>
    %1186 = arith.mulf %1183, %1185 : vector<64x32xf32>
    %cst_852 = arith.constant dense<0.000000e+00> : vector<64xf32>
    %1187 = vector.multi_reduction <add>, %1186, %cst_852 [1] : vector<64x32xf32> to vector<64xf32>
    %1188 = vector.shape_cast %1187 : vector<64xf32> to vector<64x1xf32>
    %c0_853 = arith.constant 0 : index
    %c0_854 = arith.constant 0 : index
    %1189 = vector.load %arg8[%c0_853, %c0_854] : memref<8x32xf32, #tpu.memory_space<vmem>>, vector<8x32xf32>
    %c104 = arith.constant 104 : index
    %c0_855 = arith.constant 0 : index
    %1190 = vector.load %arg3[%c104, %c0_855] : memref<232x128xf32, #tpu.memory_space<vmem>>, vector<32x32xf32>
    %cst_856 = arith.constant dense<0.000000e+00> : vector<8x32xf32>
    %1191 = tpu.matmul %1189, %1190, %cst_856 {dimension_numbers = #tpu.dot_dimension_numbers<[1], [0], [0], [1], [0, 0, 1, 1], [], []>} : vector<8x32xf32>, vector<32x32xf32>, vector<8x32xf32> -> vector<8x32xf32>
    %c66 = arith.constant 66 : index
    %c0_857 = arith.constant 0 : index
    %1192 = vector.load %arg3[%c66, %c0_857] : memref<232x128xf32, #tpu.memory_space<vmem>>, vector<1x32xf32>
    %1193 = vector.broadcast %1192 : vector<1x32xf32> to vector<8x32xf32>
    %1194 = arith.addf %1191, %1193 : vector<8x32xf32>
    %1195 = math.tanh %1194 : vector<8x32xf32>
    %c68 = arith.constant 68 : index
    %c0_858 = arith.constant 0 : index
    %1196 = vector.load %arg3[%c68, %c0_858] : memref<232x128xf32, #tpu.memory_space<vmem>>, vector<1x32xf32>
    %1197 = vector.broadcast %1196 : vector<1x32xf32> to vector<8x32xf32>
    %1198 = arith.mulf %1195, %1197 : vector<8x32xf32>
    %cst_859 = arith.constant dense<0.000000e+00> : vector<8xf32>
    %1199 = vector.multi_reduction <add>, %1198, %cst_859 [1] : vector<8x32xf32> to vector<8xf32>
    %1200 = vector.shape_cast %1199 : vector<8xf32> to vector<8x1xf32>
    %1201 = vector.shape_cast %1188 : vector<64x1xf32> to vector<8x8x1xf32>
    %1202 = vector.shape_cast %1200 : vector<8x1xf32> to vector<1x8x1xf32>
    %1203 = vector.broadcast %1202 : vector<1x8x1xf32> to vector<8x8x1xf32>
    %1204 = arith.addf %1201, %1203 : vector<8x8x1xf32>
    %c69 = arith.constant 69 : index
    %c0_860 = arith.constant 0 : index
    %1205 = vector.load %arg3[%c69, %c0_860] : memref<232x128xf32, #tpu.memory_space<vmem>>, vector<1x1xf32>
    %1206 = vector.shape_cast %1205 : vector<1x1xf32> to vector<1x1x1xf32>
    %1207 = vector.broadcast %1206 : vector<1x1x1xf32> to vector<8x8x1xf32>
    %1208 = arith.addf %1204, %1207 : vector<8x8x1xf32>
    %cst_861 = arith.constant dense<0xFF800000> : vector<8x1xf32>
    %1209 = vector.multi_reduction <maximumf>, %1208, %cst_861 [0] : vector<8x8x1xf32> to vector<8x1xf32>
    %1210 = vector.shape_cast %1209 : vector<8x1xf32> to vector<1x8x1xf32>
    %1211 = vector.broadcast %1210 : vector<1x8x1xf32> to vector<8x8x1xf32>
    %1212 = arith.subf %1208, %1211 : vector<8x8x1xf32>
    %1213 = math.exp %1212 : vector<8x8x1xf32>
    %cst_862 = arith.constant dense<0.000000e+00> : vector<8x1xf32>
    %1214 = vector.multi_reduction <add>, %1213, %cst_862 [0] : vector<8x8x1xf32> to vector<8x1xf32>
    %1215 = vector.shape_cast %1214 : vector<8x1xf32> to vector<1x8x1xf32>
    %1216 = tpu.reciprocal %1215 {approx = true} : vector<1x8x1xf32> -> vector<1x8x1xf32>
    %1217 = arith.mulf %1215, %1216 : vector<1x8x1xf32>
    %cst_863 = arith.constant 2.000000e+00 : f32
    %1218 = vector.broadcast %cst_863 : f32 to vector<1x8x1xf32>
    %1219 = arith.subf %1218, %1217 : vector<1x8x1xf32>
    %1220 = arith.mulf %1216, %1219 : vector<1x8x1xf32>
    %1221 = vector.broadcast %1220 : vector<1x8x1xf32> to vector<8x8x1xf32>
    %1222 = arith.mulf %1213, %1221 : vector<8x8x1xf32>
    %1223 = vector.shape_cast %1173 : vector<64x16xf32> to vector<8x8x16xf32>
    %1224 = vector.broadcast %1222 : vector<8x8x1xf32> to vector<8x8x16xf32>
    %1225 = arith.mulf %1224, %1223 : vector<8x8x16xf32>
    %cst_864 = arith.constant dense<0.000000e+00> : vector<8x16xf32>
    %1226 = vector.multi_reduction <add>, %1225, %cst_864 [0] : vector<8x8x16xf32> to vector<8x16xf32>
    %1227 = vector.shape_cast %1174 : vector<64x16xf32> to vector<8x8x16xf32>
    %1228 = vector.broadcast %1222 : vector<8x8x1xf32> to vector<8x8x16xf32>
    %1229 = arith.mulf %1228, %1227 : vector<8x8x16xf32>
    %cst_865 = arith.constant dense<0.000000e+00> : vector<8x16xf32>
    %1230 = vector.multi_reduction <add>, %1229, %cst_865 [0] : vector<8x8x16xf32> to vector<8x16xf32>
    %c136 = arith.constant 136 : index
    %c0_866 = arith.constant 0 : index
    %1231 = vector.load %arg3[%c136, %c0_866] : memref<232x128xf32, #tpu.memory_space<vmem>>, vector<16x32xf32>
    %cst_867 = arith.constant dense<0.000000e+00> : vector<8x32xf32>
    %1232 = tpu.matmul %1226, %1231, %cst_867 {dimension_numbers = #tpu.dot_dimension_numbers<[1], [0], [0], [1], [0, 0, 1, 1], [], []>} : vector<8x16xf32>, vector<16x32xf32>, vector<8x32xf32> -> vector<8x32xf32>
    %c152 = arith.constant 152 : index
    %c0_868 = arith.constant 0 : index
    %1233 = vector.load %arg3[%c152, %c0_868] : memref<232x128xf32, #tpu.memory_space<vmem>>, vector<16x32xf32>
    %cst_869 = arith.constant dense<0.000000e+00> : vector<8x32xf32>
    %1234 = tpu.matmul %1230, %1233, %cst_869 {dimension_numbers = #tpu.dot_dimension_numbers<[1], [0], [0], [1], [0, 0, 1, 1], [], []>} : vector<8x16xf32>, vector<16x32xf32>, vector<8x32xf32> -> vector<8x32xf32>
    %1235 = arith.addf %1232, %1234 : vector<8x32xf32>
    %c168 = arith.constant 168 : index
    %c0_870 = arith.constant 0 : index
    %1236 = vector.load %arg3[%c168, %c0_870] : memref<232x128xf32, #tpu.memory_space<vmem>>, vector<32x32xf32>
    %cst_871 = arith.constant dense<0.000000e+00> : vector<8x32xf32>
    %1237 = tpu.matmul %1168, %1236, %cst_871 {dimension_numbers = #tpu.dot_dimension_numbers<[1], [0], [0], [1], [0, 0, 1, 1], [], []>} : vector<8x32xf32>, vector<32x32xf32>, vector<8x32xf32> -> vector<8x32xf32>
    %1238 = arith.addf %1235, %1237 : vector<8x32xf32>
    %c70 = arith.constant 70 : index
    %c0_872 = arith.constant 0 : index
    %1239 = vector.load %arg3[%c70, %c0_872] : memref<232x128xf32, #tpu.memory_space<vmem>>, vector<1x32xf32>
    %1240 = vector.broadcast %1239 : vector<1x32xf32> to vector<8x32xf32>
    %1241 = arith.addf %1238, %1240 : vector<8x32xf32>
    %1242 = math.tanh %1241 : vector<8x32xf32>
    %c200 = arith.constant 200 : index
    %c0_873 = arith.constant 0 : index
    %1243 = vector.load %arg3[%c200, %c0_873] : memref<232x128xf32, #tpu.memory_space<vmem>>, vector<32x8xf32>
    %cst_874 = arith.constant dense<0.000000e+00> : vector<8x8xf32>
    %1244 = tpu.matmul %1242, %1243, %cst_874 {dimension_numbers = #tpu.dot_dimension_numbers<[1], [0], [0], [1], [0, 0, 1, 1], [], []>} : vector<8x32xf32>, vector<32x8xf32>, vector<8x8xf32> -> vector<8x8xf32>
    %c71 = arith.constant 71 : index
    %c0_875 = arith.constant 0 : index
    %1245 = vector.load %arg3[%c71, %c0_875] : memref<232x128xf32, #tpu.memory_space<vmem>>, vector<1x8xf32>
    %1246 = vector.broadcast %1245 : vector<1x8xf32> to vector<8x8xf32>
    %1247 = arith.addf %1244, %1246 : vector<8x8xf32>
    %c0_876 = arith.constant 0 : index
    %c0_877 = arith.constant 0 : index
    %1248 = vector.load %arg6[%c0_876, %c0_877] : memref<8x8xf32, #tpu.memory_space<vmem>>, vector<8x8xf32>
    tpu.vector_store %arg6[%c0_876, %c0_877], %1247 {strides = array<i32>} : memref<8x8xf32, #tpu.memory_space<vmem>>, vector<8x8xf32>,
    return
  }
  func.func @transform_0(%arg0: i32, %arg1: memref<8x8xi32, #tpu.memory_space<smem>>, %arg2: memref<8xi32, #tpu.memory_space<smem>>) -> (i32, i32) {
    %c0_i32 = arith.constant 0 : i32
    %c0_i32_0 = arith.constant 0 : i32
    %c0_i32_1 = arith.constant 0 : i32
    return %c0_i32, %c0_i32_0 : i32, i32
  }
  func.func @transform_3(%arg0: i32, %arg1: memref<8x8xi32, #tpu.memory_space<smem>>, %arg2: memref<8xi32, #tpu.memory_space<smem>>) -> (i32, i32) {
    %c0_i32 = arith.constant 0 : i32
    %c0_i32_0 = arith.constant 0 : i32
    return %arg0, %c0_i32 : i32, i32
  }
}

</mosaic_0001>

<bundles_post_ra>
// kernel: tpu_custom_call.1
= control target key start
LH: loop header
LB: loop body
LE: loop exit
PB: predicated region body
PF: predicated region fallthrough
CT: control target
= control target key end

     0   :  { %s9065_s0 = inlined_call_operand.vmem [shape: s32[8,8], index: 0, kind: input, shape index: {}]   ;;  %s9066_s2 = inlined_call_operand.hbm [shape: f32[232,128], index: 2, kind: input, shape index: {}]   ;;  %s9067_s3 = inlined_call_operand.vmem [shape: f32[50,32], index: 3, kind: input, shape index: {}]   ;;  %s9068_s4 = inlined_call_operand.vmem [shape: f32[5,32], index: 4, kind: input, shape index: {}]   ;;  %s9069_s5 = inlined_call_operand.hbm [shape: f32[8,8], index: 5, kind: output, shape index: {}]   ;;  %s9070_s1 = inlined_call_operand.vmem [shape: s32[8], index: 1, kind: input, shape index: {}]  }
   0x1   :  { %9072 = sst [smem:[#allocation142_spill]] %s9069_s5  ;;  %s10_s20 = sshll.u32 %s9065_s0, 4  ;;  %s11_s20 = int_to_ptr.vmem [resolvable:$true] %s10_s20 }
   0x2   :  { %s14_s23 = sshll.u32 %s9070_s1, 4  ;;  %s7874_s24 = scalar_lea.vmem %s11_s20, 128  ;;  %s15_s23 = int_to_ptr.vmem [resolvable:$true] %s14_s23 }
   0x3   :  { %p7875_p0 = scmp.ne.s32.totalorder %s11_s20, %s7874_s24  ;;  %p7879_p1 = scmp.lt.s32.totalorder %s11_s20, %s11_s20 }
   0x4   :  { %p7880_p2 = scmp.lt.s32.totalorder %s7874_s24, %s7874_s24 }
   0x6   :  { %p7881_p3 = por %p7880_p2, %p7879_p1 }
   0x8   :  { %p7882_p4 = pnand %p7881_p3, %p7875_p0 }
   0xa   :  { %7885 = shalt.err (!%p7882_p4)  }
   0xb   :  { %s7950_s25 = smov [#allocation8]   ;;  %s7886_s26 = scalar_lea.vmem %s15_s23, 16 }
   0xc   :  { %13 = dma.vmem_to_smem %s11_s20, 128, %s7950_s25, [#allocation7] }
   0xd   :  { %p7887_p5 = scmp.ne.s32.totalorder %s15_s23, %s7886_s26  ;;  %p7891_p6 = scmp.lt.s32.totalorder %s15_s23, %s15_s23 }
   0xe   :  { %p7892_p7 = scmp.lt.s32.totalorder %s7886_s26, %s7886_s26 }
  0x10   :  { %p7893_p8 = por %p7892_p7, %p7891_p6 }
  0x12   :  { %p7894_p9 = pnand %p7893_p8, %p7887_p5 }
  0x14   :  { %7897 = shalt.err (!%p7894_p9)  }
  0x15   :  { %s7951_s0 = smov [#allocation9]  }
  0x16   :  { %17 = dma.vmem_to_smem %s15_s23, 16, %s7951_s0, [#allocation7] }
  0x17   :  { %7942 = dma.done.wait [#allocation7], 144 }
  0x18   :  { %7943 = vsyncadd [#allocation7], 4294967152 }
  0x19   :  { %19 = sfence }
  0x1a   :  { %20 = vsyncpa [#allocation11], 0 }
  0x1b   :  { %21 = vsyncpa [#allocation12], 0  ;;  %s7952_s1 = smov [#allocation10]   ;;  %s7898_s30 = scalar_lea.hbm %s9066_s2, 3712 }
  0x1c   :  { %s27_s27 = sshll.u32 %s7952_s1, 4  ;;  %p7899_p10 = scmp.ne.s32.totalorder %s9066_s2, %s7898_s30  ;;  %s28_s27 = int_to_ptr.vmem [resolvable:$true] %s27_s27 }
  0x1d   :  { %p7902_p11 = scmp.lt.u32.totalorder %s7898_s30, %s9066_s2 }
  0x1f   :  { %p7904_p12 = pnand %p7902_p11, %p7899_p10 }
  0x21   :  { %7907 = shalt.err (!%p7904_p12)
}
  0x22   :  { %s7908_s10 = scalar_lea.vmem %s28_s27, 3712  ;;  %p7913_p0 = scmp.lt.s32.totalorder %s28_s27, %s28_s27 }
  0x23   :  { %p7909_p13 = scmp.ne.s32.totalorder %s28_s27, %s7908_s10  ;;  %p7914_p1 = scmp.lt.s32.totalorder %s7908_s10, %s7908_s10 }
  0x25   :  { %p7915_p2 = por %p7914_p1, %p7913_p0 }
  0x27   :  { %p7916_p3 = pnand %p7915_p2, %p7909_p13 }
  0x29   :  { %7919 = shalt.err (!%p7916_p3)
}
  0x2a   :  { %s7953_s11 = smov 128   ;;  %s7954_s12 = smov 8  }
  0x2b   :  { %33 = dma.hbm_to_vmem [thread:$0]  %s9066_s2, 3712, %s28_s27, [#allocation11], %s7953_s11, %s7953_s11, %s7954_s12  }
  0x2c   :  { %7944 = dma.done.wait [#allocation11], 3712  }
  0x2d   :  { %7945 = vsyncadd [#allocation11], 4294963584  ;;  %s39_s15 = sld [smem:[#allocation8]]  ;;  %s6759_s16 = sld [smem:[#allocation8 + $0x1]] }
  0x2e   :  { %s6765_s17 = sld [smem:[#allocation8 + $0x2]]  ;;  %s6771_s18 = sld [smem:[#allocation8 + $0x3]] }
  0x2f   :  { %s8011_s19 = sld [smem:[#allocation8 + $0x4]]  ;;  %s8013_s20 = sld [smem:[#allocation8 + $0x5]] }
  0x30   :  { %s8015_s21 = sld [smem:[#allocation8 + $0x6]]  ;;  %s8017_s22 = sld [smem:[#allocation8 + $0x7]] }
  0x31   :  { %s8019_s23 = sld [smem:[#allocation9]]  ;;  %s8023_s25 = sld [smem:[#allocation8 + $0x81]] }
  0x32   :  { %s8021_s24 = sld [smem:[#allocation8 + $0x80]]  ;;  %s8025_s2 = sld [smem:[#allocation8 + $0x82]] }
  0x33   :  { %p40_p4 = scmp.gt.s32.totalorder %s39_s15, 0  ;;  %p6754_p5 = scmp.lt.s32.totalorder %s39_s15, 49 }
  0x34   :  { %p46_p6 = scmp.gt.s32.totalorder %s6759_s16, 0  ;;  %p6760_p7 = scmp.lt.s32.totalorder %s6759_s16, 49 }
  0x35   :  { %s9181_s15 = smov (!%p40_p4, %s39_s15), 0  ;;  %p52_p8 = scmp.gt.s32.totalorder %s6765_s17, 0 }
  0x36   :  { %s9183_s16 = smov (!%p46_p6, %s6759_s16), 0  ;;  %s9185_s15 = smov (!%p6754_p5, %s9181_s15), 49 }
  0x37   :  { %s9187_s16 = smov (!%p6760_p7, %s9183_s16), 49  ;;  %p6766_p9 = scmp.lt.s32.totalorder %s6765_s17, 49 }
  0x38   :  { %p58_p10 = scmp.gt.s32.totalorder %s6771_s18, 0  ;;  %p6772_p11 = scmp.lt.s32.totalorder %s6771_s18, 49 }
  0x39   :  { %s9189_s17 = smov (!%p52_p8, %s6765_s17), 0  ;;  %p64_p12 = scmp.gt.s32.totalorder %s8011_s19, 0 }
  0x3a   :  { %s9191_s18 = smov (!%p58_p10, %s6771_s18), 0  ;;  %s9193_s17 = smov (!%p6766_p9, %s9189_s17), 49 }
  0x3b   :  { %s9195_s18 = smov (!%p6772_p11, %s9191_s18), 49  ;;  %p6778_p13 = scmp.lt.s32.totalorder %s8011_s19, 49 }
  0x3c   :  { %p70_p0 = scmp.gt.s32.totalorder %s8013_s20, 0  ;;  %p6784_p1 = scmp.lt.s32.totalorder %s8013_s20, 49 }
  0x3d   :  { %s9197_s19 = smov (!%p64_p12, %s8011_s19), 0  ;;  %p76_p2 = scmp.gt.s32.totalorder %s8015_s21, 0 }
  0x3e   :  { %s9199_s20 = smov (!%p70_p0, %s8013_s20), 0  ;;  %s9201_s19 = smov (!%p6778_p13, %s9197_s19), 49 }
  0x3f   :  { %s9203_s20 = smov (!%p6784_p1, %s9199_s20), 49  ;;  %p6790_p3 = scmp.lt.s32.totalorder %s8015_s21, 49 }
  0x40   :  { %p82_p4 = scmp.gt.s32.totalorder %s8017_s22, 0  ;;  %p6796_p5 = scmp.lt.s32.totalorder %s8017_s22, 49 }
  0x41   :  { %s9205_s21 = smov (!%p76_p2, %s8015_s21), 0  ;;  %p87_p6 = scmp.gt.s32.totalorder %s8019_s23, 0 }
  0x42   :  { %s9207_s22 = smov (!%p82_p4, %s8017_s22), 0  ;;  %s9209_s21 = smov (!%p6790_p3, %s9205_s21), 49 }
  0x43   :  { %s9211_s22 = smov (!%p6796_p5, %s9207_s22), 49  ;;  %p6801_p7 = scmp.lt.s32.totalorder %s8019_s23, 4 }
  0x44   :  { %p94_p8 = scmp.gt.s32.totalorder %s8021_s24, 0  ;;  %p6807_p9 = scmp.lt.s32.totalorder %s8021_s24, 49 }
  0x45   :  { %s9213_s23 = smov (!%p87_p6, %s8019_s23), 0  ;;  %p100_p10 = scmp.gt.s32.totalorder %s8023_s25, 0 }
  0x46   :  { %s9215_s24 = smov (!%p94_p8, %s8021_s24), 0  ;;  %s9217_s23 = smov (!%p6801_p7, %s9213_s23), 4 }
  0x47   :  { %s9219_s24 = smov (!%p6807_p9, %s9215_s24), 49  ;;  %p6813_p11 = scmp.lt.s32.totalorder %s8023_s25, 49 }
  0x48   :  { %p106_p12 = scmp.gt.s32.totalorder %s8025_s2, 0  ;;  %p6819_p13 = scmp.lt.s32.totalorder %s8025_s2, 49 }
  0x49   :  { %s9221_s25 = smov (!%p100_p10, %s8023_s25), 0  ;;  %s6824_s26 = sld [smem:[#allocation8 + $0x83]] }
  0x4a   :  { %s9223_s2 = smov (!%p106_p12, %s8025_s2), 0  ;;  %s9225_s25 = smov (!%p6813_p11, %s9221_s25), 49 }
  0x4b   :  { %s9227_s2 = smov (!%p6819_p13, %s9223_s2), 49  ;;  %s6830_s0 = sld [smem:[#allocation8 + $0x84]] }
  0x4c   :  { %s6836_s1 = sld [smem:[#allocation8 + $0x85]]  ;;  %s6842_s27 = sld [smem:[#allocation8 + $0x86]] }
  0x4d   :  { %s8075_s28 = sld [smem:[#allocation8 + $0x87]]  ;;  %s8077_s29 = sld [smem:[#allocation9 + $0x1]] }
  0x4e   :  { %s8079_s30 = sld [smem:[#allocation8 + $0x100]]  ;;  %s8081_s6 = sld [smem:[#allocation8 + $0x101]] }
  0x4f   :  { %s8083_s7 = sld [smem:[#allocation8 + $0x102]]  ;;  %s8085_s8 = sld [smem:[#allocation8 + $0x103]] }
  0x50   :  { %s8087_s9 = sld [smem:[#allocation8 + $0x104]]  ;;  %s8089_s10 = sld [smem:[#allocation8 + $0x105]] }
  0x51   :  { %p112_p0 = scmp.gt.s32.totalorder %s6824_s26, 0  ;;  %p6825_p1 = scmp.lt.s32.totalorder %s6824_s26, 49 }
  0x52   :  { %p118_p2 = scmp.gt.s32.totalorder %s6830_s0, 0  ;;  %p6831_p3 = scmp.lt.s32.totalorder %s6830_s0, 49 }
  0x53   :  { %s9229_s26 = smov (!%p112_p0, %s6824_s26), 0  ;;  %p124_p4 = scmp.gt.s32.totalorder %s6836_s1, 0 }
  0x54   :  { %s9231_s0 = smov (!%p118_p2, %s6830_s0), 0  ;;  %s9233_s26 = smov (!%p6825_p1, %s9229_s26), 49 }
  0x55   :  { %s9235_s0 = smov (!%p6831_p3, %s9231_s0), 49  ;;  %p6837_p5 = scmp.lt.s32.totalorder %s6836_s1, 49 }
  0x56   :  { %p130_p6 = scmp.gt.s32.totalorder %s6842_s27, 0  ;;  %p6843_p7 = scmp.lt.s32.totalorder %s6842_s27, 49 }
  0x57   :  { %s9237_s1 = smov (!%p124_p4, %s6836_s1), 0  ;;  %p136_p8 = scmp.gt.s32.totalorder %s8075_s28, 0 }
  0x58   :  { %s9239_s27 = smov (!%p130_p6, %s6842_s27), 0  ;;  %s9241_s1 = smov (!%p6837_p5, %s9237_s1), 49 }
  0x59   :  { %s9243_s27 = smov (!%p6843_p7, %s9239_s27), 49  ;;  %p6849_p9 = scmp.lt.s32.totalorder %s8075_s28, 49 }
  0x5a   :  { %p141_p10 = scmp.gt.s32.totalorder %s8077_s29, 0  ;;  %p6855_p11 = scmp.lt.s32.totalorder %s8077_s29, 4 }
  0x5b   :  { %s9245_s28 = smov (!%p136_p8, %s8075_s28), 0  ;;  %p148_p12 = scmp.gt.s32.totalorder %s8079_s30, 0 }
  0x5c   :  { %s9247_s29 = smov (!%p141_p10, %s8077_s29), 0  ;;  %s9249_s28 = smov (!%p6849_p9, %s9245_s28), 49 }
  0x5d   :  { %9073 = sst [smem:[#allocation90_spill]] %s9249_s28  ;;  %s9251_s29 = smov (!%p6855_p11, %s9247_s29), 4 }
  0x5e   :  { %9074 = sst [smem:[#allocation91_spill]] %s9251_s29  ;;  %p6861_p13 = scmp.lt.s32.totalorder %s8079_s30, 49 }
  0x5f   :  { %p154_p0 = scmp.gt.s32.totalorder %s8081_s6, 0  ;;  %p6867_p1 = scmp.lt.s32.totalorder %s8081_s6, 49 }
  0x60   :  { %s9253_s30 = smov (!%p148_p12, %s8079_s30), 0  ;;  %p160_p2 = scmp.gt.s32.totalorder %s8083_s7, 0 }
  0x61   :  { %s9255_s6 = smov (!%p154_p0, %s8081_s6), 0  ;;  %s9257_s30 = smov (!%p6861_p13, %s9253_s30), 49 }
  0x62   :  { %9075 = sst [smem:[#allocation92_spill]] %s9257_s30  ;;  %s9259_s6 = smov (!%p6867_p1, %s9255_s6), 49 }
  0x63   :  { %9076 = sst [smem:[#allocation93_spill]] %s9259_s6  ;;  %p6873_p3 = scmp.lt.s32.totalorder %s8083_s7, 49 }
  0x64   :  { %p166_p4 = scmp.gt.s32.totalorder %s8085_s8, 0  ;;  %p6879_p5 = scmp.lt.s32.totalorder %s8085_s8, 49 }
  0x65   :  { %s9261_s7 = smov (!%p160_p2, %s8083_s7), 0  ;;  %p172_p6 = scmp.gt.s32.totalorder %s8087_s9, 0 }
  0x66   :  { %s9263_s8 = smov (!%p166_p4, %s8085_s8), 0  ;;  %s9265_s7 = smov (!%p6873_p3, %s9261_s7), 49 }
  0x67   :  { %9077 = sst [smem:[#allocation94_spill]] %s9265_s7  ;;  %s9267_s8 = smov (!%p6879_p5, %s9263_s8), 49 }
  0x68   :  { %9078 = sst [smem:[#allocation95_spill]] %s9267_s8  ;;  %p6885_p7 = scmp.lt.s32.totalorder %s8087_s9, 49 }
  0x69   :  { %p178_p8 = scmp.gt.s32.totalorder %s8089_s10, 0  ;;  %p6891_p9 = scmp.lt.s32.totalorder %s8089_s10, 49 }
  0x6a   :  { %s9269_s9 = smov (!%p172_p6, %s8087_s9), 0  ;;  %s6896_s11 = sld [smem:[#allocation8 + $0x106]] }
  0x6b   :  { %s9271_s10 = smov (!%p178_p8, %s8089_s10), 0  ;;  %s9273_s9 = smov (!%p6885_p7, %s9269_s9), 49 }
  0x6c   :  { %9079 = sst [smem:[#allocation96_spill]] %s9273_s9  ;;  %s9275_s10 = smov (!%p6891_p9, %s9271_s10), 49 }
  0x6d   :  { %9080 = sst [smem:[#allocation97_spill]] %s9275_s10  ;;  %s6902_s12 = sld [smem:[#allocation8 + $0x107]] }
  0x6e   :  { %s6908_s13 = sld [smem:[#allocation9 + $0x2]]  ;;  %s6914_s14 = sld [smem:[#allocation8 + $0x180]] }
  0x6f   :  { %s8139_s5 = sld [smem:[#allocation8 + $0x181]]  ;;  %s8141_s6 = sld [smem:[#allocation8 + $0x182]] }
  0x70   :  { %s8143_s7 = sld [smem:[#allocation8 + $0x183]]  ;;  %s8145_s8 = sld [smem:[#allocation8 + $0x184]] }
  0x71   :  { %s8147_s30 = sld [smem:[#allocation8 + $0x185]]  ;;  %s8149_s29 = sld [smem:[#allocation8 + $0x186]] }
  0x72   :  { %s8151_s28 = sld [smem:[#allocation8 + $0x187]]  ;;  %s8153_s9 = sld [smem:[#allocation9 + $0x3]] }
  0x73   :  { %p184_p10 = scmp.gt.s32.totalorder %s6896_s11, 0  ;;  %p6897_p11 = scmp.lt.s32.totalorder %s6896_s11, 49 }
  0x74   :  { %p190_p12 = scmp.gt.s32.totalorder %s6902_s12, 0  ;;  %p6903_p13 = scmp.lt.s32.totalorder %s6902_s12, 49 }
  0x75   :  { %s9277_s11 = smov (!%p184_p10, %s6896_s11), 0  ;;  %p195_p0 = scmp.gt.s32.totalorder %s6908_s13, 0 }
  0x76   :  { %s9279_s12 = smov (!%p190_p12, %s6902_s12), 0  ;;  %s9281_s11 = smov (!%p6897_p11, %s9277_s11), 49 }
  0x77   :  { %9081 = sst [smem:[#allocation98_spill]] %s9281_s11  ;;  %s9283_s12 = smov (!%p6903_p13, %s9279_s12), 49 }
  0x78   :  { %9082 = sst [smem:[#allocation99_spill]] %s9283_s12  ;;  %p6909_p1 = scmp.lt.s32.totalorder %s6908_s13, 4 }
  0x79   :  { %p202_p2 = scmp.gt.s32.totalorder %s6914_s14, 0  ;;  %p6915_p3 = scmp.lt.s32.totalorder %s6914_s14, 49 }
  0x7a   :  { %s9285_s13 = smov (!%p195_p0, %s6908_s13), 0  ;;  %p208_p4 = scmp.gt.s32.totalorder %s8139_s5, 0 }
  0x7b   :  { %s9287_s14 = smov (!%p202_p2, %s6914_s14), 0  ;;  %s9289_s13 = smov (!%p6909_p1, %s9285_s13), 4 }
  0x7c   :  { %9083 = sst [smem:[#allocation100_spill]] %s9289_s13  ;;  %s9291_s14 = smov (!%p6915_p3, %s9287_s14), 49 }
  0x7d   :  { %9084 = sst [smem:[#allocation101_spill]] %s9291_s14  ;;  %p6921_p5 = scmp.lt.s32.totalorder %s8139_s5, 49 }
  0x7e   :  { %p214_p6 = scmp.gt.s32.totalorder %s8141_s6, 0  ;;  %p6927_p7 = scmp.lt.s32.totalorder %s8141_s6, 49 }
  0x7f   :  { %s9293_s5 = smov (!%p208_p4, %s8139_s5), 0  ;;  %p220_p8 = scmp.gt.s32.totalorder %s8143_s7, 0 }
  0x80   :  { %s9295_s6 = smov (!%p214_p6, %s8141_s6), 0  ;;  %s9297_s5 = smov (!%p6921_p5, %s9293_s5), 49 }
  0x81   :  { %9085 = sst [smem:[#allocation102_spill]] %s9297_s5  ;;  %s9299_s6 = smov (!%p6927_p7, %s9295_s6), 49 }
  0x82   :  { %9086 = sst [smem:[#allocation103_spill]] %s9299_s6  ;;  %p6933_p9 = scmp.lt.s32.totalorder %s8143_s7, 49 }
  0x83   :  { %p226_p10 = scmp.gt.s32.totalorder %s8145_s8, 0  ;;  %p6939_p11 = scmp.lt.s32.totalorder %s8145_s8, 49 }
  0x84   :  { %s9301_s7 = smov (!%p220_p8, %s8143_s7), 0  ;;  %p232_p12 = scmp.gt.s32.totalorder %s8147_s30, 0 }
  0x85   :  { %s9303_s8 = smov (!%p226_p10, %s8145_s8), 0  ;;  %s9305_s7 = smov (!%p6933_p9, %s9301_s7), 49 }
  0x86   :  { %9087 = sst [smem:[#allocation104_spill]] %s9305_s7  ;;  %s9307_s8 = smov (!%p6939_p11, %s9303_s8), 49 }
  0x87   :  { %9088 = sst [smem:[#allocation105_spill]] %s9307_s8  ;;  %p6945_p13 = scmp.lt.s32.totalorder %s8147_s30, 49 }
  0x88   :  { %p238_p0 = scmp.gt.s32.totalorder %s8149_s29, 0  ;;  %p6951_p1 = scmp.lt.s32.totalorder %s8149_s29, 49 }
  0x89   :  { %s9309_s30 = smov (!%p232_p12, %s8147_s30), 0  ;;  %p244_p2 = scmp.gt.s32.totalorder %s8151_s28, 0 }
  0x8a   :  { %s9311_s29 = smov (!%p238_p0, %s8149_s29), 0  ;;  %s9313_s30 = smov (!%p6945_p13, %s9309_s30), 49 }
  0x8b   :  { %9089 = sst [smem:[#allocation106_spill]] %s9313_s30  ;;  %s9315_s29 = smov (!%p6951_p1, %s9311_s29), 49 }
  0x8c   :  { %9090 = sst [smem:[#allocation107_spill]] %s9315_s29  ;;  %p6957_p3 = scmp.lt.s32.totalorder %s8151_s28, 49 }
  0x8d   :  { %p249_p4 = scmp.gt.s32.totalorder %s8153_s9, 0  ;;  %p6963_p5 = scmp.lt.s32.totalorder %s8153_s9, 4 }
  0x8e   :  { %s9317_s28 = smov (!%p244_p2, %s8151_s28), 0  ;;  %s6968_s8 = sld [smem:[#allocation8 + $0x200]] }
  0x8f   :  { %s9319_s9 = smov (!%p249_p4, %s8153_s9), 0  ;;  %s9321_s28 = smov (!%p6957_p3, %s9317_s28), 49 }
  0x90   :  { %9091 = sst [smem:[#allocation108_spill]] %s9321_s28  ;;  %s9323_s9 = smov (!%p6963_p5, %s9319_s9), 4 }
  0x91   :  { %9092 = sst [smem:[#allocation109_spill]] %s9323_s9  ;;  %s6974_s7 = sld [smem:[#allocation8 + $0x201]] }
  0x92   :  { %s6980_s6 = sld [smem:[#allocation8 + $0x202]]  ;;  %s6986_s5 = sld [smem:[#allocation8 + $0x203]] }
  0x93   :  { %s8203_s14 = sld [smem:[#allocation8 + $0x204]]  ;;  %s8205_s13 = sld [smem:[#allocation8 + $0x205]] }
  0x94   :  { %s8207_s30 = sld [smem:[#allocation8 + $0x206]]  ;;  %s8209_s29 = sld [smem:[#allocation8 + $0x207]] }
  0x95   :  { %s8211_s12 = sld [smem:[#allocation9 + $0x4]]  ;;  %s8213_s11 = sld [smem:[#allocation8 + $0x280]] }
  0x96   :  { %s8215_s10 = sld [smem:[#allocation8 + $0x281]]  ;;  %s8217_s28 = sld [smem:[#allocation8 + $0x282]] }
  0x97   :  { %p256_p6 = scmp.gt.s32.totalorder %s6968_s8, 0  ;;  %p6969_p7 = scmp.lt.s32.totalorder %s6968_s8, 49 }
  0x98   :  { %p262_p8 = scmp.gt.s32.totalorder %s6974_s7, 0  ;;  %p6975_p9 = scmp.lt.s32.totalorder %s6974_s7, 49 }
  0x99   :  { %s9325_s8 = smov (!%p256_p6, %s6968_s8), 0  ;;  %p268_p10 = scmp.gt.s32.totalorder %s6980_s6, 0 }
  0x9a   :  { %s9327_s7 = smov (!%p262_p8, %s6974_s7), 0  ;;  %s9329_s8 = smov (!%p6969_p7, %s9325_s8), 49 }
  0x9b   :  { %9093 = sst [smem:[#allocation110_spill]] %s9329_s8  ;;  %s9331_s7 = smov (!%p6975_p9, %s9327_s7), 49 }
  0x9c   :  { %9094 = sst [smem:[#allocation111_spill]] %s9331_s7  ;;  %p6981_p11 = scmp.lt.s32.totalorder %s6980_s6, 49 }
  0x9d   :  { %p274_p12 = scmp.gt.s32.totalorder %s6986_s5, 0  ;;  %p6987_p13 = scmp.lt.s32.totalorder %s6986_s5, 49 }
  0x9e   :  { %s9333_s6 = smov (!%p268_p10, %s6980_s6), 0  ;;  %p280_p0 = scmp.gt.s32.totalorder %s8203_s14, 0 }
  0x9f   :  { %s9335_s5 = smov (!%p274_p12, %s6986_s5), 0  ;;  %s9337_s6 = smov (!%p6981_p11, %s9333_s6), 49 }
  0xa0   :  { %9095 = sst [smem:[#allocation112_spill]] %s9337_s6  ;;  %s9339_s5 = smov (!%p6987_p13, %s9335_s5), 49 }
  0xa1   :  { %9096 = sst [smem:[#allocation113_spill]] %s9339_s5  ;;  %p6993_p1 = scmp.lt.s32.totalorder %s8203_s14, 49 }
  0xa2   :  { %p286_p2 = scmp.gt.s32.totalorder %s8205_s13, 0  ;;  %p6999_p3 = scmp.lt.s32.totalorder %s8205_s13, 49 }
  0xa3   :  { %s9341_s14 = smov (!%p280_p0, %s8203_s14), 0  ;;  %p292_p4 = scmp.gt.s32.totalorder %s8207_s30, 0 }
  0xa4   :  { %s9343_s13 = smov (!%p286_p2, %s8205_s13), 0  ;;  %s9345_s14 = smov (!%p6993_p1, %s9341_s14), 49 }
  0xa5   :  { %9097 = sst [smem:[#allocation114_spill]] %s9345_s14  ;;  %s9347_s13 = smov (!%p6999_p3, %s9343_s13), 49 }
  0xa6   :  { %9098 = sst [smem:[#allocation115_spill]] %s9347_s13  ;;  %p7005_p5 = scmp.lt.s32.totalorder %s8207_s30, 49 }
  0xa7   :  { %p298_p6 = scmp.gt.s32.totalorder %s8209_s29, 0  ;;  %p7011_p7 = scmp.lt.s32.totalorder %s8209_s29, 49 }
  0xa8   :  { %s9349_s30 = smov (!%p292_p4, %s8207_s30), 0  ;;  %p303_p8 = scmp.gt.s32.totalorder %s8211_s12, 0 }
  0xa9   :  { %s9351_s29 = smov (!%p298_p6, %s8209_s29), 0  ;;  %s9353_s30 = smov (!%p7005_p5, %s9349_s30), 49 }
  0xaa   :  { %9099 = sst [smem:[#allocation116_spill]] %s9353_s30  ;;  %s9355_s29 = smov (!%p7011_p7, %s9351_s29), 49 }
  0xab   :  { %9100 = sst [smem:[#allocation117_spill]] %s9355_s29  ;;  %p7017_p9 = scmp.lt.s32.totalorder %s8211_s12, 4 }
  0xac   :  { %p310_p10 = scmp.gt.s32.totalorder %s8213_s11, 0  ;;  %p7023_p11 = scmp.lt.s32.totalorder %s8213_s11, 49 }
  0xad   :  { %s9357_s12 = smov (!%p303_p8, %s8211_s12), 0  ;;  %p316_p12 = scmp.gt.s32.totalorder %s8215_s10, 0 }
  0xae   :  { %s9359_s11 = smov (!%p310_p10, %s8213_s11), 0  ;;  %s9361_s12 = smov (!%p7017_p9, %s9357_s12), 4 }
  0xaf   :  { %9101 = sst [smem:[#allocation118_spill]] %s9361_s12  ;;  %s9363_s11 = smov (!%p7023_p11, %s9359_s11), 49 }
  0xb0   :  { %9102 = sst [smem:[#allocation119_spill]] %s9363_s11  ;;  %p7029_p13 = scmp.lt.s32.totalorder %s8215_s10, 49 }
  0xb1   :  { %p322_p0 = scmp.gt.s32.totalorder %s8217_s28, 0  ;;  %p7035_p1 = scmp.lt.s32.totalorder %s8217_s28, 49 }
  0xb2   :  { %s9365_s10 = smov (!%p316_p12, %s8215_s10), 0  ;;  %s7040_s29 = sld [smem:[#allocation8 + $0x283]] }
  0xb3   :  { %s9367_s28 = smov (!%p322_p0, %s8217_s28), 0  ;;  %s9369_s10 = smov (!%p7029_p13, %s9365_s10), 49 }
  0xb4   :  { %9103 = sst [smem:[#allocation120_spill]] %s9369_s10  ;;  %s9371_s28 = smov (!%p7035_p1, %s9367_s28), 49 }
  0xb5   :  { %9104 = sst [smem:[#allocation121_spill]] %s9371_s28  ;;  %s7046_s30 = sld [smem:[#allocation8 + $0x284]] }
  0xb6   :  { %s7052_s13 = sld [smem:[#allocation8 + $0x285]]  ;;  %s7058_s14 = sld [smem:[#allocation8 + $0x286]] }
  0xb7   :  { %s8267_s5 = sld [smem:[#allocation8 + $0x287]]  ;;  %s8269_s6 = sld [smem:[#allocation9 + $0x5]] }
  0xb8   :  { %s8271_s12 = sld [smem:[#allocation8 + $0x300]]  ;;  %s8273_s11 = sld [smem:[#allocation8 + $0x301]] }
  0xb9   :  { %s8275_s7 = sld [smem:[#allocation8 + $0x302]]  ;;  %s8277_s8 = sld [smem:[#allocation8 + $0x303]] }
  0xba   :  { %s8279_s9 = sld [smem:[#allocation8 + $0x304]]  ;;  %s8281_s10 = sld [smem:[#allocation8 + $0x305]] }
  0xbb   :  { %p328_p2 = scmp.gt.s32.totalorder %s7040_s29, 0  ;;  %p7041_p3 = scmp.lt.s32.totalorder %s7040_s29, 49 }
  0xbc   :  { %p334_p4 = scmp.gt.s32.totalorder %s7046_s30, 0  ;;  %p7047_p5 = scmp.lt.s32.totalorder %s7046_s30, 49 }
  0xbd   :  { %s9373_s29 = smov (!%p328_p2, %s7040_s29), 0  ;;  %p340_p6 = scmp.gt.s32.totalorder %s7052_s13, 0 }
  0xbe   :  { %s9375_s30 = smov (!%p334_p4, %s7046_s30), 0  ;;  %s9377_s29 = smov (!%p7041_p3, %s9373_s29), 49 }
  0xbf   :  { %9105 = sst [smem:[#allocation122_spill]] %s9377_s29  ;;  %s9379_s30 = smov (!%p7047_p5, %s9375_s30), 49 }
  0xc0   :  { %9106 = sst [smem:[#allocation123_spill]] %s9379_s30  ;;  %p7053_p7 = scmp.lt.s32.totalorder %s7052_s13, 49 }
  0xc1   :  { %p346_p8 = scmp.gt.s32.totalorder %s7058_s14, 0  ;;  %p7059_p9 = scmp.lt.s32.totalorder %s7058_s14, 49 }
  0xc2   :  { %s9381_s13 = smov (!%p340_p6, %s7052_s13), 0  ;;  %p352_p10 = scmp.gt.s32.totalorder %s8267_s5, 0 }
  0xc3   :  { %s9383_s14 = smov (!%p346_p8, %s7058_s14), 0  ;;  %s9385_s13 = smov (!%p7053_p7, %s9381_s13), 49 }
  0xc4   :  { %9107 = sst [smem:[#allocation124_spill]] %s9385_s13  ;;  %s9387_s14 = smov (!%p7059_p9, %s9383_s14), 49 }
  0xc5   :  { %9108 = sst [smem:[#allocation125_spill]] %s9387_s14  ;;  %p7065_p11 = scmp.lt.s32.totalorder %s8267_s5, 49 }
  0xc6   :  { %p357_p12 = scmp.gt.s32.totalorder %s8269_s6, 0  ;;  %p7071_p13 = scmp.lt.s32.totalorder %s8269_s6, 4 }
  0xc7   :  { %s9389_s5 = smov (!%p352_p10, %s8267_s5), 0  ;;  %p364_p0 = scmp.gt.s32.totalorder %s8271_s12, 0 }
  0xc8   :  { %s9391_s6 = smov (!%p357_p12, %s8269_s6), 0  ;;  %s9393_s5 = smov (!%p7065_p11, %s9389_s5), 49 }
  0xc9   :  { %9109 = sst [smem:[#allocation126_spill]] %s9393_s5  ;;  %s9395_s6 = smov (!%p7071_p13, %s9391_s6), 4 }
  0xca   :  { %9110 = sst [smem:[#allocation127_spill]] %s9395_s6  ;;  %p7077_p1 = scmp.lt.s32.totalorder %s8271_s12, 49 }
  0xcb   :  { %p370_p2 = scmp.gt.s32.totalorder %s8273_s11, 0  ;;  %p7083_p3 = scmp.lt.s32.totalorder %s8273_s11, 49 }
  0xcc   :  { %s9397_s12 = smov (!%p364_p0, %s8271_s12), 0  ;;  %p376_p4 = scmp.gt.s32.totalorder %s8275_s7, 0 }
  0xcd   :  { %s9399_s11 = smov (!%p370_p2, %s8273_s11), 0  ;;  %s9401_s12 = smov (!%p7077_p1, %s9397_s12), 49 }
  0xce   :  { %9111 = sst [smem:[#allocation128_spill]] %s9401_s12  ;;  %s9403_s11 = smov (!%p7083_p3, %s9399_s11), 49 }
  0xcf   :  { %9112 = sst [smem:[#allocation129_spill]] %s9403_s11  ;;  %p7089_p5 = scmp.lt.s32.totalorder %s8275_s7, 49 }
  0xd0   :  { %p382_p6 = scmp.gt.s32.totalorder %s8277_s8, 0  ;;  %p7095_p7 = scmp.lt.s32.totalorder %s8277_s8, 49 }
  0xd1   :  { %s9405_s7 = smov (!%p376_p4, %s8275_s7), 0  ;;  %p388_p8 = scmp.gt.s32.totalorder %s8279_s9, 0 }
  0xd2   :  { %s9407_s8 = smov (!%p382_p6, %s8277_s8), 0  ;;  %s9409_s7 = smov (!%p7089_p5, %s9405_s7), 49 }
  0xd3   :  { %9113 = sst [smem:[#allocation130_spill]] %s9409_s7  ;;  %s9411_s8 = smov (!%p7095_p7, %s9407_s8), 49 }
  0xd4   :  { %9114 = sst [smem:[#allocation131_spill]] %s9411_s8  ;;  %p7101_p9 = scmp.lt.s32.totalorder %s8279_s9, 49 }
  0xd5   :  { %p394_p10 = scmp.gt.s32.totalorder %s8281_s10, 0  ;;  %p7107_p11 = scmp.lt.s32.totalorder %s8281_s10, 49 }
  0xd6   :  { %s9413_s9 = smov (!%p388_p8, %s8279_s9), 0  ;;  %s7112_s11 = sld [smem:[#allocation8 + $0x306]] }
  0xd7   :  { %s9415_s10 = smov (!%p394_p10, %s8281_s10), 0  ;;  %s9417_s9 = smov (!%p7101_p9, %s9413_s9), 49 }
  0xd8   :  { %9115 = sst [smem:[#allocation132_spill]] %s9417_s9  ;;  %s9419_s10 = smov (!%p7107_p11, %s9415_s10), 49 }
  0xd9   :  { %s7118_s12 = sld [smem:[#allocation8 + $0x307]]  ;;  %s7124_s6 = sld [smem:[#allocation9 + $0x6]] }
  0xda   :  { %s7130_s5 = sld [smem:[#allocation8 + $0x380]]  ;;  %s8331_s14 = sld [smem:[#allocation8 + $0x381]] }
  0xdb   :  { %s8333_s13 = sld [smem:[#allocation8 + $0x382]]  ;;  %s8335_s7 = sld [smem:[#allocation8 + $0x383]] }
  0xdc   :  { %s8337_s8 = sld [smem:[#allocation8 + $0x384]]  ;;  %s8339_s30 = sld [smem:[#allocation8 + $0x385]] }
  0xdd   :  { %s8341_s29 = sld [smem:[#allocation8 + $0x386]]  ;;  %s8343_s28 = sld [smem:[#allocation8 + $0x387]] }
  0xde   :  { %s8345_s9 = sld [smem:[#allocation9 + $0x7]]  ;;  %p400_p12 = scmp.gt.s32.totalorder %s7112_s11, 0 }
  0xdf   :  { %p7113_p13 = scmp.lt.s32.totalorder %s7112_s11, 49  ;;  %p406_p0 = scmp.gt.s32.totalorder %s7118_s12, 0 }
  0xe0   :  { %p7119_p1 = scmp.lt.s32.totalorder %s7118_s12, 49  ;;  %s9421_s11 = smov (!%p400_p12, %s7112_s11), 0 }
  0xe1   :  { %s9423_s12 = smov (!%p406_p0, %s7118_s12), 0  ;;  %s9425_s11 = smov (!%p7113_p13, %s9421_s11), 49 }
  0xe2   :  { %s9427_s12 = smov (!%p7119_p1, %s9423_s12), 49  ;;  %p411_p2 = scmp.gt.s32.totalorder %s7124_s6, 0 }
  0xe3   :  { %p7125_p3 = scmp.lt.s32.totalorder %s7124_s6, 4  ;;  %p418_p4 = scmp.gt.s32.totalorder %s7130_s5, 0 }
  0xe4   :  { %p7131_p5 = scmp.lt.s32.totalorder %s7130_s5, 49  ;;  %s9429_s6 = smov (!%p411_p2, %s7124_s6), 0 }
  0xe5   :  { %s9431_s5 = smov (!%p418_p4, %s7130_s5), 0  ;;  %s9433_s6 = smov (!%p7125_p3, %s9429_s6), 4 }
  0xe6   :  { %s9435_s5 = smov (!%p7131_p5, %s9431_s5), 49  ;;  %p424_p6 = scmp.gt.s32.totalorder %s8331_s14, 0 }
  0xe7   :  { %9116 = sst [smem:[#allocation133_spill]] %s9435_s5  ;;  %p7137_p7 = scmp.lt.s32.totalorder %s8331_s14, 49 }
  0xe8   :  { %p430_p8 = scmp.gt.s32.totalorder %s8333_s13, 0  ;;  %p7143_p9 = scmp.lt.s32.totalorder %s8333_s13, 49 }
  0xe9   :  { %s9437_s14 = smov (!%p424_p6, %s8331_s14), 0  ;;  %p436_p10 = scmp.gt.s32.totalorder %s8335_s7, 0 }
  0xea   :  { %s9439_s13 = smov (!%p430_p8, %s8333_s13), 0  ;;  %s9441_s14 = smov (!%p7137_p7, %s9437_s14), 49 }
  0xeb   :  { %9117 = sst [smem:[#allocation134_spill]] %s9441_s14  ;;  %s9443_s13 = smov (!%p7143_p9, %s9439_s13), 49 }
  0xec   :  { %9118 = sst [smem:[#allocation135_spill]] %s9443_s13  ;;  %p7149_p11 = scmp.lt.s32.totalorder %s8335_s7, 49 }
  0xed   :  { %p442_p12 = scmp.gt.s32.totalorder %s8337_s8, 0  ;;  %p7155_p13 = scmp.lt.s32.totalorder %s8337_s8, 49 }
  0xee   :  { %s9445_s7 = smov (!%p436_p10, %s8335_s7), 0  ;;  %p448_p0 = scmp.gt.s32.totalorder %s8339_s30, 0 }
  0xef   :  { %s9447_s8 = smov (!%p442_p12, %s8337_s8), 0  ;;  %s9449_s7 = smov (!%p7149_p11, %s9445_s7), 49 }
  0xf0   :  { %9119 = sst [smem:[#allocation136_spill]] %s9449_s7  ;;  %s9451_s8 = smov (!%p7155_p13, %s9447_s8), 49 }
  0xf1   :  { %9120 = sst [smem:[#allocation137_spill]] %s9451_s8  ;;  %p7161_p1 = scmp.lt.s32.totalorder %s8339_s30, 49 }
  0xf2   :  { %p454_p2 = scmp.gt.s32.totalorder %s8341_s29, 0  ;;  %p7167_p3 = scmp.lt.s32.totalorder %s8341_s29, 49 }
  0xf3   :  { %s9453_s30 = smov (!%p448_p0, %s8339_s30), 0  ;;  %p460_p4 = scmp.gt.s32.totalorder %s8343_s28, 0 }
  0xf4   :  { %s9455_s29 = smov (!%p454_p2, %s8341_s29), 0  ;;  %s9457_s30 = smov (!%p7161_p1, %s9453_s30), 49 }
  0xf5   :  { %9121 = sst [smem:[#allocation138_spill]] %s9457_s30  ;;  %s9459_s29 = smov (!%p7167_p3, %s9455_s29), 49 }
  0xf6   :  { %9122 = sst [smem:[#allocation139_spill]] %s9459_s29  ;;  %p7173_p5 = scmp.lt.s32.totalorder %s8343_s28, 49 }
  0xf7   :  { %p465_p6 = scmp.gt.s32.totalorder %s8345_s9, 0  ;;  %p7179_p7 = scmp.lt.s32.totalorder %s8345_s9, 4 }
  0xf8   :  { %s9461_s28 = smov (!%p460_p4, %s8343_s28), 0  ;;  %s469_s13 = scalar_lea.vmem %s9067_s3, %s9185_s15 }
  0xf9   :  { %s9463_s9 = smov (!%p465_p6, %s8345_s9), 0  ;;  %s9465_s28 = smov (!%p7173_p5, %s9461_s28), 49  ;;  %v487_v0 = vld [vmem:[%s469_s13] sm:$0x1] }
  0xfa   :  { %9123 = sst [smem:[#allocation140_spill]] %s9465_s28  ;;  %s9467_s9 = smov (!%p7179_p7, %s9463_s9), 4  ;;  %488 = vst [vmem:[#allocation2] sm:$0x1] %v487_v0 }
  0xfb   :  { %9124 = sst [smem:[#allocation141_spill]] %s9467_s9 }
  0xfc   :  { %513 = vsyncadd [#allocation6], 16  ;;  %s514_s14 = scalar_lea.vmem %s9067_s3, %s9187_s16 }
  0xfd   :  { %v533_v1 = vld [vmem:[%s514_s14] sm:$0x1] }
  0xfe   :  { %534 = vst [vmem:[#allocation2 + $0x8] sm:$0x1] %v533_v1 }
  0xff   :  { %559 = vsyncadd [#allocation6], 16  ;;  %s560_s9 = scalar_lea.vmem %s9067_s3, %s9193_s17 }
 0x100   :  { %v579_v2 = vld [vmem:[%s560_s9] sm:$0x1] }
 0x101   :  { %580 = vst [vmem:[#allocation2 + $0x10] sm:$0x1] %v579_v2 }
 0x102   :  { %605 = vsyncadd [#allocation6], 16  ;;  %s606_s8 = scalar_lea.vmem %s9067_s3, %s9195_s18 }
 0x103   :  { %v625_v3 = vld [vmem:[%s606_s8] sm:$0x1] }
 0x104   :  { %626 = vst [vmem:[#allocation2 + $0x18] sm:$0x1] %v625_v3 }
 0x105   :  { %651 = vsyncadd [#allocation6], 16  ;;  %s652_s30 = scalar_lea.vmem %s9067_s3, %s9201_s19 }
 0x106   :  { %v671_v4 = vld [vmem:[%s652_s30] sm:$0x1] }
 0x107   :  { %672 = vst [vmem:[#allocation2 + $0x20] sm:$0x1] %v671_v4 }
 0x108   :  { %697 = vsyncadd [#allocation6], 16  ;;  %s698_s28 = scalar_lea.vmem %s9067_s3, %s9203_s20 }
 0x109   :  { %v717_v5 = vld [vmem:[%s698_s28] sm:$0x1] }
 0x10a   :  { %718 = vst [vmem:[#allocation2 + $0x28] sm:$0x1] %v717_v5 }
 0x10b   :  { %743 = vsyncadd [#allocation6], 16  ;;  %s744_s13 = scalar_lea.vmem %s9067_s3, %s9209_s21 }
 0x10c   :  { %v763_v6 = vld [vmem:[%s744_s13] sm:$0x1] }
 0x10d   :  { %764 = vst [vmem:[#allocation2 + $0x30] sm:$0x1] %v763_v6 }
 0x10e   :  { %789 = vsyncadd [#allocation6], 16  ;;  %s790_s15 = scalar_lea.vmem %s9067_s3, %s9211_s22 }
 0x10f   :  { %v809_v7 = vld [vmem:[%s790_s15] sm:$0x1] }
 0x110   :  { %810 = vst [vmem:[#allocation2 + $0x38] sm:$0x1] %v809_v7 }
 0x111   :  { %835 = vsyncadd [#allocation6], 16  ;;  %s836_s8 = scalar_lea.vmem %s9068_s4, %s9217_s23 }
 0x112   :  { %v854_v8 = vld [vmem:[%s836_s8] sm:$0x1] }
 0x113   :  { %855 = vst [vmem:[#allocation3] sm:$0x1] %v854_v8 }
 0x114   :  { %880 = vsyncadd [#allocation6], 16  ;;  %s881_s29 = scalar_lea.vmem %s9067_s3, %s9219_s24 }
 0x115   :  { %v900_v9 = vld [vmem:[%s881_s29] sm:$0x1] }
 0x116   :  { %901 = vst [vmem:[#allocation2 + $0x1] sm:$0x1] %v900_v9 }
 0x117   :  { %926 = vsyncadd [#allocation6], 16  ;;  %s927_s5 = scalar_lea.vmem %s9067_s3, %s9225_s25 }
 0x118   :  { %v946_v10 = vld [vmem:[%s927_s5] sm:$0x1] }
 0x119   :  { %947 = vst [vmem:[#allocation2 + $0x9] sm:$0x1] %v946_v10 }
 0x11a   :  { %972 = vsyncadd [#allocation6], 16  ;;  %s973_s28 = scalar_lea.vmem %s9067_s3, %s9227_s2 }
 0x11b   :  { %v992_v11 = vld [vmem:[%s973_s28] sm:$0x1] }
 0x11c   :  { %993 = vst [vmem:[#allocation2 + $0x11] sm:$0x1] %v992_v11 }
 0x11d   :  { %1018 = vsyncadd [#allocation6], 16  ;;  %s1019_s9 = scalar_lea.vmem %s9067_s3, %s9233_s26 }
 0x11e   :  { %v1038_v12 = vld [vmem:[%s1019_s9] sm:$0x1] }
 0x11f   :  { %1039 = vst [vmem:[#allocation2 + $0x19] sm:$0x1] %v1038_v12 }
 0x120   :  { %1064 = vsyncadd [#allocation6], 16  ;;  %s1065_s19 = scalar_lea.vmem %s9067_s3, %s9235_s0 }
 0x121   :  { %v1084_v13 = vld [vmem:[%s1065_s19] sm:$0x1] }
 0x122   :  { %1085 = vst [vmem:[#allocation2 + $0x21] sm:$0x1] %v1084_v13 }
 0x123   :  { %1110 = vsyncadd [#allocation6], 16  ;;  %s1111_s15 = scalar_lea.vmem %s9067_s3, %s9241_s1 }
 0x124   :  { %v1130_v14 = vld [vmem:[%s1111_s15] sm:$0x1] }
 0x125   :  { %1131 = vst [vmem:[#allocation2 + $0x29] sm:$0x1] %v1130_v14 }
 0x126   :  { %1156 = vsyncadd [#allocation6], 16  ;;  %s1157_s7 = scalar_lea.vmem %s9067_s3, %s9243_s27 }
 0x127   :  { %v1176_v15 = vld [vmem:[%s1157_s7] sm:$0x1] }
 0x128   :  { %1177 = vst [vmem:[#allocation2 + $0x31] sm:$0x1] %v1176_v15 }
 0x129   :  { %1202 = vsyncadd [#allocation6], 16  ;;  %s9125_s0 = sld [smem:[#allocation90_spill]] }
 0x12f   :  { %s1203_s16 = scalar_lea.vmem %s9067_s3, %s9125_s0 }
 0x130   :  { %v1222_v16 = vld [vmem:[%s1203_s16] sm:$0x1] }
 0x131   :  { %1223 = vst [vmem:[#allocation2 + $0x39] sm:$0x1] %v1222_v16 }
 0x132   :  { %1248 = vsyncadd [#allocation6], 16  ;;  %s9126_s1 = sld [smem:[#allocation91_spill]] }
 0x138   :  { %s1249_s30 = scalar_lea.vmem %s9068_s4, %s9126_s1 }
 0x139   :  { %v1268_v17 = vld [vmem:[%s1249_s30] sm:$0x1] }
 0x13a   :  { %1269 = vst [vmem:[#allocation3 + $0x1] sm:$0x1] %v1268_v17 }
 0x13b   :  { %1294 = vsyncadd [#allocation6], 16  ;;  %s9127_s27 = sld [smem:[#allocation92_spill]] }
 0x141   :  { %s1295_s17 = scalar_lea.vmem %s9067_s3, %s9127_s27 }
 0x142   :  { %v1314_v18 = vld [vmem:[%s1295_s17] sm:$0x1] }
 0x143   :  { %1315 = vst [vmem:[#allocation2 + $0x2] sm:$0x1] %v1314_v18 }
 0x144   :  { %1340 = vsyncadd [#allocation6], 16  ;;  %s9128_s28 = sld [smem:[#allocation93_spill]] }
 0x14a   :  { %s1341_s9 = scalar_lea.vmem %s9067_s3, %s9128_s28 }
 0x14b   :  { %v1360_v19 = vld [vmem:[%s1341_s9] sm:$0x1] }
 0x14c   :  { %1361 = vst [vmem:[#allocation2 + $0xa] sm:$0x1] %v1360_v19 }
 0x14d   :  { %1386 = vsyncadd [#allocation6], 16  ;;  %s9129_s25 = sld [smem:[#allocation94_spill]] }
 0x153   :  { %s1387_s2 = scalar_lea.vmem %s9067_s3, %s9129_s25 }
 0x154   :  { %v1406_v20 = vld [vmem:[%s1387_s2] sm:$0x1] }
 0x155   :  { %1407 = vst [vmem:[#allocation2 + $0x12] sm:$0x1] %v1406_v20 }
 0x156   :  { %1432 = vsyncadd [#allocation6], 16  ;;  %s9130_s14 = sld [smem:[#allocation95_spill]] }
 0x15c   :  { %s1433_s20 = scalar_lea.vmem %s9067_s3, %s9130_s14 }
 0x15d   :  { %v1452_v21 = vld [vmem:[%s1433_s20] sm:$0x1] }
 0x15e   :  { %1453 = vst [vmem:[#allocation2 + $0x1a] sm:$0x1] %v1452_v21 }
 0x15f   :  { %1478 = vsyncadd [#allocation6], 16  ;;  %s9131_s7 = sld [smem:[#allocation96_spill]] }
 0x165   :  { %s1479_s21 = scalar_lea.vmem %s9067_s3, %s9131_s7 }
 0x166   :  { %v1498_v22 = vld [vmem:[%s1479_s21] sm:$0x1] }
 0x167   :  { %1499 = vst [vmem:[#allocation2 + $0x22] sm:$0x1] %v1498_v22 }
 0x168   :  { %1524 = vsyncadd [#allocation6], 16  ;;  %s9132_s16 = sld [smem:[#allocation97_spill]] }
 0x16e   :  { %s1525_s22 = scalar_lea.vmem %s9067_s3, %s9132_s16 }
 0x16f   :  { %v1544_v23 = vld [vmem:[%s1525_s22] sm:$0x1] }
 0x170   :  { %1545 = vst [vmem:[#allocation2 + $0x2a] sm:$0x1] %v1544_v23 }
 0x171   :  { %1570 = vsyncadd [#allocation6], 16  ;;  %s9133_s30 = sld [smem:[#allocation98_spill]] }
 0x177   :  { %s1571_s23 = scalar_lea.vmem %s9067_s3, %s9133_s30 }
 0x178   :  { %v1590_v24 = vld [vmem:[%s1571_s23] sm:$0x1] }
 0x179   :  { %1591 = vst [vmem:[#allocation2 + $0x32] sm:$0x1] %v1590_v24 }
 0x17a   :  { %1616 = vsyncadd [#allocation6], 16  ;;  %s9134_s17 = sld [smem:[#allocation99_spill]] }
 0x180   :  { %s1617_s18 = scalar_lea.vmem %s9067_s3, %s9134_s17 }
 0x181   :  { %v1636_v25 = vld [vmem:[%s1617_s18] sm:$0x1] }
 0x182   :  { %1637 = vst [vmem:[#allocation2 + $0x3a] sm:$0x1] %v1636_v25 }
 0x183   :  { %1662 = vsyncadd [#allocation6], 16  ;;  %s9135_s9 = sld [smem:[#allocation100_spill]] }
 0x189   :  { %s1663_s19 = scalar_lea.vmem %s9068_s4, %s9135_s9 }
 0x18a   :  { %v1682_v26 = vld [vmem:[%s1663_s19] sm:$0x1] }
 0x18b   :  { %1683 = vst [vmem:[#allocation3 + $0x2] sm:$0x1] %v1682_v26 }
 0x18c   :  { %1708 = vsyncadd [#allocation6], 16  ;;  %s9136_s2 = sld [smem:[#allocation101_spill]] }
 0x192   :  { %s1709_s26 = scalar_lea.vmem %s9067_s3, %s9136_s2 }
 0x193   :  { %v1728_v27 = vld [vmem:[%s1709_s26] sm:$0x1] }
 0x194   :  { %1729 = vst [vmem:[#allocation2 + $0x3] sm:$0x1] %v1728_v27 }
 0x195   :  { %1754 = vsyncadd [#allocation6], 16  ;;  %s9137_s20 = sld [smem:[#allocation102_spill]] }
 0x19b   :  { %s1755_s8 = scalar_lea.vmem %s9067_s3, %s9137_s20 }
 0x19c   :  { %v1774_v28 = vld [vmem:[%s1755_s8] sm:$0x1] }
 0x19d   :  { %1775 = vst [vmem:[#allocation2 + $0xb] sm:$0x1] %v1774_v28 }
 0x19e   :  { %1800 = vsyncadd [#allocation6], 16  ;;  %s9138_s21 = sld [smem:[#allocation103_spill]] }
 0x1a4   :  { %s1801_s29 = scalar_lea.vmem %s9067_s3, %s9138_s21 }
 0x1a5   :  { %v1820_v29 = vld [vmem:[%s1801_s29] sm:$0x1] }
 0x1a6   :  { %1821 = vst [vmem:[#allocation2 + $0x13] sm:$0x1] %v1820_v29 }
 0x1a7   :  { %1846 = vsyncadd [#allocation6], 16  ;;  %s9139_s22 = sld [smem:[#allocation104_spill]] }
 0x1ad   :  { %s1847_s5 = scalar_lea.vmem %s9067_s3, %s9139_s22 }
 0x1ae   :  { %v1866_v30 = vld [vmem:[%s1847_s5] sm:$0x1] }
 0x1af   :  { %1867 = vst [vmem:[#allocation2 + $0x1b] sm:$0x1] %v1866_v30 }
 0x1b0   :  { %1892 = vsyncadd [#allocation6], 16  ;;  %s9140_s23 = sld [smem:[#allocation105_spill]] }
 0x1b6   :  { %s1893_s24 = scalar_lea.vmem %s9067_s3, %s9140_s23 }
 0x1b7   :  { %v1912_v31 = vld [vmem:[%s1893_s24] sm:$0x1] }
 0x1b8   :  { %1913 = vst [vmem:[#allocation2 + $0x23] sm:$0x1] %v1912_v31 }
 0x1b9   :  { %1938 = vsyncadd [#allocation6], 16  ;;  %s9141_s18 = sld [smem:[#allocation106_spill]] }
 0x1bf   :  { %s1939_s13 = scalar_lea.vmem %s9067_s3, %s9141_s18 }
 0x1c0   :  { %v1958_v32 = vld [vmem:[%s1939_s13] sm:$0x1] }
 0x1c1   :  { %1959 = vst [vmem:[#allocation2 + $0x2b] sm:$0x1] %v1958_v32 }
 0x1c2   :  { %1984 = vsyncadd [#allocation6], 16  ;;  %s9142_s19 = sld [smem:[#allocation107_spill]] }
 0x1c8   :  { %s1985_s15 = scalar_lea.vmem %s9067_s3, %s9142_s19 }
 0x1c9   :  { %v2004_v33 = vld [vmem:[%s1985_s15] sm:$0x1] }
 0x1ca   :  { %2005 = vst [vmem:[#allocation2 + $0x33] sm:$0x1] %v2004_v33 }
 0x1cb   :  { %2030 = vsyncadd [#allocation6], 16  ;;  %s9143_s26 = sld [smem:[#allocation108_spill]] }
 0x1d1   :  { %s2031_s0 = scalar_lea.vmem %s9067_s3, %s9143_s26 }
 0x1d2   :  { %v2050_v34 = vld [vmem:[%s2031_s0] sm:$0x1] }
 0x1d3   :  { %2051 = vst [vmem:[#allocation2 + $0x3b] sm:$0x1] %v2050_v34 }
 0x1d4   :  { %2076 = vsyncadd [#allocation6], 16  ;;  %s9144_s8 = sld [smem:[#allocation109_spill]] }
 0x1da   :  { %s2077_s1 = scalar_lea.vmem %s9068_s4, %s9144_s8 }
 0x1db   :  { %v2096_v35 = vld [vmem:[%s2077_s1] sm:$0x1] }
 0x1dc   :  { %2097 = vst [vmem:[#allocation3 + $0x3] sm:$0x1] %v2096_v35 }
 0x1dd   :  { %2122 = vsyncadd [#allocation6], 16  ;;  %s9145_s29 = sld [smem:[#allocation110_spill]] }
 0x1e3   :  { %s2123_s27 = scalar_lea.vmem %s9067_s3, %s9145_s29 }
 0x1e4   :  { %v2142_v36 = vld [vmem:[%s2123_s27] sm:$0x1] }
 0x1e5   :  { %2143 = vst [vmem:[#allocation2 + $0x4] sm:$0x1] %v2142_v36 }
 0x1e6   :  { %2168 = vsyncadd [#allocation6], 16  ;;  %s9146_s5 = sld [smem:[#allocation111_spill]] }
 0x1ec   :  { %s2169_s28 = scalar_lea.vmem %s9067_s3, %s9146_s5 }
 0x1ed   :  { %v2188_v37 = vld [vmem:[%s2169_s28] sm:$0x1] }
 0x1ee   :  { %2189 = vst [vmem:[#allocation2 + $0xc] sm:$0x1] %v2188_v37 }
 0x1ef   :  { %2214 = vsyncadd [#allocation6], 16  ;;  %s9147_s24 = sld [smem:[#allocation112_spill]] }
 0x1f5   :  { %s2215_s25 = scalar_lea.vmem %s9067_s3, %s9147_s24 }
 0x1f6   :  { %v2234_v38 = vld [vmem:[%s2215_s25] sm:$0x1] }
 0x1f7   :  { %2235 = vst [vmem:[#allocation2 + $0x14] sm:$0x1] %v2234_v38 }
 0x1f8   :  { %2260 = vsyncadd [#allocation6], 16  ;;  %s9148_s13 = sld [smem:[#allocation113_spill]] }
 0x1fe   :  { %s2261_s14 = scalar_lea.vmem %s9067_s3, %s9148_s13 }
 0x1ff   :  { %v2280_v39 = vld [vmem:[%s2261_s14] sm:$0x1] }
 0x200   :  { %2281 = vst [vmem:[#allocation2 + $0x1c] sm:$0x1] %v2280_v39 }
 0x201   :  { %2306 = vsyncadd [#allocation6], 16  ;;  %s9149_s15 = sld [smem:[#allocation114_spill]] }
 0x207   :  { %s2307_s7 = scalar_lea.vmem %s9067_s3, %s9149_s15 }
 0x208   :  { %v2326_v40 = vld [vmem:[%s2307_s7] sm:$0x1] }
 0x209   :  { %2327 = vst [vmem:[#allocation2 + $0x24] sm:$0x1] %v2326_v40 }
 0x20a   :  { %2352 = vsyncadd [#allocation6], 16  ;;  %s9150_s0 = sld [smem:[#allocation115_spill]] }
 0x210   :  { %s2353_s16 = scalar_lea.vmem %s9067_s3, %s9150_s0 }
 0x211   :  { %v2372_v41 = vld [vmem:[%s2353_s16] sm:$0x1] }
 0x212   :  { %2373 = vst [vmem:[#allocation2 + $0x2c] sm:$0x1] %v2372_v41 }
 0x213   :  { %2398 = vsyncadd [#allocation6], 16  ;;  %s9151_s1 = sld [smem:[#allocation116_spill]] }
 0x219   :  { %s2399_s30 = scalar_lea.vmem %s9067_s3, %s9151_s1 }
 0x21a   :  { %v2418_v42 = vld [vmem:[%s2399_s30] sm:$0x1] }
 0x21b   :  { %2419 = vst [vmem:[#allocation2 + $0x34] sm:$0x1] %v2418_v42 }
 0x21c   :  { %2444 = vsyncadd [#allocation6], 16  ;;  %s9152_s27 = sld [smem:[#allocation117_spill]] }
 0x222   :  { %s2445_s17 = scalar_lea.vmem %s9067_s3, %s9152_s27 }
 0x223   :  { %v2464_v43 = vld [vmem:[%s2445_s17] sm:$0x1] }
 0x224   :  { %2465 = vst [vmem:[#allocation2 + $0x3c] sm:$0x1] %v2464_v43 }
 0x225   :  { %2490 = vsyncadd [#allocation6], 16  ;;  %s9153_s28 = sld [smem:[#allocation118_spill]] }
 0x22b   :  { %s2491_s9 = scalar_lea.vmem %s9068_s4, %s9153_s28 }
 0x22c   :  { %v2510_v44 = vld [vmem:[%s2491_s9] sm:$0x1] }
 0x22d   :  { %2511 = vst [vmem:[#allocation3 + $0x4] sm:$0x1] %v2510_v44 }
 0x22e   :  { %2536 = vsyncadd [#allocation6], 16  ;;  %s9154_s25 = sld [smem:[#allocation119_spill]] }
 0x234   :  { %s2537_s2 = scalar_lea.vmem %s9067_s3, %s9154_s25 }
 0x235   :  { %v2556_v45 = vld [vmem:[%s2537_s2] sm:$0x1] }
 0x236   :  { %2557 = vst [vmem:[#allocation2 + $0x5] sm:$0x1] %v2556_v45 }
 0x237   :  { %2582 = vsyncadd [#allocation6], 16  ;;  %s9155_s14 = sld [smem:[#allocation120_spill]] }
 0x23d   :  { %s2583_s20 = scalar_lea.vmem %s9067_s3, %s9155_s14 }
 0x23e   :  { %v2602_v46 = vld [vmem:[%s2583_s20] sm:$0x1] }
 0x23f   :  { %2603 = vst [vmem:[#allocation2 + $0xd] sm:$0x1] %v2602_v46 }
 0x240   :  { %2628 = vsyncadd [#allocation6], 16  ;;  %s9156_s7 = sld [smem:[#allocation121_spill]] }
 0x246   :  { %s2629_s21 = scalar_lea.vmem %s9067_s3, %s9156_s7 }
 0x247   :  { %v2648_v47 = vld [vmem:[%s2629_s21] sm:$0x1] }
 0x248   :  { %2649 = vst [vmem:[#allocation2 + $0x15] sm:$0x1] %v2648_v47 }
 0x249   :  { %2674 = vsyncadd [#allocation6], 16  ;;  %s9157_s16 = sld [smem:[#allocation122_spill]] }
 0x24f   :  { %s2675_s22 = scalar_lea.vmem %s9067_s3, %s9157_s16 }
 0x250   :  { %v2694_v48 = vld [vmem:[%s2675_s22] sm:$0x1] }
 0x251   :  { %2695 = vst [vmem:[#allocation2 + $0x1d] sm:$0x1] %v2694_v48 }
 0x252   :  { %2720 = vsyncadd [#allocation6], 16  ;;  %s9158_s30 = sld [smem:[#allocation123_spill]] }
 0x258   :  { %s2721_s23 = scalar_lea.vmem %s9067_s3, %s9158_s30 }
 0x259   :  { %v2740_v49 = vld [vmem:[%s2721_s23] sm:$0x1] }
 0x25a   :  { %2741 = vst [vmem:[#allocation2 + $0x25] sm:$0x1] %v2740_v49 }
 0x25b   :  { %2766 = vsyncadd [#allocation6], 16  ;;  %s9159_s17 = sld [smem:[#allocation124_spill]] }
 0x261   :  { %s2767_s18 = scalar_lea.vmem %s9067_s3, %s9159_s17 }
 0x262   :  { %v2786_v50 = vld [vmem:[%s2767_s18] sm:$0x1] }
 0x263   :  { %2787 = vst [vmem:[#allocation2 + $0x2d] sm:$0x1] %v2786_v50 }
 0x264   :  { %2812 = vsyncadd [#allocation6], 16  ;;  %s9160_s9 = sld [smem:[#allocation125_spill]] }
 0x26a   :  { %s2813_s19 = scalar_lea.vmem %s9067_s3, %s9160_s9 }
 0x26b   :  { %v2832_v51 = vld [vmem:[%s2813_s19] sm:$0x1] }
 0x26c   :  { %2833 = vst [vmem:[#allocation2 + $0x35] sm:$0x1] %v2832_v51 }
 0x26d   :  { %2858 = vsyncadd [#allocation6], 16  ;;  %s9161_s2 = sld [smem:[#allocation126_spill]] }
 0x273   :  { %s2859_s26 = scalar_lea.vmem %s9067_s3, %s9161_s2 }
 0x274   :  { %v2878_v52 = vld [vmem:[%s2859_s26] sm:$0x1] }
 0x275   :  { %2879 = vst [vmem:[#allocation2 + $0x3d] sm:$0x1] %v2878_v52 }
 0x276   :  { %2904 = vsyncadd [#allocation6], 16  ;;  %s9162_s20 = sld [smem:[#allocation127_spill]] }
 0x27c   :  { %s2905_s8 = scalar_lea.vmem %s9068_s4, %s9162_s20 }
 0x27d   :  { %v2924_v53 = vld [vmem:[%s2905_s8] sm:$0x1] }
 0x27e   :  { %2925 = vst [vmem:[#allocation3 + $0x5] sm:$0x1] %v2924_v53 }
 0x27f   :  { %2950 = vsyncadd [#allocation6], 16  ;;  %s9163_s21 = sld [smem:[#allocation128_spill]] }
 0x285   :  { %s2951_s29 = scalar_lea.vmem %s9067_s3, %s9163_s21 }
 0x286   :  { %v2970_v54 = vld [vmem:[%s2951_s29] sm:$0x1] }
 0x287   :  { %2971 = vst [vmem:[#allocation2 + $0x6] sm:$0x1] %v2970_v54 }
 0x288   :  { %2996 = vsyncadd [#allocation6], 16  ;;  %s9164_s22 = sld [smem:[#allocation129_spill]] }
 0x28e   :  { %s2997_s5 = scalar_lea.vmem %s9067_s3, %s9164_s22 }
 0x28f   :  { %v3016_v55 = vld [vmem:[%s2997_s5] sm:$0x1] }
 0x290   :  { %3017 = vst [vmem:[#allocation2 + $0xe] sm:$0x1] %v3016_v55 }
 0x291   :  { %3042 = vsyncadd [#allocation6], 16  ;;  %s9165_s23 = sld [smem:[#allocation130_spill]] }
 0x297   :  { %s3043_s24 = scalar_lea.vmem %s9067_s3, %s9165_s23 }
 0x298   :  { %v3062_v56 = vld [vmem:[%s3043_s24] sm:$0x1] }
 0x299   :  { %3063 = vst [vmem:[#allocation2 + $0x16] sm:$0x1] %v3062_v56 }
 0x29a   :  { %3088 = vsyncadd [#allocation6], 16  ;;  %s9166_s18 = sld [smem:[#allocation131_spill]] }
 0x2a0   :  { %s3089_s13 = scalar_lea.vmem %s9067_s3, %s9166_s18 }
 0x2a1   :  { %v3108_v57 = vld [vmem:[%s3089_s13] sm:$0x1] }
 0x2a2   :  { %3109 = vst [vmem:[#allocation2 + $0x1e] sm:$0x1] %v3108_v57 }
 0x2a3   :  { %3134 = vsyncadd [#allocation6], 16  ;;  %s9167_s19 = sld [smem:[#allocation132_spill]] }
 0x2a9   :  { %s3135_s15 = scalar_lea.vmem %s9067_s3, %s9167_s19 }
 0x2aa   :  { %v3154_v58 = vld [vmem:[%s3135_s15] sm:$0x1] }
 0x2ab   :  { %3155 = vst [vmem:[#allocation2 + $0x26] sm:$0x1] %v3154_v58 }
 0x2ac   :  { %3180 = vsyncadd [#allocation6], 16  ;;  %s3181_s7 = scalar_lea.vmem %s9067_s3, %s9419_s10 }
 0x2ad   :  { %v3200_v59 = vld [vmem:[%s3181_s7] sm:$0x1] }
 0x2ae   :  { %3201 = vst [vmem:[#allocation2 + $0x2e] sm:$0x1] %v3200_v59 }
 0x2af   :  { %3226 = vsyncadd [#allocation6], 16  ;;  %s3227_s21 = scalar_lea.vmem %s9067_s3, %s9425_s11 }
 0x2b0   :  { %v3246_v60 = vld [vmem:[%s3227_s21] sm:$0x1] }
 0x2b1   :  { %3247 = vst [vmem:[#allocation2 + $0x36] sm:$0x1] %v3246_v60 }
 0x2b2   :  { %3272 = vsyncadd [#allocation6], 16  ;;  %s3273_s29 = scalar_lea.vmem %s9067_s3, %s9427_s12 }
 0x2b3   :  { %v3292_v61 = vld [vmem:[%s3273_s29] sm:$0x1] }
 0x2b4   :  { %3293 = vst [vmem:[#allocation2 + $0x3e] sm:$0x1] %v3292_v61 }
 0x2b5   :  { %3318 = vsyncadd [#allocation6], 16  ;;  %s3319_s30 = scalar_lea.vmem %s9068_s4, %s9433_s6 }
 0x2b6   :  { %v3338_v62 = vld [vmem:[%s3319_s30] sm:$0x1] }
 0x2b7   :  { %3339 = vst [vmem:[#allocation3 + $0x6] sm:$0x1] %v3338_v62 }
 0x2b8   :  { %3364 = vsyncadd [#allocation6], 16  ;;  %s9168_s11 = sld [smem:[#allocation133_spill]] }
 0x2be   :  { %s3365_s23 = scalar_lea.vmem %s9067_s3, %s9168_s11 }
 0x2bf   :  { %v3384_v63 = vld [vmem:[%s3365_s23] sm:$0x1] }
 0x2c0   :  { %3385 = vst [vmem:[#allocation2 + $0x7] sm:$0x1] %v3384_v63 }
 0x2c1   :  { %3410 = vsyncadd [#allocation6], 16  ;;  %s9169_s12 = sld [smem:[#allocation134_spill]] }
 0x2c7   :  { %s3411_s24 = scalar_lea.vmem %s9067_s3, %s9169_s12 }
 0x2c8   :  { %v3430_v0 = vld [vmem:[%s3411_s24] sm:$0x1] }
 0x2c9   :  { %3431 = vst [vmem:[#allocation2 + $0xf] sm:$0x1] %v3430_v0 }
 0x2ca   :  { %3456 = vsyncadd [#allocation6], 16  ;;  %s9170_s6 = sld [smem:[#allocation135_spill]] }
 0x2d0   :  { %s3457_s25 = scalar_lea.vmem %s9067_s3, %s9170_s6 }
 0x2d1   :  { %v3476_v1 = vld [vmem:[%s3457_s25] sm:$0x1] }
 0x2d2   :  { %3477 = vst [vmem:[#allocation2 + $0x17] sm:$0x1] %v3476_v1 }
 0x2d3   :  { %3502 = vsyncadd [#allocation6], 16  ;;  %s9171_s13 = sld [smem:[#allocation136_spill]] }
 0x2d9   :  { %s3503_s14 = scalar_lea.vmem %s9067_s3, %s9171_s13 }
 0x2da   :  { %v3522_v2 = vld [vmem:[%s3503_s14] sm:$0x1] }
 0x2db   :  { %3523 = vst [vmem:[#allocation2 + $0x1f] sm:$0x1] %v3522_v2 }
 0x2dc   :  { %3548 = vsyncadd [#allocation6], 16  ;;  %s9172_s15 = sld [smem:[#allocation137_spill]] }
 0x2e2   :  { %s3549_s7 = scalar_lea.vmem %s9067_s3, %s9172_s15 }
 0x2e3   :  { %v3568_v3 = vld [vmem:[%s3549_s7] sm:$0x1] }
 0x2e4   :  { %3569 = vst [vmem:[#allocation2 + $0x27] sm:$0x1] %v3568_v3 }
 0x2e5   :  { %3594 = vsyncadd [#allocation6], 16  ;;  %s9173_s0 = sld [smem:[#allocation138_spill]] }
 0x2eb   :  { %s3595_s16 = scalar_lea.vmem %s9067_s3, %s9173_s0 }
 0x2ec   :  { %v3614_v4 = vld [vmem:[%s3595_s16] sm:$0x1] }
 0x2ed   :  { %3615 = vst [vmem:[#allocation2 + $0x2f] sm:$0x1] %v3614_v4 }
 0x2ee   :  { %3640 = vsyncadd [#allocation6], 16  ;;  %s9174_s1 = sld [smem:[#allocation139_spill]] }
 0x2f4   :  { %s3641_s22 = scalar_lea.vmem %s9067_s3, %s9174_s1 }
 0x2f5   :  { %v3660_v5 = vld [vmem:[%s3641_s22] sm:$0x1] }
 0x2f6   :  { %3661 = vst [vmem:[#allocation2 + $0x37] sm:$0x1] %v3660_v5 }
 0x2f7   :  { %3686 = vsyncadd [#allocation6], 16  ;;  %s9175_s30 = sld [smem:[#allocation140_spill]] }
 0x2fd   :  { %s3687_s5 = scalar_lea.vmem %s9067_s3, %s9175_s30 }
 0x2fe   :  { %v3706_v6 = vld [vmem:[%s3687_s5] sm:$0x1] }
 0x2ff   :  { %3707 = vst [vmem:[#allocation2 + $0x3f] sm:$0x1] %v3706_v6 }
 0x300   :  { %3732 = vsyncadd [#allocation6], 16  ;;  %s9176_s23 = sld [smem:[#allocation141_spill]] }
 0x306   :  { %s3733_s28 = scalar_lea.vmem %s9068_s4, %s9176_s23 }
 0x307   :  { %v3752_v7 = vld [vmem:[%s3733_s28] sm:$0x1] }
 0x308   :  { %3753 = vst [vmem:[#allocation3 + $0x7] sm:$0x1] %v3752_v7 }
 0x309   :  { %3778 = vsyncadd [#allocation6], 16 }
 0x30a   :  { %7946 = dma.done.wait [#allocation6], 1152 }
 0x30b   :  { %7947 = vsyncadd [#allocation6], 4294966144  ;;  %v7955_v8 = vmov 0.0|0.0   ;;  %vm7956_vm0 = vmmov 0   ;;  %v7957_v9 = vmov 0.0   ;;  %vm3941_vm1 = vcmask 261120  }
 0x30c   :  { %7669 = vmatprep.subr.bf16.mxu1 %v7955_v8  ;;  %7502 = vmatprep.mubr.msk.f32.mxu1 %vm7956_vm0, %v7957_v9  ;;  %v3932_v10 = vld [vmem:[#allocation10] sm:$0xff]  ;;  %v3933_v11 = vld [vmem:[#allocation10 + $0x8] sm:$0xff]  ;;  %v3934_v12 = vld [vmem:[#allocation10 + $0x10] sm:$0xff]  ;;  %v4071_v30 = vlaneseq  ;;  %s7958_s3 = smov 32   ;;  %s7959_s4 = smov 64   ;;  %vm4202_vm3 = vcmask 130048  }
 0x30d   :  { %v7661_v13 = vpack.c.bf16 %v3933_v11, %v3932_v10  ;;  %v3935_v14 = vld [vmem:[#allocation10 + $0x18] sm:$0xff]  ;;  %v4096_v17 = vld [vmem:[#allocation10 + $0x20] sm:$0xff]  ;;  %v4097_v18 = vld [vmem:[#allocation10 + $0x28] sm:$0xff]  ;;  %s7960_s24 = smov 48   ;;  %vm5400_vm4 = vcmask 7168   ;;  %s7962_s6 = smov [#allocation13]  }
 0x30e   :  { %v3924_v15 = vld [vmem:[#allocation2] sm:$0xff]  ;;  %v7665_v16 = vpack.c.bf16 %v3935_v14, %v3934_v12  ;;  %v8687_v19 = vpack.c.bf16 %v4097_v18, %v4096_v17  ;;  %v4098_v20 = vld [vmem:[#allocation10 + $0x30] sm:$0xff]  ;;  %v3925_v23 = vld [vmem:[#allocation2 + $0x8] sm:$0xff]  ;;  %v4072_v33 = vand.u32 127, %v4071_v30  ;;  %s5877_s18 = sshll.u32 %s7962_s6, 4  ;;  %vm5869_vm5 = vcmask 64512   ;;  %s5878_s18 = int_to_ptr.vmem [resolvable:$true] %s5877_s18 }
 0x30f   :  { %7482 = vmatprep.mubr.msk.f32.mxu0 %vm3941_vm1, %v3924_v15  ;;  %7662 = vmatprep.subr.bf16.mxu0 %v7661_v13  ;;  %v4099_v21 = vld [vmem:[#allocation10 + $0x38] sm:$0xff]  ;;  %v3926_v24 = vld [vmem:[#allocation2 + $0x10] sm:$0xff]  ;;  %v3927_v25 = vld [vmem:[#allocation2 + $0x18] sm:$0xff]  ;;  %s7920_s9 = scalar_lea.vmem %s5878_s18, 128  ;;  %p7925_p9 = scmp.lt.s32.totalorder %s5878_s18, %s5878_s18 }
 0x310   :  { %7664 = vmatpush3.bf16.msra.mxu0 %v7661_v13  ;;  %7671 = vmatpush3.bf16.msra.mxu1 %v8687_v19  ;;  %v8690_v22 = vpack.c.bf16 %v4099_v21, %v4098_v20  ;;  %v3928_v26 = vld [vmem:[#allocation2 + $0x20] sm:$0xff]  ;;  %v3929_v27 = vld [vmem:[#allocation2 + $0x28] sm:$0xff]  ;;  %v3930_v28 = vld [vmem:[#allocation2 + $0x30] sm:$0xff]  ;;  %v4077_v39 = vand.u32 31, %v4072_v33  ;;  %p7921_p8 = scmp.ne.s32.totalorder %s5878_s18, %s7920_s9  ;;  %p7926_p10 = scmp.lt.s32.totalorder %s7920_s9, %s7920_s9 }
 0x311   :  { %7666 = vmatprep.subr.bf16.mxu0 %v7665_v16  ;;  %7672 = vmatprep.subr.bf16.mxu1 %v7955_v8  ;;  %v3931_v29 = vld [vmem:[#allocation2 + $0x38] sm:$0xff]  ;;  %v7184_v31 = vld [vmem:[#allocation10 + $0x40] ss:$0 sm:$0xff] }
 0x312   :  { %vm8722_vm2 = vcmp.lt.s32.totalorder %v4077_v39, 16  ;;  %p7927_p11 = por %p7926_p10, %p7925_p9 }
 0x314   :  { %7668 = vmatpush3.bf16.msra.mxu0 %v7665_v16  ;;  %7674 = vmatpush3.bf16.msra.mxu1 %v8690_v22  ;;  %p7928_p12 = pnand %p7927_p11, %p7921_p8 }
 0x315   :  { %7681 = vmatprep.subr.bf16.mxu0 %v7955_v8  ;;  %7675 = vmatprep.subr.bf16.mxu1 %v7955_v8 }
 0x317   :  { %7483 = vmatmul.mubr.msk.f32.vlgmr.msra.gmra.mrb[0].mxu0 %vm3941_vm1, %v3925_v23  ;;  %7503 = vmatmul.mubr.f32.vlgmr.msra.gmra.mrb[0].mxu1 %v7957_v9 }
 0x318   :  { %7485 = vmatprep.mubr.msk.f32.mxu0 %vm3941_vm1, %v3926_v24  ;;  %7683 = vmatpush3.bf16.msra.mxu0 %v8687_v19 }
 0x319   :  { %7684 = vmatprep.subr.bf16.mxu0 %v7955_v8  ;;  %7677 = vmatpush3.bf16.msra.mxu1 %v8687_v19 }
 0x31a   :  { %7513 = vmatprep.mubr.msk.f32.mxu1 %vm7956_vm0, %v7957_v9  ;;  %7678 = vmatprep.subr.bf16.mxu1 %v7955_v8 }
 0x31b   :  { %7486 = vmatmul.mubr.msk.f32.gmra.mrb[2].mxu0 %vm3941_vm1, %v3927_v25 }
 0x31c   :  { %7488 = vmatprep.mubr.msk.f32.mxu0 %vm3941_vm1, %v3928_v26  ;;  %7686 = vmatpush3.bf16.msra.mxu0 %v8690_v22 }
 0x31d   :  { %7693 = vmatprep.subr.bf16.mxu0 %v7955_v8  ;;  %7680 = vmatpush3.bf16.msra.mxu1 %v8690_v22 }
 0x31e   :  { %7687 = vmatprep.subr.bf16.mxu1 %v7955_v8 }
 0x31f   :  { %7489 = vmatmul.mubr.msk.f32.gmra.mrb[4].mxu0 %vm3941_vm1, %v3929_v27 }
 0x320   :  { %7491 = vmatprep.mubr.msk.f32.mxu0 %vm3941_vm1, %v3930_v28 }
 0x323   :  { %7492 = vmatmul.mubr.msk.f32.gmra.mrb[6].mxu0 %vm3941_vm1, %v3931_v29 }
 0x324   :  { %7524 = vmatprep.mubr.msk.f32.mxu0 %vm7956_vm0, %v7957_v9 }
 0x3ea   :  { %v7484_v32 = vpop.f32.mrb[0].mxu0  ;;  %v4169_v36 = vpop.f32.mrb[0].mxu1 }
 0x3eb   :  { %v8716_v34 = vadd.f32 %v7484_v32, %v7184_v31  ;;  %v4032_v35 = vpop.f32.mrb[1].mxu0  ;;  %v7504_v37 = vpop.f32.mrb[1].mxu1 }
 0x3ec   :  { %v8746_v53 = vadd.f32 %v7184_v31, %v4032_v35 }
 0x3ee   :  { %v7487_v38 = vpop.f32.mrb[2].mxu0 }
 0x3ef   :  { %v8718_v40 = vadd.f32 %v7487_v38, %v7184_v31  ;;  %v4042_v41 = vpop.f32.mrb[3].mxu0 }
 0x3f0   :  { %v8720_v42 = vadd.f32 %v7184_v31, %v4042_v41 }
 0x3f2   :  { %v7490_v43 = vpop.f32.mrb[4].mxu0 }
 0x3f3   :  { %v8726_v45 = vadd.f32 %v7490_v43, %v7184_v31  ;;  %v4052_v46 = vpop.f32.mrb[5].mxu0 }
 0x3f4   :  { %v8728_v47 = vadd.f32 %v7184_v31, %v4052_v46 }
 0x3f5   :  { %v4090_v48 = vsel %vm8722_vm2, %v8720_v42, %v8726_v45  ;;  %v4093_v49 = vsel %vm8722_vm2, %v8726_v45, %v8720_v42 }
 0x3f6   :  { %v7493_v50 = vpop.f32.mrb[6].mxu0  ;;  %v4091_v51 = vsel %vm8722_vm2, %v8718_v40, %v8728_v47  ;;  %v4092_v52 = vsel %vm8722_vm2, %v8728_v47, %v8718_v40 }
 0x3f7   :  { %v8748_v54 = vadd.f32 %v7493_v50, %v7184_v31  ;;  %v4062_v55 = vpop.f32.mrb[7].mxu0 }
 0x3f8   :  { %v8750_v56 = vadd.f32 %v7184_v31, %v4062_v55 }
 0x3f9   :  { %v4088_v57 = vsel %vm8722_vm2, %v8746_v53, %v8748_v54  ;;  %v4095_v58 = vsel %vm8722_vm2, %v8748_v54, %v8746_v53  ;;  %v4968_v54 = vld [vmem:[#allocation10 + $0x58] sm:$0xff] }
 0x3fa   :  { %v4173_v59 = vadd.f32 %v4169_v36, %v4088_v57  ;;  %v4089_v60 = vsel %vm8722_vm2, %v8716_v34, %v8750_v56  ;;  %v4094_v61 = vsel %vm8722_vm2, %v8750_v56, %v8716_v34 }
 0x3fc   :  { %7772 = vtanh.f32 %v4173_v59  ;;  %v7193_v63 = vmul.f32 -1.442695, %v4173_v59 }
 0x3fe   :  { %7774 = vpow2.f32 %v7193_v63 }
 0x406   :  { %v7773_v62 = vpop.eup %7772 }
 0x407   :  { %4183 = vrot.lane.b32.xlu0 %v7773_v62, %s7958_s3 }
 0x408   :  { %v7775_v0 = vpop.eup %7774 }
 0x409   :  { %v4177_v1 = vadd.f32 1.0, %v7775_v0 }
 0x40b   :  { %7776 = vrcp.f32 %v4177_v1 }
 0x415   :  { %v7777_v2 = vpop.eup %7776 }
 0x416   :  { %v4181_v5 = vmul.f32 0.0, %v7777_v2 }
 0x479   :  { %v4184_v3 = vpop.permute.xlu0 %4183 }
 0x47a   :  { %v4186_v4 = vmul.f32 %v7777_v2, %v4184_v3 }
 0x47c   :  { %4188 = vrot.lane.b32.xlu0 %v4186_v4, %s7958_s3 }
 0x4ee   :  { %v4189_v6 = vpop.permute.xlu0 %4188 }
 0x4ef   :  { %v4191_v7 = vadd.f32 %v4189_v6, %v4181_v5 }
 0x4f1   :  { %7778 = vtanh.f32 %v4191_v7 }
 0x4fb   :  { %v7779_v10 = vpop.eup %7778 }
 0x4fc   :  { %4194 = vrot.lane.b32.xlu1 %v7779_v10, %s7958_s3 }
 0x56e   :  { %v4195_v11 = vpop.permute.xlu1 %4194 }
 0x56f   :  { %v8771_v12 = vmul.f32 %v7777_v2, %v4195_v11 }
 0x571   :  { %4199 = vrot.lane.b32.xlu1 %v8771_v12, %s7959_s4 }
 0x5e3   :  { %v4200_v13 = vpop.permute.xlu1 %4199 }
 0x5e4   :  { %4203 = vst.msk [vmem:[#allocation4] sm:$0xff] %vm4202_vm3, %v4200_v13  ;;  %7514 = vmatmul.mubr.msk.f32.vlgmr.msra.gmra.mrb[2].mxu1 %vm3941_vm1, %v4200_v13 }
 0x5e5   :  { %7689 = vmatpush3.bf16.msra.mxu1 %v8687_v19  ;;  %7535 = vmatprep.mubr.msk.f32.mxu1 %vm7956_vm0, %v7957_v9 }
 0x5e6   :  { %7690 = vmatprep.subr.bf16.mxu1 %v7955_v8 }
 0x5e9   :  { %7692 = vmatpush3.bf16.msra.mxu1 %v8690_v22 }
 0x5ea   :  { %7699 = vmatprep.subr.bf16.mxu1 %v7955_v8 }
 0x6b7   :  { %v4276_v14 = vpop.f32.mrb[2].mxu1 }
 0x6b8   :  { %v4280_v15 = vadd.f32 %v4276_v14, %v4089_v60  ;;  %v7515_v16 = vpop.f32.mrb[3].mxu1 }
 0x6ba   :  { %7780 = vtanh.f32 %v4280_v15  ;;  %v7195_v18 = vmul.f32 -1.442695, %v4280_v15 }
 0x6bc   :  { %7782 = vpow2.f32 %v7195_v18 }
 0x6c4   :  { %v7781_v17 = vpop.eup %7780 }
 0x6c5   :  { %4290 = vrot.lane.b32.xlu0 %v7781_v17, %s7958_s3 }
 0x6c6   :  { %v7783_v20 = vpop.eup %7782 }
 0x6c7   :  { %v4284_v21 = vadd.f32 1.0, %v7783_v20 }
 0x6c9   :  { %7784 = vrcp.f32 %v4284_v21 }
 0x6d3   :  { %v7785_v23 = vpop.eup %7784 }
 0x6d4   :  { %v4288_v26 = vmul.f32 %v7785_v23, %v4191_v7 }
 0x737   :  { %v4291_v24 = vpop.permute.xlu0 %4290 }
 0x738   :  { %v4293_v25 = vmul.f32 %v7785_v23, %v4291_v24 }
 0x73a   :  { %4295 = vrot.lane.b32.xlu1 %v4293_v25, %s7958_s3 }
 0x7ac   :  { %v4296_v27 = vpop.permute.xlu1 %4295 }
 0x7ad   :  { %v4298_v28 = vadd.f32 %v4296_v27, %v4288_v26 }
 0x7af   :  { %7786 = vtanh.f32 %v4298_v28 }
 0x7b9   :  { %v7787_v29 = vpop.eup %7786 }
 0x7ba   :  { %4301 = vrot.lane.b32.xlu0 %v7787_v29, %s7958_s3 }
 0x82c   :  { %v4302_v30 = vpop.permute.xlu0 %4301 }
 0x82d   :  { %v8786_v31 = vmul.f32 %v7785_v23, %v4302_v30 }
 0x82f   :  { %4306 = vrot.lane.b32.xlu1 %v8786_v31, %s7959_s4 }
 0x8a1   :  { %v4307_v32 = vpop.permute.xlu1 %4306 }
 0x8a2   :  { %4309 = vst.msk [vmem:[#allocation4 + $0x8] sm:$0xff] %vm4202_vm3, %v4307_v32  ;;  %7525 = vmatmul.mubr.msk.f32.vlgmr.msra.gmra.mrb[8].mxu0 %vm3941_vm1, %v4307_v32 }
 0x8a3   :  { %7695 = vmatpush3.bf16.msra.mxu0 %v8687_v19  ;;  %7546 = vmatprep.mubr.msk.f32.mxu0 %vm7956_vm0, %v7957_v9 }
 0x8a4   :  { %7696 = vmatprep.subr.bf16.mxu0 %v7955_v8 }
 0x8a7   :  { %7698 = vmatpush3.bf16.msra.mxu0 %v8690_v22 }
 0x8a8   :  { %7705 = vmatprep.subr.bf16.mxu0 %v7955_v8 }
 0x975   :  { %v4382_v33 = vpop.f32.mrb[8].mxu0 }
 0x976   :  { %v4386_v35 = vadd.f32 %v4382_v33, %v4090_v48  ;;  %v7526_v36 = vpop.f32.mrb[9].mxu0 }
 0x978   :  { %7788 = vtanh.f32 %v4386_v35  ;;  %v7197_v38 = vmul.f32 -1.442695, %v4386_v35 }
 0x97a   :  { %7790 = vpow2.f32 %v7197_v38 }
 0x982   :  { %v7789_v37 = vpop.eup %7788 }
 0x983   :  { %4396 = vrot.lane.b32.xlu0 %v7789_v37, %s7958_s3 }
 0x984   :  { %v7791_v39 = vpop.eup %7790 }
 0x985   :  { %v4390_v41 = vadd.f32 1.0, %v7791_v39 }
 0x987   :  { %7792 = vrcp.f32 %v4390_v41 }
 0x991   :  { %v7793_v43 = vpop.eup %7792 }
 0x992   :  { %v4394_v55 = vmul.f32 %v7793_v43, %v4298_v28 }
 0x9f5   :  { %v4397_v46 = vpop.permute.xlu0 %4396 }
 0x9f6   :  { %v4399_v50 = vmul.f32 %v7793_v43, %v4397_v46 }
 0x9f8   :  { %4401 = vrot.lane.b32.xlu1 %v4399_v50, %s7958_s3 }
 0xa6a   :  { %v4402_v57 = vpop.permute.xlu1 %4401 }
 0xa6b   :  { %v4404_v59 = vadd.f32 %v4402_v57, %v4394_v55 }
 0xa6d   :  { %7794 = vtanh.f32 %v4404_v59 }
 0xa77   :  { %v7795_v48 = vpop.eup %7794 }
 0xa78   :  { %4407 = vrot.lane.b32.xlu0 %v7795_v48, %s7958_s3 }
 0xaea   :  { %v4408_v60 = vpop.permute.xlu0 %4407 }
 0xaeb   :  { %v8806_v62 = vmul.f32 %v7793_v43, %v4408_v60 }
 0xaed   :  { %4412 = vrot.lane.b32.xlu1 %v8806_v62, %s7959_s4 }
 0xb5f   :  { %v4413_v63 = vpop.permute.xlu1 %4412 }
 0xb60   :  { %4415 = vst.msk [vmem:[#allocation4 + $0x10] sm:$0xff] %vm4202_vm3, %v4413_v63  ;;  %7536 = vmatmul.mubr.msk.f32.vlgmr.msra.gmra.mrb[4].mxu1 %vm3941_vm1, %v4413_v63 }
 0xb61   :  { %7701 = vmatpush3.bf16.msra.mxu1 %v8687_v19  ;;  %7557 = vmatprep.mubr.msk.f32.mxu1 %vm7956_vm0, %v7957_v9 }
 0xb62   :  { %7702 = vmatprep.subr.bf16.mxu1 %v7955_v8 }
 0xb65   :  { %7704 = vmatpush3.bf16.msra.mxu1 %v8690_v22 }
 0xb66   :  { %7711 = vmatprep.subr.bf16.mxu1 %v7955_v8 }
 0xc33   :  { %v4488_v0 = vpop.f32.mrb[4].mxu1 }
 0xc34   :  { %v4492_v1 = vadd.f32 %v4488_v0, %v4091_v51  ;;  %v7537_v2 = vpop.f32.mrb[5].mxu1 }
 0xc36   :  { %7796 = vtanh.f32 %v4492_v1  ;;  %v7199_v4 = vmul.f32 -1.442695, %v4492_v1 }
 0xc38   :  { %7798 = vpow2.f32 %v7199_v4 }
 0xc40   :  { %v7797_v3 = vpop.eup %7796 }
 0xc41   :  { %4502 = vrot.lane.b32.xlu0 %v7797_v3, %s7958_s3 }
 0xc42   :  { %v7799_v5 = vpop.eup %7798 }
 0xc43   :  { %v4496_v6 = vadd.f32 1.0, %v7799_v5 }
 0xc45   :  { %7800 = vrcp.f32 %v4496_v6 }
 0xc4f   :  { %v7801_v7 = vpop.eup %7800 }
 0xc50   :  { %v4500_v13 = vmul.f32 %v7801_v7, %v4404_v59 }
 0xcb3   :  { %v4503_v10 = vpop.permute.xlu0 %4502 }
 0xcb4   :  { %v4505_v11 = vmul.f32 %v7801_v7, %v4503_v10 }
 0xcb6   :  { %4507 = vrot.lane.b32.xlu1 %v4505_v11, %s7958_s3 }
 0xd28   :  { %v4508_v14 = vpop.permute.xlu1 %4507 }
 0xd29   :  { %v4510_v15 = vadd.f32 %v4508_v14, %v4500_v13 }
 0xd2b   :  { %7802 = vtanh.f32 %v4510_v15 }
 0xd35   :  { %v7803_v51 = vpop.eup %7802 }
 0xd36   :  { %4513 = vrot.lane.b32.xlu0 %v7803_v51, %s7958_s3 }
 0xda8   :  { %v4514_v16 = vpop.permute.xlu0 %4513 }
 0xda9   :  { %v8826_v17 = vmul.f32 %v7801_v7, %v4514_v16 }
 0xdab   :  { %4518 = vrot.lane.b32.xlu1 %v8826_v17, %s7959_s4 }
 0xe1d   :  { %v4519_v18 = vpop.permute.xlu1 %4518 }
 0xe1e   :  { %4521 = vst.msk [vmem:[#allocation4 + $0x18] sm:$0xff] %vm4202_vm3, %v4519_v18  ;;  %7547 = vmatmul.mubr.msk.f32.vlgmr.msra.gmra.mrb[10].mxu0 %vm3941_vm1, %v4519_v18 }
 0xe1f   :  { %7707 = vmatpush3.bf16.msra.mxu0 %v8687_v19  ;;  %7568 = vmatprep.mubr.msk.f32.mxu0 %vm7956_vm0, %v7957_v9 }
 0xe20   :  { %7708 = vmatprep.subr.bf16.mxu0 %v7955_v8 }
 0xe23   :  { %7710 = vmatpush3.bf16.msra.mxu0 %v8690_v22 }
 0xef1   :  { %v4594_v20 = vpop.f32.mrb[10].mxu0 }
 0xef2   :  { %v4598_v21 = vadd.f32 %v4594_v20, %v4092_v52  ;;  %v7548_v23 = vpop.f32.mrb[11].mxu0 }
 0xef4   :  { %7804 = vtanh.f32 %v4598_v21  ;;  %v7201_v25 = vmul.f32 -1.442695, %v4598_v21 }
 0xef6   :  { %7806 = vpow2.f32 %v7201_v25 }
 0xefe   :  { %v7805_v24 = vpop.eup %7804 }
 0xeff   :  { %4608 = vrot.lane.b32.xlu0 %v7805_v24, %s7958_s3 }
 0xf00   :  { %v7807_v26 = vpop.eup %7806 }
 0xf01   :  { %v4602_v27 = vadd.f32 1.0, %v7807_v26 }
 0xf03   :  { %7808 = vrcp.f32 %v4602_v27 }
 0xf0d   :  { %v7809_v28 = vpop.eup %7808 }
 0xf0e   :  { %v4606_v32 = vmul.f32 %v7809_v28, %v4510_v15 }
 0xf71   :  { %v4609_v29 = vpop.permute.xlu0 %4608 }
 0xf72   :  { %v4611_v30 = vmul.f32 %v7809_v28, %v4609_v29 }
 0xf74   :  { %4613 = vrot.lane.b32.xlu1 %v4611_v30, %s7958_s3 }
 0xfe6   :  { %v4614_v33 = vpop.permute.xlu1 %4613 }
 0xfe7   :  { %v4616_v35 = vadd.f32 %v4614_v33, %v4606_v32  ;;  %v4966_v32 = vld [vmem:[#allocation10 + $0x48] sm:$0xff]  ;;  %v4967_v33 = vld [vmem:[#allocation10 + $0x50] sm:$0xff] }
 0xfe9   :  { %7810 = vtanh.f32 %v4616_v35 }
 0xff3   :  { %v7811_v40 = vpop.eup %7810 }
 0xff4   :  { %4619 = vrot.lane.b32.xlu0 %v7811_v40, %s7958_s3 }
0x1066   :  { %v4620_v47 = vpop.permute.xlu0 %4619 }
0x1067   :  { %v8845_v52 = vmul.f32 %v7809_v28, %v4620_v47 }
0x1069   :  { %4624 = vrot.lane.b32.xlu1 %v8845_v52, %s7959_s4 }
0x10db   :  { %v4625_v36 = vpop.permute.xlu1 %4624 }
0x10dc   :  { %4627 = vst.msk [vmem:[#allocation4 + $0x20] sm:$0xff] %vm4202_vm3, %v4625_v36  ;;  %7558 = vmatmul.mubr.msk.f32.vlgmr.msra.gmra.mrb[6].mxu1 %vm3941_vm1, %v4625_v36 }
0x10dd   :  { %7713 = vmatpush3.bf16.msra.mxu1 %v8687_v19  ;;  %7579 = vmatprep.mubr.msk.f32.mxu1 %vm7956_vm0, %v7957_v9 }
0x10de   :  { %7714 = vmatprep.subr.bf16.mxu1 %v7955_v8 }
0x10e1   :  { %7716 = vmatpush3.bf16.msra.mxu1 %v8690_v22 }
0x10e2   :  { %7725 = vmatprep.subr.bf16.mxu1 %v7955_v8 }
0x11af   :  { %v4700_v37 = vpop.f32.mrb[6].mxu1 }
0x11b0   :  { %v4704_v38 = vadd.f32 %v4700_v37, %v4093_v49  ;;  %v7559_v39 = vpop.f32.mrb[7].mxu1  ;;  %v5287_v37 = vld [vmem:[#allocation10 + $0x68] sm:$0xff] }
0x11b2   :  { %7812 = vtanh.f32 %v4704_v38  ;;  %v7203_v19 = vmul.f32 -1.442695, %v4704_v38  ;;  %v5288_v38 = vld [vmem:[#allocation10 + $0x70] sm:$0xff] }
0x11b3   :  { %v7726_v39 = vpack.c.bf16 %v5288_v38, %v5287_v37 }
0x11b4   :  { %7814 = vpow2.f32 %v7203_v19  ;;  %v5290_v19 = vld [vmem:[#allocation10 + $0x80] sm:$0xff] }
0x11bc   :  { %v7813_v41 = vpop.eup %7812 }
0x11bd   :  { %4714 = vrot.lane.b32.xlu0 %v7813_v41, %s7958_s3  ;;  %v5289_v41 = vld [vmem:[#allocation10 + $0x78] sm:$0xff] }
0x11be   :  { %v7815_v43 = vpop.eup %7814 }
0x11bf   :  { %v4708_v46 = vadd.f32 1.0, %v7815_v43  ;;  %v7729_v43 = vpack.c.bf16 %v5290_v19, %v5289_v41  ;;  %v7228_v41 = vld [vmem:[#allocation10 + $0x44] ss:$0 sm:$0xff] }
0x11c1   :  { %7816 = vrcp.f32 %v4708_v46 }
0x11cb   :  { %v7817_v22 = vpop.eup %7816 }
0x11cc   :  { %v4712_v57 = vmul.f32 %v7817_v22, %v4616_v35  ;;  %v7721_v35 = vpack.c.bf16 %v4967_v33, %v4966_v32 }
0x122f   :  { %v4715_v50 = vpop.permute.xlu0 %4714 }
0x1230   :  { %v4717_v55 = vmul.f32 %v7817_v22, %v4715_v50 }
0x1232   :  { %4719 = vrot.lane.b32.xlu1 %v4717_v55, %s7958_s3 }
0x12a4   :  { %v4720_v59 = vpop.permute.xlu1 %4719 }
0x12a5   :  { %v4722_v48 = vadd.f32 %v4720_v59, %v4712_v57 }
0x12a7   :  { %7818 = vtanh.f32 %v4722_v48 }
0x12b1   :  { %v7819_v42 = vpop.eup %7818 }
0x12b2   :  { %4725 = vrot.lane.b32.xlu0 %v7819_v42, %s7958_s3 }
0x1324   :  { %v4726_v45 = vpop.permute.xlu0 %4725 }
0x1325   :  { %v8865_v49 = vmul.f32 %v7817_v22, %v4726_v45 }
0x1327   :  { %4730 = vrot.lane.b32.xlu1 %v8865_v49, %s7959_s4 }
0x1399   :  { %v4731_v60 = vpop.permute.xlu1 %4730 }
0x139a   :  { %4733 = vst.msk [vmem:[#allocation4 + $0x28] sm:$0xff] %vm4202_vm3, %v4731_v60  ;;  %7569 = vmatmul.mubr.msk.f32.vlgmr.msra.gmra.mrb[12].mxu0 %vm3941_vm1, %v4731_v60 }
0x146d   :  { %v4806_v63 = vpop.f32.mrb[12].mxu0 }
0x146e   :  { %v4810_v0 = vadd.f32 %v4806_v63, %v4094_v61  ;;  %v7570_v1 = vpop.f32.mrb[13].mxu0 }
0x146f   :  { %v8952_v1 = vld [vmem:[#allocation4 + $0x8] sm:$0xff] }
0x1470   :  { %7820 = vtanh.f32 %v4810_v0  ;;  %v7205_v3 = vmul.f32 -1.442695, %v4810_v0  ;;  %v8948_v0 = vld [vmem:[#allocation4] sm:$0xff] }
0x1472   :  { %7822 = vpow2.f32 %v7205_v3  ;;  %v8960_v3 = vld [vmem:[#allocation4 + $0x18] sm:$0xff] }
0x147a   :  { %v7821_v2 = vpop.eup %7820 }
0x147b   :  { %4820 = vrot.lane.b32.xlu0 %v7821_v2, %s7958_s3  ;;  %v8956_v2 = vld [vmem:[#allocation4 + $0x10] sm:$0xff] }
0x147c   :  { %v7823_v4 = vpop.eup %7822 }
0x147d   :  { %v4814_v5 = vadd.f32 1.0, %v7823_v4  ;;  %v8964_v4 = vld [vmem:[#allocation4 + $0x20] sm:$0xff] }
0x147f   :  { %7824 = vrcp.f32 %v4814_v5  ;;  %v8968_v5 = vld [vmem:[#allocation4 + $0x28] sm:$0xff] }
0x1489   :  { %v7825_v6 = vpop.eup %7824 }
0x148a   :  { %v4818_v11 = vmul.f32 %v7825_v6, %v4722_v48 }
0x14ed   :  { %v4821_v7 = vpop.permute.xlu0 %4820 }
0x14ee   :  { %v4823_v10 = vmul.f32 %v7825_v6, %v4821_v7 }
0x14f0   :  { %4825 = vrot.lane.b32.xlu1 %v4823_v10, %s7958_s3 }
0x1562   :  { %v4826_v13 = vpop.permute.xlu1 %4825 }
0x1563   :  { %v4828_v14 = vadd.f32 %v4826_v13, %v4818_v11  ;;  %v7224_v13 = vld [vmem:[#allocation10 + $0x41] ss:$0 sm:$0xff] }
0x1565   :  { %7826 = vtanh.f32 %v4828_v14 }
0x156f   :  { %v7827_v34 = vpop.eup %7826 }
0x1570   :  { %4831 = vrot.lane.b32.xlu0 %v7827_v34, %s7958_s3 }
0x15e2   :  { %v4832_v56 = vpop.permute.xlu0 %4831 }
0x15e3   :  { %v4834_v61 = vmul.f32 %v7825_v6, %v4832_v56 }
0x15e5   :  { %4836 = vrot.lane.b32.xlu1 %v4834_v61, %s7959_s4 }
0x1657   :  { %v4837_v15 = vpop.permute.xlu1 %4836 }
0x1658   :  { %4839 = vst.msk [vmem:[#allocation4 + $0x30] sm:$0xff] %vm4202_vm3, %v4837_v15  ;;  %7580 = vmatmul.mubr.msk.f32.vlgmr.msra.gmra.mrb[8].mxu1 %vm3941_vm1, %v4837_v15 }
0x1659   :  { %7622 = vmatprep.mubr.msk.f32.mxu1 %vm7956_vm0, %v7957_v9  ;;  %7727 = vmatpush3.bf16.msra.mxu1 %v7726_v39 }
0x165a   :  { %7728 = vmatprep.subr.bf16.mxu1 %v7955_v8 }
0x165d   :  { %7730 = vmatpush3.bf16.msra.mxu1 %v7729_v43 }
0x165e   :  { %7731 = vmatprep.subr.bf16.mxu1 %v7955_v8 }
0x165f   :  { %v8972_v6 = vld [vmem:[#allocation4 + $0x30] sm:$0xff] }
0x172b   :  { %v4912_v51 = vpop.f32.mrb[8].mxu1 }
0x172c   :  { %v4916_v16 = vadd.f32 %v4912_v51, %v4095_v58  ;;  %v7581_v18 = vpop.f32.mrb[9].mxu1  ;;  %v4969_v58 = vld [vmem:[#allocation10 + $0x60] sm:$0xff] }
0x172d   :  { %v7717_v30 = vpack.c.bf16 %v4969_v58, %v4968_v54 }
0x172e   :  { %7828 = vtanh.f32 %v4916_v16  ;;  %v7207_v21 = vmul.f32 -1.442695, %v4916_v16 }
0x172f   :  { %7718 = vmatprep.subr.bf16.mxu0 %v7717_v30 }
0x1730   :  { %7830 = vpow2.f32 %v7207_v21  ;;  %7720 = vmatpush3.bf16.msra.mxu0 %v7717_v30 }
0x1731   :  { %7722 = vmatprep.subr.bf16.mxu0 %v7721_v35 }
0x1738   :  { %v7829_v20 = vpop.eup %7828 }
0x1739   :  { %4926 = vrot.lane.b32.xlu0 %v7829_v20, %s7958_s3  ;;  %v7226_v20 = vld [vmem:[#allocation10 + $0x42] ss:$0 sm:$0xff] }
0x173a   :  { %v7831_v23 = vpop.eup %7830 }
0x173b   :  { %v4920_v24 = vadd.f32 1.0, %v7831_v23 }
0x173d   :  { %7832 = vrcp.f32 %v4920_v24 }
0x1747   :  { %v7833_v25 = vpop.eup %7832 }
0x1748   :  { %v4924_v44 = vmul.f32 %v7833_v25, %v4828_v14 }
0x17ab   :  { %v4927_v26 = vpop.permute.xlu0 %4926 }
0x17ac   :  { %v4929_v27 = vmul.f32 %v7833_v25, %v4927_v26 }
0x17ae   :  { %4931 = vrot.lane.b32.xlu1 %v4929_v27, %s7958_s3  ;;  %v7225_v27 = vld [vmem:[#allocation10 + $0x43] ss:$0 sm:$0xff] }
0x1820   :  { %v4932_v28 = vpop.permute.xlu1 %4931 }
0x1821   :  { %v4934_v29 = vadd.f32 %v4932_v28, %v4924_v44 }
0x1823   :  { %7834 = vtanh.f32 %v4934_v29 }
0x182d   :  { %v7835_v53 = vpop.eup %7834 }
0x182e   :  { %4937 = vrot.lane.b32.xlu0 %v7835_v53, %s7958_s3 }
0x1832   :  { %4840 = vrot.lane.b32.xlu0 %v4834_v61, %s7960_s24 }
0x1836   :  { %4628 = vrot.lane.b32.xlu0 %v8845_v52, %s7960_s24 }
0x183a   :  { %4416 = vrot.lane.b32.xlu0 %v8806_v62, %s7960_s24 }
0x183e   :  { %4204 = vrot.lane.b32.xlu0 %v8771_v12, %s7960_s24 }
0x18a0   :  { %v4938_v40 = vpop.permute.xlu0 %4937 }
0x18a1   :  { %v4940_v47 = vmul.f32 %v7833_v25, %v4938_v40 }
0x18a3   :  { %4946 = vrot.lane.b32.xlu1 %v4940_v47, %s7960_s24 }
0x18a4   :  { %v4841_v36 = vpop.permute.xlu0 %4840 }
0x18a5   :  { %4843 = vst.msk [vmem:[#allocation5 + $0x8] sm:$0xff] %vm4202_vm3, %v4841_v36 }
0x18a7   :  { %4734 = vrot.lane.b32.xlu1 %v8865_v49, %s7960_s24 }
0x18a8   :  { %v4629_v62 = vpop.permute.xlu0 %4628 }
0x18a9   :  { %4631 = vst.msk [vmem:[#allocation5 + $0x18] sm:$0xff] %vm4202_vm3, %v4629_v62 }
0x18ab   :  { %4522 = vrot.lane.b32.xlu1 %v8826_v17, %s7960_s24  ;;  %v5286_v17 = vld [vmem:[#allocation3] sm:$0xff] }
0x18ac   :  { %v4417_v12 = vpop.permute.xlu0 %4416  ;;  %7623 = vmatmul.mubr.msk.f32.vlgmr.msra.gmra.mrb[10].mxu1 %vm3941_vm1, %v5286_v17  ;;  %v8915_v55 = vld [vmem:[#allocation5 + $0x8] sm:$0xff] }
0x18ad   :  { %4419 = vst.msk [vmem:[#allocation5 + $0x28] sm:$0xff] %vm4202_vm3, %v4417_v12  ;;  %7629 = vmatprep.mubr.msk.f32.mxu1 %vm7956_vm0, %v7957_v9 }
0x18af   :  { %4310 = vrot.lane.b32.xlu1 %v8786_v31, %s7960_s24 }
0x18b0   :  { %v4205_v52 = vpop.permute.xlu0 %4204  ;;  %v8924_v48 = vld [vmem:[#allocation5 + $0x18] sm:$0xff] }
0x18b1   :  { %4207 = vst.msk [vmem:[#allocation5 + $0x38] sm:$0xff] %vm4202_vm3, %v4205_v52 }
0x18b3   :  { %4942 = vrot.lane.b32.xlu1 %v4940_v47, %s7959_s4 }
0x18b4   :  { %v8936_v49 = vld [vmem:[#allocation5 + $0x28] sm:$0xff] }
0x18b8   :  { %v8944_v63 = vld [vmem:[#allocation5 + $0x38] sm:$0xff] }
0x1915   :  { %v4947_v31 = vpop.permute.xlu1 %4946 }
0x1916   :  { %4949 = vst.msk [vmem:[#allocation5] sm:$0xff] %vm4202_vm3, %v4947_v31 }
0x1919   :  { %v4735_v46 = vpop.permute.xlu1 %4734 }
0x191a   :  { %4737 = vst.msk [vmem:[#allocation5 + $0x10] sm:$0xff] %vm4202_vm3, %v4735_v46 }
0x191d   :  { %v4523_v22 = vpop.permute.xlu1 %4522  ;;  %v8910_v50 = vld [vmem:[#allocation5] sm:$0xff] }
0x191e   :  { %4525 = vst.msk [vmem:[#allocation5 + $0x20] sm:$0xff] %vm4202_vm3, %v4523_v22  ;;  %7586 = vmatprep.mubr.msk.f32.mxu0 %vm4202_vm3, %v8910_v50 }
0x191f   :  { %7587 = vmatmul.mubr.msk.f32.vlgmr.msra.gmra.mrb[14].mxu0 %vm4202_vm3, %v8915_v55 }
0x1920   :  { %7724 = vmatpush3.bf16.msra.mxu0 %v7721_v35 }
0x1921   :  { %v4311_v57 = vpop.permute.xlu1 %4310  ;;  %v8919_v59 = vld [vmem:[#allocation5 + $0x10] sm:$0xff] }
0x1922   :  { %4313 = vst.msk [vmem:[#allocation5 + $0x30] sm:$0xff] %vm4202_vm3, %v4311_v57  ;;  %7589 = vmatprep.mubr.msk.f32.mxu0 %vm4202_vm3, %v8919_v59 }
0x1923   :  { %7590 = vmatmul.mubr.msk.f32.gmra.mrb[16].mxu0 %vm4202_vm3, %v8924_v48 }
0x1925   :  { %v8928_v42 = vpop.permute.xlu1 %4942  ;;  %v8930_v45 = vld [vmem:[#allocation5 + $0x20] sm:$0xff] }
0x1926   :  { %4945 = vst.msk [vmem:[#allocation4 + $0x38] sm:$0xff] %vm4202_vm3, %v8928_v42  ;;  %7592 = vmatprep.mubr.msk.f32.mxu0 %vm4202_vm3, %v8930_v45 }
0x1927   :  { %7593 = vmatmul.mubr.msk.f32.gmra.mrb[18].mxu0 %vm4202_vm3, %v8936_v49 }
0x1929   :  { %v8940_v60 = vld [vmem:[#allocation5 + $0x30] sm:$0xff] }
0x192a   :  { %7595 = vmatprep.mubr.msk.f32.mxu0 %vm4202_vm3, %v8940_v60 }
0x192b   :  { %7596 = vmatmul.mubr.msk.f32.gmra.mrb[20].mxu0 %vm4202_vm3, %v8944_v63 }
0x192c   :  { %7602 = vmatprep.mubr.msk.f32.mxu0 %vm4202_vm3, %v8948_v0 }
0x192d   :  { %v8976_v7 = vld [vmem:[#allocation4 + $0x38] sm:$0xff] }
0x192f   :  { %7603 = vmatmul.mubr.msk.f32.vlgmr.msra.gmra.mrb[14].mxu0 %vm4202_vm3, %v8952_v1 }
0x1930   :  { %7605 = vmatprep.mubr.msk.f32.mxu0 %vm4202_vm3, %v8956_v2 }
0x1933   :  { %7606 = vmatmul.mubr.msk.f32.gmra.mrb[16].mxu0 %vm4202_vm3, %v8960_v3 }
0x1934   :  { %7608 = vmatprep.mubr.msk.f32.mxu0 %vm4202_vm3, %v8964_v4 }
0x1937   :  { %7609 = vmatmul.mubr.msk.f32.gmra.mrb[18].mxu0 %vm4202_vm3, %v8968_v5 }
0x1938   :  { %7611 = vmatprep.mubr.msk.f32.mxu0 %vm4202_vm3, %v8972_v6 }
0x193b   :  { %7612 = vmatmul.mubr.msk.f32.gmra.mrb[20].mxu0 %vm4202_vm3, %v8976_v7 }
0x197f   :  { %v5365_v10 = vpop.f32.mrb[10].mxu1 }
0x1980   :  { %v7624_v11 = vpop.f32.mrb[11].mxu1  ;;  %v5366_v26 = vadd.f32 %v7226_v20, %v5365_v10 }
0x1a02   :  { %v7604_v14 = vpop.f32.mrb[14].mxu0 }
0x1a03   :  { %v5234_v34 = vadd.f32 %v7604_v14, %v7224_v13  ;;  %v5189_v56 = vpop.f32.mrb[15].mxu0 }
0x1a04   :  { %v5233_v61 = vadd.f32 %v7224_v13, %v5189_v56  ;;  %v7961_v56 = vmov 0  }
0x1a05   :  { %7836 = vtanh.f32 %v5234_v34  ;;  %7771 = vset.pattern.permute.xlu1 %v7961_v56  ;;  %7770 = vset.pattern.permute.xlu0 %v7961_v56 }
0x1a06   :  { %7838 = vtanh.f32 %v5233_v61  ;;  %v7607_v15 = vpop.f32.mrb[16].mxu0 }
0x1a07   :  { %v5236_v51 = vadd.f32 %v7607_v15, %v7224_v13  ;;  %v5199_v16 = vpop.f32.mrb[17].mxu0 }
0x1a08   :  { %v5235_v18 = vadd.f32 %v7224_v13, %v5199_v16 }
0x1a09   :  { %7840 = vtanh.f32 %v5236_v51 }
0x1a0a   :  { %7842 = vtanh.f32 %v5235_v18  ;;  %v7610_v21 = vpop.f32.mrb[18].mxu0 }
0x1a0b   :  { %v5238_v23 = vadd.f32 %v7610_v21, %v7224_v13  ;;  %v5209_v24 = vpop.f32.mrb[19].mxu0 }
0x1a0c   :  { %v5237_v25 = vadd.f32 %v7224_v13, %v5209_v24  ;;  %v7229_v24 = vld [vmem:[#allocation10 + $0x45] ss:$0 sm:$0xff] }
0x1a0d   :  { %7844 = vtanh.f32 %v5238_v23 }
0x1a0e   :  { %7846 = vtanh.f32 %v5237_v25  ;;  %v7613_v44 = vpop.f32.mrb[20].mxu0 }
0x1a0f   :  { %v7837_v28 = vpop.eup %7836  ;;  %v5240_v29 = vadd.f32 %v7613_v44, %v7224_v13  ;;  %v5219_v53 = vpop.f32.mrb[21].mxu0  ;;  %7848 = vtanh.f32 %v5366_v26 }
0x1a10   :  { %v7839_v54 = vpop.eup %7838  ;;  %v5239_v58 = vadd.f32 %v7224_v13, %v5219_v53  ;;  %v5255_v30 = vmul.f32 %v7837_v28, %v7225_v27 }
0x1a11   :  { %7850 = vtanh.f32 %v5240_v29  ;;  %v5254_v32 = vmul.f32 %v7839_v54, %v7225_v27 }
0x1a12   :  { %7852 = vtanh.f32 %v5239_v58  ;;  %v5265_v33 = vsel %vm3941_vm1, %v5255_v30, 0.0 }
0x1a13   :  { %v7841_v35 = vpop.eup %7840  ;;  %5266 = vadd.xlane.f32.xlu1 %v5265_v33  ;;  %v5262_v40 = vsel %vm3941_vm1, %v5254_v32, 0.0 }
0x1a14   :  { %v7843_v47 = vpop.eup %7842  ;;  %5263 = vadd.xlane.f32.xlu0 %v5262_v40  ;;  %v5257_v36 = vmul.f32 %v7841_v35, %v7225_v27 }
0x1a15   :  { %v5256_v52 = vmul.f32 %v7843_v47, %v7225_v27 }
0x1a16   :  { %v5271_v62 = vsel %vm3941_vm1, %v5257_v36, 0.0 }
0x1a17   :  { %v7845_v12 = vpop.eup %7844  ;;  %v5268_v43 = vsel %vm3941_vm1, %v5256_v52, 0.0 }
0x1a18   :  { %v7847_v37 = vpop.eup %7846  ;;  %5272 = vadd.xlane.f32.xlu0 %v5271_v62  ;;  %v5259_v31 = vmul.f32 %v7845_v12, %v7225_v27 }
0x1a19   :  { %v5258_v38 = vmul.f32 %v7847_v37, %v7225_v27  ;;  %v7849_v39 = vpop.eup %7848 }
0x1a1a   :  { %v5375_v57 = vmul.f32 %v7849_v39, %v7228_v41  ;;  %v5277_v10 = vsel %vm3941_vm1, %v5259_v31, 0.0 }
0x1a1b   :  { %v7851_v19 = vpop.eup %7850  ;;  %v5274_v17 = vsel %vm3941_vm1, %v5258_v38, 0.0 }
0x1a1c   :  { %v7853_v46 = vpop.eup %7852  ;;  %5269 = vadd.xlane.f32.xlu0 %v5268_v43  ;;  %5275 = vadd.xlane.f32.xlu1 %v5274_v17  ;;  %v5261_v13 = vmul.f32 %v7851_v19, %v7225_v27  ;;  %v5376_v14 = vsel %vm3941_vm1, %v5375_v57, 0.0 }
0x1a1d   :  { %v5260_v22 = vmul.f32 %v7853_v46, %v7225_v27 }
0x1a1e   :  { %v5283_v34 = vsel %vm3941_vm1, %v5261_v13, 0.0 }
0x1a1f   :  { %v5280_v11 = vsel %vm3941_vm1, %v5260_v22, 0.0 }
0x1a20   :  { %5278 = vadd.xlane.f32.xlu0 %v5277_v10  ;;  %5281 = vadd.xlane.f32.xlu1 %v5280_v11 }
0x1a24   :  { %5284 = vadd.xlane.f32.xlu0 %v5283_v34  ;;  %5377 = vadd.xlane.f32.xlu1 %v5376_v14 }
0x1aa0   :  { %v5267_v15 = vpop.xlane.xlu1 %5266 }
0x1aa1   :  { %v5264_v61 = vpop.xlane.xlu0 %5263 }
0x1aa5   :  { %v5273_v51 = vpop.xlane.xlu0 %5272 }
0x1aa9   :  { %v5270_v16 = vpop.xlane.xlu0 %5269  ;;  %v5276_v18 = vpop.xlane.xlu1 %5275 }
0x1aad   :  { %v5279_v20 = vpop.xlane.xlu0 %5278  ;;  %v5282_v21 = vpop.xlane.xlu1 %5281 }
0x1ab1   :  { %v5285_v23 = vpop.xlane.xlu0 %5284  ;;  %v5378_v25 = vpop.xlane.xlu1 %5377 }
0x1ab2   :  { %v5379_v26 = vadd.f32 %v5378_v25, %v5264_v61  ;;  %v5380_v27 = vadd.f32 %v5378_v25, %v5267_v15  ;;  %v5381_v44 = vadd.f32 %v5378_v25, %v5270_v16  ;;  %v5382_v28 = vadd.f32 %v5378_v25, %v5273_v51 }
0x1ab3   :  { %v5383_v29 = vadd.f32 %v5378_v25, %v5276_v18  ;;  %v5384_v53 = vadd.f32 %v5378_v25, %v5279_v20  ;;  %v5385_v54 = vadd.f32 %v5378_v25, %v5282_v21  ;;  %v5386_v58 = vadd.f32 %v5378_v25, %v5285_v23 }
0x1ab4   :  { %v5392_v30 = vadd.f32 %v7229_v24, %v5379_v26  ;;  %v5394_v32 = vadd.f32 %v7229_v24, %v5381_v44  ;;  %v5395_v33 = vadd.f32 %v7229_v24, %v5382_v28  ;;  %v5393_v35 = vadd.f32 %v7229_v24, %v5380_v27 }
0x1ab5   :  { %v5396_v40 = vadd.f32 %v7229_v24, %v5383_v29  ;;  %v5397_v47 = vadd.f32 %v7229_v24, %v5384_v53  ;;  %v5398_v36 = vadd.f32 %v7229_v24, %v5385_v54  ;;  %v5399_v62 = vadd.f32 %v7229_v24, %v5386_v58 }
0x1ab6   :  { %v5401_v12 = vsel %vm5400_vm4, %v5392_v30, -inf  ;;  %v5403_v52 = vsel %vm5400_vm4, %v5394_v32, -inf  ;;  %v5404_v37 = vsel %vm5400_vm4, %v5395_v33, -inf  ;;  %v5402_v38 = vsel %vm5400_vm4, %v5393_v35, -inf }
0x1ab7   :  { %v5405_v39 = vsel %vm5400_vm4, %v5396_v40, -inf  ;;  %v5409_v41 = vsel %vm5400_vm4, %v5398_v36, -inf  ;;  %v5411_v19 = vsel %vm5400_vm4, %v5399_v62, -inf  ;;  %v5407_v43 = vsel %vm5400_vm4, %v5397_v47, -inf }
0x1ab8   :  { %v5406_v17 = vmax.f32 %v5401_v12, %v5405_v39  ;;  %v5410_v31 = vmax.f32 %v5403_v52, %v5409_v41  ;;  %v5412_v46 = vmax.f32 %v5404_v37, %v5411_v19  ;;  %v5408_v22 = vmax.f32 %v5402_v38, %v5407_v43 }
0x1aba   :  { %v5414_v57 = vmax.f32 %v5410_v31, %v5412_v46  ;;  %v5413_v10 = vmax.f32 %v5406_v17, %v5408_v22 }
0x1abc   :  { %v5415_v11 = vmax.f32 %v5413_v10, %v5414_v57 }
0x1abe   :  { %v5416_v13 = vsub.f32 %v5392_v30, %v5415_v11  ;;  %v5417_v14 = vsub.f32 %v5393_v35, %v5415_v11  ;;  %v5418_v34 = vsub.f32 %v5394_v32, %v5415_v11  ;;  %v5419_v56 = vsub.f32 %v5395_v33, %v5415_v11 }
0x1abf   :  { %v5420_v61 = vsub.f32 %v5396_v40, %v5415_v11  ;;  %v5421_v18 = vsub.f32 %v5397_v47, %v5415_v11  ;;  %v5422_v21 = vsub.f32 %v5398_v36, %v5415_v11  ;;  %v5423_v24 = vsub.f32 %v5399_v62, %v5415_v11 }
0x1ac0   :  { %v5424_v15 = vmul.f32 1.442695, %v5416_v13  ;;  %v5426_v51 = vmul.f32 1.442695, %v5417_v14  ;;  %v5428_v16 = vmul.f32 1.442695, %v5418_v34 }
0x1ac1   :  { %v5430_v20 = vmul.f32 1.442695, %v5419_v56  ;;  %v5432_v23 = vmul.f32 1.442695, %v5420_v61  ;;  %v5434_v25 = vmul.f32 1.442695, %v5421_v18 }
0x1ac2   :  { %7854 = vpow2.f32 %v5424_v15  ;;  %v5436_v26 = vmul.f32 1.442695, %v5422_v21  ;;  %v5438_v27 = vmul.f32 1.442695, %v5423_v24 }
0x1ac3   :  { %7856 = vpow2.f32 %v5426_v51  ;;  %v5555_v51 = vld [vmem:[#allocation10 + $0x98] sm:$0xff] }
0x1ac4   :  { %7858 = vpow2.f32 %v5428_v16  ;;  %v5556_v16 = vld [vmem:[#allocation10 + $0xa0] sm:$0xff] }
0x1ac5   :  { %7860 = vpow2.f32 %v5430_v20  ;;  %v7732_v18 = vpack.c.bf16 %v5556_v16, %v5555_v51 }
0x1ac6   :  { %7862 = vpow2.f32 %v5432_v23 }
0x1ac7   :  { %7864 = vpow2.f32 %v5434_v25  ;;  %7733 = vmatpush3.bf16.msra.mxu1 %v7732_v18  ;;  %v5705_v18 = vld [vmem:[#allocation10 + $0xb8] sm:$0xff] }
0x1ac8   :  { %7866 = vpow2.f32 %v5436_v26  ;;  %7734 = vmatprep.subr.bf16.mxu1 %v7955_v8 }
0x1ac9   :  { %7868 = vpow2.f32 %v5438_v27 }
0x1acc   :  { %v7855_v44 = vpop.eup %7854 }
0x1acd   :  { %v7857_v28 = vpop.eup %7856  ;;  %v5440_v29 = vsel %vm5400_vm4, %v7855_v44, 0.0 }
0x1ace   :  { %v7859_v53 = vpop.eup %7858  ;;  %v5441_v54 = vsel %vm5400_vm4, %v7857_v28, 0.0 }
0x1acf   :  { %v7861_v58 = vpop.eup %7860  ;;  %v5442_v30 = vadd.f32 %v5441_v54, %v5440_v29  ;;  %v5443_v32 = vsel %vm5400_vm4, %v7859_v53, 0.0 }
0x1ad0   :  { %v7863_v33 = vpop.eup %7862  ;;  %v5445_v40 = vsel %vm5400_vm4, %v7861_v58, 0.0 }
0x1ad1   :  { %v5444_v35 = vadd.f32 %v5443_v32, %v5442_v30  ;;  %v7865_v47 = vpop.eup %7864  ;;  %v5447_v62 = vsel %vm5400_vm4, %v7863_v33, 0.0 }
0x1ad2   :  { %v7867_v12 = vpop.eup %7866  ;;  %v5449_v37 = vsel %vm5400_vm4, %v7865_v47, 0.0 }
0x1ad3   :  { %v5446_v36 = vadd.f32 %v5445_v40, %v5444_v35  ;;  %v7869_v38 = vpop.eup %7868  ;;  %v5451_v41 = vsel %vm5400_vm4, %v7867_v12, 0.0 }
0x1ad4   :  { %v5453_v43 = vsel %vm5400_vm4, %v7869_v38, 0.0 }
0x1ad5   :  { %v5448_v52 = vadd.f32 %v5447_v62, %v5446_v36 }
0x1ad7   :  { %v5450_v39 = vadd.f32 %v5449_v37, %v5448_v52 }
0x1ad9   :  { %v5452_v19 = vadd.f32 %v5451_v41, %v5450_v39 }
0x1adb   :  { %v5454_v17 = vadd.f32 %v5453_v43, %v5452_v19 }
0x1add   :  { %7870 = vrcp.f32 %v5454_v17 }
0x1ae7   :  { %v7871_v31 = vpop.eup %7870 }
0x1ae8   :  { %v5456_v46 = vmul.f32 %v7871_v31, %v5454_v17 }
0x1aea   :  { %v5457_v22 = vsub.f32 2.0, %v5456_v46  ;;  %v5553_v46 = vld [vmem:[#allocation10 + $0x88] sm:$0xff] }
0x1aec   :  { %v5458_v57 = vmul.f32 %v7871_v31, %v5457_v22  ;;  %v5554_v22 = vld [vmem:[#allocation10 + $0x90] sm:$0xff] }
0x1aee   :  { %v5460_v10 = vmul.f32 %v7857_v28, %v5458_v57  ;;  %v5459_v11 = vmul.f32 %v7855_v44, %v5458_v57  ;;  %v5461_v13 = vmul.f32 %v7859_v53, %v5458_v57  ;;  %v5462_v14 = vmul.f32 %v7861_v58, %v5458_v57 }
0x1aef   :  { %v5463_v34 = vmul.f32 %v7863_v33, %v5458_v57  ;;  %v5464_v56 = vmul.f32 %v7865_v47, %v5458_v57  ;;  %v5465_v61 = vmul.f32 %v7867_v12, %v5458_v57  ;;  %v5466_v15 = vmul.f32 %v7869_v38, %v5458_v57 }
0x1af0   :  { %5474 = vperm.xlu1 %7771, %v5460_v10   ;;  %5469 = vperm.xlu0 %7770, %v5459_v11  }
0x1af4   :  { %5479 = vperm.xlu1 %7771, %v5461_v13  }
0x1af8   :  { %5484 = vperm.xlu1 %7771, %v5462_v14  }
0x1afc   :  { %5489 = vperm.xlu1 %7771, %v5463_v34  }
0x1b00   :  { %5494 = vperm.xlu1 %7771, %v5464_v56  }
0x1b04   :  { %5499 = vperm.xlu1 %7771, %v5465_v61   ;;  %v5703_v61 = vld [vmem:[#allocation10 + $0xa8] sm:$0xff] }
0x1b08   :  { %5504 = vperm.xlu1 %7771, %v5466_v15   ;;  %v5704_v15 = vld [vmem:[#allocation10 + $0xb0] sm:$0xff] }
0x1b6f   :  { %v5475_v20 = vpop.permute.xlu1 %5474  ;;  %v5470_v23 = vpop.permute.xlu0 %5469 }
0x1b70   :  { %v5531_v25 = vmul.f32 %v5475_v20, %v8915_v55  ;;  %v5530_v26 = vmul.f32 %v5470_v23, %v8910_v50  ;;  %v5508_v44 = vmul.f32 %v5475_v20, %v8952_v1  ;;  %v5507_v53 = vmul.f32 %v5470_v23, %v8948_v0  ;;  %v5706_v20 = vld [vmem:[#allocation10 + $0xc0] sm:$0xff]  ;;  %v5787_v23 = vld [vmem:[#allocation10 + $0xc8] sm:$0xff] }
0x1b72   :  { %v5539_v29 = vsel %vm4202_vm3, %v5531_v25, 0.0  ;;  %v5538_v54 = vsel %vm4202_vm3, %v5530_v26, 0.0  ;;  %v5516_v50 = vsel %vm4202_vm3, %v5508_v44, 0.0  ;;  %v5515_v1 = vsel %vm4202_vm3, %v5507_v53, 0.0  ;;  %v5789_v25 = vld [vmem:[#allocation10 + $0xd8] sm:$0xff] }
0x1b73   :  { %v5480_v21 = vpop.permute.xlu1 %5479 }
0x1b74   :  { %v5532_v27 = vmul.f32 %v5480_v21, %v8919_v59  ;;  %v5509_v30 = vmul.f32 %v5480_v21, %v8956_v2  ;;  %v5540_v59 = vadd.f32 %v5539_v29, %v5538_v54  ;;  %v7741_v21 = vpack.c.bf16 %v5706_v20, %v5705_v18 }
0x1b76   :  { %v5541_v32 = vsel %vm4202_vm3, %v5532_v27, 0.0  ;;  %v5790_v27 = vld [vmem:[#allocation10 + $0xe0] sm:$0xff] }
0x1b77   :  { %v5485_v24 = vpop.permute.xlu1 %5484  ;;  %v5542_v47 = vadd.f32 %v5541_v32, %v5540_v59  ;;  %v7747_v44 = vpack.c.bf16 %v5790_v27, %v5789_v25  ;;  %v7234_v59 = vld [vmem:[#allocation10 + $0x47] ss:$0 sm:$0xff] }
0x1b78   :  { %v5533_v58 = vmul.f32 %v5485_v24, %v8924_v48  ;;  %v5510_v35 = vmul.f32 %v5485_v24, %v8960_v3  ;;  %v5518_v48 = vsel %vm4202_vm3, %v5509_v30, 0.0  ;;  %v5788_v24 = vld [vmem:[#allocation10 + $0xd0] sm:$0xff] }
0x1b79   :  { %v7744_v26 = vpack.c.bf16 %v5788_v24, %v5787_v23 }
0x1b7a   :  { %v5543_v0 = vsel %vm4202_vm3, %v5533_v58, 0.0  ;;  %v5520_v52 = vsel %vm4202_vm3, %v5510_v35, 0.0 }
0x1b7b   :  { %v5490_v28 = vpop.permute.xlu1 %5489  ;;  %v5544_v62 = vadd.f32 %v5543_v0, %v5542_v47 }
0x1b7c   :  { %v5534_v55 = vmul.f32 %v5490_v28, %v8930_v45  ;;  %v5511_v2 = vmul.f32 %v5490_v28, %v8964_v4  ;;  %v5517_v45 = vadd.f32 %v5516_v50, %v5515_v1 }
0x1b7e   :  { %v5545_v36 = vsel %vm4202_vm3, %v5534_v55, 0.0  ;;  %v5519_v39 = vadd.f32 %v5518_v48, %v5517_v45  ;;  %v5522_v41 = vsel %vm4202_vm3, %v5511_v2, 0.0 }
0x1b7f   :  { %v5495_v33 = vpop.permute.xlu1 %5494 }
0x1b80   :  { %v5535_v40 = vmul.f32 %v5495_v33, %v8936_v49  ;;  %v5512_v37 = vmul.f32 %v5495_v33, %v8968_v5  ;;  %v5546_v49 = vadd.f32 %v5545_v36, %v5544_v62  ;;  %v5521_v43 = vadd.f32 %v5520_v52, %v5519_v39 }
0x1b82   :  { %v5547_v3 = vsel %vm4202_vm3, %v5535_v40, 0.0  ;;  %v5524_v57 = vsel %vm4202_vm3, %v5512_v37, 0.0 }
0x1b83   :  { %v5500_v12 = vpop.permute.xlu1 %5499  ;;  %v5548_v17 = vadd.f32 %v5547_v3, %v5546_v49 }
0x1b84   :  { %v5536_v38 = vmul.f32 %v5500_v12, %v8940_v60  ;;  %v5513_v19 = vmul.f32 %v5500_v12, %v8972_v6  ;;  %v5523_v60 = vadd.f32 %v5522_v41, %v5521_v43  ;;  %v7735_v6 = vpack.c.bf16 %v5554_v22, %v5553_v46 }
0x1b86   :  { %v5549_v4 = vsel %vm4202_vm3, %v5536_v38, 0.0  ;;  %v5526_v13 = vsel %vm4202_vm3, %v5513_v19, 0.0  ;;  %v5525_v34 = vadd.f32 %v5524_v57, %v5523_v60 }
0x1b87   :  { %v5505_v31 = vpop.permute.xlu1 %5504  ;;  %v5550_v11 = vadd.f32 %v5549_v4, %v5548_v17 }
0x1b88   :  { %v5514_v5 = vmul.f32 %v5505_v31, %v8976_v7  ;;  %v5537_v10 = vmul.f32 %v5505_v31, %v8944_v63  ;;  %v5527_v16 = vadd.f32 %v5526_v13, %v5525_v34  ;;  %v7738_v63 = vpack.c.bf16 %v5704_v15, %v5703_v61 }
0x1b8a   :  { %v5551_v14 = vsel %vm4202_vm3, %v5537_v10, 0.0  ;;  %v5528_v51 = vsel %vm4202_vm3, %v5514_v5, 0.0 }
0x1b8b   :  { %v5552_v56 = vadd.f32 %v5551_v14, %v5550_v11  ;;  %v5529_v7 = vadd.f32 %v5528_v51, %v5527_v16 }
0x1b8d   :  { %7630 = vmatmul.mubr.msk.f32.vlgmr.msra.gmra.mrb[12].mxu1 %vm4202_vm3, %v5552_v56 }
0x1b8e   :  { %7736 = vmatpush3.bf16.msra.mxu1 %v7735_v6  ;;  %7636 = vmatprep.mubr.msk.f32.mxu1 %vm7956_vm0, %v7957_v9 }
0x1b8f   :  { %7737 = vmatprep.subr.bf16.mxu1 %v7955_v8 }
0x1b91   :  { %7637 = vmatmul.mubr.msk.f32.vlgmr.msra.gmra.mrb[14].mxu1 %vm4202_vm3, %v5529_v7 }
0x1b92   :  { %7739 = vmatpush3.bf16.msra.mxu1 %v7738_v63  ;;  %7647 = vmatprep.mubr.msk.f32.mxu1 %vm7956_vm0, %v7957_v9 }
0x1b93   :  { %7740 = vmatprep.subr.bf16.mxu1 %v7955_v8 }
0x1b96   :  { %7742 = vmatpush3.bf16.msra.mxu1 %v7741_v21 }
0x1b97   :  { %7743 = vmatprep.subr.bf16.mxu1 %v7955_v8 }
0x1b99   :  { %7648 = vmatmul.mubr.msk.f32.vlgmr.msra.gmra.mrb[16].mxu1 %vm3941_vm1, %v8928_v42  ;;  %v7233_v42 = vld [vmem:[#allocation10 + $0x46] ss:$0 sm:$0xff] }
0x1b9a   :  { %7658 = vmatprep.mubr.msk.f32.mxu1 %vm7956_vm0, %v7957_v9  ;;  %7745 = vmatpush3.bf16.msra.mxu1 %v7744_v26 }
0x1b9b   :  { %7746 = vmatprep.subr.bf16.mxu1 %v7955_v8 }
0x1b9e   :  { %7748 = vmatpush3.bf16.msra.mxu1 %v7747_v44 }
0x1c60   :  { %v5626_v28 = vpop.f32.mrb[12].mxu1 }
0x1c61   :  { %v7631_v29 = vpop.f32.mrb[13].mxu1 }
0x1c64   :  { %v5699_v53 = vpop.f32.mrb[14].mxu1 }
0x1c65   :  { %v5700_v54 = vadd.f32 %v5699_v53, %v5626_v28  ;;  %v7638_v58 = vpop.f32.mrb[15].mxu1 }
0x1c6c   :  { %v5775_v30 = vpop.f32.mrb[16].mxu1 }
0x1c6d   :  { %v5779_v32 = vadd.f32 %v5775_v30, %v5700_v54  ;;  %v7649_v55 = vpop.f32.mrb[17].mxu1 }
0x1c6f   :  { %v5785_v9 = vadd.f32 %v7233_v42, %v5779_v32 }
0x1c71   :  { %7872 = vtanh.f32 %v5785_v9 }
0x1c7b   :  { %v7873_v50 = vpop.eup %7872 }
0x1c7c   :  { %7659 = vmatmul.mubr.msk.f32.vlgmr.msra.gmra.mrb[18].mxu1 %vm3941_vm1, %v7873_v50 }
0x1d4f   :  { %v5865_v33 = vpop.f32.mrb[18].mxu1 }
0x1d50   :  { %v5866_v8 = vadd.f32 %v7234_v59, %v5865_v33  ;;  %v7660_v1 = vpop.f32.mrb[19].mxu1 }
0x1d52   :  { %5870 = vst.msk [vmem:[#allocation13] sm:$0xff] %vm5869_vm5, %v5866_v8 }
0x1d53   :  { %7931 = shalt.err (!%p7928_p12)
}
0x1d54   :  { %s9179_s19 = sld [smem:[#allocation142_spill]] }
0x1d5a   :  { %s7932_s2 = scalar_lea.hbm %s9179_s19, 128 }
0x1d5b   :  { %p7933_p13 = scmp.ne.s32.totalorder %s9179_s19, %s7932_s2  ;;  %p7936_p0 = scmp.lt.u32.totalorder %s7932_s2, %s9179_s19 }
0x1d5d   :  { %p7938_p1 = pnand %p7936_p0, %p7933_p13 }
0x1d5f   :  { %7941 = shalt.err (!%p7938_p1)
}
0x1d60   :  { %5880 = dma.vmem_to_hbm [thread:$0]  %s5878_s18, 128, %s9179_s19, [#allocation12]  }
0x1d61   :  { %7948 = dma.done.wait [#allocation12], 128  }
0x1d62   :  { %7949 = vsyncadd [#allocation12], 4294967168 }
0x1d63   :  { %5884 = vsyncpa [#allocation11], 1 }
0x1d64   :  { %5885 = vsyncpa [#allocation12], 1 }
0x1d65   :  { %5886 = vsyncmov [#allocation6] }
0x1d68   :  { %s5887_s8 = vpop.sfrf %5886 }
0x1d69   :  { %p7236_p2 = scmp.ne.s32.totalorder %s5887_s8, 0 }
0x1d6b   :  { %5891 = shalt.err (%p7236_p2)  }

</bundles_post_ra>
